<compile_context>
chip_gen: v6e
topology: v6e:2x2x1
jax: 0.10.0
libtpu: 0.0.40
codegen_flags: <defaults>
</compile_context>

<pallas_src>
import numpy as np
import jax
import jax.numpy as jnp
from jax import lax
from jax.experimental import pallas as pl
from jax.experimental.pallas import tpu as pltpu

NEG_SLOPE = 0.01   # torch.nn.LeakyReLU() default negative_slope
LANE = 128         # channel padding target (lane width)


def _leaky(v):
    return jnp.where(v > 0, v, NEG_SLOPE * v)


# ---------------------------------------------------------------------------
# Fused Pallas kernel: TCN residual stack + pool + FC + L2-normalize (one batch tile)
# ---------------------------------------------------------------------------
def _make_fused_kernel(block_cfg, ksize, b_tile, seq_len, c_pad, segments, split_taps):
    rows = b_tile * seq_len
    n_seg = len(segments)
    # Distinct causal shifts actually used (static, from the compile-time config).
    shift_vals = sorted({(ksize - 1 - k) * cfg["dilation"]
                         for cfg in block_cfg for k in range(ksize)
                         if 0 < (ksize - 1 - k) * cfg["dilation"] < seq_len})

    def kernel(x_ref, w_ref, b_ref, wm_ref, bm_ref, fcw_ref, fcb_ref, o_ref, h_ref):
        b_all = b_ref[...]                                  # (n_conv, C_pad), f32
        bm_all = bm_ref[...]                                # (n_match, C_pad), f32

        # Hoisted causal masks: one (rows, C_pad) 0/1 f32 mask per distinct shift,
        # computed once per grid step and reused by every conv tap.
        tmod = lax.broadcasted_iota(jnp.int32, (rows, c_pad), 0) % seq_len
        masks = {s: (tmod >= s).astype(jnp.float32) for s in shift_vals}

        def shifted(hf, shift):
            if shift == 0:
                return hf
            if shift >= seq_len:
                return jnp.zeros_like(hf)
            # XLU sublane rotate (separate VLIW slot); rows that would wrap from another
            # batch element (local time < shift) are zeroed by the precomputed mask.
            return pltpu.roll(hf, shift, axis=0) * masks[shift]

        def causal_conv(hf, conv_idx, dilation):
            # Shift/mask in f32 (8-row sublane granularity), cast to bf16 only for the MXU.
            taps = [shifted(hf, (ksize - 1 - k) * dilation).astype(jnp.bfloat16)
                    for k in range(ksize)]
            if split_taps:
                # v5e (128x128 MXU): K separate 128-deep matmuls, f32 accumulation —
                # same MXU passes, no (rows, K*128) bf16 concat materialization.
                y = jnp.dot(taps[0], w_ref[conv_idx, 0:c_pad, :],
                            preferred_element_type=jnp.float32)
                for k in range(1, ksize):
                    y = y + jnp.dot(taps[k],
                                    w_ref[conv_idx, k * c_pad:(k + 1) * c_pad, :],
                                    preferred_element_type=jnp.float32)
            else:
                # v6e/v7x (256x256 MXU): one wide K*C_pad-deep contraction.
                stacked = jnp.concatenate(taps, axis=-1)    # (rows, K*C_pad), bf16
                y = jnp.dot(stacked, w_ref[conv_idx],
                            preferred_element_type=jnp.float32)
            return y + b_all[conv_idx:conv_idx + 1, :]

        # Residual blocks.  Activations round-trip through one reused VMEM scratch ref
        # between blocks so the static unroll does not inflate live VMEM / vregs.
        h_ref[...] = x_ref[...].astype(jnp.float32)
        for cfg in block_cfg:                               # static Python unroll
            h = h_ref[...]
            d = cfg["dilation"]
            h1 = _leaky(causal_conv(h, cfg["c1"], d))
            h2 = _leaky(causal_conv(h1, cfg["c2"], d))
            if cfg["match"] is None:
                res = h
            else:
                mi = cfg["match"]
                res = jnp.dot(h.astype(jnp.bfloat16), wm_ref[mi],
                              preferred_element_type=jnp.float32) + bm_all[mi:mi + 1, :]
            h_ref[...] = _leaky(h2 + res)

        # Head: AdaptiveMaxPool1d -> Flatten -> Linear -> L2 normalize.
        h3 = h_ref[...].reshape(b_tile, seq_len, c_pad)     # free split of the major dim
        segs = [jnp.max(h3[:, s:e, :], axis=1) for (s, e) in segments]   # m reductions
        pooled = segs[0] if n_seg == 1 else jnp.concatenate(segs, axis=-1)
        y = jnp.dot(pooled.astype(jnp.bfloat16), fcw_ref[...],
                    preferred_element_type=jnp.float32) + fcb_ref[...]
        ssq = jnp.sum(y * y, axis=-1, keepdims=True)        # padded lanes are exactly 0
        inv = lax.rsqrt(jnp.maximum(ssq, 1e-24))            # == 1 / max(||y||, 1e-12)
        o_ref[...] = y * inv

    return kernel


# ---------------------------------------------------------------------------
# Tiling / VMEM sizing helpers
# ---------------------------------------------------------------------------
def _pick_batch_tile(bsz, seq_len, max_rows):
    # Largest divisor of bsz whose row count fits the budget and keeps the output
    # block sublane-aligned (b_tile % 8 == 0 or b_tile == bsz).
    candidates = [d for d in range(1, bsz + 1)
                  if bsz % d == 0 and d * seq_len <= max_rows
                  and (d == bsz or d % 8 == 0)]
    return max(candidates) if candidates else bsz


def _vmem_limit_bytes(rows, c_pad, ksize, n_masks, x_itemsize, weight_bytes, split_taps):
    per_row = (c_pad * 4                                     # VMEM scratch h
               + 4 * c_pad * 4                               # f32 temporaries h1/h2/res/y
               + (1 if split_taps else ksize) * c_pad * 2    # bf16 im2col slab
               + n_masks * c_pad * 4                         # hoisted causal masks
               + 2 * c_pad * x_itemsize)                     # double-buffered input tile
    est = rows * per_row + weight_bytes + (8 << 20)          # + headroom
    return int(min(max(est, 32 << 20), 64 << 20))            # stay under v7x physical VMEM


# ---------------------------------------------------------------------------
# Wrapper
# ---------------------------------------------------------------------------
def tcn_encoder_forward(x_ncl, kp, *, ksize, maxpool_out, out_channels,
                        max_rows_per_tile=4096, split_taps=None):
    """x_ncl: (B, C_in, L), exactly like the PyTorch module's input."""
    bsz, c_in, seq_len = x_ncl.shape
    c_pad, out_pad = kp["c_pad"], kp["out_pad"]
    block_cfg = kp["block_cfg"]

    if split_taps is None:  # v5e's 128x128 MXU prefers split 128-deep matmuls
        try:
            split_taps = "v5" in jax.devices()[0].device_kind.lower()
        except Exception:
            split_taps = False

    # bf16 input halves the only per-tile streamed DMA; it is numerically identical to
    # the f32 path whenever the first block has a 1x1 match conv (both the first conv
    # and the match conv cast to bf16 anyway).  Keep f32 for identity-residual configs.
    input_dtype = jnp.bfloat16 if block_cfg[0]["match"] is not None else jnp.float32
    x_itemsize = 2 if input_dtype == jnp.bfloat16 else 4

    # NCW -> (B*L, C_pad): time on sublanes, (padded) channels on lanes.
    xt = jnp.transpose(x_ncl, (0, 2, 1)).astype(jnp.float32)
    xt = jnp.pad(xt, ((0, 0), (0, 0), (0, c_pad - c_in)))
    x2d = xt.reshape(bsz * seq_len, c_pad).astype(input_dtype)

    m = maxpool_out
    # PyTorch AdaptiveMaxPool1d segment boundaries (static).
    segments = tuple(((i * seq_len) // m, -((-(i + 1) * seq_len) // m)) for i in range(m))

    b_tile = _pick_batch_tile(bsz, seq_len, max_rows_per_tile)
    n_tiles = bsz // b_tile
    rows = b_tile * seq_len

    kernel = _make_fused_kernel(block_cfg, ksize, b_tile, seq_len, c_pad,
                                segments, split_taps)

    weights = (kp["w_stack"], kp["b_stack"], kp["wm_stack"], kp["bm_stack"],
               kp["fcw"], kp["fcb"])

    def _resident_spec(shape):
        nd = len(shape)
        return pl.BlockSpec(shape, lambda i, _nd=nd: (0,) * _nd)   # constant -> stays in VMEM

    shift_vals = {(ksize - 1 - k) * cfg["dilation"]
                  for cfg in block_cfg for k in range(ksize)}
    n_masks = len([s for s in shift_vals if 0 < s < seq_len])
    weight_bytes = sum(int(w.size) * w.dtype.itemsize for w in weights)
    vmem_limit = _vmem_limit_bytes(rows, c_pad, ksize, n_masks, x_itemsize,
                                   weight_bytes, split_taps)

    y_pad = pl.pallas_call(
        kernel,
        out_shape=jax.ShapeDtypeStruct((bsz, out_pad), jnp.float32),
        grid=(n_tiles,),
        in_specs=[pl.BlockSpec((rows, c_pad), lambda i: (i, 0))]     # streamed activations
                 + [_resident_spec(w.shape) for w in weights],       # resident weights
        out_specs=pl.BlockSpec((b_tile, out_pad), lambda i: (i, 0)),
        scratch_shapes=[pltpu.VMEM((rows, c_pad), jnp.float32)],     # reused activation slab
        compiler_params=pltpu.CompilerParams(
            dimension_semantics=("parallel",),                       # v7x dual-TC sharding
            vmem_limit_bytes=vmem_limit),
    )(x2d, *weights)
    return y_pad[:, :out_channels]


# ---------------------------------------------------------------------------
# Parameter packing: torch layouts -> lane-dense, channel-padded kernel layouts
# ---------------------------------------------------------------------------
def _pack_conv(w_torch, ksize, c_pad):
    # torch (C_out, C_in, K) -> (K*C_pad, C_pad); row k*C_pad+cin, col cout
    c_out, c_in, _ = w_torch.shape
    wp = np.zeros((ksize, c_pad, c_pad), np.float32)
    wp[:, :c_in, :c_out] = np.transpose(w_torch, (2, 1, 0))
    return wp.reshape(ksize * c_pad, c_pad)


def _pack_bias(b, c_pad):
    bp = np.zeros(c_pad, np.float32)
    bp[: b.shape[0]] = b
    return bp


def pack_params(blocks_np, fc_w, fc_b, ksize, maxpool_out, c_pad=LANE, out_pad=LANE):
    w_list, b_list, wm_list, bm_list, block_cfg = [], [], [], [], []
    for blk in blocks_np:
        c1 = len(w_list)
        w_list.append(_pack_conv(blk["w1"], ksize, c_pad))
        b_list.append(_pack_bias(blk["b1"], c_pad))
        c2 = len(w_list)
        w_list.append(_pack_conv(blk["w2"], ksize, c_pad))
        b_list.append(_pack_bias(blk["b2"], c_pad))
        if blk["wr"] is not None:
            c_out, c_in, _ = blk["wr"].shape
            wm = np.zeros((c_pad, c_pad), np.float32)
            wm[:c_in, :c_out] = blk["wr"][:, :, 0].T
            m_idx = len(wm_list)
            wm_list.append(wm)
            bm_list.append(_pack_bias(blk["br"], c_pad))
        else:
            m_idx = None
        block_cfg.append(dict(dilation=int(blk["dilation"]), c1=c1, c2=c2, match=m_idx))

    if not wm_list:   # keep the pallas_call signature fixed; never read (static branch)
        wm_list = [np.zeros((c_pad, c_pad), np.float32)]
        bm_list = [np.zeros(c_pad, np.float32)]

    out_channels, flat_in = fc_w.shape
    tcn_out = flat_in // maxpool_out
    # torch flatten index = c*m + i  ->  kernel pooled index = i*C_pad + c
    fw = fc_w.reshape(out_channels, tcn_out, maxpool_out)
    fcw = np.zeros((maxpool_out, c_pad, out_pad), np.float32)
    fcw[:, :tcn_out, :out_channels] = np.transpose(fw, (2, 1, 0))
    fcw = fcw.reshape(maxpool_out * c_pad, out_pad)
    fcb = np.zeros((1, out_pad), np.float32)
    fcb[0, :out_channels] = fc_b

    return dict(
        w_stack=jnp.asarray(np.stack(w_list), jnp.bfloat16),
        b_stack=jnp.asarray(np.stack(b_list), jnp.float32),
        wm_stack=jnp.asarray(np.stack(wm_list), jnp.bfloat16),
        bm_stack=jnp.asarray(np.stack(bm_list), jnp.float32),
        fcw=jnp.asarray(fcw, jnp.bfloat16),
        fcb=jnp.asarray(fcb, jnp.float32),
        block_cfg=tuple(block_cfg),
        c_pad=c_pad, out_pad=out_pad,
    )


# ---------------------------------------------------------------------------
# Deterministic parameter construction (torch layouts)
# ---------------------------------------------------------------------------
def _init_conv(key, c_out, c_in, k):
    k1, k2 = jax.random.split(key)
    bound = 1.0 / np.sqrt(c_in * k)
    w = np.asarray(jax.random.uniform(k1, (c_out, c_in, k), jnp.float32, -bound, bound),
                   np.float64)
    b = np.asarray(jax.random.uniform(k2, (c_out,), jnp.float32, -bound, bound), np.float64)
    return w, b


def build_params(key, in_channels, kernel_size, tcn_channels, tcn_layers,
                 tcn_out_channels, out_channels, maxpool_out):
    dilations = [2 ** i for i in range(tcn_layers + 1)]
    filters = [tcn_channels] * tcn_layers + [tcn_out_channels]
    chans = [in_channels] + filters

    blocks_np = []
    for c_in, c_f, d in zip(chans[:-1], filters, dilations):
        key, k1, k2, k3 = jax.random.split(key, 4)
        w1, b1 = _init_conv(k1, c_f, c_in, kernel_size)
        w2, b2 = _init_conv(k2, c_f, c_f, kernel_size)
        if c_in != c_f:
            wr, br = _init_conv(k3, c_f, c_in, 1)
        else:
            wr, br = None, None
        blocks_np.append(dict(w1=w1, b1=b1, w2=w2, b2=b2, wr=wr, br=br, dilation=d))

    key, kf = jax.random.split(key)
    fc_w, fc_b = _init_conv(kf, out_channels, tcn_out_channels * maxpool_out, 1)
    fc_w = fc_w[:, :, 0]                                   # (out, C_tcn * m)
    return blocks_np, fc_w, fc_b


# ---------------------------------------------------------------------------
# Pure numpy reference (mirrors the PyTorch forward, float64)
# ---------------------------------------------------------------------------
def reference_forward(x, blocks_np, fc_w, fc_b, ksize, m, normalize=True):
    def leaky(v):
        return np.where(v > 0, v, NEG_SLOPE * v)

    def cconv(h, w, b, d):
        bsz, c_in, length = h.shape
        c_out, _, k = w.shape
        pad = (k - 1) * d
        hp = np.concatenate([np.zeros((bsz, c_in, pad), h.dtype), h], axis=2)
        y = np.zeros((bsz, c_out, length), np.float64)
        for t in range(k):
            y += np.einsum('oc,bct->bot', w[:, :, t], hp[:, :, t * d:t * d + length])
        return y + b[None, :, None]

    h = x.astype(np.float64)
    for blk in blocks_np:
        d = blk["dilation"]
        h1 = leaky(cconv(h, blk["w1"], blk["b1"], d))
        h2 = leaky(cconv(h1, blk["w2"], blk["b2"], d))
        if blk["wr"] is not None:
            res = np.einsum('oc,bct->bot', blk["wr"][:, :, 0], h) + blk["br"][None, :, None]
        else:
            res = h
        h = leaky(h2 + res)

    bsz, c_tcn, length = h.shape
    pooled = np.zeros((bsz, c_tcn, m), np.float64)
    for i in range(m):
        s, e = (i * length) // m, -((-(i + 1) * length) // m)
        pooled[:, :, i] = h[:, :, s:e].max(axis=2)
    flat = pooled.reshape(bsz, -1)
    u = flat @ fc_w.T + fc_b
    if normalize:
        u = u / np.maximum(np.linalg.norm(u, axis=1, keepdims=True), 1e-12)
    return u


# ---------------------------------------------------------------------------
if __name__ == "__main__":
    B, C_IN, L = 16, 4, 32
    KERNEL_SIZE = 3
    TCN_CHANNELS, TCN_LAYERS, TCN_OUT_CHANNELS = 16, 2, 8
    OUT_CHANNELS = 8
    MAXPOOL_OUT = 1          # AdaptiveMaxPool1d default in the module

    root = jax.random.PRNGKey(0)
    kx, kparam = jax.random.split(root)
    x = jax.random.normal(kx, (B, C_IN, L), jnp.float32)

    blocks_np, fc_w, fc_b = build_params(
        kparam, C_IN, KERNEL_SIZE, TCN_CHANNELS, TCN_LAYERS,
        TCN_OUT_CHANNELS, OUT_CHANNELS, MAXPOOL_OUT)
    kp = pack_params(blocks_np, fc_w, fc_b, KERNEL_SIZE, MAXPOOL_OUT)

    # max_rows_per_tile=256 -> b_tile=8, grid=(2,) at these demo sizes, exercising the
    # batched "parallel" grid + pipelining path (production default is 4096 rows).
    y = tcn_encoder_forward(x, kp, ksize=KERNEL_SIZE, maxpool_out=MAXPOOL_OUT,
                            out_channels=OUT_CHANNELS, max_rows_per_tile=256)
    y = jax.block_until_ready(y)

    y_ref = reference_forward(np.asarray(x, np.float64), blocks_np, fc_w, fc_b,
                              KERNEL_SIZE, MAXPOOL_OUT, normalize=True)
    # bf16 matmul operands (f32 accumulation) -> slightly looser tolerance vs f64 ref.
    np.testing.assert_allclose(np.asarray(y, np.float64), y_ref, rtol=2e-2, atol=2e-2)
    print("KERNEL_OK")
</pallas_src>

<mosaic_0001>
module attributes {stable_mosaic.version = 11 : i64} {
  func.func @kernel(%arg0: i32, %arg1: memref<256x128xbf16, #tpu.memory_space<vmem>>, %arg2: memref<6x384x128xbf16, #tpu.memory_space<vmem>>, %arg3: memref<6x128xf32, #tpu.memory_space<vmem>>, %arg4: memref<2x128x128xbf16, #tpu.memory_space<vmem>>, %arg5: memref<2x128xf32, #tpu.memory_space<vmem>>, %arg6: memref<128x128xbf16, #tpu.memory_space<vmem>>, %arg7: memref<1x128xf32, #tpu.memory_space<vmem>>, %arg8: memref<8x128xf32, #tpu.memory_space<vmem>>, %arg9: memref<256x128xf32, #tpu.memory_space<vmem>>) attributes {dimension_semantics = [#tpu.dimension_semantics<parallel>], iteration_bounds = array<i64: 2>, scalar_prefetch = 0 : i64, scratch_operands = 1 : i64, tpu.core_type = #tpu.core_type<tc>, window_params = [{transform_indices = @transform_0, window_bounds = array<i64: 256, 128>}, {pipeline_mode = #tpu.pipeline_mode<synchronous>, transform_indices = @transform_1, window_bounds = array<i64: 6, 384, 128>}, {pipeline_mode = #tpu.pipeline_mode<synchronous>, transform_indices = @transform_2, window_bounds = array<i64: 6, 128>}, {pipeline_mode = #tpu.pipeline_mode<synchronous>, transform_indices = @transform_3, window_bounds = array<i64: 2, 128, 128>}, {pipeline_mode = #tpu.pipeline_mode<synchronous>, transform_indices = @transform_4, window_bounds = array<i64: 2, 128>}, {pipeline_mode = #tpu.pipeline_mode<synchronous>, transform_indices = @transform_5, window_bounds = array<i64: 128, 128>}, {pipeline_mode = #tpu.pipeline_mode<synchronous>, transform_indices = @transform_6, window_bounds = array<i64: 1, 128>}, {transform_indices = @transform_7, window_bounds = array<i64: 8, 128>}]} {
    %c0 = arith.constant 0 : index
    %c0_0 = arith.constant 0 : index
    %0 = vector.load %arg3[%c0, %c0_0] : memref<6x128xf32, #tpu.memory_space<vmem>>, vector<6x128xf32>
    %c0_1 = arith.constant 0 : index
    %c0_2 = arith.constant 0 : index
    %1 = vector.load %arg5[%c0_1, %c0_2] : memref<2x128xf32, #tpu.memory_space<vmem>>, vector<2x128xf32>
    %2 = tpu.iota {dimensions = array<i32: 0>} : vector<256x128xi32>
    %c32_i32 = arith.constant 32 : i32
    %c0_i32 = arith.constant 0 : i32
    %3 = arith.cmpi eq, %c32_i32, %c0_i32 : i32
    %c1_i32 = arith.constant 1 : i32
    %4 = arith.select %3, %c1_i32, %c32_i32 : i32
    %5 = vector.broadcast %4 : i32 to vector<256x128xi32>
    %6 = arith.remsi %2, %5 : vector<256x128xi32>
    %c0_i32_3 = arith.constant 0 : i32
    %7 = vector.broadcast %c0_i32_3 : i32 to vector<256x128xi32>
    %8 = arith.cmpi ne, %6, %7 : vector<256x128xi32>
    %c0_i32_4 = arith.constant 0 : i32
    %9 = vector.broadcast %c0_i32_4 : i32 to vector<256x128xi32>
    %10 = arith.cmpi slt, %6, %9 : vector<256x128xi32>
    %c0_i32_5 = arith.constant 0 : i32
    %11 = arith.cmpi slt, %4, %c0_i32_5 : i32
    %12 = vector.broadcast %11 : i1 to vector<256x128xi1>
    %13 = vector.broadcast %12 : vector<256x128xi1> to vector<256x128xi1>
    %14 = arith.xori %10, %13 : vector<256x128xi1>
    %15 = arith.andi %14, %8 : vector<256x128xi1>
    %16 = vector.broadcast %4 : i32 to vector<256x128xi32>
    %17 = arith.addi %6, %16 : vector<256x128xi32>
    %18 = arith.select %15, %17, %6 : vector<256x128xi1>, vector<256x128xi32>
    %c1_i32_6 = arith.constant 1 : i32
    %19 = vector.broadcast %c1_i32_6 : i32 to vector<256x128xi32>
    %20 = arith.cmpi sge, %18, %19 : vector<256x128xi32>
    %21 = arith.extui %20 : vector<256x128xi1> to vector<256x128xi32>
    %22 = arith.sitofp %21 : vector<256x128xi32> to vector<256x128xf32>
    %c2_i32 = arith.constant 2 : i32
    %23 = vector.broadcast %c2_i32 : i32 to vector<256x128xi32>
    %24 = arith.cmpi sge, %18, %23 : vector<256x128xi32>
    %25 = arith.extui %24 : vector<256x128xi1> to vector<256x128xi32>
    %26 = arith.sitofp %25 : vector<256x128xi32> to vector<256x128xf32>
    %c4_i32 = arith.constant 4 : i32
    %27 = vector.broadcast %c4_i32 : i32 to vector<256x128xi32>
    %28 = arith.cmpi sge, %18, %27 : vector<256x128xi32>
    %29 = arith.extui %28 : vector<256x128xi1> to vector<256x128xi32>
    %30 = arith.sitofp %29 : vector<256x128xi32> to vector<256x128xf32>
    %c8_i32 = arith.constant 8 : i32
    %31 = vector.broadcast %c8_i32 : i32 to vector<256x128xi32>
    %32 = arith.cmpi sge, %18, %31 : vector<256x128xi32>
    %33 = arith.extui %32 : vector<256x128xi1> to vector<256x128xi32>
    %34 = arith.sitofp %33 : vector<256x128xi32> to vector<256x128xf32>
    %c0_7 = arith.constant 0 : index
    %c0_8 = arith.constant 0 : index
    %35 = vector.load %arg1[%c0_7, %c0_8] : memref<256x128xbf16, #tpu.memory_space<vmem>>, vector<256x128xbf16>
    %36 = arith.extf %35 : vector<256x128xbf16> to vector<256x128xf32>
    %c0_9 = arith.constant 0 : index
    %c0_10 = arith.constant 0 : index
    %37 = vector.load %arg9[%c0_9, %c0_10] : memref<256x128xf32, #tpu.memory_space<vmem>>, vector<256x128xf32>
    tpu.vector_store %arg9[%c0_9, %c0_10], %36 {strides = array<i32>} : memref<256x128xf32, #tpu.memory_space<vmem>>, vector<256x128xf32>,
    %c0_11 = arith.constant 0 : index
    %c0_12 = arith.constant 0 : index
    %38 = vector.load %arg9[%c0_11, %c0_12] : memref<256x128xf32, #tpu.memory_space<vmem>>, vector<256x128xf32>
    %c2_i32_13 = arith.constant 2 : i32
    %39 = tpu.dynamic_rotate %38 by %c2_i32_13 dim 0 : vector<256x128xf32>, i32 -> vector<256x128xf32>
    %40 = arith.mulf %39, %26 : vector<256x128xf32>
    %41 = arith.truncf %40 : vector<256x128xf32> to vector<256x128xbf16>
    %c1_i32_14 = arith.constant 1 : i32
    %42 = tpu.dynamic_rotate %38 by %c1_i32_14 dim 0 : vector<256x128xf32>, i32 -> vector<256x128xf32>
    %43 = arith.mulf %42, %22 : vector<256x128xf32>
    %44 = arith.truncf %43 : vector<256x128xf32> to vector<256x128xbf16>
    %45 = arith.truncf %38 : vector<256x128xf32> to vector<256x128xbf16>
    %46 = tpu.concatenate %41, %44, %45 in 1 : vector<256x128xbf16>, vector<256x128xbf16>, vector<256x128xbf16> -> vector<256x384xbf16>
    %c0_15 = arith.constant 0 : index
    %c0_16 = arith.constant 0 : index
    %c0_17 = arith.constant 0 : index
    %47 = vector.load %arg2[%c0_15, %c0_16, %c0_17] : memref<6x384x128xbf16, #tpu.memory_space<vmem>>, vector<1x384x128xbf16>
    %48 = vector.shape_cast %47 : vector<1x384x128xbf16> to vector<384x128xbf16>
    %cst = arith.constant dense<0.000000e+00> : vector<256x128xf32>
    %49 = tpu.matmul %46, %48, %cst {dimension_numbers = #tpu.dot_dimension_numbers<[1], [0], [0], [1], [0, 0, 1, 1], [], []>} : vector<256x384xbf16>, vector<384x128xbf16>, vector<256x128xf32> -> vector<256x128xf32>
    %50 = vector.extract_strided_slice %0 {offsets = [0, 0], sizes = [1, 128], strides = [1, 1]} : vector<6x128xf32> to vector<1x128xf32>
    %51 = vector.broadcast %50 : vector<1x128xf32> to vector<256x128xf32>
    %52 = arith.addf %49, %51 : vector<256x128xf32>
    %cst_18 = arith.constant 0.000000e+00 : f32
    %53 = vector.broadcast %cst_18 : f32 to vector<256x128xf32>
    %54 = arith.cmpf ogt, %52, %53 : vector<256x128xf32>
    %cst_19 = arith.constant 0.00999999977 : f32
    %55 = vector.broadcast %cst_19 : f32 to vector<256x128xf32>
    %56 = arith.mulf %55, %52 : vector<256x128xf32>
    %57 = arith.select %54, %52, %56 : vector<256x128xi1>, vector<256x128xf32>
    %c2_i32_20 = arith.constant 2 : i32
    %58 = tpu.dynamic_rotate %57 by %c2_i32_20 dim 0 : vector<256x128xf32>, i32 -> vector<256x128xf32>
    %59 = arith.mulf %58, %26 : vector<256x128xf32>
    %60 = arith.truncf %59 : vector<256x128xf32> to vector<256x128xbf16>
    %c1_i32_21 = arith.constant 1 : i32
    %61 = tpu.dynamic_rotate %57 by %c1_i32_21 dim 0 : vector<256x128xf32>, i32 -> vector<256x128xf32>
    %62 = arith.mulf %61, %22 : vector<256x128xf32>
    %63 = arith.truncf %62 : vector<256x128xf32> to vector<256x128xbf16>
    %64 = arith.truncf %57 : vector<256x128xf32> to vector<256x128xbf16>
    %65 = tpu.concatenate %60, %63, %64 in 1 : vector<256x128xbf16>, vector<256x128xbf16>, vector<256x128xbf16> -> vector<256x384xbf16>
    %c1 = arith.constant 1 : index
    %c0_22 = arith.constant 0 : index
    %c0_23 = arith.constant 0 : index
    %66 = vector.load %arg2[%c1, %c0_22, %c0_23] : memref<6x384x128xbf16, #tpu.memory_space<vmem>>, vector<1x384x128xbf16>
    %67 = vector.shape_cast %66 : vector<1x384x128xbf16> to vector<384x128xbf16>
    %cst_24 = arith.constant dense<0.000000e+00> : vector<256x128xf32>
    %68 = tpu.matmul %65, %67, %cst_24 {dimension_numbers = #tpu.dot_dimension_numbers<[1], [0], [0], [1], [0, 0, 1, 1], [], []>} : vector<256x384xbf16>, vector<384x128xbf16>, vector<256x128xf32> -> vector<256x128xf32>
    %69 = vector.extract_strided_slice %0 {offsets = [1, 0], sizes = [1, 128], strides = [1, 1]} : vector<6x128xf32> to vector<1x128xf32>
    %70 = vector.broadcast %69 : vector<1x128xf32> to vector<256x128xf32>
    %71 = arith.addf %68, %70 : vector<256x128xf32>
    %cst_25 = arith.constant 0.000000e+00 : f32
    %72 = vector.broadcast %cst_25 : f32 to vector<256x128xf32>
    %73 = arith.cmpf ogt, %71, %72 : vector<256x128xf32>
    %cst_26 = arith.constant 0.00999999977 : f32
    %74 = vector.broadcast %cst_26 : f32 to vector<256x128xf32>
    %75 = arith.mulf %74, %71 : vector<256x128xf32>
    %76 = arith.select %73, %71, %75 : vector<256x128xi1>, vector<256x128xf32>
    %77 = arith.truncf %38 : vector<256x128xf32> to vector<256x128xbf16>
    %c0_27 = arith.constant 0 : index
    %c0_28 = arith.constant 0 : index
    %c0_29 = arith.constant 0 : index
    %78 = vector.load %arg4[%c0_27, %c0_28, %c0_29] : memref<2x128x128xbf16, #tpu.memory_space<vmem>>, vector<1x128x128xbf16>
    %79 = vector.shape_cast %78 : vector<1x128x128xbf16> to vector<128x128xbf16>
    %cst_30 = arith.constant dense<0.000000e+00> : vector<256x128xf32>
    %80 = tpu.matmul %77, %79, %cst_30 {dimension_numbers = #tpu.dot_dimension_numbers<[1], [0], [0], [1], [0, 0, 1, 1], [], []>} : vector<256x128xbf16>, vector<128x128xbf16>, vector<256x128xf32> -> vector<256x128xf32>
    %81 = vector.extract_strided_slice %1 {offsets = [0, 0], sizes = [1, 128], strides = [1, 1]} : vector<2x128xf32> to vector<1x128xf32>
    %82 = vector.broadcast %81 : vector<1x128xf32> to vector<256x128xf32>
    %83 = arith.addf %80, %82 : vector<256x128xf32>
    %84 = arith.addf %76, %83 : vector<256x128xf32>
    %cst_31 = arith.constant 0.000000e+00 : f32
    %85 = vector.broadcast %cst_31 : f32 to vector<256x128xf32>
    %86 = arith.cmpf ogt, %84, %85 : vector<256x128xf32>
    %cst_32 = arith.constant 0.00999999977 : f32
    %87 = vector.broadcast %cst_32 : f32 to vector<256x128xf32>
    %88 = arith.mulf %87, %84 : vector<256x128xf32>
    %89 = arith.select %86, %84, %88 : vector<256x128xi1>, vector<256x128xf32>
    %c0_33 = arith.constant 0 : index
    %c0_34 = arith.constant 0 : index
    %90 = vector.load %arg9[%c0_33, %c0_34] : memref<256x128xf32, #tpu.memory_space<vmem>>, vector<256x128xf32>
    tpu.vector_store %arg9[%c0_33, %c0_34], %89 {strides = array<i32>} : memref<256x128xf32, #tpu.memory_space<vmem>>, vector<256x128xf32>,
    %c0_35 = arith.constant 0 : index
    %c0_36 = arith.constant 0 : index
    %91 = vector.load %arg9[%c0_35, %c0_36] : memref<256x128xf32, #tpu.memory_space<vmem>>, vector<256x128xf32>
    %c4_i32_37 = arith.constant 4 : i32
    %92 = tpu.dynamic_rotate %91 by %c4_i32_37 dim 0 : vector<256x128xf32>, i32 -> vector<256x128xf32>
    %93 = arith.mulf %92, %30 : vector<256x128xf32>
    %94 = arith.truncf %93 : vector<256x128xf32> to vector<256x128xbf16>
    %c2_i32_38 = arith.constant 2 : i32
    %95 = tpu.dynamic_rotate %91 by %c2_i32_38 dim 0 : vector<256x128xf32>, i32 -> vector<256x128xf32>
    %96 = arith.mulf %95, %26 : vector<256x128xf32>
    %97 = arith.truncf %96 : vector<256x128xf32> to vector<256x128xbf16>
    %98 = arith.truncf %91 : vector<256x128xf32> to vector<256x128xbf16>
    %99 = tpu.concatenate %94, %97, %98 in 1 : vector<256x128xbf16>, vector<256x128xbf16>, vector<256x128xbf16> -> vector<256x384xbf16>
    %c2 = arith.constant 2 : index
    %c0_39 = arith.constant 0 : index
    %c0_40 = arith.constant 0 : index
    %100 = vector.load %arg2[%c2, %c0_39, %c0_40] : memref<6x384x128xbf16, #tpu.memory_space<vmem>>, vector<1x384x128xbf16>
    %101 = vector.shape_cast %100 : vector<1x384x128xbf16> to vector<384x128xbf16>
    %cst_41 = arith.constant dense<0.000000e+00> : vector<256x128xf32>
    %102 = tpu.matmul %99, %101, %cst_41 {dimension_numbers = #tpu.dot_dimension_numbers<[1], [0], [0], [1], [0, 0, 1, 1], [], []>} : vector<256x384xbf16>, vector<384x128xbf16>, vector<256x128xf32> -> vector<256x128xf32>
    %103 = vector.extract_strided_slice %0 {offsets = [2, 0], sizes = [1, 128], strides = [1, 1]} : vector<6x128xf32> to vector<1x128xf32>
    %104 = vector.broadcast %103 : vector<1x128xf32> to vector<256x128xf32>
    %105 = arith.addf %102, %104 : vector<256x128xf32>
    %cst_42 = arith.constant 0.000000e+00 : f32
    %106 = vector.broadcast %cst_42 : f32 to vector<256x128xf32>
    %107 = arith.cmpf ogt, %105, %106 : vector<256x128xf32>
    %cst_43 = arith.constant 0.00999999977 : f32
    %108 = vector.broadcast %cst_43 : f32 to vector<256x128xf32>
    %109 = arith.mulf %108, %105 : vector<256x128xf32>
    %110 = arith.select %107, %105, %109 : vector<256x128xi1>, vector<256x128xf32>
    %c4_i32_44 = arith.constant 4 : i32
    %111 = tpu.dynamic_rotate %110 by %c4_i32_44 dim 0 : vector<256x128xf32>, i32 -> vector<256x128xf32>
    %112 = arith.mulf %111, %30 : vector<256x128xf32>
    %113 = arith.truncf %112 : vector<256x128xf32> to vector<256x128xbf16>
    %c2_i32_45 = arith.constant 2 : i32
    %114 = tpu.dynamic_rotate %110 by %c2_i32_45 dim 0 : vector<256x128xf32>, i32 -> vector<256x128xf32>
    %115 = arith.mulf %114, %26 : vector<256x128xf32>
    %116 = arith.truncf %115 : vector<256x128xf32> to vector<256x128xbf16>
    %117 = arith.truncf %110 : vector<256x128xf32> to vector<256x128xbf16>
    %118 = tpu.concatenate %113, %116, %117 in 1 : vector<256x128xbf16>, vector<256x128xbf16>, vector<256x128xbf16> -> vector<256x384xbf16>
    %c3 = arith.constant 3 : index
    %c0_46 = arith.constant 0 : index
    %c0_47 = arith.constant 0 : index
    %119 = vector.load %arg2[%c3, %c0_46, %c0_47] : memref<6x384x128xbf16, #tpu.memory_space<vmem>>, vector<1x384x128xbf16>
    %120 = vector.shape_cast %119 : vector<1x384x128xbf16> to vector<384x128xbf16>
    %cst_48 = arith.constant dense<0.000000e+00> : vector<256x128xf32>
    %121 = tpu.matmul %118, %120, %cst_48 {dimension_numbers = #tpu.dot_dimension_numbers<[1], [0], [0], [1], [0, 0, 1, 1], [], []>} : vector<256x384xbf16>, vector<384x128xbf16>, vector<256x128xf32> -> vector<256x128xf32>
    %122 = vector.extract_strided_slice %0 {offsets = [3, 0], sizes = [1, 128], strides = [1, 1]} : vector<6x128xf32> to vector<1x128xf32>
    %123 = vector.broadcast %122 : vector<1x128xf32> to vector<256x128xf32>
    %124 = arith.addf %121, %123 : vector<256x128xf32>
    %cst_49 = arith.constant 0.000000e+00 : f32
    %125 = vector.broadcast %cst_49 : f32 to vector<256x128xf32>
    %126 = arith.cmpf ogt, %124, %125 : vector<256x128xf32>
    %cst_50 = arith.constant 0.00999999977 : f32
    %127 = vector.broadcast %cst_50 : f32 to vector<256x128xf32>
    %128 = arith.mulf %127, %124 : vector<256x128xf32>
    %129 = arith.select %126, %124, %128 : vector<256x128xi1>, vector<256x128xf32>
    %130 = arith.addf %129, %91 : vector<256x128xf32>
    %cst_51 = arith.constant 0.000000e+00 : f32
    %131 = vector.broadcast %cst_51 : f32 to vector<256x128xf32>
    %132 = arith.cmpf ogt, %130, %131 : vector<256x128xf32>
    %cst_52 = arith.constant 0.00999999977 : f32
    %133 = vector.broadcast %cst_52 : f32 to vector<256x128xf32>
    %134 = arith.mulf %133, %130 : vector<256x128xf32>
    %135 = arith.select %132, %130, %134 : vector<256x128xi1>, vector<256x128xf32>
    %c0_53 = arith.constant 0 : index
    %c0_54 = arith.constant 0 : index
    %136 = vector.load %arg9[%c0_53, %c0_54] : memref<256x128xf32, #tpu.memory_space<vmem>>, vector<256x128xf32>
    tpu.vector_store %arg9[%c0_53, %c0_54], %135 {strides = array<i32>} : memref<256x128xf32, #tpu.memory_space<vmem>>, vector<256x128xf32>,
    %c0_55 = arith.constant 0 : index
    %c0_56 = arith.constant 0 : index
    %137 = vector.load %arg9[%c0_55, %c0_56] : memref<256x128xf32, #tpu.memory_space<vmem>>, vector<256x128xf32>
    %c8_i32_57 = arith.constant 8 : i32
    %138 = tpu.dynamic_rotate %137 by %c8_i32_57 dim 0 : vector<256x128xf32>, i32 -> vector<256x128xf32>
    %139 = arith.mulf %138, %34 : vector<256x128xf32>
    %140 = arith.truncf %139 : vector<256x128xf32> to vector<256x128xbf16>
    %c4_i32_58 = arith.constant 4 : i32
    %141 = tpu.dynamic_rotate %137 by %c4_i32_58 dim 0 : vector<256x128xf32>, i32 -> vector<256x128xf32>
    %142 = arith.mulf %141, %30 : vector<256x128xf32>
    %143 = arith.truncf %142 : vector<256x128xf32> to vector<256x128xbf16>
    %144 = arith.truncf %137 : vector<256x128xf32> to vector<256x128xbf16>
    %145 = tpu.concatenate %140, %143, %144 in 1 : vector<256x128xbf16>, vector<256x128xbf16>, vector<256x128xbf16> -> vector<256x384xbf16>
    %c4 = arith.constant 4 : index
    %c0_59 = arith.constant 0 : index
    %c0_60 = arith.constant 0 : index
    %146 = vector.load %arg2[%c4, %c0_59, %c0_60] : memref<6x384x128xbf16, #tpu.memory_space<vmem>>, vector<1x384x128xbf16>
    %147 = vector.shape_cast %146 : vector<1x384x128xbf16> to vector<384x128xbf16>
    %cst_61 = arith.constant dense<0.000000e+00> : vector<256x128xf32>
    %148 = tpu.matmul %145, %147, %cst_61 {dimension_numbers = #tpu.dot_dimension_numbers<[1], [0], [0], [1], [0, 0, 1, 1], [], []>} : vector<256x384xbf16>, vector<384x128xbf16>, vector<256x128xf32> -> vector<256x128xf32>
    %149 = vector.extract_strided_slice %0 {offsets = [4, 0], sizes = [1, 128], strides = [1, 1]} : vector<6x128xf32> to vector<1x128xf32>
    %150 = vector.broadcast %149 : vector<1x128xf32> to vector<256x128xf32>
    %151 = arith.addf %148, %150 : vector<256x128xf32>
    %cst_62 = arith.constant 0.000000e+00 : f32
    %152 = vector.broadcast %cst_62 : f32 to vector<256x128xf32>
    %153 = arith.cmpf ogt, %151, %152 : vector<256x128xf32>
    %cst_63 = arith.constant 0.00999999977 : f32
    %154 = vector.broadcast %cst_63 : f32 to vector<256x128xf32>
    %155 = arith.mulf %154, %151 : vector<256x128xf32>
    %156 = arith.select %153, %151, %155 : vector<256x128xi1>, vector<256x128xf32>
    %c8_i32_64 = arith.constant 8 : i32
    %157 = tpu.dynamic_rotate %156 by %c8_i32_64 dim 0 : vector<256x128xf32>, i32 -> vector<256x128xf32>
    %158 = arith.mulf %157, %34 : vector<256x128xf32>
    %159 = arith.truncf %158 : vector<256x128xf32> to vector<256x128xbf16>
    %c4_i32_65 = arith.constant 4 : i32
    %160 = tpu.dynamic_rotate %156 by %c4_i32_65 dim 0 : vector<256x128xf32>, i32 -> vector<256x128xf32>
    %161 = arith.mulf %160, %30 : vector<256x128xf32>
    %162 = arith.truncf %161 : vector<256x128xf32> to vector<256x128xbf16>
    %163 = arith.truncf %156 : vector<256x128xf32> to vector<256x128xbf16>
    %164 = tpu.concatenate %159, %162, %163 in 1 : vector<256x128xbf16>, vector<256x128xbf16>, vector<256x128xbf16> -> vector<256x384xbf16>
    %c5 = arith.constant 5 : index
    %c0_66 = arith.constant 0 : index
    %c0_67 = arith.constant 0 : index
    %165 = vector.load %arg2[%c5, %c0_66, %c0_67] : memref<6x384x128xbf16, #tpu.memory_space<vmem>>, vector<1x384x128xbf16>
    %166 = vector.shape_cast %165 : vector<1x384x128xbf16> to vector<384x128xbf16>
    %cst_68 = arith.constant dense<0.000000e+00> : vector<256x128xf32>
    %167 = tpu.matmul %164, %166, %cst_68 {dimension_numbers = #tpu.dot_dimension_numbers<[1], [0], [0], [1], [0, 0, 1, 1], [], []>} : vector<256x384xbf16>, vector<384x128xbf16>, vector<256x128xf32> -> vector<256x128xf32>
    %168 = vector.extract_strided_slice %0 {offsets = [5, 0], sizes = [1, 128], strides = [1, 1]} : vector<6x128xf32> to vector<1x128xf32>
    %169 = vector.broadcast %168 : vector<1x128xf32> to vector<256x128xf32>
    %170 = arith.addf %167, %169 : vector<256x128xf32>
    %cst_69 = arith.constant 0.000000e+00 : f32
    %171 = vector.broadcast %cst_69 : f32 to vector<256x128xf32>
    %172 = arith.cmpf ogt, %170, %171 : vector<256x128xf32>
    %cst_70 = arith.constant 0.00999999977 : f32
    %173 = vector.broadcast %cst_70 : f32 to vector<256x128xf32>
    %174 = arith.mulf %173, %170 : vector<256x128xf32>
    %175 = arith.select %172, %170, %174 : vector<256x128xi1>, vector<256x128xf32>
    %176 = arith.truncf %137 : vector<256x128xf32> to vector<256x128xbf16>
    %c1_71 = arith.constant 1 : index
    %c0_72 = arith.constant 0 : index
    %c0_73 = arith.constant 0 : index
    %177 = vector.load %arg4[%c1_71, %c0_72, %c0_73] : memref<2x128x128xbf16, #tpu.memory_space<vmem>>, vector<1x128x128xbf16>
    %178 = vector.shape_cast %177 : vector<1x128x128xbf16> to vector<128x128xbf16>
    %cst_74 = arith.constant dense<0.000000e+00> : vector<256x128xf32>
    %179 = tpu.matmul %176, %178, %cst_74 {dimension_numbers = #tpu.dot_dimension_numbers<[1], [0], [0], [1], [0, 0, 1, 1], [], []>} : vector<256x128xbf16>, vector<128x128xbf16>, vector<256x128xf32> -> vector<256x128xf32>
    %180 = vector.extract_strided_slice %1 {offsets = [1, 0], sizes = [1, 128], strides = [1, 1]} : vector<2x128xf32> to vector<1x128xf32>
    %181 = vector.broadcast %180 : vector<1x128xf32> to vector<256x128xf32>
    %182 = arith.addf %179, %181 : vector<256x128xf32>
    %183 = arith.addf %175, %182 : vector<256x128xf32>
    %cst_75 = arith.constant 0.000000e+00 : f32
    %184 = vector.broadcast %cst_75 : f32 to vector<256x128xf32>
    %185 = arith.cmpf ogt, %183, %184 : vector<256x128xf32>
    %cst_76 = arith.constant 0.00999999977 : f32
    %186 = vector.broadcast %cst_76 : f32 to vector<256x128xf32>
    %187 = arith.mulf %186, %183 : vector<256x128xf32>
    %188 = arith.select %185, %183, %187 : vector<256x128xi1>, vector<256x128xf32>
    %c0_77 = arith.constant 0 : index
    %c0_78 = arith.constant 0 : index
    %189 = vector.load %arg9[%c0_77, %c0_78] : memref<256x128xf32, #tpu.memory_space<vmem>>, vector<256x128xf32>
    tpu.vector_store %arg9[%c0_77, %c0_78], %188 {strides = array<i32>} : memref<256x128xf32, #tpu.memory_space<vmem>>, vector<256x128xf32>,
    %c0_79 = arith.constant 0 : index
    %c0_80 = arith.constant 0 : index
    %190 = vector.load %arg9[%c0_79, %c0_80] : memref<256x128xf32, #tpu.memory_space<vmem>>, vector<256x128xf32>
    %191 = vector.shape_cast %190 : vector<256x128xf32> to vector<8x32x128xf32>
    %cst_81 = arith.constant dense<0xFF800000> : vector<8x128xf32>
    %192 = vector.multi_reduction <maximumf>, %191, %cst_81 [1] : vector<8x32x128xf32> to vector<8x128xf32>
    %193 = arith.truncf %192 : vector<8x128xf32> to vector<8x128xbf16>
    %c0_82 = arith.constant 0 : index
    %c0_83 = arith.constant 0 : index
    %194 = vector.load %arg6[%c0_82, %c0_83] : memref<128x128xbf16, #tpu.memory_space<vmem>>, vector<128x128xbf16>
    %cst_84 = arith.constant dense<0.000000e+00> : vector<8x128xf32>
    %195 = tpu.matmul %193, %194, %cst_84 {dimension_numbers = #tpu.dot_dimension_numbers<[1], [0], [0], [1], [0, 0, 1, 1], [], []>} : vector<8x128xbf16>, vector<128x128xbf16>, vector<8x128xf32> -> vector<8x128xf32>
    %c0_85 = arith.constant 0 : index
    %c0_86 = arith.constant 0 : index
    %196 = vector.load %arg7[%c0_85, %c0_86] : memref<1x128xf32, #tpu.memory_space<vmem>>, vector<1x128xf32>
    %197 = vector.broadcast %196 : vector<1x128xf32> to vector<8x128xf32>
    %198 = arith.addf %195, %197 : vector<8x128xf32>
    %199 = arith.mulf %198, %198 : vector<8x128xf32>
    %cst_87 = arith.constant dense<0.000000e+00> : vector<8xf32>
    %200 = vector.multi_reduction <add>, %199, %cst_87 [1] : vector<8x128xf32> to vector<8xf32>
    %201 = vector.shape_cast %200 : vector<8xf32> to vector<8x1xf32>
    %cst_88 = arith.constant 1.000000e-24 : f32
    %202 = vector.broadcast %cst_88 : f32 to vector<8x1xf32>
    %203 = arith.maximumf %201, %202 : vector<8x1xf32>
    %204 = math.rsqrt %203 : vector<8x1xf32>
    %205 = vector.broadcast %204 : vector<8x1xf32> to vector<8x128xf32>
    %206 = arith.mulf %198, %205 : vector<8x128xf32>
    %c0_89 = arith.constant 0 : index
    %c0_90 = arith.constant 0 : index
    %207 = vector.load %arg8[%c0_89, %c0_90] : memref<8x128xf32, #tpu.memory_space<vmem>>, vector<8x128xf32>
    tpu.vector_store %arg8[%c0_89, %c0_90], %206 {strides = array<i32>} : memref<8x128xf32, #tpu.memory_space<vmem>>, vector<8x128xf32>,
    return
  }
  func.func @transform_0(%arg0: i32) -> (i32, i32) {
    %c0_i32 = arith.constant 0 : i32
    %c0_i32_0 = arith.constant 0 : i32
    return %arg0, %c0_i32 : i32, i32
  }
  func.func @transform_1(%arg0: i32) -> (i32, i32, i32) {
    %c0_i32 = arith.constant 0 : i32
    %c0_i32_0 = arith.constant 0 : i32
    %c0_i32_1 = arith.constant 0 : i32
    %c0_i32_2 = arith.constant 0 : i32
    return %c0_i32, %c0_i32_0, %c0_i32_1 : i32, i32, i32
  }
  func.func @transform_2(%arg0: i32) -> (i32, i32) {
    %c0_i32 = arith.constant 0 : i32
    %c0_i32_0 = arith.constant 0 : i32
    %c0_i32_1 = arith.constant 0 : i32
    return %c0_i32, %c0_i32_0 : i32, i32
  }
  func.func @transform_3(%arg0: i32) -> (i32, i32, i32) {
    %c0_i32 = arith.constant 0 : i32
    %c0_i32_0 = arith.constant 0 : i32
    %c0_i32_1 = arith.constant 0 : i32
    %c0_i32_2 = arith.constant 0 : i32
    return %c0_i32, %c0_i32_0, %c0_i32_1 : i32, i32, i32
  }
  func.func @transform_4(%arg0: i32) -> (i32, i32) {
    %c0_i32 = arith.constant 0 : i32
    %c0_i32_0 = arith.constant 0 : i32
    %c0_i32_1 = arith.constant 0 : i32
    return %c0_i32, %c0_i32_0 : i32, i32
  }
  func.func @transform_5(%arg0: i32) -> (i32, i32) {
    %c0_i32 = arith.constant 0 : i32
    %c0_i32_0 = arith.constant 0 : i32
    %c0_i32_1 = arith.constant 0 : i32
    return %c0_i32, %c0_i32_0 : i32, i32
  }
  func.func @transform_6(%arg0: i32) -> (i32, i32) {
    %c0_i32 = arith.constant 0 : i32
    %c0_i32_0 = arith.constant 0 : i32
    %c0_i32_1 = arith.constant 0 : i32
    return %c0_i32, %c0_i32_0 : i32, i32
  }
  func.func @transform_7(%arg0: i32) -> (i32, i32) {
    %c0_i32 = arith.constant 0 : i32
    %c0_i32_0 = arith.constant 0 : i32
    return %arg0, %c0_i32 : i32, i32
  }
}

</mosaic_0001>

<bundles_post_ra>
// kernel: tpu_custom_call.1
= control target key start
LH: loop header
LB: loop body
LE: loop exit
PB: predicated region body
PF: predicated region fallthrough
CT: control target
= control target key end

     0   :  { %s13167_s0 = inlined_call_operand.hbm [shape: bf16[512,128], index: 0, kind: input, shape index: {}]   ;;  %s13168_s1 = inlined_call_operand.hbm [shape: bf16[6,384,128], index: 1, kind: input, shape index: {}]   ;;  %s13169_s2 = inlined_call_operand.hbm [shape: f32[6,128], index: 2, kind: input, shape index: {}]   ;;  %s13170_s3 = inlined_call_operand.hbm [shape: bf16[2,128,128], index: 3, kind: input, shape index: {}]   ;;  %s13171_s4 = inlined_call_operand.vmem [shape: f32[2,128], index: 4, kind: input, shape index: {}]   ;;  %s13172_s5 = inlined_call_operand.hbm [shape: bf16[128,128], index: 5, kind: input, shape index: {}]   ;;  %s13173_s6 = inlined_call_operand.vmem [shape: f32[1,128], index: 6, kind: input, shape index: {}]   ;;  %s13174_s7 = inlined_call_operand.hbm [shape: f32[16,128], index: 7, kind: output, shape index: {}]  }
   0x1   :  { %13349 = sst [smem:[#allocation77_spill]] %s13168_s1 }
   0x2   :  { %12 = vsyncpa [#allocation4], 0 }
   0x3   :  { %14 = vsyncpa [#allocation4 + $0x1], 0 }
   0x4   :  { %15 = vsyncpa [#allocation7], 0 }
   0x5   :  { %16 = vsyncpa [#allocation10], 0 }
   0x6   :  { %17 = vsyncpa [#allocation5], 0 }
   0x7   :  { %19 = vsyncpa [#allocation5 + $0x1], 0  ;;  %s9787_s24 = smov 0   ;;  %s9789_s25 = smov 0  }
   0x8   :  { %s9791_s26 = smov 0   ;;  %s9793_s27 = smov 0  }
   0x9 LB: > { %s9808_s28 = sadd.s32 4294967295, %s9735_s27   ;;  %s7677_s29 = sadd.s32 4294967294, %s9735_s27   ;;  %s9735_s27 = sphi %s9793_s27, %s13781_s27   ;;  %s9731_s26 = sphi %s9791_s26, %s13780_s26   ;;  %s9727_s25 = sphi %s9789_s25, %s13779_s25   ;;  %s9723_s24 = sphi %s9787_s24, %s13778_s24  }
   0xa   : > { %p45_p0 = scmp.ne.s32.totalorder %s9727_s25, %s9723_s24  ;;  %p13175_p1 = scmp.eq.s32.totalorder %s9808_s28, 0 }
   0xb   : > { %p201_p3 = scmp.eq.s32.totalorder %s7677_s29, 1  ;;  %p7678_p5 = scmp.ge.s32.totalorder %s9735_s27, 1 }
   0xc   : > { %p9817_p4 = por %p13175_p1, %p45_p0  ;;  %p208_p7 = scmp.lt.s32.totalorder %s9735_s27, 3 }
   0xd   : > { %p9822_p6 = por %p201_p3, %p45_p0  ;;  %s9737_s10 = smov [#allocation6]  }
   0xe   : > { %s13350_s30 = scalar_select %p9817_p4, 1, 0 }
   0xf   : > { %s13351_s8 = scalar_select %p9822_p6, 1, 0 }
  0x10   : > { %p9827_p8 = pnand %p7678_p5, %p208_p7  ;;  %s220_s11 = sshll.u32 %s9737_s10, 4  ;;  %s221_s11 = int_to_ptr.vmem [resolvable:$true] %s220_s11 }
  0x11   : > { %s9738_s13 = smov [#allocation9]   ;;  %s9739_s15 = smov [#allocation8]  }
  0x12   : > { %s13352_s9 = scalar_select %p9827_p8, 1, 0 }
  0x13   : > { %p9268_p9 = pneg %p9827_p8  ;;  %s244_s14 = sshll.u32 %s9738_s13, 4  ;;  %s245_s14 = int_to_ptr.vmem [resolvable:$true] %s244_s14 }
  0x14   : > { %s234_s16 = sshll.u32 %s9739_s15, 4  ;;  %s9542_s17 = scalar_lea.vmem %s221_s11, 18432  ;;  %s235_s16 = int_to_ptr.vmem [resolvable:$true] %s234_s16 }
  0x15   : > { %p9836_p11 = pnand %p9268_p9, %p13175_p1  ;;  %p9543_p13 = scmp.ne.s32.totalorder %s221_s11, %s9542_s17 }
  0x16   : > { %p9550_p5 = scmp.lt.s32.totalorder %s221_s11, %s221_s11  ;;  %p9551_p7 = scmp.lt.s32.totalorder %s9542_s17, %s9542_s17 }
  0x17   : > { %p9533_p12 = pneg %p9836_p11 }
  0x18   : > { %p9552_p9 = por %p9551_p7, %p9550_p5 }
  0x19   : > { %p9545_p0 = pnand %p9543_p13, %p9533_p12 }
  0x1b   : > { %p9546_p3 = pneg %p9545_p0 }
  0x1d   : > { %p9553_p10 = pnand %p9552_p9, %p9546_p3 }
  0x1f   : > { %9556 = shalt.err (!%p9553_p10)
}
  0x20   : > { %s13176_s18 = smov 64   ;;  %s13177_s19 = smov 4  }
  0x21   : > { %s13354_s1 = sld [smem:[#allocation77_spill]]  ;;  %s9568_s22 = scalar_lea.vmem %s245_s14, 2048 }
  0x22   : > { %p9569_p13 = scmp.ne.s32.totalorder %s245_s14, %s9568_s22  ;;  %p9576_p3 = scmp.lt.s32.totalorder %s245_s14, %s245_s14 }
  0x23   : > { %p9577_p10 = scmp.lt.s32.totalorder %s9568_s22, %s9568_s22 }
  0x24   : > { %p9571_p0 = pnand %p9569_p13, %p9533_p12 }
  0x25   : > { %p9578_p7 = por %p9577_p10, %p9576_p3 }
  0x26   : > { %p9572_p5 = pneg %p9571_p0 }
  0x27   : > { %9271 = dma.hbm_to_vmem [thread:$0]  (!%p9836_p11), %s13354_s1, 18432, %s221_s11, [#allocation7], %s13176_s18, %s13176_s18, %s13177_s19  }
  0x28   : > { %p9579_p9 = pnand %p9578_p7, %p9572_p5 }
  0x2a   : > { %9582 = shalt.err (!%p9579_p9)
}
  0x2b   : > { %9277 = dma.hbm_to_vmem [thread:$0]  (!%p9836_p11), %s13170_s3, 2048, %s245_s14, [#allocation10], %s13176_s18, %s13176_s18, %s13177_s19  }
  0x2c   : > { %s9594_s10 = scalar_lea.vmem %s235_s16, 128  ;;  %p9602_p3 = scmp.lt.s32.totalorder %s235_s16, %s235_s16 }
  0x2d   : > { %p9595_p1 = scmp.ne.s32.totalorder %s235_s16, %s9594_s10  ;;  %p9603_p5 = scmp.lt.s32.totalorder %s9594_s10, %s9594_s10 }
  0x2f   : > { %p9597_p13 = pnand %p9595_p1, %p9533_p12  ;;  %p9604_p10 = por %p9603_p5, %p9602_p3 }
  0x31   : > { %p9598_p0 = pneg %p9597_p13 }
  0x33   : > { %p9605_p7 = pnand %p9604_p10, %p9598_p0 }
  0x35   : > { %9608 = shalt.err (!%p9605_p7)
}
  0x36   : > { %9274 = dma.hbm_to_vmem [thread:$0]  (!%p9836_p11), %s13169_s2, 128, %s235_s16, [#allocation7]  }
  0x37   : > { %s9742_s14 = smov [#allocation11]  }
  0x38   : > { %s260_s15 = sshll.u32 %s9742_s14, 4  ;;  %s261_s15 = int_to_ptr.vmem [resolvable:$true] %s260_s15 }
  0x39   : > { %s9620_s17 = scalar_lea.vmem %s261_s15, 1024  ;;  %p9628_p2 = scmp.lt.s32.totalorder %s261_s15, %s261_s15 }
  0x3a   : > { %p9621_p9 = scmp.ne.s32.totalorder %s261_s15, %s9620_s17  ;;  %p9629_p3 = scmp.lt.s32.totalorder %s9620_s17, %s9620_s17 }
  0x3c   : > { %p9623_p1 = pnand %p9621_p9, %p9533_p12  ;;  %p9630_p0 = por %p9629_p3, %p9628_p2 }
  0x3e   : > { %p9624_p13 = pneg %p9623_p1 }
  0x40   : > { %p9631_p5 = pnand %p9630_p0, %p9624_p13 }
  0x42   : > { %9634 = shalt.err (!%p9631_p5)
}
  0x43   : > { %9280 = dma.hbm_to_vmem [thread:$0]  (!%p9836_p11), %s13172_s5, 1024, %s261_s15, [#allocation10], %s13176_s18, %s13176_s18, %s13177_s19  }
  0x44   : > { %s9884_s21 = sadd.s32 1, %s9735_s27   ;;  %s32_s12 = sadd.s32 1, %s9731_s26 }
  0x45   : > { %s29_s22 = ssub.s32 %s9735_s27, %s9884_s21  ;;  %p39_p2 = scmp.ne.s32.totalorder %s9731_s26, %s9727_s25 }
  0x46   : > { %p30_p12 = scmp.eq.s32.totalorder %s29_s22, 0  ;;  %p40_p10 = scmp.eq.s32.totalorder %s9735_s27, 0 }
  0x47   : > { %p13355_p7 = scmp.eq.s32.totalorder %s9808_s28, 1  ;;  %p9293_p1 = scmp.lt.s32.totalorder %s9735_s27, 2 }
  0x48   : > { %s9900_s29 = scalar_select %p30_p12, %s9731_s26, %s32_s12  }
  0x49   : > { %p9894_p9 = por %p13355_p7, %p39_p2  ;;  %p41_p13 = por %p40_p10, %p39_p2 }
  0x4a   : > { %s277_s10 = sand.u32 1, %s9731_s26   ;;  %s7891_s13 = sshll.u32 %s9735_s27, 11 }
  0x4b   : > { %s13356_s23 = scalar_select %p9894_p9, 1, 0 }
  0x4c   : > { %s7684_s11 = sshll.u32 %s277_s10, 7  ;;  %s9907_s17 = scalar_lea.hbm %s13167_s0, %s7891_s13 }
  0x4d   : > { %s281_s16 = scalar_lea.vmem [#allocation3], %s7684_s11  ;;  %p9911_p11 = pnand %p9293_p1, %p41_p13 }
  0x4e   : > { %s288_s20 = sshll.u32 %s281_s16, 4  ;;  %s9915_s12 = scalar_lea.sflag [#allocation4], %s277_s10  ;;  %s9909_s20 = int_to_ptr.vmem [resolvable:$true] %s288_s20 }
  0x4f   : > { %s9635_s18 = scalar_lea.hbm %s9907_s17, 2048  ;;  %p9637_p0 = pneg %p9911_p11 }
  0x50   : > { %p9636_p3 = scmp.ne.s32.totalorder %s9907_s17, %s9635_s18  ;;  %s9640_s11 = scalar_lea.hbm %s13167_s0, 4096 }
  0x51   : > { %p9641_p12 = scmp.lt.s32.totalorder %s9907_s17, %s13167_s0  ;;  %p9642_p10 = scmp.lt.s32.totalorder %s9640_s11, %s9635_s18 }
  0x52   : > { %p9638_p5 = pnand %p9637_p0, %p9636_p3 }
  0x53   : > { %p9643_p7 = por %p9642_p10, %p9641_p12 }
  0x54   : > { %p9639_p2 = pneg %p9638_p5 }
  0x56   : > { %p9644_p1 = pnand %p9643_p7, %p9639_p2 }
  0x58   : > { %9647 = shalt.err (!%p9644_p1)
}
  0x59   : > { %s9648_s10 = scalar_lea.vmem %s9909_s20, 2048  ;;  %s9743_s19 = smov [#allocation3]  }
  0x5a   : > { %p9649_p13 = scmp.ne.s32.totalorder %s9909_s20, %s9648_s10  ;;  %s9653_s1 = sshll.u32 %s9743_s19, 4  ;;  %s9654_s1 = int_to_ptr.vmem [resolvable:$false] %s9653_s1 }
  0x5b   : > { %s9655_s13 = scalar_lea.vmem %s9654_s1, 4096  ;;  %p9656_p5 = scmp.lt.s32.totalorder %s9909_s20, %s9654_s1 }
  0x5c   : > { %p9651_p6 = pnand %p9649_p13, %p9637_p0  ;;  %p9657_p9 = scmp.lt.s32.totalorder %s9655_s13, %s9648_s10 }
  0x5e   : > { %p9652_p3 = pneg %p9651_p6  ;;  %p9658_p4 = por %p9657_p9, %p9656_p5 }
  0x60   : > { %p9659_p8 = pnand %p9658_p4, %p9652_p3 }
  0x62   : > { %9662 = shalt.err (!%p9659_p8)
}
  0x63   : > { %s13358_s18 = smov 4   ;;  %s13359_s14 = smov 64  }
  0x64   : > { %9284 = dma.hbm_to_vmem [thread:$0]  (!%p9911_p11), %s9907_s17, 2048, %s9909_s20, %s9915_s12, %s13359_s14, %s13359_s14, %s13358_s18  }
  0x65   : > { %p13360_p6 = scmp.ne.s32.totalorder %s13352_s9, 0 }
  0x67   : > { %300 = sbr.rel (%p13360_p6) target bundleno = 2561 (0xa01), region = 48 }
  0x6c   : > { %s9942_s19 = sand.u32 1, %s9727_s25   ;;  %p13361_p4 = scmp.ne.s32.totalorder %s13350_s30, 0 }
  0x6d   : > { %s7688_s1 = sshll.u32 %s9942_s19, 7  ;;  %s303_s11 = scalar_lea.sflag [#allocation4], %s9942_s19 }
  0x6e   : > { %s9946_s15 = scalar_lea.vmem [#allocation3], %s7688_s1 }
  0x6f   : > { %9706 = dma.done.wait (%p13361_p4), %s303_s11, 2048  }
  0x70   : > { %9708 = vsyncadd (%p13361_p4), %s303_s11, 4294965248  ;;  %p13362_p8 = scmp.eq.s32.totalorder %s9808_s28, 0 }
  0x72   : > { %9710 = dma.done.wait (%p13362_p8), [#allocation7], 18560   ;;  %p13363_p9 = pmov %p13362_p8 }
  0x73   : > { %p13364_p11 = pmov %p13362_p8 }
  0x74   : > { %9712 = vsyncadd (%p13363_p9), [#allocation7], 4294948736 }
  0x75   : > { %9714 = dma.done.wait (%p13364_p11), [#allocation10], 3072   ;;  %p13365_p0 = pmov %p13362_p8 }
  0x76   : > { %v9339_v0 = vld [vmem:[#allocation6 + $0x78] sm:$0xff]   ;;  %v9341_v2 = vld [vmem:[#allocation6 + $0x70] sm:$0xff]   ;;  %v9344_v5 = vld [vmem:[#allocation6 + $0x68] sm:$0xff]   ;;  %v357_v10 = vlaneseq  ;;  %v13183_v33 = vmov 0.0   ;;  %s7693_s16 = sshll.u32 %s9942_s19, 3  ;;  %s7888_s10 = sshll.u32 %s9808_s28, 7 }
  0x77   : > { %9716 = vsyncadd (%p13365_p0), [#allocation10], 4294964224  ;;  %v9340_v1 = vld [vmem:[#allocation6 + $0x38] sm:$0xff]   ;;  %7971 = vmatprep.subr.bf16.mxu0 %v9339_v0  ;;  %v9343_v4 = vld [vmem:[#allocation6 + $0x30] sm:$0xff]   ;;  %s352_s13 = scalar_lea.vmem [#allocation12], %s7693_s16  ;;  %s7567_s11 = scalar_lea.hbm %s13174_s7, %s7888_s10 }
  0x78   : > { %7972 = vmatpush3.bf16.msra.mxu0 %v9340_v1  ;;  %v9342_v3 = vld [vmem:[#allocation6 + $0xb8] sm:$0xff]   ;;  %v9345_v6 = vld [vmem:[#allocation6 + $0xb0] sm:$0xff]   ;;  %v9346_v7 = vld [vmem:[#allocation6 + $0x28] sm:$0xff]   ;;  %v9960_v14 = vshrl.u32 %v357_v10, 7  ;;  %s7569_s18 = sshll.u32 %s352_s13, 4  ;;  %p13775_p12 = scmp.ne.s32.totalorder %s13356_s23, 0  ;;  %s7570_s18 = int_to_ptr.vmem [resolvable:$true] %s7569_s18 }
  0x79   : > { %7973 = vmatprep.subr.bf16.mxu0 %v9341_v2  ;;  %8844 = vmatprep.subr.bf16.mxu1 %v9342_v3  ;;  %v9347_v8 = vld [vmem:[#allocation6 + $0x60] sm:$0xff]   ;;  %v9348_v9 = vld [vmem:[#allocation6 + $0xa8] sm:$0xff]   ;;  %v9350_v12 = vld [vmem:[#allocation6 + $0x58] sm:$0xff]   ;;  %s9663_s30 = scalar_lea.vmem %s7570_s18, 128  ;;  %s9746_s9 = smov [#allocation12]  }
  0x7a   : > { %8845 = vmatpush3.bf16.msra.mxu1 %v9342_v3  ;;  %v9349_v11 = vld [vmem:[#allocation6 + $0x20] sm:$0xff]   ;;  %v9352_v15 = vld [vmem:[#allocation6 + $0x18] sm:$0xff]   ;;  %v362_v17 = vadd.s32 32, %v9960_v14  ;;  %v9353_v18 = vld [vmem:[#allocation6 + $0x50] sm:$0xff]   ;;  %v9964_v19 = vand.u32 31, %v9960_v14  ;;  %v366_v24 = vadd.s32 64, %v9960_v14  ;;  %p9664_p2 = scmp.ne.s32.totalorder %s7570_s18, %s9663_s30 }
  0x7b   : > { %8846 = vmatprep.subr.bf16.mxu1 %v9345_v6  ;;  %v9351_v13 = vld [vmem:[#allocation6 + $0xa0] sm:$0xff]   ;;  %v9354_v16 = vld [vmem:[#allocation6 + $0x98] sm:$0xff]   ;;  %v9355_v20 = vld [vmem:[#allocation6 + $0x10] sm:$0xff]   ;;  %vm1318_vm2 = vcmp.lt.s32.totalorder %v9960_v14, 2  ;;  %vm1431_vm3 = vcmp.lt.s32.totalorder %v9960_v14, 1  ;;  %v13181_v32 = vsub.s32 1, %v9960_v14 }
  0x7c   : > { %7974 = vmatpush3.bf16.msra.mxu0 %v9343_v4  ;;  %13366 = vst [vmem:[#allocation17_spill] sm:$0xff] %v9964_v19  ;;  %v9357_v21 = vld [vmem:[#allocation6 + $0x90] sm:$0xff]   ;;  %v9966_v22 = vand.u32 31, %v362_v17  ;;  %v9356_v23 = vld [vmem:[#allocation6 + $0x48] sm:$0xff]   ;;  %vm774_vm0 = vcmp.ge.s32.totalorder %v9964_v19, 1  ;;  %vm870_vm1 = vcmp.ge.s32.totalorder %v9964_v19, 2  ;;  %p9665_p10 = pnand %p9664_p2, %p13775_p12 }
  0x7d   : > { %7975 = vmatprep.subr.bf16.mxu0 %v9344_v5  ;;  %v9358_v25 = vld [vmem:[#allocation6 + $0x8] sm:$0xff]   ;;  %v9359_v26 = vld [vmem:[#allocation6 + $0x40] sm:$0xff]   ;;  %v9976_v31 = vld [vmem:[%s9946_s15 + $0x78] sm:$0xff]   ;;  %v9982_v34 = vsel %vm774_vm0, 1.0, %v13183_v33  ;;  %v9988_v36 = vsel %vm870_vm1, 1.0, %v13183_v33  ;;  %v9991_v38 = vand.u32 31, %v366_v24 }
  0x7e   : > { %8847 = vmatpush3.bf16.msra.mxu1 %v9345_v6  ;;  %13367 = vst [vmem:[#allocation18_spill] sm:$0xff] %v9966_v22  ;;  %v9360_v27 = vld [vmem:[#allocation6 + $0x88] sm:$0xff]   ;;  %v7893_v28 = vld [vmem:[%s9946_s15] sm:$0xff]   ;;  %vm778_vm4 = vcmp.ge.s32.totalorder %v9966_v22, 1  ;;  %13368 = vst [vmem:[#allocation19_spill] sm:$0xff] %v9982_v34  ;;  %v7955_v35 = vunpack.c.h.bf16 %v9976_v31  ;;  %vm874_vm5 = vcmp.ge.s32.totalorder %v9966_v22, 2  ;;  %p9666_p7 = pneg %p9665_p10 }
  0x7f   : > { %8848 = vmatprep.subr.bf16.mxu1 %v9348_v9  ;;  %v7894_v29 = vunpack.c.l.bf16 %v7893_v28  ;;  %v7895_v30 = vunpack.c.h.bf16 %v7893_v28  ;;  %8860 = vmatprep.mubr.bf16.mxu1 %v7893_v28  ;;  %13369 = vst [vmem:[#allocation20_spill] sm:$0xff] %v9988_v36  ;;  %v7956_v37 = vld [vmem:[%s9946_s15 + $0x8] sm:$0xff]   ;;  %13370 = vst [vmem:[#allocation21_spill] sm:$0xff] %v9991_v38  ;;  %v356_v39 = vld [vmem:[%s13171_s4] sm:$0x3]  ;;  %v9999_v42 = vsel %vm778_vm4, 1.0, %v13183_v33 }
  0x80   : > { %7976 = vmatpush3.bf16.msra.mxu0 %v9346_v7  ;;  %v7957_v43 = vld [vmem:[%s9946_s15 + $0x10] sm:$0xff]   ;;  %v9361_v44 = vld [vmem:[#allocation6] sm:$0xff]   ;;  %v10002_v45 = vrot.slane %v7955_v35, 7  ;;  %v10006_v46 = vrot.slane %v356_v39, %v13181_v32  ;;  %v10010_v51 = vrot.slane %v7955_v35, 6  ;;  %v7898_v52 = vunpack.c.l.bf16 %v7956_v37  ;;  %v7958_v62 = vld [vmem:[%s9946_s15 + $0x18] sm:$0xff]   ;;  %s9667_s17 = sshll.u32 %s9746_s9, 4  ;;  %s9668_s17 = int_to_ptr.vmem [resolvable:$false] %s9667_s17 }
  0x81   : > { %7977 = vmatprep.subr.bf16.mxu0 %v9347_v8  ;;  %v1399_v40 = vrot.slane %v7894_v29, 7  ;;  %v1400_v41 = vrot.slane %v7895_v30, 7  ;;  %v1286_v47 = vrot.slane %v7894_v29, 6  ;;  %v1287_v48 = vrot.slane %v7895_v30, 6  ;;  %v9362_v49 = vld [vmem:[#allocation6 + $0x80] sm:$0xff]   ;;  %v9363_v3 = vld [vmem:[#allocation6 + $0x178] sm:$0xff]   ;;  %p9670_p1 = scmp.lt.s32.totalorder %s7570_s18, %s9668_s17 }
  0x82   : > { %8849 = vmatpush3.bf16.msra.mxu1 %v9348_v9  ;;  %13371 = vst [vmem:[#allocation22_spill] sm:$0xff] %v10006_v46  ;;  %v7899_v53 = vunpack.c.h.bf16 %v7956_v37  ;;  %v7902_v56 = vunpack.c.l.bf16 %v7957_v43  ;;  %v7903_v57 = vunpack.c.h.bf16 %v7957_v43  ;;  %v1401_v60 = vrot.slane %v7898_v52, 7  ;;  %v9364_v8 = vld [vmem:[#allocation6 + $0x170] sm:$0xff]   ;;  %s9669_s28 = scalar_lea.vmem %s9668_s17, 256 }
  0x83   : > { %8850 = vmatprep.subr.bf16.mxu1 %v9351_v13  ;;  %v1462_v50 = vsel %vm1431_vm3, %v1399_v40, %v1400_v41  ;;  %v1463_v54 = vsel %vm1431_vm3, %v10002_v45, %v1399_v40  ;;  %v1349_v55 = vsel %vm1318_vm2, %v1286_v47, %v1287_v48  ;;  %v1350_v59 = vsel %vm1318_vm2, %v10010_v51, %v1286_v47  ;;  %p9671_p13 = scmp.lt.s32.totalorder %s9669_s28, %s9663_s30 }
  0x84   : > { %7978 = vmatpush3.bf16.msra.mxu0 %v9349_v11  ;;  %v1464_v58 = vmul.f32 %v9982_v34, %v1463_v54  ;;  %v1402_v61 = vrot.slane %v7899_v53, 7  ;;  %v1351_v63 = vmul.f32 %v9988_v36, %v1350_v59  ;;  %v1288_v0 = vrot.slane %v7898_v52, 6  ;;  %v7960_v52 = vld [vmem:[%s9946_s15 + $0x28] sm:$0xff]  }
  0x85   : > { %7979 = vmatprep.subr.bf16.mxu0 %v9350_v12  ;;  %v1289_v1 = vrot.slane %v7899_v53, 6  ;;  %v1403_v2 = vrot.slane %v7902_v56, 7  ;;  %v1461_v6 = vsel %vm1431_vm3, %v1400_v41, %v1401_v60  ;;  %v1404_v7 = vrot.slane %v7903_v57, 7  ;;  %p9672_p3 = por %p9671_p13, %p9670_p1 }
  0x86   : > { %8851 = vmatpush3.bf16.msra.mxu1 %v9351_v13  ;;  %v1496_v4 = vpack.c.bf16 %v1462_v50, %v1464_v58  ;;  %v1460_v5 = vsel %vm1431_vm3, %v1401_v60, %v1402_v61  ;;  %v1383_v9 = vpack.c.bf16 %v1349_v55, %v1351_v63  ;;  %v370_v12 = vadd.s32 96, %v9960_v14  ;;  %v7962_v60 = vld [vmem:[%s9946_s15 + $0x38] sm:$0xff]  }
  0x87   : > { %8852 = vmatprep.subr.bf16.mxu1 %v9354_v16  ;;  %v1497_v10 = vpack.c.bf16 %v1460_v5, %v1461_v6  ;;  %v1459_v11 = vsel %vm1431_vm3, %v1402_v61, %v1403_v2  ;;  %v1290_v13 = vrot.slane %v7902_v56, 6  ;;  %v1347_v17 = vsel %vm1318_vm2, %v1288_v0, %v1289_v1  ;;  %v7961_v56 = vld [vmem:[%s9946_s15 + $0x30] sm:$0xff]   ;;  %p9673_p5 = pnand %p9672_p3, %p9666_p7 }
  0x88   : > { %7980 = vmatpush3.bf16.msra.mxu0 %v9352_v15  ;;  %1756 = vmatprep.mubr.bf16.mxu0 %v1496_v4  ;;  %v7906_v15 = vunpack.c.l.bf16 %v7958_v62  ;;  %vm782_vm6 = vcmp.ge.s32.totalorder %v9991_v38, 1  ;;  %v1291_v24 = vrot.slane %v7903_v57, 6  ;;  %vm878_vm7 = vcmp.ge.s32.totalorder %v9991_v38, 2 }
  0x89   : > { %7981 = vmatprep.subr.bf16.mxu0 %v9353_v18  ;;  %v1348_v18 = vsel %vm1318_vm2, %v1287_v48, %v1288_v0  ;;  %v1346_v35 = vsel %vm1318_vm2, %v1289_v1, %v1290_v13  ;;  %v10052_v40 = vsel %vm782_vm6, 1.0, %v13183_v33  ;;  %v374_v41 = vadd.s32 128, %v9960_v14 }
  0x8a   : > { %8853 = vmatpush3.bf16.msra.mxu1 %v9354_v16  ;;  %v7907_v16 = vunpack.c.h.bf16 %v7958_v62  ;;  %v1405_v28 = vrot.slane %v7906_v15, 7  ;;  %v1292_v53 = vrot.slane %v7906_v15, 6  ;;  %v7914_v59 = vunpack.c.l.bf16 %v7960_v52 }
  0x8b   : > { %8854 = vmatprep.subr.bf16.mxu1 %v9357_v21  ;;  %v10067_v57 = vand.u32 31, %v374_v41  ;;  %v7915_v63 = vunpack.c.h.bf16 %v7960_v52  ;;  %v7919_v4 = vunpack.c.h.bf16 %v7961_v56  ;;  %v7965_v41 = vld [vmem:[%s9946_s15 + $0x50] sm:$0xff]  }
  0x8c   : > { %7982 = vmatpush3.bf16.msra.mxu0 %v9355_v20  ;;  %v1468_v20 = vmul.f32 %v9999_v42, %v1459_v11  ;;  %v1406_v29 = vrot.slane %v7907_v16, 7  ;;  %v1457_v48 = vsel %vm1431_vm3, %v1404_v7, %v1405_v28  ;;  %v1293_v54 = vrot.slane %v7907_v16, 6 }
  0x8d   : > { %7983 = vmatprep.subr.bf16.mxu0 %v9356_v23  ;;  %v10039_v23 = vsel %vm874_vm5, 1.0, %v13183_v33  ;;  %13375 = vst [vmem:[#allocation26_spill] sm:$0xff] %v10067_v57  ;;  %v7923_v11 = vunpack.c.h.bf16 %v7962_v60  ;;  %v1410_v16 = vrot.slane %v7915_v63, 7  ;;  %vm790_vm10 = vcmp.ge.s32.totalorder %v10067_v57, 1 }
  0x8e   : > { %8855 = vmatpush3.bf16.msra.mxu1 %v9357_v21  ;;  %v1458_v21 = vsel %vm1431_vm3, %v1403_v2, %v1404_v7  ;;  %13372 = vst [vmem:[#allocation23_spill] sm:$0xff] %v10039_v23  ;;  %v1355_v39 = vmul.f32 %v10039_v23, %v1346_v35  ;;  %v1456_v47 = vsel %vm1431_vm3, %v1405_v28, %v1406_v29  ;;  %v7922_v7 = vunpack.c.l.bf16 %v7962_v60 }
  0x8f   : > { %8856 = vmatprep.subr.bf16.mxu1 %v9360_v27  ;;  %v1498_v30 = vpack.c.bf16 %v1458_v21, %v1468_v20  ;;  %v1499_v58 = vpack.c.bf16 %v1456_v47, %v1457_v48  ;;  %v1343_v1 = vsel %vm1318_vm2, %v1292_v53, %v1293_v54  ;;  %v1344_v2 = vsel %vm1318_vm2, %v1291_v24, %v1292_v53 }
  0x90   : > { %7984 = vmatpush3.bf16.msra.mxu0 %v9358_v25  ;;  %v7959_v25 = vld [vmem:[%s9946_s15 + $0x20] sm:$0xff]   ;;  %v10095_v21 = vrot.slane %v7919_v4, 7  ;;  %v10102_v28 = vrot.slane %v7922_v7, 7  ;;  %v10113_v47 = vrot.slane %v7923_v11, 6  ;;  %vm886_vm11 = vcmp.ge.s32.totalorder %v10067_v57, 2 }
  0x91   : > { %7985 = vmatprep.subr.bf16.mxu0 %v9359_v26  ;;  %v10044_v26 = vand.u32 31, %v370_v12  ;;  %v7963_v12 = vld [vmem:[%s9946_s15 + $0x40] sm:$0xff]  }
  0x92   : > { %8857 = vmatpush3.bf16.msra.mxu1 %v9360_v27  ;;  %v1384_v27 = vpack.c.bf16 %v1347_v17, %v1348_v18  ;;  %v1296_v17 = vrot.slane %v7914_v59, 6  ;;  %v10091_v18 = vrot.slane %v7915_v63, 6  ;;  %v7927_v48 = vunpack.c.h.bf16 %v7963_v12 }
  0x93   : > { %8858 = vmatprep.subr.bf16.mxu1 %v9362_v49  ;;  %13373 = vst [vmem:[#allocation24_spill] sm:$0xff] %v10044_v26  ;;  %vm786_vm8 = vcmp.ge.s32.totalorder %v10044_v26, 1  ;;  %vm882_vm9 = vcmp.ge.s32.totalorder %v10044_v26, 2  ;;  %v7934_v63 = vunpack.c.l.bf16 %v7965_v41 }
  0x94   : > { %7986 = vmatpush3.bf16.msra.mxu0 %v9361_v44  ;;  %v10058_v44 = vsel %vm878_vm7, 1.0, %v13183_v33  ;;  %v10076_v0 = vsel %vm786_vm8, 1.0, %v13183_v33  ;;  %v10083_v6 = vsel %vm882_vm9, 1.0, %v13183_v33 }
  0x95   : > { %8892 = vmatprep.subr.bf16.mxu0 %v9363_v3  ;;  %13374 = vst [vmem:[#allocation25_spill] sm:$0xff] %v10058_v44  ;;  %13376 = vst [vmem:[#allocation27_spill] sm:$0xff] %v10083_v6 }
  0x96   : > { %8859 = vmatpush3.bf16.msra.mxu1 %v9362_v49  ;;  %v7911_v49 = vunpack.c.h.bf16 %v7959_v25 }
  0x97   : > { %1757 = vmatmul.mubr.bf16.vlgmr.msra.gmra.mxu0 %v1383_v9 }
  0x98   : > { %1764 = vmatprep.mubr.bf16.mxu0 %v1497_v10  ;;  %8893 = vmatpush3.bf16.msra.mxu0 %v9363_v3  ;;  %v1408_v61 = vrot.slane %v7911_v49, 7  ;;  %v7918_v3 = vunpack.c.l.bf16 %v7961_v56  ;;  %v10086_v9 = vrot.slane %v7911_v49, 6  ;;  %v1409_v10 = vrot.slane %v7914_v59, 7 }
  0x99   : > { %8861 = vmatmul.mubr.bf16.vlgmr.msra.gmra.mxu1 %v7956_v37  ;;  %8894 = vmatprep.subr.bf16.mxu0 %v9364_v8  ;;  %v7910_v37 = vunpack.c.l.bf16 %v7959_v25 }
  0x9a   : > { %8864 = vmatprep.mubr.bf16.mxu1 %v7957_v43  ;;  %v1345_v43 = vsel %vm1318_vm2, %v1290_v13, %v1291_v24  ;;  %v1386_v13 = vpack.c.bf16 %v1343_v1, %v1344_v2  ;;  %v10093_v20 = vrot.slane %v7918_v3, 7  ;;  %v10097_v24 = vrot.slane %v7918_v3, 6  ;;  %v10135_v1 = vld [vmem:[%s9946_s15 + $0x58] sm:$0xff]  }
  0x9b   : > { %v1407_v50 = vrot.slane %v7910_v37, 7  ;;  %v1385_v55 = vpack.c.bf16 %v1345_v43, %v1355_v39  ;;  %v1294_v5 = vrot.slane %v7910_v37, 6  ;;  %v10109_v39 = vrot.slane %v7923_v11, 7 }
  0x9c   : > { %8895 = vmatpush3.bf16.msra.mxu0 %v9364_v8  ;;  %v7926_v43 = vunpack.c.l.bf16 %v7963_v12  ;;  %v10137_v2 = vrot.slane %v7927_v48, 7 }
  0x9d   : > { %v1454_v15 = vsel %vm1431_vm3, %v1407_v50, %v1408_v61  ;;  %v1342_v37 = vsel %vm1318_vm2, %v1293_v54, %v1294_v5  ;;  %v1341_v54 = vsel %vm1318_vm2, %v1294_v5, %v10086_v9 }
  0x9e   : > { %v1359_v49 = vmul.f32 %v10058_v44, %v1342_v37  ;;  %v10129_v59 = vrot.slane %v7926_v43, 7  ;;  %v10139_v3 = vrot.slane %v7926_v43, 6  ;;  %v7939_v37 = vunpack.c.h.bf16 %v10135_v1 }
  0x9f   : > { %1765 = vmatmul.mubr.bf16.gmra.mxu0 %v1384_v27  ;;  %v10100_v27 = vrot.slane %v7919_v4, 6  ;;  %v10141_v4 = vrot.slane %v7927_v48, 6  ;;  %v382_v43 = vadd.s32 192, %v9960_v14  ;;  %v1340_v48 = vsel %vm1318_vm2, %v10086_v9, %v1296_v17 }
  0xa0   : > { %1772 = vmatprep.mubr.bf16.mxu0 %v1498_v30  ;;  %v378_v30 = vadd.s32 160, %v9960_v14  ;;  %v1387_v5 = vpack.c.bf16 %v1341_v54, %v1359_v49  ;;  %v10194_v46 = vrot.slane %v7939_v37, 6 }
  0xa1   : > { %8865 = vmatmul.mubr.bf16.gmra.mxu1 %v7958_v62  ;;  %v1455_v62 = vsel %vm1431_vm3, %v1406_v29, %v1407_v50  ;;  %v10104_v29 = vrot.slane %v7922_v7, 6  ;;  %v10118_v50 = vsel %vm790_vm10, 1.0, %v13183_v33 }
  0xa2   : > { %8868 = vmatprep.mubr.bf16.mxu1 %v7959_v25  ;;  %v1472_v8 = vmul.f32 %v10052_v40, %v1455_v62  ;;  %v7964_v25 = vld [vmem:[%s9946_s15 + $0x48] sm:$0xff]   ;;  %v10120_v53 = vand.u32 31, %v378_v30  ;;  %v10132_v62 = vsel %vm886_vm11, 1.0, %v13183_v33  ;;  %v10159_v30 = vrot.slane %v7934_v63, 7 }
  0xa3   : > { %13378 = vst [vmem:[#allocation29_spill] sm:$0xff] %v10132_v62 }
  0xa4   : > { %v1500_v35 = vpack.c.bf16 %v1454_v15, %v1472_v8  ;;  %13377 = vst [vmem:[#allocation28_spill] sm:$0xff] %v10120_v53  ;;  %vm794_vm12 = vcmp.ge.s32.totalorder %v10120_v53, 1  ;;  %v1451_v15 = vsel %vm1431_vm3, %v1410_v16, %v10093_v20  ;;  %vm890_vm13 = vcmp.ge.s32.totalorder %v10120_v53, 2 }
  0xa5   : > { %v10182_v9 = vsel %vm890_vm13, 1.0, %v13183_v33 }
  0xa6   : > { %13379 = vst [vmem:[#allocation30_spill] sm:$0xff] %v10182_v9 }
  0xa7   : > { %1773 = vmatmul.mubr.bf16.gmra.mxu0 %v1385_v55  ;;  %v1453_v55 = vsel %vm1431_vm3, %v1408_v61, %v1409_v10  ;;  %v7967_v61 = vld [vmem:[%s9946_s15 + $0x60] sm:$0xff]  }
  0xa8   : > { %1780 = vmatprep.mubr.bf16.mxu0 %v1499_v58  ;;  %v1452_v58 = vsel %vm1431_vm3, %v1409_v10, %v1410_v16  ;;  %v7942_v49 = vunpack.c.l.bf16 %v7967_v61  ;;  %v1339_v16 = vsel %vm1318_vm2, %v1296_v17, %v10091_v18 }
  0xa9   : > { %8869 = vmatmul.mubr.bf16.gmra.mxu1 %v7960_v52  ;;  %v7930_v52 = vunpack.c.l.bf16 %v7964_v25  ;;  %v1501_v8 = vpack.c.bf16 %v1452_v58, %v1453_v55  ;;  %v10174_v55 = vrot.slane %v7934_v63, 6  ;;  %v1450_v58 = vsel %vm1431_vm3, %v10093_v20, %v10095_v21 }
  0xaa   : > { %8872 = vmatprep.mubr.bf16.mxu1 %v7961_v56  ;;  %v7931_v56 = vunpack.c.h.bf16 %v7964_v25  ;;  %v10190_v63 = vrot.slane %v7939_v37, 7  ;;  %v1388_v32 = vpack.c.bf16 %v1339_v16, %v1340_v48  ;;  %v7943_v20 = vunpack.c.h.bf16 %v7967_v61 }
  0xab   : > { %v10147_v7 = vrot.slane %v7930_v52, 6  ;;  %v1337_v37 = vsel %vm1318_vm2, %v10097_v24, %v10100_v27 }
  0xac   : > { %v10149_v10 = vrot.slane %v7931_v56, 7  ;;  %v10151_v11 = vrot.slane %v7931_v56, 6  ;;  %v7968_v56 = vld [vmem:[%s9946_s15 + $0x68] sm:$0xff]  }
  0xad   : > { %v7947_v48 = vunpack.c.h.bf16 %v7968_v56 }
  0xaf   : > { %1781 = vmatmul.mubr.bf16.gmra.mxu0 %v1386_v13  ;;  %v7935_v13 = vunpack.c.h.bf16 %v7965_v41  ;;  %v10240_v19 = vrot.slane %v7947_v48, 6 }
  0xb0   : > { %1788 = vmatprep.mubr.bf16.mxu0 %v1500_v35  ;;  %v7938_v35 = vunpack.c.l.bf16 %v10135_v1 }
  0xb1   : > { %8873 = vmatmul.mubr.bf16.gmra.mxu1 %v7962_v60  ;;  %v10145_v60 = vrot.slane %v7930_v52, 7  ;;  %v1476_v52 = vmul.f32 %v10076_v0, %v1451_v15  ;;  %v10172_v54 = vrot.slane %v7935_v13, 7  ;;  %v10186_v17 = vrot.slane %v7935_v13, 6 }
  0xb2   : > { %8876 = vmatprep.mubr.bf16.mxu1 %v7963_v12  ;;  %v10157_v12 = vsel %vm794_vm12, 1.0, %v13183_v33  ;;  %v10192_v15 = vrot.slane %v7938_v35, 6  ;;  %v1338_v13 = vsel %vm1318_vm2, %v10091_v18, %v10097_v24  ;;  %v386_v18 = vadd.s32 224, %v9960_v14 }
  0xb3   : > { %v1502_v33 = vpack.c.bf16 %v1450_v58, %v1476_v52  ;;  %v1363_v16 = vmul.f32 %v10083_v6, %v1338_v13  ;;  %v10212_v52 = vrot.slane %v7943_v20, 7  ;;  %v13381_v58 = vmov 0.0  }
  0xb4   : > { %v1449_v24 = vsel %vm1431_vm3, %v10095_v21, %v10102_v28  ;;  %v10236_v13 = vrot.slane %v7947_v48, 7  ;;  %v10242_v36 = vand.u32 31, %v386_v18  ;;  %v1336_v48 = vsel %vm1318_vm2, %v10100_v27, %v10104_v29 }
  0xb5   : > { %v1389_v22 = vpack.c.bf16 %v1337_v37, %v1363_v16  ;;  %v1333_v27 = vsel %vm1318_vm2, %v10139_v3, %v10141_v4 }
  0xb6   : > { %13383 = vst [vmem:[#allocation33_spill] sm:$0xff] %v10242_v36  ;;  %vm802_vm0 = vcmp.ge.s32.totalorder %v10242_v36, 1  ;;  %vm898_vm1 = vcmp.ge.s32.totalorder %v10242_v36, 2 }
  0xb7   : > { %1789 = vmatmul.mubr.bf16.gmra.mxu0 %v1387_v5  ;;  %v10184_v5 = vand.u32 31, %v382_v43  ;;  %v7969_v43 = vld [vmem:[%s9946_s15 + $0x70] sm:$0xff]  }
  0xb8   : > { %1796 = vmatprep.mubr.bf16.mxu0 %v1501_v8  ;;  %v10188_v8 = vrot.slane %v7938_v35, 7  ;;  %v7946_v35 = vunpack.c.l.bf16 %v7968_v56  ;;  %v7950_v57 = vunpack.c.l.bf16 %v7969_v43  ;;  %v7951_v26 = vunpack.c.h.bf16 %v7969_v43 }
  0xb9   : > { %8877 = vmatmul.mubr.bf16.gmra.mxu1 %v7964_v25  ;;  %13380 = vst [vmem:[#allocation31_spill] sm:$0xff] %v10184_v5  ;;  %v10196_v25 = vrot.slane %v7942_v49, 7  ;;  %vm798_vm14 = vcmp.ge.s32.totalorder %v10184_v5, 1  ;;  %vm894_vm15 = vcmp.ge.s32.totalorder %v10184_v5, 2  ;;  %v1447_v5 = vsel %vm1431_vm3, %v10109_v39, %v10129_v59 }
  0xba   : > { %8880 = vmatprep.mubr.bf16.mxu1 %v7965_v41  ;;  %v10204_v41 = vrot.slane %v7942_v49, 6  ;;  %v10216_v53 = vsel %vm798_vm14, 1.0, %v13381_v58  ;;  %v10218_v49 = vrot.slane %v7943_v20, 6  ;;  %v10234_v20 = vrot.slane %v7946_v35, 7 }
  0xbb   : > { %v10238_v38 = vrot.slane %v7946_v35, 6  ;;  %v10254_v34 = vrot.slane %v7951_v26, 6  ;;  %v1335_v35 = vsel %vm1318_vm2, %v10104_v29, %v10113_v47  ;;  %v1480_v37 = vmul.f32 %v10118_v50, %v1447_v5 }
  0xbc   : > { %v1444_v29 = vsel %vm1431_vm3, %v10145_v60, %v10149_v10  ;;  %v1443_v5 = vsel %vm1431_vm3, %v10149_v10, %v10159_v30  ;;  %v1442_v10 = vsel %vm1431_vm3, %v10159_v30, %v10172_v54  ;;  %v9367_v30 = vld [vmem:[#allocation6 + $0x158] sm:$0xff]  }
  0xbf   : > { %1797 = vmatmul.mubr.bf16.gmra.mxu0 %v1388_v32  ;;  %v1448_v32 = vsel %vm1431_vm3, %v10102_v28, %v10109_v39  ;;  %v10244_v28 = vrot.slane %v7950_v57, 7  ;;  %v1334_v39 = vsel %vm1318_vm2, %v10113_v47, %v10139_v3  ;;  %v9365_v3 = vld [vmem:[#allocation6 + $0x168] sm:$0xff]  }
  0xc0   : > { %1804 = vmatprep.mubr.bf16.mxu0 %v1502_v33  ;;  %v10232_v33 = vsel %vm894_vm15, 1.0, %v13381_v58  ;;  %v1503_v21 = vpack.c.bf16 %v1448_v32, %v1449_v24  ;;  %v1367_v16 = vmul.f32 %v10132_v62, %v1334_v39  ;;  %8896 = vmatprep.subr.bf16.mxu0 %v9365_v3  ;;  %v10306_v32 = vsel %vm802_vm0, 1.0, %v13381_v58  ;;  %v9366_v24 = vld [vmem:[#allocation6 + $0x160] sm:$0xff]  }
  0xc1   : > { %8881 = vmatmul.mubr.bf16.gmra.mxu1 %v10135_v1  ;;  %13382 = vst [vmem:[#allocation32_spill] sm:$0xff] %v10232_v33  ;;  %v10246_v1 = vrot.slane %v7951_v26, 7  ;;  %v1446_v26 = vsel %vm1431_vm3, %v10129_v59, %v10137_v2  ;;  %v1445_v59 = vsel %vm1431_vm3, %v10137_v2, %v10145_v60  ;;  %v1332_v2 = vsel %vm1318_vm2, %v10141_v4, %v10147_v7 }
  0xc2   : > { %8884 = vmatprep.mubr.bf16.mxu1 %v7967_v61  ;;  %v10252_v61 = vrot.slane %v7950_v57, 6  ;;  %v1504_v57 = vpack.c.bf16 %v1446_v26, %v1480_v37  ;;  %v1391_v47 = vpack.c.bf16 %v1333_v27, %v1367_v16  ;;  %v1484_v60 = vmul.f32 %v10157_v12, %v1443_v5  ;;  %8897 = vmatpush3.bf16.msra.mxu0 %v9365_v3 }
  0xc3   : > { %v1330_v4 = vsel %vm1318_vm2, %v10151_v11, %v10174_v55  ;;  %8898 = vmatprep.subr.bf16.mxu0 %v9366_v24  ;;  %v10327_v26 = vsel %vm898_vm1, 1.0, %v13381_v58  ;;  %v1439_v39 = vsel %vm1431_vm3, %v10190_v63, %v10196_v25  ;;  %v1326_v5 = vsel %vm1318_vm2, %v10194_v46, %v10204_v41 }
  0xc4   : > { %v1488_v27 = vmul.f32 %v10216_v53, %v1439_v39  ;;  %v9383_v39 = vld [vmem:[#allocation6 + $0xd0] sm:$0xff]  }
  0xc6   : > { %8899 = vmatpush3.bf16.msra.mxu0 %v9366_v24 }
  0xc7   : > { %1805 = vmatmul.mubr.bf16.gmra.mxu0 %v1389_v22  ;;  %v1390_v22 = vpack.c.bf16 %v1335_v35, %v1336_v48  ;;  %v1329_v35 = vsel %vm1318_vm2, %v10174_v55, %v10186_v17  ;;  %v1440_v48 = vsel %vm1431_vm3, %v10188_v8, %v10190_v63  ;;  %8900 = vmatprep.subr.bf16.mxu0 %v9367_v30 }
  0xc8   : > { %1812 = vmatprep.mubr.bf16.mxu0 %v1503_v21  ;;  %v1506_v21 = vpack.c.bf16 %v1442_v10, %v1484_v60  ;;  %v1438_v63 = vsel %vm1431_vm3, %v10196_v25, %v10212_v52  ;;  %v1436_v25 = vsel %vm1431_vm3, %v10234_v20, %v10236_v13  ;;  %v1324_v60 = vsel %vm1318_vm2, %v10218_v49, %v10238_v38 }
  0xc9   : > { %8885 = vmatmul.mubr.bf16.gmra.mxu1 %v7968_v56  ;;  %v1505_v56 = vpack.c.bf16 %v1444_v29, %v1445_v59 }
  0xca   : > { %8888 = vmatprep.mubr.bf16.mxu1 %v7969_v43  ;;  %v1331_v43 = vsel %vm1318_vm2, %v10147_v7, %v10151_v11  ;;  %v1371_v7 = vmul.f32 %v10182_v9, %v1330_v4  ;;  %v1441_v11 = vsel %vm1431_vm3, %v10172_v54, %v10188_v8  ;;  %8901 = vmatpush3.bf16.msra.mxu0 %v9367_v30  ;;  %v9369_v54 = vld [vmem:[#allocation6 + $0x148] sm:$0xff]   ;;  %v9371_v30 = vld [vmem:[#allocation6 + $0x138] sm:$0xff]  }
  0xcb   : > { %v1392_v18 = vpack.c.bf16 %v1331_v43, %v1332_v2  ;;  %v1507_v55 = vpack.c.bf16 %v1440_v48, %v1441_v11  ;;  %v1327_v8 = vsel %vm1318_vm2, %v10192_v15, %v10194_v46  ;;  %v1437_v46 = vsel %vm1431_vm3, %v10212_v52, %v10234_v20  ;;  %8107 = vmatprep.subr.bf16.mxu1 %v9371_v30  ;;  %v9375_v48 = vld [vmem:[#allocation6 + $0x128] sm:$0xff]  }
  0xcc   : > { %v1393_v37 = vpack.c.bf16 %v1329_v35, %v1371_v7  ;;  %v1509_v43 = vpack.c.bf16 %v1436_v25, %v1437_v46  ;;  %v1435_v2 = vsel %vm1431_vm3, %v10236_v13, %v10244_v28  ;;  %v1434_v20 = vsel %vm1431_vm3, %v10244_v28, %v10246_v1  ;;  %v9373_v35 = vld [vmem:[#allocation6 + $0x130] sm:$0xff]   ;;  %v9376_v11 = vld [vmem:[#allocation6 + $0xe8] sm:$0xff]  }
  0xcd   : > { %v1492_v52 = vmul.f32 %v10306_v32, %v1435_v2 }
  0xcf   : > { %1813 = vmatmul.mubr.bf16.gmra.mxu0 %v1390_v22  ;;  %v7954_v22 = vunpack.c.l.bf16 %v9976_v31  ;;  %v1510_v10 = vpack.c.bf16 %v1434_v20, %v1492_v52 }
  0xd0   : > { %1820 = vmatprep.mubr.bf16.mxu0 %v1504_v57  ;;  %v9368_v57 = vld [vmem:[#allocation6 + $0x150] sm:$0xff]  }
  0xd1   : > { %8889 = vmatmul.mubr.bf16.gmra.mxu1 %v9976_v31  ;;  %8902 = vmatprep.subr.bf16.mxu0 %v9368_v57  ;;  %v1429_v16 = vrot.slane %v7954_v22, 7  ;;  %v1328_v31 = vsel %vm1318_vm2, %v10186_v17, %v10192_v15  ;;  %v1316_v59 = vrot.slane %v7954_v22, 6  ;;  %v1375_v17 = vmul.f32 %v10232_v33, %v1326_v5  ;;  %v9379_v22 = vld [vmem:[#allocation6 + $0x118] sm:$0xff]   ;;  %v9385_v5 = vld [vmem:[#allocation6 + $0x108] sm:$0xff]  }
  0xd2   : > { %8903 = vmatpush3.bf16.msra.mxu0 %v9368_v57  ;;  %v1394_v29 = vpack.c.bf16 %v1327_v8, %v1328_v31  ;;  %v1325_v15 = vsel %vm1318_vm2, %v10204_v41, %v10218_v49  ;;  %v1323_v41 = vsel %vm1318_vm2, %v10238_v38, %v10240_v19  ;;  %v1321_v38 = vsel %vm1318_vm2, %v10252_v61, %v10254_v34  ;;  %v10402_v57 = vld [vmem:[#allocation9 + $0x38] sm:$0xff]  }
  0xd3   : > { %8904 = vmatprep.subr.bf16.mxu0 %v9369_v54  ;;  %v1395_v3 = vpack.c.bf16 %v1325_v15, %v1375_v17  ;;  %v1396_v13 = vpack.c.bf16 %v1323_v41, %v1324_v60  ;;  %v1432_v49 = vsel %vm1431_vm3, %v1429_v16, %v10002_v45  ;;  %v1433_v28 = vsel %vm1431_vm3, %v10246_v1, %v1429_v16  ;;  %v9372_v45 = vld [vmem:[#allocation6 + $0xf8] sm:$0xff]   ;;  %v9374_v1 = vld [vmem:[#allocation6 + $0xf0] sm:$0xff]   ;;  %v9387_v17 = vld [vmem:[#allocation6 + $0xc8] sm:$0xff]  }
  0xd4   : > { %v1511_v4 = vpack.c.bf16 %v1432_v49, %v1433_v28  ;;  %8108 = vmatpush3.bf16.msra.mxu1 %v9372_v45  ;;  %v13195_v16 = vsub.s32 0, %v9960_v14  ;;  %v9389_v15 = vld [vmem:[#allocation6 + $0x100] sm:$0xff]  }
  0xd5   : > { %8109 = vmatprep.subr.bf16.mxu1 %v9373_v35  ;;  %v9391_v60 = vld [vmem:[#allocation6 + $0xc0] sm:$0xff]  }
  0xd6   : > { %8905 = vmatpush3.bf16.msra.mxu0 %v9369_v54  ;;  %v355_v54 = vld [vmem:[#allocation8] sm:$0x3f] }
  0xd7   : > { %1821 = vmatmul.mubr.bf16.gmra.mxu0 %v1391_v47  ;;  %v9370_v47 = vld [vmem:[#allocation6 + $0x140] sm:$0xff]   ;;  %v10408_v31 = vrot.slane %v355_v54, %v13195_v16 }
  0xd8   : > { %1828 = vmatprep.mubr.bf16.mxu0 %v1505_v56  ;;  %v1508_v56 = vpack.c.bf16 %v1438_v63, %v1488_v27  ;;  %8906 = vmatprep.subr.bf16.mxu0 %v9370_v47 }
  0xd9   : > { %8110 = vmatpush3.bf16.msra.mxu1 %v9374_v1 }
  0xda   : > { %8907 = vmatpush3.bf16.msra.mxu0 %v9370_v47  ;;  %8111 = vmatprep.subr.bf16.mxu1 %v9375_v48 }
  0xdb   : > { %8940 = vmatprep.subr.bf16.mxu0 %v10402_v57 }
  0xdd   : > { %8112 = vmatpush3.bf16.msra.mxu1 %v9376_v11 }
  0xdf   : > { %1829 = vmatmul.mubr.bf16.gmra.mxu0 %v1392_v18  ;;  %v1322_v18 = vsel %vm1318_vm2, %v10240_v19, %v10252_v61  ;;  %v1319_v19 = vsel %vm1318_vm2, %v1316_v59, %v10010_v51  ;;  %v1320_v61 = vsel %vm1318_vm2, %v10254_v34, %v1316_v59  ;;  %v9378_v51 = vld [vmem:[#allocation6 + $0xe0] sm:$0xff]   ;;  %v9380_v34 = vld [vmem:[#allocation6 + $0xd8] sm:$0xff]  }
  0xe0   : > { %1836 = vmatprep.mubr.bf16.mxu0 %v1506_v21  ;;  %v1379_v24 = vmul.f32 %v10327_v26, %v1322_v18  ;;  %v1398_v7 = vpack.c.bf16 %v1319_v19, %v1320_v61 }
  0xe2   : > { %v1397_v21 = vpack.c.bf16 %v1321_v38, %v1379_v24 }
  0xe7   : > { %1837 = vmatmul.mubr.bf16.gmra.mxu0 %v1393_v37  ;;  %v9377_v37 = vld [vmem:[#allocation6 + $0x120] sm:$0xff]  }
  0xe8   : > { %1844 = vmatprep.mubr.bf16.mxu0 %v1507_v55  ;;  %8113 = vmatprep.subr.bf16.mxu1 %v9377_v37  ;;  %v9381_v55 = vld [vmem:[#allocation6 + $0x110] sm:$0xff]  }
  0xe9   : > { %8114 = vmatpush3.bf16.msra.mxu1 %v9378_v51 }
  0xea   : > { %8115 = vmatprep.subr.bf16.mxu1 %v9379_v22 }
  0xed   : > { %8116 = vmatpush3.bf16.msra.mxu1 %v9380_v34 }
  0xee   : > { %8117 = vmatprep.subr.bf16.mxu1 %v9381_v55 }
  0xef   : > { %1845 = vmatmul.mubr.bf16.gmra.mxu0 %v1394_v29 }
  0xf0   : > { %1852 = vmatprep.mubr.bf16.mxu0 %v1508_v56 }
  0xf1   : > { %8118 = vmatpush3.bf16.msra.mxu1 %v9383_v39 }
  0xf2   : > { %8119 = vmatprep.subr.bf16.mxu1 %v9385_v5 }
  0xf5   : > { %8120 = vmatpush3.bf16.msra.mxu1 %v9387_v17 }
  0xf6   : > { %8121 = vmatprep.subr.bf16.mxu1 %v9389_v15 }
  0xf7   : > { %1853 = vmatmul.mubr.bf16.gmra.mxu0 %v1395_v3 }
  0xf8   : > { %1860 = vmatprep.mubr.bf16.mxu0 %v1509_v43 }
  0xf9   : > { %8122 = vmatpush3.bf16.msra.mxu1 %v9391_v60 }
  0xff   : > { %1861 = vmatmul.mubr.bf16.gmra.mxu0 %v1396_v13 }
 0x100   : > { %1868 = vmatprep.mubr.bf16.mxu0 %v1510_v10 }
 0x107   : > { %1869 = vmatmul.mubr.bf16.gmra.mxu0 %v1397_v21 }
 0x108   : > { %1876 = vmatprep.mubr.bf16.mxu0 %v1511_v4 }
 0x10f   : > { %1877 = vmatmul.mubr.bf16.gmra.mxu0 %v1398_v7 }
 0x157   : > { %v7987_v8 = vpop.f32.mrf.mxu0 }
 0x159   : > { %v7988_v27 = vpop.f32.mrf.mxu0  ;;  %v8862_v63 = vpop.f32.mrf.mxu1 }
 0x15a   : > { %v7989_v29 = vadd.f32 %v7988_v27, %v7987_v8 }
 0x15b   : > { %v7990_v59 = vpop.f32.mrf.mxu0  ;;  %v1919_v47 = vpop.f32.mrf.mxu1 }
 0x15c   : > { %v1759_v56 = vadd.f32 %v7989_v29, %v10408_v31 }
 0x15d   : > { %v7991_v25 = vpop.f32.mrf.mxu0  ;;  %v8863_v46 = vpop.f32.mrf.mxu1 }
 0x15e   : > { %v7992_v3 = vadd.f32 %v7991_v25, %v7990_v59  ;;  %v1920_v43 = vadd.f32 %v1919_v47, %v1759_v56 }
 0x15f   : > { %v7993_v2 = vpop.f32.mrf.mxu0  ;;  %v1922_v41 = vpop.f32.mrf.mxu1 }
 0x160   : > { %vm2046_vm4 = vcmp.gt.f32.partialorder %v1920_v43, 0.0  ;;  %v2078_v52 = vmul.f32 0.01, %v1920_v43  ;;  %v1762_v20 = vadd.f32 %v7992_v3, %v10408_v31 }
 0x161   : > { %v7994_v13 = vpop.f32.mrf.mxu0  ;;  %v10414_v49 = vpop.f32.mrf.mxu1 }
 0x162   : > { %v7995_v10 = vadd.f32 %v7994_v13, %v7993_v2  ;;  %v1923_v18 = vadd.f32 %v1922_v41, %v1762_v20  ;;  %v10412_v24 = vsel %vm2046_vm4, %v1920_v43, %v2078_v52  ;;  %v9384_v52 = vld [vmem:[#allocation9 + $0x30] sm:$0xff]  }
 0x163   : > { %v7996_v38 = vpop.f32.mrf.mxu0  ;;  %v13197_v19 = vrot.slane %v10412_v24, 6  ;;  %v13196_v45 = vrot.slane %v10412_v24, 7  ;;  %v1935_v37 = vpop.f32.mrf.mxu1 }
 0x164   : > { %v1767_v28 = vadd.f32 %v7995_v10, %v10408_v31  ;;  %vm2047_vm5 = vcmp.gt.f32.partialorder %v1923_v18, 0.0  ;;  %v2079_v21 = vmul.f32 0.01, %v1923_v18 }
 0x165   : > { %v7997_v4 = vpop.f32.mrf.mxu0  ;;  %v10433_v29 = vpop.f32.mrf.mxu1 }
 0x166   : > { %v1928_v61 = vadd.f32 %v8862_v63, %v1767_v28  ;;  %v7998_v7 = vadd.f32 %v7997_v4, %v7996_v38  ;;  %v2111_v30 = vsel %vm2047_vm5, %v1923_v18, %v2079_v21 }
 0x167   : > { %v7999_v35 = vpop.f32.mrf.mxu0  ;;  %v2143_v1 = vrot.slane %v2111_v30, 6  ;;  %v2255_v48 = vrot.slane %v2111_v30, 7  ;;  %v2366_v11 = vpack.c.bf16 %v2111_v30, %v10412_v24  ;;  %v1938_v41 = vpop.f32.mrf.mxu1 }
 0x168   : > { %vm2048_vm6 = vcmp.gt.f32.partialorder %v1928_v61, 0.0  ;;  %v2080_v51 = vmul.f32 0.01, %v1928_v61  ;;  %v1770_v22 = vadd.f32 %v7998_v7, %v10408_v31 }
 0x169   : > { %v8000_v34 = vpop.f32.mrf.mxu0  ;;  %8908 = vmatprep.mubr.bf16.mxu0 %v2366_v11  ;;  %v10425_v55 = vsel %vm1431_vm3, %v13196_v45, %v2255_v48  ;;  %v10431_v39 = vsel %vm1318_vm2, %v13197_v19, %v2143_v1  ;;  %v10456_v11 = vpop.f32.mrf.mxu1 }
 0x16a   : > { %v2112_v54 = vsel %vm2048_vm6, %v1928_v61, %v2080_v51  ;;  %v1931_v8 = vadd.f32 %v8863_v46, %v1770_v22  ;;  %v8001_v27 = vadd.f32 %v8000_v34, %v7999_v35 }
 0x16b   : > { %v8002_v63 = vpop.f32.mrf.mxu0  ;;  %v2256_v59 = vrot.slane %v2112_v54, 7  ;;  %v2144_v47 = vrot.slane %v2112_v54, 6 }
 0x16c   : > { %vm2049_vm7 = vcmp.gt.f32.partialorder %v1931_v8, 0.0  ;;  %v2081_v56 = vmul.f32 0.01, %v1931_v8  ;;  %v1775_v5 = vadd.f32 %v8001_v27, %v10408_v31 }
 0x16d   : > { %v8003_v17 = vpop.f32.mrf.mxu0  ;;  %v10438_v15 = vsel %vm1431_vm3, %v2255_v48, %v2256_v59  ;;  %v10442_v25 = vsel %vm1318_vm2, %v2143_v1, %v2144_v47 }
 0x16e   : > { %v2113_v46 = vsel %vm2049_vm7, %v1931_v8, %v2081_v56  ;;  %v8004_v3 = vadd.f32 %v8003_v17, %v8002_v63  ;;  %v1936_v43 = vadd.f32 %v1935_v37, %v1775_v5  ;;  %v9386_v37 = vld [vmem:[#allocation9 + $0x28] sm:$0xff]  }
 0x16f   : > { %v8005_v2 = vpop.f32.mrf.mxu0  ;;  %v2367_v60 = vpack.c.bf16 %v2113_v46, %v2112_v54  ;;  %v2257_v20 = vrot.slane %v2113_v46, 7  ;;  %v2145_v13 = vrot.slane %v2113_v46, 6  ;;  %v1951_v46 = vpop.f32.mrf.mxu1 }
 0x170   : > { %vm2050_vm8 = vcmp.gt.f32.partialorder %v1936_v43, 0.0  ;;  %v2082_v10 = vmul.f32 0.01, %v1936_v43  ;;  %v1778_v18 = vadd.f32 %v8004_v3, %v10408_v31  ;;  %v9388_v3 = vld [vmem:[#allocation9 + $0x20] sm:$0xff]  }
 0x171   : > { %v8006_v38 = vpop.f32.mrf.mxu0  ;;  %8909 = vmatmul.mubr.bf16.vlgmr.msra.gmra.mxu0 %v2367_v60  ;;  %v10447_v28 = vsel %vm1431_vm3, %v2256_v59, %v2257_v20  ;;  %v10451_v21 = vsel %vm1318_vm2, %v2144_v47, %v2145_v13 }
 0x172   : > { %v2114_v4 = vsel %vm2050_vm8, %v1936_v43, %v2082_v10  ;;  %v8007_v61 = vadd.f32 %v8006_v38, %v8005_v2  ;;  %v1939_v7 = vadd.f32 %v1938_v41, %v1778_v18  ;;  %8941 = vmatpush3.bf16.msra.mxu0 %v10402_v57 }
 0x173   : > { %v2146_v35 = vrot.slane %v2114_v4, 6  ;;  %v2258_v1 = vrot.slane %v2114_v4, 7  ;;  %v8008_v48 = vpop.f32.mrf.mxu0  ;;  %8942 = vmatprep.subr.bf16.mxu0 %v9384_v52 }
 0x174   : > { %v1783_v22 = vadd.f32 %v8007_v61, %v10408_v31  ;;  %vm2051_vm9 = vcmp.gt.f32.partialorder %v1939_v7, 0.0  ;;  %v2083_v34 = vmul.f32 0.01, %v1939_v7 }
 0x175   : > { %v8009_v54 = vpop.f32.mrf.mxu0  ;;  %v2313_v57 = vsel %vm1431_vm3, %v2257_v20, %v2258_v1  ;;  %v2201_v8 = vsel %vm1318_vm2, %v2145_v13, %v2146_v35 }
 0x176   : > { %v1944_v27 = vadd.f32 %v10414_v49, %v1783_v22  ;;  %v8010_v63 = vadd.f32 %v8009_v54, %v8008_v48  ;;  %v2115_v59 = vsel %vm2051_vm9, %v1939_v7, %v2083_v34  ;;  %8943 = vmatpush3.bf16.msra.mxu0 %v9384_v52  ;;  %v10468_v41 = vmul.f32 %v9999_v42, %v2313_v57 }
 0x177   : > { %v8011_v47 = vpop.f32.mrf.mxu0  ;;  %v2147_v56 = vrot.slane %v2115_v59, 6  ;;  %v2259_v5 = vrot.slane %v2115_v59, 7  ;;  %v2368_v17 = vpack.c.bf16 %v2115_v59, %v2114_v4  ;;  %8944 = vmatprep.subr.bf16.mxu0 %v9386_v37  ;;  %v10479_v20 = vmul.f32 %v10039_v23, %v2201_v8  ;;  %v10484_v4 = vpop.f32.mrf.mxu1 }
 0x178   : > { %v2084_v43 = vmul.f32 0.01, %v1944_v27  ;;  %v1786_v2 = vadd.f32 %v8010_v63, %v10408_v31  ;;  %vm2052_vm10 = vcmp.gt.f32.partialorder %v1944_v27, 0.0 }
 0x179   : > { %v8012_v60 = vpop.f32.mrf.mxu0  ;;  %8912 = vmatprep.mubr.bf16.mxu0 %v2368_v17  ;;  %v10472_v49 = vsel %vm1431_vm3, %v2258_v1, %v2259_v5  ;;  %v10476_v52 = vsel %vm1318_vm2, %v2146_v35, %v2147_v56  ;;  %v9390_v1 = vld [vmem:[#allocation9 + $0x18] sm:$0xff]   ;;  %v1954_v63 = vpop.f32.mrf.mxu1 }
 0x17a   : > { %v1947_v13 = vadd.f32 %v10433_v29, %v1786_v2  ;;  %v8013_v10 = vadd.f32 %v8012_v60, %v8011_v47  ;;  %v2116_v18 = vsel %vm2052_vm10, %v1944_v27, %v2084_v43  ;;  %8945 = vmatpush3.bf16.msra.mxu0 %v9386_v37  ;;  %v9392_v43 = vld [vmem:[#allocation9 + $0x10] sm:$0xff]  }
 0x17b   : > { %v8014_v38 = vpop.f32.mrf.mxu0  ;;  %v2148_v61 = vrot.slane %v2116_v18, 6  ;;  %v2260_v7 = vrot.slane %v2116_v18, 7  ;;  %8946 = vmatprep.subr.bf16.mxu0 %v9388_v3 }
 0x17c   : > { %v2085_v48 = vmul.f32 0.01, %v1947_v13  ;;  %v1791_v22 = vadd.f32 %v8013_v10, %v10408_v31  ;;  %vm2053_vm11 = vcmp.gt.f32.partialorder %v1947_v13, 0.0 }
 0x17d   : > { %v8015_v29 = vpop.f32.mrf.mxu0  ;;  %v10491_v37 = vsel %vm1431_vm3, %v2259_v5, %v2260_v7  ;;  %v10495_v34 = vsel %vm1318_vm2, %v2147_v56, %v2148_v61 }
 0x17e   : > { %v8016_v54 = vadd.f32 %v8015_v29, %v8014_v38  ;;  %v1952_v57 = vadd.f32 %v1951_v46, %v1791_v22  ;;  %v2117_v8 = vsel %vm2053_vm11, %v1947_v13, %v2085_v48  ;;  %8947 = vmatpush3.bf16.msra.mxu0 %v9388_v3  ;;  %v10508_v29 = vpop.f32.mrf.mxu1 }
 0x17f   : > { %v8017_v27 = vpop.f32.mrf.mxu0  ;;  %v2149_v59 = vrot.slane %v2117_v8, 6  ;;  %v2261_v47 = vrot.slane %v2117_v8, 7  ;;  %v2369_v17 = vpack.c.bf16 %v2117_v8, %v2116_v18  ;;  %8948 = vmatprep.subr.bf16.mxu0 %v9390_v1 }
 0x180   : > { %vm2054_vm12 = vcmp.gt.f32.partialorder %v1952_v57, 0.0  ;;  %v2086_v2 = vmul.f32 0.01, %v1952_v57  ;;  %v1794_v5 = vadd.f32 %v8016_v54, %v10408_v31  ;;  %v9393_v54 = vld [vmem:[#allocation9 + $0x8] sm:$0xff]   ;;  %v1967_v18 = vpop.f32.mrf.mxu1 }
 0x181   : > { %v8018_v60 = vpop.f32.mrf.mxu0  ;;  %8913 = vmatmul.mubr.bf16.gmra.mxu0 %v2369_v17  ;;  %v10500_v56 = vsel %vm1431_vm3, %v2260_v7, %v2261_v47  ;;  %v10504_v46 = vsel %vm1318_vm2, %v2148_v61, %v2149_v59 }
 0x182   : > { %v2118_v3 = vsel %vm2054_vm12, %v1952_v57, %v2086_v2  ;;  %v8019_v13 = vadd.f32 %v8018_v60, %v8017_v27  ;;  %v1955_v10 = vadd.f32 %v1954_v63, %v1794_v5  ;;  %8949 = vmatpush3.bf16.msra.mxu0 %v9390_v1 }
 0x183   : > { %v2150_v38 = vrot.slane %v2118_v3, 6  ;;  %v2262_v48 = vrot.slane %v2118_v3, 7  ;;  %v8020_v22 = vpop.f32.mrf.mxu0  ;;  %8950 = vmatprep.subr.bf16.mxu0 %v9392_v43 }
 0x184   : > { %v1799_v61 = vadd.f32 %v8019_v13, %v10408_v31  ;;  %vm2055_vm13 = vcmp.gt.f32.partialorder %v1955_v10, 0.0  ;;  %v2087_v57 = vmul.f32 0.01, %v1955_v10  ;;  %v9394_v13 = vld [vmem:[#allocation9] sm:$0xff]  }
 0x185   : > { %v8021_v8 = vpop.f32.mrf.mxu0  ;;  %v2309_v1 = vsel %vm1431_vm3, %v2261_v47, %v2262_v48  ;;  %v2197_v27 = vsel %vm1318_vm2, %v2149_v59, %v2150_v38 }
 0x186   : > { %v1960_v63 = vadd.f32 %v10456_v11, %v1799_v61  ;;  %v8022_v17 = vadd.f32 %v8021_v8, %v8020_v22  ;;  %v2119_v2 = vsel %vm2055_vm13, %v1955_v10, %v2087_v57  ;;  %8951 = vmatpush3.bf16.msra.mxu0 %v9392_v43  ;;  %v10520_v47 = vmul.f32 %v10052_v40, %v2309_v1  ;;  %v8875_v57 = vpop.f32.mrf.mxu1 }
 0x187   : > { %v8023_v5 = vpop.f32.mrf.mxu0  ;;  %v2151_v60 = vrot.slane %v2119_v2, 6  ;;  %v2263_v16 = vrot.slane %v2119_v2, 7  ;;  %v2370_v7 = vpack.c.bf16 %v2119_v2, %v2118_v3  ;;  %8952 = vmatprep.subr.bf16.mxu0 %v9393_v54  ;;  %v10531_v3 = vmul.f32 %v10058_v44, %v2197_v27 }
 0x188   : > { %v2088_v35 = vmul.f32 0.01, %v1960_v63  ;;  %v1802_v42 = vadd.f32 %v8022_v17, %v10408_v31  ;;  %vm2056_vm14 = vcmp.gt.f32.partialorder %v1960_v63, 0.0 }
 0x189   : > { %v8024_v59 = vpop.f32.mrf.mxu0  ;;  %8916 = vmatprep.mubr.bf16.mxu0 %v2370_v7  ;;  %v10524_v11 = vsel %vm1431_vm3, %v2262_v48, %v2263_v16  ;;  %v10528_v43 = vsel %vm1318_vm2, %v2150_v38, %v2151_v60 }
 0x18a   : > { %v1963_v10 = vadd.f32 %v10484_v4, %v1802_v42  ;;  %v8025_v22 = vadd.f32 %v8024_v59, %v8023_v5  ;;  %v2120_v61 = vsel %vm2056_vm14, %v1960_v63, %v2088_v35  ;;  %8953 = vmatpush3.bf16.msra.mxu0 %v9393_v54  ;;  %v1970_v5 = vpop.f32.mrf.mxu1 }
 0x18b   : > { %v8026_v7 = vpop.f32.mrf.mxu0  ;;  %v2152_v8 = vrot.slane %v2120_v61, 6  ;;  %v2264_v48 = vrot.slane %v2120_v61, 7  ;;  %8954 = vmatprep.subr.bf16.mxu0 %v9394_v13 }
 0x18c   : > { %v2089_v1 = vmul.f32 0.01, %v1963_v10  ;;  %v1807_v27 = vadd.f32 %v8025_v22, %v10408_v31  ;;  %vm2057_vm15 = vcmp.gt.f32.partialorder %v1963_v10, 0.0 }
 0x18d   : > { %v8027_v17 = vpop.f32.mrf.mxu0  ;;  %v10541_v42 = vsel %vm1431_vm3, %v2263_v16, %v2264_v48  ;;  %v10545_v4 = vsel %vm1318_vm2, %v2151_v60, %v2152_v8 }
 0x18e   : > { %v8028_v35 = vadd.f32 %v8027_v17, %v8026_v7  ;;  %v1968_v54 = vadd.f32 %v1967_v18, %v1807_v27  ;;  %v2121_v63 = vsel %vm2057_vm15, %v1963_v10, %v2089_v1  ;;  %8955 = vmatpush3.bf16.msra.mxu0 %v9394_v13  ;;  %v10558_v17 = vpop.f32.mrf.mxu1 }
 0x18f   : > { %v8029_v2 = vpop.f32.mrf.mxu0  ;;  %v2153_v59 = vrot.slane %v2121_v63, 6  ;;  %v2265_v38 = vrot.slane %v2121_v63, 7  ;;  %v2371_v40 = vpack.c.bf16 %v2121_v63, %v2120_v61 }
 0x190   : > { %vm2058_vm0 = vcmp.gt.f32.partialorder %v1968_v54, 0.0  ;;  %v2090_v22 = vmul.f32 0.01, %v1968_v54  ;;  %v1810_v51 = vadd.f32 %v8028_v35, %v10408_v31 }
 0x191   : > { %v8030_v30 = vpop.f32.mrf.mxu0  ;;  %8917 = vmatmul.mubr.bf16.gmra.mxu0 %v2371_v40  ;;  %v10550_v16 = vsel %vm1431_vm3, %v2264_v48, %v2265_v38  ;;  %v10554_v18 = vsel %vm1318_vm2, %v2152_v8, %v2153_v59  ;;  %v1983_v40 = vpop.f32.mrf.mxu1 }
 0x192   : > { %v2122_v60 = vsel %vm2058_vm0, %v1968_v54, %v2090_v22  ;;  %v8031_v13 = vadd.f32 %v8030_v30, %v8029_v2  ;;  %v1971_v10 = vadd.f32 %v1970_v5, %v1810_v51 }
 0x193   : > { %v2154_v7 = vrot.slane %v2122_v60, 6  ;;  %v2266_v1 = vrot.slane %v2122_v60, 7  ;;  %v8032_v27 = vpop.f32.mrf.mxu0 }
 0x194   : > { %v1815_v48 = vadd.f32 %v8031_v13, %v10408_v31  ;;  %vm2059_vm1 = vcmp.gt.f32.partialorder %v1971_v10, 0.0  ;;  %v2091_v35 = vmul.f32 0.01, %v1971_v10 }
 0x195   : > { %v8033_v8 = vpop.f32.mrf.mxu0  ;;  %v2305_v30 = vsel %vm1431_vm3, %v2265_v38, %v2266_v1  ;;  %v2193_v51 = vsel %vm1318_vm2, %v2153_v59, %v2154_v7 }
 0x196   : > { %v1976_v54 = vadd.f32 %v10508_v29, %v1815_v48  ;;  %v8034_v63 = vadd.f32 %v8033_v8, %v8032_v27  ;;  %v2123_v2 = vsel %vm2059_vm1, %v1971_v10, %v2091_v35  ;;  %v10570_v36 = vmul.f32 %v10076_v0, %v2305_v30  ;;  %v8879_v8 = vpop.f32.mrf.mxu1 }
 0x197   : > { %v8035_v5 = vpop.f32.mrf.mxu0  ;;  %v2155_v22 = vrot.slane %v2123_v2, 6  ;;  %v2267_v61 = vrot.slane %v2123_v2, 7  ;;  %v2372_v45 = vpack.c.bf16 %v2123_v2, %v2122_v60  ;;  %v10581_v60 = vmul.f32 %v10083_v6, %v2193_v51 }
 0x198   : > { %v2092_v19 = vmul.f32 0.01, %v1976_v54  ;;  %v1818_v13 = vadd.f32 %v8034_v63, %v10408_v31  ;;  %vm2060_vm4 = vcmp.gt.f32.partialorder %v1976_v54, 0.0 }
 0x199   : > { %v8036_v38 = vpop.f32.mrf.mxu0  ;;  %8920 = vmatprep.mubr.bf16.mxu0 %v2372_v45  ;;  %v10574_v59 = vsel %vm1431_vm3, %v2266_v1, %v2267_v61  ;;  %v10578_v29 = vsel %vm1318_vm2, %v2154_v7, %v2155_v22 }
 0x19a   : > { %v1979_v10 = vadd.f32 %v8875_v57, %v1818_v13  ;;  %v8037_v27 = vadd.f32 %v8036_v38, %v8035_v5  ;;  %v2124_v48 = vsel %vm2060_vm4, %v1976_v54, %v2092_v19  ;;  %v1986_v38 = vpop.f32.mrf.mxu1 }
 0x19b   : > { %v8038_v35 = vpop.f32.mrf.mxu0  ;;  %v2156_v45 = vrot.slane %v2124_v48, 6  ;;  %v2268_v30 = vrot.slane %v2124_v48, 7 }
 0x19c   : > { %v2093_v63 = vmul.f32 0.01, %v1979_v10  ;;  %v1823_v7 = vadd.f32 %v8037_v27, %v10408_v31  ;;  %vm2061_vm5 = vcmp.gt.f32.partialorder %v1979_v10, 0.0 }
 0x19d   : > { %v8039_v2 = vpop.f32.mrf.mxu0  ;;  %v10590_v57 = vsel %vm1431_vm3, %v2267_v61, %v2268_v30  ;;  %v10594_v19 = vsel %vm1318_vm2, %v2155_v22, %v2156_v45 }
 0x19e   : > { %13384 = vst [vmem:[#allocation34_spill] sm:$0xff] %v10590_v57  ;;  %13385 = vst [vmem:[#allocation35_spill] sm:$0xff] %v10594_v19  ;;  %v8040_v51 = vadd.f32 %v8039_v2, %v8038_v35  ;;  %v1984_v54 = vadd.f32 %v1983_v40, %v1823_v7  ;;  %v2125_v5 = vsel %vm2061_vm5, %v1979_v10, %v2093_v63 }
 0x19f   : > { %v8041_v13 = vpop.f32.mrf.mxu0  ;;  %v2157_v0 = vrot.slane %v2125_v5, 6  ;;  %v2269_v1 = vrot.slane %v2125_v5, 7  ;;  %v2373_v6 = vpack.c.bf16 %v2125_v5, %v2124_v48 }
 0x1a0   : > { %vm2062_vm6 = vcmp.gt.f32.partialorder %v1984_v54, 0.0  ;;  %v2094_v27 = vmul.f32 0.01, %v1984_v54  ;;  %v1826_v44 = vadd.f32 %v8040_v51, %v10408_v31  ;;  %v10607_v51 = vpop.f32.mrf.mxu1 }
 0x1a1   : > { %v8042_v23 = vpop.f32.mrf.mxu0  ;;  %8921 = vmatmul.mubr.bf16.gmra.mxu0 %v2373_v6  ;;  %v10599_v61 = vsel %vm1431_vm3, %v2268_v30, %v2269_v1  ;;  %v10603_v22 = vsel %vm1318_vm2, %v2156_v45, %v2157_v0 }
 0x1a2   : > { %13386 = vst [vmem:[#allocation36_spill] sm:$0xff] %v10603_v22  ;;  %v2126_v40 = vsel %vm2062_vm6, %v1984_v54, %v2094_v27  ;;  %v8043_v10 = vadd.f32 %v8042_v23, %v8041_v13  ;;  %v1987_v35 = vadd.f32 %v1986_v38, %v1826_v44  ;;  %v1999_v6 = vpop.f32.mrf.mxu1 }
 0x1a3   : > { %v2158_v63 = vrot.slane %v2126_v40, 6  ;;  %v2270_v7 = vrot.slane %v2126_v40, 7  ;;  %v8044_v2 = vpop.f32.mrf.mxu0 }
 0x1a4   : > { %v1831_v30 = vadd.f32 %v8043_v10, %v10408_v31  ;;  %vm2063_vm7 = vcmp.gt.f32.partialorder %v1987_v35, 0.0  ;;  %v2095_v5 = vmul.f32 0.01, %v1987_v35 }
 0x1a5   : > { %v8045_v45 = vpop.f32.mrf.mxu0  ;;  %v2301_v23 = vsel %vm1431_vm3, %v2269_v1, %v2270_v7  ;;  %v2189_v44 = vsel %vm1318_vm2, %v2157_v0, %v2158_v63 }
 0x1a6   : > { %v1992_v54 = vadd.f32 %v10558_v17, %v1831_v30  ;;  %v8046_v13 = vadd.f32 %v8045_v45, %v8044_v2  ;;  %v2127_v38 = vsel %vm2063_vm7, %v1987_v35, %v2095_v5  ;;  %v10619_v22 = vmul.f32 %v10118_v50, %v2301_v23  ;;  %v8883_v45 = vpop.f32.mrf.mxu1 }
 0x1a7   : > { %v8047_v27 = vpop.f32.mrf.mxu0  ;;  %v2159_v48 = vrot.slane %v2127_v38, 6  ;;  %v2271_v58 = vrot.slane %v2127_v38, 7  ;;  %v2374_v57 = vpack.c.bf16 %v2127_v38, %v2126_v40  ;;  %v10630_v40 = vmul.f32 %v10132_v62, %v2189_v44 }
 0x1a8   : > { %v2096_v19 = vmul.f32 0.01, %v1992_v54  ;;  %v1834_v10 = vadd.f32 %v8046_v13, %v10408_v31  ;;  %vm2064_vm8 = vcmp.gt.f32.partialorder %v1992_v54, 0.0 }
 0x1a9   : > { %v8048_v1 = vpop.f32.mrf.mxu0  ;;  %8924 = vmatprep.mubr.bf16.mxu0 %v2374_v57  ;;  %v10623_v0 = vsel %vm1431_vm3, %v2270_v7, %v2271_v58  ;;  %v10627_v17 = vsel %vm1318_vm2, %v2158_v63, %v2159_v48  ;;  %13388 = vst [vmem:[#allocation38_spill] sm:$0xff] %v10630_v40 }
 0x1aa   : > { %13387 = vst [vmem:[#allocation37_spill] sm:$0xff] %v10627_v17  ;;  %v1995_v35 = vadd.f32 %v8879_v8, %v1834_v10  ;;  %v8049_v2 = vadd.f32 %v8048_v1, %v8047_v27  ;;  %v2128_v30 = vsel %vm2064_vm8, %v1992_v54, %v2096_v19  ;;  %v2002_v1 = vpop.f32.mrf.mxu1 }
 0x1ab   : > { %v8050_v5 = vpop.f32.mrf.mxu0  ;;  %v2160_v57 = vrot.slane %v2128_v30, 6  ;;  %v2272_v23 = vrot.slane %v2128_v30, 7 }
 0x1ac   : > { %v2097_v13 = vmul.f32 0.01, %v1995_v35  ;;  %v1839_v63 = vadd.f32 %v8049_v2, %v10408_v31  ;;  %vm2065_vm9 = vcmp.gt.f32.partialorder %v1995_v35, 0.0 }
 0x1ad   : > { %v8051_v38 = vpop.f32.mrf.mxu0  ;;  %v10639_v8 = vsel %vm1431_vm3, %v2271_v58, %v2272_v23  ;;  %v10643_v19 = vsel %vm1318_vm2, %v2159_v48, %v2160_v57 }
 0x1ae   : > { %13389 = vst [vmem:[#allocation39_spill] sm:$0xff] %v10639_v8  ;;  %13390 = vst [vmem:[#allocation40_spill] sm:$0xff] %v10643_v19  ;;  %v8052_v44 = vadd.f32 %v8051_v38, %v8050_v5  ;;  %v2000_v54 = vadd.f32 %v1999_v6, %v1839_v63  ;;  %v2129_v27 = vsel %vm2065_vm9, %v1995_v35, %v2097_v13 }
 0x1af   : > { %v8053_v10 = vpop.f32.mrf.mxu0  ;;  %v2161_v50 = vrot.slane %v2129_v27, 6  ;;  %v2273_v7 = vrot.slane %v2129_v27, 7  ;;  %v2375_v62 = vpack.c.bf16 %v2129_v27, %v2128_v30 }
 0x1b0   : > { %vm2066_vm10 = vcmp.gt.f32.partialorder %v2000_v54, 0.0  ;;  %v2098_v2 = vmul.f32 0.01, %v2000_v54  ;;  %v1842_v40 = vadd.f32 %v8052_v44, %v10408_v31  ;;  %v10656_v44 = vpop.f32.mrf.mxu1 }
 0x1b1   : > { %v8054_v17 = vpop.f32.mrf.mxu0  ;;  %8925 = vmatmul.mubr.bf16.gmra.mxu0 %v2375_v62  ;;  %v10648_v58 = vsel %vm1431_vm3, %v2272_v23, %v2273_v7  ;;  %v10652_v48 = vsel %vm1318_vm2, %v2160_v57, %v2161_v50 }
 0x1b2   : > { %13391 = vst [vmem:[#allocation41_spill] sm:$0xff] %v10648_v58  ;;  %13392 = vst [vmem:[#allocation42_spill] sm:$0xff] %v10652_v48  ;;  %v2130_v6 = vsel %vm2066_vm10, %v2000_v54, %v2098_v2  ;;  %v8055_v35 = vadd.f32 %v8054_v17, %v8053_v10  ;;  %v2003_v5 = vadd.f32 %v2002_v1, %v1842_v40  ;;  %v2015_v62 = vpop.f32.mrf.mxu1 }
 0x1b3   : > { %v2162_v13 = vrot.slane %v2130_v6, 6  ;;  %v2274_v63 = vrot.slane %v2130_v6, 7  ;;  %v8056_v38 = vpop.f32.mrf.mxu0 }
 0x1b4   : > { %v1847_v23 = vadd.f32 %v8055_v35, %v10408_v31  ;;  %vm2067_vm11 = vcmp.gt.f32.partialorder %v2003_v5, 0.0  ;;  %v2099_v27 = vmul.f32 0.01, %v2003_v5 }
 0x1b5   : > { %v8057_v57 = vpop.f32.mrf.mxu0  ;;  %v2297_v17 = vsel %vm1431_vm3, %v2273_v7, %v2274_v63  ;;  %v2185_v40 = vsel %vm1318_vm2, %v2161_v50, %v2162_v13 }
 0x1b6   : > { %v2008_v54 = vadd.f32 %v10607_v51, %v1847_v23  ;;  %v8058_v10 = vadd.f32 %v8057_v57, %v8056_v38  ;;  %v2131_v1 = vsel %vm2067_vm11, %v2003_v5, %v2099_v27  ;;  %v10668_v48 = vmul.f32 %v10157_v12, %v2297_v17  ;;  %v8887_v57 = vpop.f32.mrf.mxu1 }
 0x1b7   : > { %v8059_v2 = vpop.f32.mrf.mxu0  ;;  %v2163_v30 = vrot.slane %v2131_v1, 6  ;;  %v2275_v8 = vrot.slane %v2131_v1, 7  ;;  %v2376_v58 = vpack.c.bf16 %v2131_v1, %v2130_v6  ;;  %v10679_v6 = vmul.f32 %v10182_v9, %v2185_v40 }
 0x1b8   : > { %v2100_v19 = vmul.f32 0.01, %v2008_v54  ;;  %v1850_v35 = vadd.f32 %v8058_v10, %v10408_v31  ;;  %vm2068_vm12 = vcmp.gt.f32.partialorder %v2008_v54, 0.0 }
 0x1b9   : > { %v8060_v7 = vpop.f32.mrf.mxu0  ;;  %8928 = vmatprep.mubr.bf16.mxu0 %v2376_v58  ;;  %v10672_v50 = vsel %vm1431_vm3, %v2274_v63, %v2275_v8  ;;  %v10676_v51 = vsel %vm1318_vm2, %v2162_v13, %v2163_v30  ;;  %13394 = vst [vmem:[#allocation44_spill] sm:$0xff] %v10679_v6 }
 0x1ba   : > { %13393 = vst [vmem:[#allocation43_spill] sm:$0xff] %v10676_v51  ;;  %v2011_v5 = vadd.f32 %v8883_v45, %v1850_v35  ;;  %v8061_v38 = vadd.f32 %v8060_v7, %v8059_v2  ;;  %v2132_v23 = vsel %vm2068_vm12, %v2008_v54, %v2100_v19  ;;  %v2018_v7 = vpop.f32.mrf.mxu1 }
 0x1bb   : > { %v8062_v27 = vpop.f32.mrf.mxu0  ;;  %v2164_v58 = vrot.slane %v2132_v23, 6  ;;  %v2276_v17 = vrot.slane %v2132_v23, 7 }
 0x1bc   : > { %v2101_v10 = vmul.f32 0.01, %v2011_v5  ;;  %v1855_v13 = vadd.f32 %v8061_v38, %v10408_v31  ;;  %vm2069_vm13 = vcmp.gt.f32.partialorder %v2011_v5, 0.0 }
 0x1bd   : > { %v8063_v1 = vpop.f32.mrf.mxu0  ;;  %v10688_v45 = vsel %vm1431_vm3, %v2275_v8, %v2276_v17  ;;  %v10692_v19 = vsel %vm1318_vm2, %v2163_v30, %v2164_v58 }
 0x1be   : > { %13395 = vst [vmem:[#allocation45_spill] sm:$0xff] %v10688_v45  ;;  %13396 = vst [vmem:[#allocation46_spill] sm:$0xff] %v10692_v19  ;;  %v8064_v40 = vadd.f32 %v8063_v1, %v8062_v27  ;;  %v2016_v54 = vadd.f32 %v2015_v62, %v1855_v13  ;;  %v2133_v2 = vsel %vm2069_vm13, %v2011_v5, %v2101_v10 }
 0x1bf   : > { %v8065_v35 = vpop.f32.mrf.mxu0  ;;  %v2165_v12 = vrot.slane %v2133_v2, 6  ;;  %v2277_v63 = vrot.slane %v2133_v2, 7  ;;  %v2377_v9 = vpack.c.bf16 %v2133_v2, %v2132_v23 }
 0x1c0   : > { %vm2070_vm14 = vcmp.gt.f32.partialorder %v2016_v54, 0.0  ;;  %v2102_v38 = vmul.f32 0.01, %v2016_v54  ;;  %v1858_v6 = vadd.f32 %v8064_v40, %v10408_v31  ;;  %v10705_v40 = vpop.f32.mrf.mxu1 }
 0x1c1   : > { %v8066_v51 = vpop.f32.mrf.mxu0  ;;  %8929 = vmatmul.mubr.bf16.gmra.mxu0 %v2377_v9  ;;  %v10697_v8 = vsel %vm1431_vm3, %v2276_v17, %v2277_v63  ;;  %v10701_v30 = vsel %vm1318_vm2, %v2164_v58, %v2165_v12 }
 0x1c2   : > { %13397 = vst [vmem:[#allocation47_spill] sm:$0xff] %v10697_v8  ;;  %13398 = vst [vmem:[#allocation48_spill] sm:$0xff] %v10701_v30  ;;  %v2134_v62 = vsel %vm2070_vm14, %v2016_v54, %v2102_v38  ;;  %v8067_v5 = vadd.f32 %v8066_v51, %v8065_v35  ;;  %v2019_v27 = vadd.f32 %v2018_v7, %v1858_v6  ;;  %v2031_v9 = vpop.f32.mrf.mxu1 }
 0x1c3   : > { %v2166_v10 = vrot.slane %v2134_v62, 6  ;;  %v2278_v13 = vrot.slane %v2134_v62, 7  ;;  %v8068_v1 = vpop.f32.mrf.mxu0 }
 0x1c4   : > { %v1863_v17 = vadd.f32 %v8067_v5, %v10408_v31  ;;  %vm2071_vm15 = vcmp.gt.f32.partialorder %v2019_v27, 0.0  ;;  %v2103_v2 = vmul.f32 0.01, %v2019_v27 }
 0x1c5   : > { %v8069_v58 = vpop.f32.mrf.mxu0  ;;  %v2293_v51 = vsel %vm1431_vm3, %v2277_v63, %v2278_v13  ;;  %v2181_v6 = vsel %vm1318_vm2, %v2165_v12, %v2166_v10 }
 0x1c6   : > { %v2024_v54 = vadd.f32 %v10656_v44, %v1863_v17  ;;  %v8070_v35 = vadd.f32 %v8069_v58, %v8068_v1  ;;  %v2135_v7 = vsel %vm2071_vm15, %v2019_v27, %v2103_v2  ;;  %v10717_v30 = vmul.f32 %v10216_v53, %v2293_v51  ;;  %v8891_v58 = vpop.f32.mrf.mxu1 }
 0x1c7   : > { %v8071_v38 = vpop.f32.mrf.mxu0  ;;  %v2167_v23 = vrot.slane %v2135_v7, 6  ;;  %v2279_v45 = vrot.slane %v2135_v7, 7  ;;  %v2378_v8 = vpack.c.bf16 %v2135_v7, %v2134_v62  ;;  %v10728_v62 = vmul.f32 %v10232_v33, %v2181_v6 }
 0x1c8   : > { %v2104_v19 = vmul.f32 0.01, %v2024_v54  ;;  %v1866_v5 = vadd.f32 %v8070_v35, %v10408_v31  ;;  %vm2072_vm0 = vcmp.gt.f32.partialorder %v2024_v54, 0.0 }
 0x1c9   : > { %v8072_v63 = vpop.f32.mrf.mxu0  ;;  %8932 = vmatprep.mubr.bf16.mxu0 %v2378_v8  ;;  %v10721_v12 = vsel %vm1431_vm3, %v2278_v13, %v2279_v45  ;;  %v10725_v44 = vsel %vm1318_vm2, %v2166_v10, %v2167_v23  ;;  %13400 = vst [vmem:[#allocation50_spill] sm:$0xff] %v10728_v62 }
 0x1ca   : > { %13399 = vst [vmem:[#allocation49_spill] sm:$0xff] %v10725_v44  ;;  %v2027_v27 = vadd.f32 %v8887_v57, %v1866_v5  ;;  %v8073_v1 = vadd.f32 %v8072_v63, %v8071_v38  ;;  %v2136_v17 = vsel %vm2072_vm0, %v2024_v54, %v2104_v19  ;;  %v2034_v63 = vpop.f32.mrf.mxu1 }
 0x1cb   : > { %v8074_v2 = vpop.f32.mrf.mxu0  ;;  %v2168_v8 = vrot.slane %v2136_v17, 6  ;;  %v2280_v51 = vrot.slane %v2136_v17, 7 }
 0x1cc   : > { %v2105_v35 = vmul.f32 0.01, %v2027_v27  ;;  %v1871_v10 = vadd.f32 %v8073_v1, %v10408_v31  ;;  %vm2073_vm1 = vcmp.gt.f32.partialorder %v2027_v27, 0.0 }
 0x1cd   : > { %v8075_v7 = vpop.f32.mrf.mxu0  ;;  %v10737_v57 = vsel %vm1431_vm3, %v2279_v45, %v2280_v51  ;;  %v10741_v19 = vsel %vm1318_vm2, %v2167_v23, %v2168_v8 }
 0x1ce   : > { %13401 = vst [vmem:[#allocation51_spill] sm:$0xff] %v10741_v19  ;;  %v8076_v6 = vadd.f32 %v8075_v7, %v8074_v2  ;;  %v2032_v54 = vadd.f32 %v2031_v9, %v1871_v10  ;;  %v2137_v38 = vsel %vm2073_vm1, %v2027_v27, %v2105_v35 }
 0x1cf   : > { %v8077_v5 = vpop.f32.mrf.mxu0  ;;  %v2169_v53 = vrot.slane %v2137_v38, 6  ;;  %v2281_v13 = vrot.slane %v2137_v38, 7  ;;  %v2379_v33 = vpack.c.bf16 %v2137_v38, %v2136_v17 }
 0x1d0   : > { %vm2074_vm4 = vcmp.gt.f32.partialorder %v2032_v54, 0.0  ;;  %v2106_v1 = vmul.f32 0.01, %v2032_v54  ;;  %v1874_v62 = vadd.f32 %v8076_v6, %v10408_v31 }
 0x1d1   : > { %v8078_v44 = vpop.f32.mrf.mxu0  ;;  %8933 = vmatmul.mubr.bf16.gmra.mxu0 %v2379_v33  ;;  %v10746_v45 = vsel %vm1431_vm3, %v2280_v51, %v2281_v13  ;;  %v10750_v23 = vsel %vm1318_vm2, %v2168_v8, %v2169_v53 }
 0x1d2   : > { %13402 = vst [vmem:[#allocation52_spill] sm:$0xff] %v10750_v23  ;;  %v2138_v9 = vsel %vm2074_vm4, %v2032_v54, %v2106_v1  ;;  %v8079_v27 = vadd.f32 %v8078_v44, %v8077_v5  ;;  %v2035_v2 = vadd.f32 %v2034_v63, %v1874_v62 }
 0x1d3   : > { %v2170_v35 = vrot.slane %v2138_v9, 6  ;;  %v2282_v10 = vrot.slane %v2138_v9, 7  ;;  %v8080_v7 = vpop.f32.mrf.mxu0 }
 0x1d4   : > { %v1879_v6 = vadd.f32 %v8079_v27, %v10408_v31  ;;  %vm2075_vm5 = vcmp.gt.f32.partialorder %v2035_v2, 0.0  ;;  %v2107_v51 = vmul.f32 0.01, %v2035_v2 }
 0x1d5   : > { %v8081_v38 = vpop.f32.mrf.mxu0  ;;  %v2289_v8 = vsel %vm1431_vm3, %v2281_v13, %v2282_v10  ;;  %v2177_v44 = vsel %vm1318_vm2, %v2169_v53, %v2170_v35 }
 0x1d6   : > { %v2040_v62 = vadd.f32 %v10705_v40, %v1879_v6  ;;  %v8082_v54 = vadd.f32 %v8081_v38, %v8080_v7  ;;  %v2139_v5 = vsel %vm2075_vm5, %v2035_v2, %v2107_v51  ;;  %v10763_v33 = vmul.f32 %v10306_v32, %v2289_v8 }
 0x1d7   : > { %v2171_v63 = vrot.slane %v2139_v5, 6  ;;  %v2283_v1 = vrot.slane %v2139_v5, 7  ;;  %v2380_v17 = vpack.c.bf16 %v2139_v5, %v2138_v9  ;;  %v10767_v23 = vmul.f32 %v10327_v26, %v2177_v44 }
 0x1d8   : > { %v2108_v27 = vmul.f32 0.01, %v2040_v62  ;;  %v1882_v19 = vadd.f32 %v8082_v54, %v10408_v31  ;;  %vm2076_vm6 = vcmp.gt.f32.partialorder %v2040_v62, 0.0  ;;  %v13403_v38 = vrot.slane %v10412_v24, 6 }
 0x1d9   : > { %8936 = vmatprep.mubr.bf16.mxu0 %v2380_v17  ;;  %v10771_v53 = vsel %vm1431_vm3, %v2282_v10, %v2283_v1  ;;  %v10775_v40 = vsel %vm1318_vm2, %v2170_v35, %v2171_v63  ;;  %v13404_v44 = vrot.slane %v10412_v24, 7 }
 0x1da   : > { %v2043_v13 = vadd.f32 %v8891_v58, %v1882_v19  ;;  %v2140_v9 = vsel %vm2076_vm6, %v2040_v62, %v2108_v27  ;;  %v2364_v32 = vpack.c.bf16 %v10771_v53, %v10763_v33  ;;  %v2252_v31 = vpack.c.bf16 %v10775_v40, %v10767_v23  ;;  %v13406_v27 = vld [vmem:[#allocation20_spill] sm:$0xff] }
 0x1db   : > { %v2172_v2 = vrot.slane %v2140_v9, 6  ;;  %v2284_v7 = vrot.slane %v2140_v9, 7 }
 0x1dc   : > { %v2109_v17 = vmul.f32 0.01, %v2043_v13  ;;  %vm2077_vm7 = vcmp.gt.f32.partialorder %v2043_v13, 0.0 }
 0x1dd   : > { %v10783_v10 = vsel %vm1431_vm3, %v2283_v1, %v2284_v7  ;;  %v10787_v35 = vsel %vm1318_vm2, %v2171_v63, %v2172_v2  ;;  %v13405_v63 = vld [vmem:[#allocation19_spill] sm:$0xff] }
 0x1de   : > { %v2141_v58 = vsel %vm2077_vm7, %v2043_v13, %v2109_v17 }
 0x1df   : > { %v2173_v19 = vrot.slane %v2141_v58, 6  ;;  %v2285_v6 = vrot.slane %v2141_v58, 7  ;;  %v2381_v51 = vpack.c.bf16 %v2141_v58, %v2140_v9  ;;  %v9509_v9 = vld [vmem:[%s9946_s15] sm:$0xff]  }
 0x1e1   : > { %v2205_v8 = vsel %vm1318_vm2, %v2173_v19, %v13403_v38  ;;  %8937 = vmatmul.mubr.bf16.gmra.mxu0 %v2381_v51  ;;  %v2317_v62 = vsel %vm1431_vm3, %v2285_v6, %v13404_v44  ;;  %v10799_v54 = vsel %vm1431_vm3, %v2284_v7, %v2285_v6  ;;  %v10803_v5 = vsel %vm1318_vm2, %v2172_v2, %v2173_v19  ;;  %v9510_v19 = vld [vmem:[%s9946_s15 + $0x8] sm:$0xff]   ;;  %v9511_v6 = vld [vmem:[%s9946_s15 + $0x10] sm:$0xff]   ;;  %v9513_v38 = vld [vmem:[%s9946_s15 + $0x20] sm:$0xff]  }
 0x1e2   : > { %v2318_v1 = vmul.f32 %v13405_v63, %v2317_v62  ;;  %v2206_v13 = vmul.f32 %v13406_v27, %v2205_v8  ;;  %8956 = vmatprep.mubr.bf16.mxu0 %v9509_v9  ;;  %v2365_v24 = vpack.c.bf16 %v10799_v54, %v10783_v10  ;;  %v2253_v17 = vpack.c.bf16 %v10803_v5, %v10787_v35  ;;  %v9522_v44 = vld [vmem:[%s9946_s15 + $0x68] sm:$0xff]   ;;  %v9524_v63 = vld [vmem:[%s9946_s15 + $0x78] sm:$0xff]   ;;  %v9409_v54 = vld [vmem:[#allocation6 + $0x1e0] sm:$0xff]  }
 0x1e3   : > { %v13407_v2 = vpack.c.bf16 %v10447_v28, %v10438_v15  ;;  %v13408_v51 = vpack.c.bf16 %v10451_v21, %v10442_v25  ;;  %v13410_v15 = vpack.c.bf16 %v10476_v52, %v10479_v20  ;;  %v13411_v28 = vpack.c.bf16 %v10500_v56, %v10491_v37  ;;  %v9514_v25 = vld [vmem:[%s9946_s15 + $0x28] sm:$0xff]   ;;  %v9515_v21 = vld [vmem:[%s9946_s15 + $0x30] sm:$0xff]   ;;  %v9516_v52 = vld [vmem:[%s9946_s15 + $0x38] sm:$0xff]  }
 0x1e4   : > { %v2350_v7 = vpack.c.bf16 %v10425_v55, %v2318_v1  ;;  %v2238_v58 = vpack.c.bf16 %v10431_v39, %v2206_v13  ;;  %v13409_v55 = vpack.c.bf16 %v10472_v49, %v10468_v41  ;;  %v9512_v39 = vld [vmem:[%s9946_s15 + $0x18] sm:$0xff]   ;;  %v13412_v41 = vpack.c.bf16 %v10504_v46, %v10495_v34  ;;  %v9517_v20 = vld [vmem:[%s9946_s15 + $0x40] sm:$0xff]   ;;  %v9518_v34 = vld [vmem:[%s9946_s15 + $0x48] sm:$0xff]  }
 0x1e5   : > { %v13413_v49 = vpack.c.bf16 %v10524_v11, %v10520_v47  ;;  %v13414_v37 = vpack.c.bf16 %v10528_v43, %v10531_v3  ;;  %v13415_v56 = vpack.c.bf16 %v10550_v16, %v10541_v42  ;;  %v9519_v46 = vld [vmem:[%s9946_s15 + $0x50] sm:$0xff]   ;;  %v13416_v47 = vpack.c.bf16 %v10554_v18, %v10545_v4  ;;  %v9520_v43 = vld [vmem:[%s9946_s15 + $0x58] sm:$0xff]   ;;  %v9521_v3 = vld [vmem:[%s9946_s15 + $0x60] sm:$0xff]  }
 0x1e6   : > { %2611 = vmatprep.mubr.bf16.mxu1 %v2350_v7  ;;  %v13417_v11 = vpack.c.bf16 %v10574_v59, %v10570_v36  ;;  %v13418_v42 = vpack.c.bf16 %v10578_v29, %v10581_v60  ;;  %v13419_v16 = vld [vmem:[#allocation34_spill] sm:$0xff]  ;;  %v9523_v4 = vld [vmem:[%s9946_s15 + $0x70] sm:$0xff]   ;;  %v13422_v62 = vld [vmem:[#allocation35_spill] sm:$0xff]  ;;  %v13424_v59 = vpack.c.bf16 %v10623_v0, %v10619_v22  ;;  %s7556_s15 = scalar_lea.sflag [#allocation5], %s9942_s19 }
 0x1e7   : > { %2612 = vmatmul.mubr.bf16.vlgmr.msra.gmra.mxu1 %v2238_v58  ;;  %v13420_v8 = vpack.c.bf16 %v10599_v61, %v13419_v16  ;;  %v13421_v18 = vld [vmem:[#allocation36_spill] sm:$0xff]  ;;  %v9395_v29 = vld [vmem:[#allocation6 + $0x238] sm:$0xff]   ;;  %v13426_v1 = vld [vmem:[#allocation38_spill] sm:$0xff] }
 0x1e8   : > { %2619 = vmatprep.mubr.bf16.mxu1 %v13407_v2  ;;  %v13423_v36 = vpack.c.bf16 %v13421_v18, %v13422_v62  ;;  %v13425_v60 = vld [vmem:[#allocation37_spill] sm:$0xff]  ;;  %8988 = vmatprep.subr.bf16.mxu0 %v9395_v29  ;;  %v13429_v9 = vld [vmem:[#allocation39_spill] sm:$0xff]  ;;  %v9396_v58 = vld [vmem:[#allocation6 + $0x230] sm:$0xff]  }
 0x1e9   : > { %8957 = vmatmul.mubr.bf16.vlgmr.msra.gmra.mxu0 %v9510_v19  ;;  %v13427_v13 = vpack.c.bf16 %v13425_v60, %v13426_v1  ;;  %v13428_v61 = vld [vmem:[#allocation41_spill] sm:$0xff]  ;;  %v9397_v2 = vld [vmem:[#allocation6 + $0x228] sm:$0xff]   ;;  %v13431_v19 = vld [vmem:[#allocation42_spill] sm:$0xff] }
 0x1ea   : > { %8960 = vmatprep.mubr.bf16.mxu0 %v9511_v6  ;;  %v13430_v7 = vpack.c.bf16 %v13428_v61, %v13429_v9  ;;  %8989 = vmatpush3.bf16.msra.mxu0 %v9395_v29  ;;  %v13432_v22 = vld [vmem:[#allocation40_spill] sm:$0xff]  ;;  %v13434_v6 = vpack.c.bf16 %v10672_v50, %v10668_v48  ;;  %v9403_v48 = vld [vmem:[#allocation6 + $0x208] sm:$0xff]   ;;  %v9411_v60 = vld [vmem:[#allocation6 + $0x1d8] sm:$0xff]  }
 0x1eb   : > { %8990 = vmatprep.subr.bf16.mxu0 %v9396_v58  ;;  %v13433_v0 = vpack.c.bf16 %v13431_v19, %v13432_v22  ;;  %v9405_v62 = vld [vmem:[#allocation6 + $0x1f0] sm:$0xff]   ;;  %v9412_v1 = vld [vmem:[#allocation6 + $0x198] sm:$0xff]  }
 0x1ec   : > { %v9414_v19 = vld [vmem:[#allocation6 + $0x190] sm:$0xff]  }
 0x1ee   : > { %8991 = vmatpush3.bf16.msra.mxu0 %v9396_v58 }
 0x1ef   : > { %2620 = vmatmul.mubr.bf16.gmra.mxu1 %v13408_v51  ;;  %8992 = vmatprep.subr.bf16.mxu0 %v9397_v2  ;;  %v9398_v51 = vld [vmem:[#allocation6 + $0x220] sm:$0xff]  }
 0x1f0   : > { %2627 = vmatprep.mubr.bf16.mxu1 %v13409_v55  ;;  %v9399_v55 = vld [vmem:[#allocation6 + $0x218] sm:$0xff]  }
 0x1f1   : > { %8961 = vmatmul.mubr.bf16.gmra.mxu0 %v9512_v39  ;;  %v13435_v39 = vld [vmem:[#allocation43_spill] sm:$0xff] }
 0x1f2   : > { %8964 = vmatprep.mubr.bf16.mxu0 %v9513_v38  ;;  %8993 = vmatpush3.bf16.msra.mxu0 %v9397_v2  ;;  %v13436_v38 = vld [vmem:[#allocation44_spill] sm:$0xff] }
 0x1f3   : > { %8994 = vmatprep.subr.bf16.mxu0 %v9398_v51  ;;  %v9413_v2 = vld [vmem:[#allocation6 + $0x1d0] sm:$0xff]  }
 0x1f6   : > { %8995 = vmatpush3.bf16.msra.mxu0 %v9398_v51 }
 0x1f7   : > { %2628 = vmatmul.mubr.bf16.gmra.mxu1 %v13410_v15  ;;  %v13437_v15 = vpack.c.bf16 %v13435_v39, %v13436_v38  ;;  %8996 = vmatprep.subr.bf16.mxu0 %v9399_v55  ;;  %v9415_v39 = vld [vmem:[#allocation6 + $0x1c8] sm:$0xff]  }
 0x1f8   : > { %2635 = vmatprep.mubr.bf16.mxu1 %v13411_v28  ;;  %v13438_v28 = vld [vmem:[#allocation47_spill] sm:$0xff] }
 0x1f9   : > { %8965 = vmatmul.mubr.bf16.gmra.mxu0 %v9514_v25  ;;  %v13439_v25 = vld [vmem:[#allocation45_spill] sm:$0xff]  ;;  %v9416_v38 = vld [vmem:[#allocation6 + $0x188] sm:$0xff]  }
 0x1fa   : > { %8968 = vmatprep.mubr.bf16.mxu0 %v9515_v21  ;;  %v13440_v21 = vpack.c.bf16 %v13438_v28, %v13439_v25  ;;  %8997 = vmatpush3.bf16.msra.mxu0 %v9399_v55 }
 0x1ff   : > { %2636 = vmatmul.mubr.bf16.gmra.mxu1 %v13412_v41  ;;  %v9400_v41 = vld [vmem:[#allocation6 + $0x210] sm:$0xff]  }
 0x200   : > { %2643 = vmatprep.mubr.bf16.mxu1 %v13413_v49  ;;  %8998 = vmatprep.subr.bf16.mxu0 %v9400_v41  ;;  %v13441_v49 = vld [vmem:[#allocation48_spill] sm:$0xff] }
 0x201   : > { %8969 = vmatmul.mubr.bf16.gmra.mxu0 %v9516_v52  ;;  %v13442_v52 = vld [vmem:[#allocation46_spill] sm:$0xff] }
 0x202   : > { %8972 = vmatprep.mubr.bf16.mxu0 %v9517_v20  ;;  %8999 = vmatpush3.bf16.msra.mxu0 %v9400_v41  ;;  %v13443_v20 = vpack.c.bf16 %v13441_v49, %v13442_v52  ;;  %v9525_v41 = vld [vmem:[#allocation8] sm:$0x3f] }
 0x203   : > { %9000 = vmatprep.subr.bf16.mxu0 %v9403_v48 }
 0x206   : > { %9001 = vmatpush3.bf16.msra.mxu0 %v9403_v48  ;;  %v13452_v48 = vsub.s32 1, %v9960_v14 }
 0x207   : > { %2644 = vmatmul.mubr.bf16.gmra.mxu1 %v13414_v37  ;;  %v13444_v37 = vpack.c.bf16 %v10721_v12, %v10717_v30  ;;  %v13448_v30 = vpack.c.bf16 %v10746_v45, %v10737_v57 }
 0x208   : > { %2651 = vmatprep.mubr.bf16.mxu1 %v13415_v56  ;;  %v9404_v56 = vld [vmem:[#allocation6 + $0x200] sm:$0xff]   ;;  %v10985_v49 = vrot.slane %v9525_v41, %v13452_v48 }
 0x209   : > { %8973 = vmatmul.mubr.bf16.gmra.mxu0 %v9518_v34  ;;  %9002 = vmatprep.subr.bf16.mxu0 %v9404_v56 }
 0x20a   : > { %8976 = vmatprep.mubr.bf16.mxu0 %v9519_v46  ;;  %v9401_v46 = vld [vmem:[#allocation6 + $0x1f8] sm:$0xff]   ;;  %9003 = vmatpush3.bf16.msra.mxu0 %v9404_v56  ;;  %v9526_v56 = vld [vmem:[%s13171_s4] sm:$0x3] }
 0x20b   : > { %8267 = vmatprep.subr.bf16.mxu1 %v9401_v46  ;;  %v13453_v46 = vsub.s32 0, %v9960_v14 }
 0x20f   : > { %2652 = vmatmul.mubr.bf16.gmra.mxu1 %v13416_v47  ;;  %v9402_v47 = vld [vmem:[#allocation6 + $0x1b8] sm:$0xff]  }
 0x210   : > { %2659 = vmatprep.mubr.bf16.mxu1 %v13417_v11  ;;  %8268 = vmatpush3.bf16.msra.mxu1 %v9402_v47  ;;  %v10992_v47 = vrot.slane %v9526_v56, %v13453_v46 }
 0x211   : > { %8977 = vmatmul.mubr.bf16.gmra.mxu0 %v9520_v43  ;;  %v13445_v43 = vld [vmem:[#allocation49_spill] sm:$0xff]  ;;  %8269 = vmatprep.subr.bf16.mxu1 %v9405_v62 }
 0x212   : > { %8980 = vmatprep.mubr.bf16.mxu0 %v9521_v3  ;;  %v13446_v3 = vld [vmem:[#allocation50_spill] sm:$0xff] }
 0x217   : > { %2660 = vmatmul.mubr.bf16.gmra.mxu1 %v13418_v42  ;;  %v13447_v42 = vpack.c.bf16 %v13445_v43, %v13446_v3 }
 0x218   : > { %2667 = vmatprep.mubr.bf16.mxu1 %v13420_v8  ;;  %v13449_v8 = vld [vmem:[#allocation52_spill] sm:$0xff] }
 0x219   : > { %8981 = vmatmul.mubr.bf16.gmra.mxu0 %v9522_v44  ;;  %v13450_v44 = vld [vmem:[#allocation51_spill] sm:$0xff] }
 0x21a   : > { %8984 = vmatprep.mubr.bf16.mxu0 %v9523_v4  ;;  %v13451_v4 = vpack.c.bf16 %v13449_v8, %v13450_v44 }
 0x21f   : > { %2668 = vmatmul.mubr.bf16.gmra.mxu1 %v13423_v36  ;;  %v9406_v36 = vld [vmem:[#allocation6 + $0x1b0] sm:$0xff]  }
 0x220   : > { %2675 = vmatprep.mubr.bf16.mxu1 %v13424_v59  ;;  %8270 = vmatpush3.bf16.msra.mxu1 %v9406_v36  ;;  %v9408_v59 = vld [vmem:[#allocation6 + $0x1a8] sm:$0xff]  }
 0x221   : > { %8985 = vmatmul.mubr.bf16.gmra.mxu0 %v9524_v63 }
 0x227   : > { %2676 = vmatmul.mubr.bf16.gmra.mxu1 %v13427_v13 }
 0x228   : > { %2683 = vmatprep.mubr.bf16.mxu1 %v13430_v7 }
 0x22f   : > { %2684 = vmatmul.mubr.bf16.gmra.mxu1 %v13433_v0 }
 0x230   : > { %2691 = vmatprep.mubr.bf16.mxu1 %v13434_v6 }
 0x231   : > { %v10892_v50 = vpop.f32.mrf.mxu0 }
 0x233   : > { %v10900_v34 = vpop.f32.mrf.mxu0 }
 0x235   : > { %v10902_v11 = vpop.f32.mrf.mxu0 }
 0x237   : > { %2692 = vmatmul.mubr.bf16.gmra.mxu1 %v13437_v15  ;;  %v10910_v12 = vpop.f32.mrf.mxu0 }
 0x238   : > { %2699 = vmatprep.mubr.bf16.mxu1 %v13440_v21 }
 0x23f   : > { %2700 = vmatmul.mubr.bf16.gmra.mxu1 %v13443_v20 }
 0x240   : > { %2707 = vmatprep.mubr.bf16.mxu1 %v13444_v37 }
 0x241   : > { %v10912_v16 = vpop.f32.mrf.mxu0 }
 0x243   : > { %v10920_v18 = vpop.f32.mrf.mxu0 }
 0x245   : > { %v10922_v57 = vpop.f32.mrf.mxu0 }
 0x247   : > { %2708 = vmatmul.mubr.bf16.gmra.mxu1 %v13447_v42  ;;  %v10930_v45 = vpop.f32.mrf.mxu0 }
 0x248   : > { %2715 = vmatprep.mubr.bf16.mxu1 %v13448_v30 }
 0x24f   : > { %2716 = vmatmul.mubr.bf16.gmra.mxu1 %v13451_v4 }
 0x250   : > { %2723 = vmatprep.mubr.bf16.mxu1 %v2364_v32  ;;  %v9407_v32 = vld [vmem:[#allocation6 + $0x1e8] sm:$0xff]  }
 0x251   : > { %v10932_v33 = vpop.f32.mrf.mxu0  ;;  %8271 = vmatprep.subr.bf16.mxu1 %v9407_v32 }
 0x252   : > { %8272 = vmatpush3.bf16.msra.mxu1 %v9408_v59 }
 0x253   : > { %v10934_v53 = vpop.f32.mrf.mxu0  ;;  %8273 = vmatprep.subr.bf16.mxu1 %v9409_v54 }
 0x255   : > { %v10939_v63 = vpop.f32.mrf.mxu0 }
 0x257   : > { %2724 = vmatmul.mubr.bf16.gmra.mxu1 %v2252_v31  ;;  %v10941_v23 = vpop.f32.mrf.mxu0 }
 0x258   : > { %2731 = vmatprep.mubr.bf16.mxu1 %v2365_v24  ;;  %v9410_v24 = vld [vmem:[#allocation6 + $0x1a0] sm:$0xff]  }
 0x259   : > { %8274 = vmatpush3.bf16.msra.mxu1 %v9410_v24 }
 0x25a   : > { %8275 = vmatprep.subr.bf16.mxu1 %v9411_v60  ;;  %v9417_v60 = vld [vmem:[#allocation6 + $0x1c0] sm:$0xff]  }
 0x25d   : > { %8276 = vmatpush3.bf16.msra.mxu1 %v9412_v1  ;;  %v9418_v1 = vld [vmem:[#allocation6 + $0x180] sm:$0xff]  }
 0x25e   : > { %8277 = vmatprep.subr.bf16.mxu1 %v9413_v2 }
 0x25f   : > { %2732 = vmatmul.mubr.bf16.gmra.mxu1 %v2253_v17 }
 0x261   : > { %v10943_v40 = vpop.f32.mrf.mxu0  ;;  %8278 = vmatpush3.bf16.msra.mxu1 %v9414_v19 }
 0x262   : > { %8279 = vmatprep.subr.bf16.mxu1 %v9415_v39 }
 0x263   : > { %v10945_v31 = vpop.f32.mrf.mxu0 }
 0x265   : > { %v10947_v10 = vpop.f32.mrf.mxu0  ;;  %8280 = vmatpush3.bf16.msra.mxu1 %v9416_v38 }
 0x266   : > { %8281 = vmatprep.subr.bf16.mxu1 %v9417_v60 }
 0x267   : > { %v10949_v35 = vpop.f32.mrf.mxu0 }
 0x269   : > { %8282 = vmatpush3.bf16.msra.mxu1 %v9418_v1 }
 0x271   : > { %v10951_v5 = vpop.f32.mrf.mxu0 }
 0x273   : > { %v10953_v17 = vpop.f32.mrf.mxu0 }
 0x275   : > { %v10955_v29 = vpop.f32.mrf.mxu0 }
 0x277   : > { %v10957_v13 = vpop.f32.mrf.mxu0 }
 0x281   : > { %v10959_v61 = vpop.f32.mrf.mxu0 }
 0x283   : > { %v10961_v9 = vpop.f32.mrf.mxu0 }
 0x285   : > { %v10963_v7 = vpop.f32.mrf.mxu0 }
 0x287   : > { %v10965_v58 = vpop.f32.mrf.mxu0 }
 0x291   : > { %v10967_v22 = vpop.f32.mrf.mxu0 }
 0x293   : > { %v10969_v0 = vpop.f32.mrf.mxu0 }
 0x295   : > { %v10971_v6 = vpop.f32.mrf.mxu0 }
 0x297   : > { %v10973_v51 = vpop.f32.mrf.mxu0 }
 0x2a1   : > { %v10975_v55 = vpop.f32.mrf.mxu0 }
 0x2a3   : > { %v10977_v15 = vpop.f32.mrf.mxu0 }
 0x2a5   : > { %v10979_v28 = vpop.f32.mrf.mxu0 }
 0x2a7   : > { %v8123_v25 = vpop.f32.mrf.mxu1  ;;  %v10981_v21 = vpop.f32.mrf.mxu0 }
 0x2a9   : > { %v8124_v52 = vpop.f32.mrf.mxu1  ;;  %v8958_v20 = vpop.f32.mrf.mxu0 }
 0x2aa   : > { %v8125_v37 = vadd.f32 %v8124_v52, %v8123_v25 }
 0x2ab   : > { %v8126_v43 = vpop.f32.mrf.mxu1  ;;  %v3099_v3 = vpop.f32.mrf.mxu0 }
 0x2ac   : > { %v2614_v42 = vadd.f32 %v8125_v37, %v10985_v49  ;;  %v3100_v36 = vadd.f32 %v3099_v3, %v10992_v47 }
 0x2ad   : > { %v8127_v30 = vpop.f32.mrf.mxu1  ;;  %v8959_v8 = vpop.f32.mrf.mxu0 }
 0x2ae   : > { %v2775_v44 = vadd.f32 %v10900_v34, %v2614_v42  ;;  %v8128_v4 = vadd.f32 %v8127_v30, %v8126_v43  ;;  %v3111_v60 = vadd.f32 %v8959_v8, %v10992_v47 }
 0x2af   : > { %v8129_v62 = vpop.f32.mrf.mxu1  ;;  %v3102_v54 = vpop.f32.mrf.mxu0 }
 0x2b0   : > { %v2617_v32 = vadd.f32 %v8128_v4, %v10985_v49  ;;  %vm2901_vm3 = vcmp.gt.f32.partialorder %v2775_v44, 0.0  ;;  %v2933_v59 = vmul.f32 0.01, %v2775_v44  ;;  %v3103_v34 = vadd.f32 %v3102_v54, %v10992_v47 }
 0x2b1   : > { %v8130_v24 = vpop.f32.mrf.mxu1  ;;  %v11001_v52 = vpop.f32.mrf.mxu0 }
 0x2b2   : > { %v2778_v2 = vadd.f32 %v10910_v12, %v2617_v32  ;;  %v2965_v19 = vsel %vm2901_vm3, %v2775_v44, %v2933_v59  ;;  %v8131_v39 = vadd.f32 %v8130_v24, %v8129_v62  ;;  %v3108_v12 = vadd.f32 %v8958_v20, %v10992_v47 }
 0x2b3   : > { %v3226_v38 = vadd.f32 %v3100_v36, %v2965_v19  ;;  %v8132_v25 = vpop.f32.mrf.mxu1  ;;  %v3115_v62 = vpop.f32.mrf.mxu0 }
 0x2b4   : > { %v2622_v41 = vadd.f32 %v8131_v39, %v10985_v49  ;;  %vm2902_vm8 = vcmp.gt.f32.partialorder %v2778_v2, 0.0  ;;  %v2934_v48 = vmul.f32 0.01, %v2778_v2 }
 0x2b5   : > { %v8133_v37 = vpop.f32.mrf.mxu1  ;;  %v3290_v30 = vmul.f32 0.01, %v3226_v38  ;;  %vm3258_vm10 = vcmp.gt.f32.partialorder %v3226_v38, 0.0 }
 0x2b6   : > { %v2783_v56 = vadd.f32 %v10892_v50, %v2622_v41  ;;  %v2966_v46 = vsel %vm2902_vm8, %v2778_v2, %v2934_v48  ;;  %v8134_v43 = vadd.f32 %v8133_v37, %v8132_v25  ;;  %v8963_v25 = vpop.f32.mrf.mxu0 }
 0x2b7   : > { %v3227_v3 = vadd.f32 %v3103_v34, %v2966_v46  ;;  %v8135_v42 = vpop.f32.mrf.mxu1  ;;  %v11010_v2 = vsel %vm3258_vm10, %v3226_v38, %v3290_v30  ;;  %v3116_v38 = vadd.f32 %v3115_v62, %v10992_v47 }
 0x2b8   : > { %vm2903_vm9 = vcmp.gt.f32.partialorder %v2783_v56, 0.0  ;;  %v2935_v44 = vmul.f32 0.01, %v2783_v56  ;;  %v2625_v4 = vadd.f32 %v8134_v43, %v10985_v49  ;;  %13455 = vst [vmem:[#allocation20_spill] sm:$0xff] %v11010_v2 }
 0x2b9   : > { %vm3259_vm11 = vcmp.gt.f32.partialorder %v3227_v3, 0.0  ;;  %v3291_v36 = vmul.f32 0.01, %v3227_v3  ;;  %v8136_v32 = vpop.f32.mrf.mxu1 }
 0x2ba   : > { %v2967_v59 = vsel %vm2903_vm9, %v2783_v56, %v2935_v44  ;;  %v2786_v54 = vadd.f32 %v10902_v11, %v2625_v4  ;;  %v8137_v50 = vadd.f32 %v8136_v32, %v8135_v42 }
 0x2bb   : > { %v3228_v24 = vadd.f32 %v3108_v12, %v2967_v59  ;;  %v8138_v20 = vpop.f32.mrf.mxu1  ;;  %v11008_v1 = vsel %vm3259_vm11, %v3227_v3, %v3291_v36  ;;  %v3118_v3 = vpop.f32.mrf.mxu0 }
 0x2bc   : > { %13454 = vst [vmem:[#allocation19_spill] sm:$0xff] %v11008_v1  ;;  %vm2904_vm12 = vcmp.gt.f32.partialorder %v2786_v54, 0.0  ;;  %v2936_v19 = vmul.f32 0.01, %v2786_v54  ;;  %v2630_v39 = vadd.f32 %v8137_v50, %v10985_v49  ;;  %v3643_v41 = vpack.c.bf16 %v11008_v1, %v11010_v2 }
 0x2bd   : > { %v8139_v34 = vpop.f32.mrf.mxu1  ;;  %v3292_v56 = vmul.f32 0.01, %v3228_v24  ;;  %vm3260_vm13 = vcmp.gt.f32.partialorder %v3228_v24, 0.0  ;;  %v3119_v62 = vadd.f32 %v3118_v3, %v10992_v47 }
 0x2be   : > { %v2968_v48 = vsel %vm2904_vm12, %v2786_v54, %v2936_v19  ;;  %v2791_v11 = vadd.f32 %v10920_v18, %v2630_v39  ;;  %v8140_v37 = vadd.f32 %v8139_v34, %v8138_v20  ;;  %9004 = vmatprep.mubr.bf16.mxu0 %v3643_v41  ;;  %v11027_v19 = vpop.f32.mrf.mxu0  ;;  %v3124_v41 = vadd.f32 %v11001_v52, %v10992_v47 }
 0x2bf   : > { %v3229_v8 = vadd.f32 %v3111_v60, %v2968_v48  ;;  %v8141_v46 = vpop.f32.mrf.mxu1  ;;  %v11019_v36 = vsel %vm3260_vm13, %v3228_v24, %v3292_v56  ;;  %v3127_v52 = vadd.f32 %v8963_v25, %v10992_v47 }
 0x2c0   : > { %v2633_v43 = vadd.f32 %v8140_v37, %v10985_v49  ;;  %vm2905_vm14 = vcmp.gt.f32.partialorder %v2791_v11, 0.0  ;;  %v2937_v12 = vmul.f32 0.01, %v2791_v11  ;;  %13456 = vst [vmem:[#allocation34_spill] sm:$0xff] %v11019_v36 }
 0x2c1   : > { %vm3261_vm15 = vcmp.gt.f32.partialorder %v3229_v8, 0.0  ;;  %v3293_v42 = vmul.f32 0.01, %v3229_v8  ;;  %v8142_v30 = vpop.f32.mrf.mxu1 }
 0x2c2   : > { %v2794_v44 = vadd.f32 %v10930_v45, %v2633_v43  ;;  %v2969_v4 = vsel %vm2905_vm14, %v2791_v11, %v2937_v12  ;;  %v8143_v18 = vadd.f32 %v8142_v30, %v8141_v46  ;;  %v3131_v46 = vpop.f32.mrf.mxu0 }
 0x2c3   : > { %v11021_v32 = vsel %vm3261_vm15, %v3229_v8, %v3293_v42  ;;  %v3230_v59 = vadd.f32 %v3116_v38, %v2969_v4  ;;  %v8144_v54 = vpop.f32.mrf.mxu1 }
 0x2c4   : > { %13457 = vst [vmem:[#allocation36_spill] sm:$0xff] %v11021_v32  ;;  %v2638_v50 = vadd.f32 %v8143_v18, %v10985_v49  ;;  %vm2906_vm0 = vcmp.gt.f32.partialorder %v2794_v44, 0.0  ;;  %v2938_v60 = vmul.f32 0.01, %v2794_v44  ;;  %v3644_v20 = vpack.c.bf16 %v11021_v32, %v11019_v36 }
 0x2c5   : > { %v8145_v45 = vpop.f32.mrf.mxu1  ;;  %v3294_v48 = vmul.f32 0.01, %v3230_v59  ;;  %vm3262_vm1 = vcmp.gt.f32.partialorder %v3230_v59, 0.0 }
 0x2c6   : > { %v2799_v39 = vadd.f32 %v10912_v16, %v2638_v50  ;;  %v2970_v24 = vsel %vm2906_vm0, %v2794_v44, %v2938_v60  ;;  %v8146_v34 = vadd.f32 %v8145_v45, %v8144_v54  ;;  %9005 = vmatmul.mubr.bf16.vlgmr.msra.gmra.mxu0 %v3644_v20  ;;  %v8967_v50 = vpop.f32.mrf.mxu0 }
 0x2c7   : > { %v3231_v11 = vadd.f32 %v3119_v62, %v2970_v24  ;;  %v8147_v37 = vpop.f32.mrf.mxu1  ;;  %v11034_v42 = vsel %vm3262_vm1, %v3230_v59, %v3294_v48  ;;  %v3132_v24 = vadd.f32 %v3131_v46, %v10992_v47 }
 0x2c8   : > { %vm2907_vm4 = vcmp.gt.f32.partialorder %v2799_v39, 0.0  ;;  %v2939_v56 = vmul.f32 0.01, %v2799_v39  ;;  %v2641_v8 = vadd.f32 %v8146_v34, %v10985_v49  ;;  %13458 = vst [vmem:[#allocation35_spill] sm:$0xff] %v11034_v42  ;;  %v3134_v48 = vpop.f32.mrf.mxu0 }
 0x2c9   : > { %vm3263_vm5 = vcmp.gt.f32.partialorder %v3231_v11, 0.0  ;;  %v3295_v38 = vmul.f32 0.01, %v3231_v11  ;;  %v8148_v43 = vpop.f32.mrf.mxu1 }
 0x2ca   : > { %v2971_v12 = vsel %vm2907_vm4, %v2799_v39, %v2939_v56  ;;  %v2802_v16 = vadd.f32 %v10922_v57, %v2641_v8  ;;  %v8149_v3 = vadd.f32 %v8148_v43, %v8147_v37 }
 0x2cb   : > { %v3232_v30 = vadd.f32 %v3124_v41, %v2971_v12  ;;  %v8150_v44 = vpop.f32.mrf.mxu1  ;;  %v11037_v4 = vsel %vm3263_vm5, %v3231_v11, %v3295_v38  ;;  %v3135_v12 = vadd.f32 %v3134_v48, %v10992_v47 }
 0x2cc   : > { %13459 = vst [vmem:[#allocation37_spill] sm:$0xff] %v11037_v4  ;;  %vm2908_vm6 = vcmp.gt.f32.partialorder %v2802_v16, 0.0  ;;  %v2940_v18 = vmul.f32 0.01, %v2802_v16  ;;  %v2646_v54 = vadd.f32 %v8149_v3, %v10985_v49  ;;  %v3645_v62 = vpack.c.bf16 %v11037_v4, %v11034_v42 }
 0x2cd   : > { %v8151_v60 = vpop.f32.mrf.mxu1  ;;  %v3296_v45 = vmul.f32 0.01, %v3232_v30  ;;  %vm3264_vm3 = vcmp.gt.f32.partialorder %v3232_v30, 0.0 }
 0x2ce   : > { %v2972_v20 = vsel %vm2908_vm6, %v2802_v16, %v2940_v18  ;;  %v2807_v57 = vadd.f32 %v10934_v53, %v2646_v54  ;;  %v8152_v59 = vadd.f32 %v8151_v60, %v8150_v44  ;;  %9008 = vmatprep.mubr.bf16.mxu0 %v3645_v62  ;;  %v11054_v18 = vpop.f32.mrf.mxu0 }
 0x2cf   : > { %v3233_v39 = vadd.f32 %v3127_v52, %v2972_v20  ;;  %v8153_v25 = vpop.f32.mrf.mxu1  ;;  %v11047_v16 = vsel %vm3264_vm3, %v3232_v30, %v3296_v45  ;;  %v3140_v30 = vadd.f32 %v11027_v19, %v10992_v47 }
 0x2d0   : > { %v2649_v34 = vadd.f32 %v8152_v59, %v10985_v49  ;;  %vm2909_vm7 = vcmp.gt.f32.partialorder %v2807_v57, 0.0  ;;  %v2941_v41 = vmul.f32 0.01, %v2807_v57  ;;  %13460 = vst [vmem:[#allocation38_spill] sm:$0xff] %v11047_v16 }
 0x2d1   : > { %v3297_v11 = vmul.f32 0.01, %v3233_v39  ;;  %v8154_v37 = vpop.f32.mrf.mxu1  ;;  %vm3265_vm8 = vcmp.gt.f32.partialorder %v3233_v39, 0.0 }
 0x2d2   : > { %v2810_v56 = vadd.f32 %v10941_v23, %v2649_v34  ;;  %v2973_v8 = vsel %vm2909_vm7, %v2807_v57, %v2941_v41  ;;  %v8155_v53 = vadd.f32 %v8154_v37, %v8153_v25  ;;  %v3147_v25 = vpop.f32.mrf.mxu0  ;;  %v3143_v37 = vadd.f32 %v8967_v50, %v10992_v47 }
 0x2d3   : > { %v3234_v38 = vadd.f32 %v3132_v24, %v2973_v8  ;;  %v8156_v43 = vpop.f32.mrf.mxu1  ;;  %v11049_v46 = vsel %vm3265_vm8, %v3233_v39, %v3297_v11 }
 0x2d4   : > { %13461 = vst [vmem:[#allocation41_spill] sm:$0xff] %v11049_v46  ;;  %v2654_v3 = vadd.f32 %v8155_v53, %v10985_v49  ;;  %vm2910_vm9 = vcmp.gt.f32.partialorder %v2810_v56, 0.0  ;;  %v2942_v52 = vmul.f32 0.01, %v2810_v56  ;;  %v3646_v44 = vpack.c.bf16 %v11049_v46, %v11047_v16 }
 0x2d5   : > { %v8157_v23 = vpop.f32.mrf.mxu1  ;;  %v3298_v59 = vmul.f32 0.01, %v3234_v38  ;;  %vm3266_vm11 = vcmp.gt.f32.partialorder %v3234_v38, 0.0 }
 0x2d6   : > { %v2815_v54 = vadd.f32 %v10932_v33, %v2654_v3  ;;  %v2974_v62 = vsel %vm2910_vm9, %v2810_v56, %v2942_v52  ;;  %v8158_v60 = vadd.f32 %v8157_v23, %v8156_v43  ;;  %9009 = vmatmul.mubr.bf16.gmra.mxu0 %v3646_v44 }
 0x2d7   : > { %v3235_v20 = vadd.f32 %v3135_v12, %v2974_v62  ;;  %v8159_v57 = vpop.f32.mrf.mxu1  ;;  %v11064_v8 = vsel %vm3266_vm11, %v3234_v38, %v3298_v59  ;;  %v8971_v12 = vpop.f32.mrf.mxu0  ;;  %v3148_v38 = vadd.f32 %v3147_v25, %v10992_v47 }
 0x2d8   : > { %vm2911_vm10 = vcmp.gt.f32.partialorder %v2815_v54, 0.0  ;;  %v2943_v45 = vmul.f32 0.01, %v2815_v54  ;;  %v2657_v39 = vadd.f32 %v8158_v60, %v10985_v49  ;;  %13463 = vst [vmem:[#allocation42_spill] sm:$0xff] %v11064_v8 }
 0x2d9   : > { %vm3267_vm12 = vcmp.gt.f32.partialorder %v3235_v20, 0.0  ;;  %v3299_v24 = vmul.f32 0.01, %v3235_v20  ;;  %v8160_v34 = vpop.f32.mrf.mxu1 }
 0x2da   : > { %v2975_v41 = vsel %vm2911_vm10, %v2815_v54, %v2943_v45  ;;  %v2818_v33 = vadd.f32 %v10939_v63, %v2657_v39  ;;  %v8161_v48 = vadd.f32 %v8160_v34, %v8159_v57 }
 0x2db   : > { %v3236_v11 = vadd.f32 %v3140_v30, %v2975_v41  ;;  %v8162_v19 = vpop.f32.mrf.mxu1  ;;  %v11062_v56 = vsel %vm3267_vm12, %v3235_v20, %v3299_v24  ;;  %v3150_v20 = vpop.f32.mrf.mxu0 }
 0x2dc   : > { %13462 = vst [vmem:[#allocation39_spill] sm:$0xff] %v11062_v56  ;;  %vm2912_vm13 = vcmp.gt.f32.partialorder %v2818_v33, 0.0  ;;  %v2944_v53 = vmul.f32 0.01, %v2818_v33  ;;  %v2662_v43 = vadd.f32 %v8161_v48, %v10985_v49  ;;  %v3647_v52 = vpack.c.bf16 %v11062_v56, %v11064_v8 }
 0x2dd   : > { %v8163_v3 = vpop.f32.mrf.mxu1  ;;  %v3300_v54 = vmul.f32 0.01, %v3236_v11  ;;  %vm3268_vm15 = vcmp.gt.f32.partialorder %v3236_v11, 0.0  ;;  %v3151_v41 = vadd.f32 %v3150_v20, %v10992_v47 }
 0x2de   : > { %v2976_v44 = vsel %vm2912_vm13, %v2818_v33, %v2944_v53  ;;  %v2823_v63 = vadd.f32 %v10945_v31, %v2662_v43  ;;  %v8164_v23 = vadd.f32 %v8163_v3, %v8162_v19  ;;  %9012 = vmatprep.mubr.bf16.mxu0 %v3647_v52  ;;  %v11081_v53 = vpop.f32.mrf.mxu0 }
 0x2df   : > { %v3237_v50 = vadd.f32 %v3143_v37, %v2976_v44  ;;  %v8165_v62 = vpop.f32.mrf.mxu1  ;;  %v11074_v33 = vsel %vm3268_vm15, %v3236_v11, %v3300_v54  ;;  %v3156_v11 = vadd.f32 %v11054_v18, %v10992_v47 }
 0x2e0   : > { %v2665_v60 = vadd.f32 %v8164_v23, %v10985_v49  ;;  %vm2913_vm14 = vcmp.gt.f32.partialorder %v2823_v63, 0.0  ;;  %v2945_v30 = vmul.f32 0.01, %v2823_v63  ;;  %13464 = vst [vmem:[#allocation40_spill] sm:$0xff] %v11074_v33 }
 0x2e1   : > { %v3301_v57 = vmul.f32 0.01, %v3237_v50  ;;  %v8166_v59 = vpop.f32.mrf.mxu1  ;;  %vm3269_vm0 = vcmp.gt.f32.partialorder %v3237_v50, 0.0 }
 0x2e2   : > { %v2826_v45 = vadd.f32 %v10949_v35, %v2665_v60  ;;  %v2977_v39 = vsel %vm2913_vm14, %v2823_v63, %v2945_v30  ;;  %v8167_v31 = vadd.f32 %v8166_v59, %v8165_v62  ;;  %v3163_v62 = vpop.f32.mrf.mxu0  ;;  %v3159_v59 = vadd.f32 %v8971_v12, %v10992_v47 }
 0x2e3   : > { %v3238_v24 = vadd.f32 %v3148_v38, %v2977_v39  ;;  %v8168_v34 = vpop.f32.mrf.mxu1  ;;  %v11076_v25 = vsel %vm3269_vm0, %v3237_v50, %v3301_v57 }
 0x2e4   : > { %13465 = vst [vmem:[#allocation43_spill] sm:$0xff] %v11076_v25  ;;  %v2670_v48 = vadd.f32 %v8167_v31, %v10985_v49  ;;  %vm2914_vm1 = vcmp.gt.f32.partialorder %v2826_v45, 0.0  ;;  %v2946_v37 = vmul.f32 0.01, %v2826_v45  ;;  %v3648_v19 = vpack.c.bf16 %v11076_v25, %v11074_v33 }
 0x2e5   : > { %v8169_v35 = vpop.f32.mrf.mxu1  ;;  %v3302_v23 = vmul.f32 0.01, %v3238_v24  ;;  %vm3270_vm5 = vcmp.gt.f32.partialorder %v3238_v24, 0.0 }
 0x2e6   : > { %v2831_v43 = vadd.f32 %v10943_v40, %v2670_v48  ;;  %v2978_v3 = vsel %vm2914_vm1, %v2826_v45, %v2946_v37  ;;  %v8170_v52 = vadd.f32 %v8169_v35, %v8168_v34  ;;  %9013 = vmatmul.mubr.bf16.gmra.mxu0 %v3648_v19 }
 0x2e7   : > { %v3239_v44 = vadd.f32 %v3151_v41, %v2978_v3  ;;  %v8171_v63 = vpop.f32.mrf.mxu1  ;;  %v11091_v39 = vsel %vm3270_vm5, %v3238_v24, %v3302_v23  ;;  %v8975_v41 = vpop.f32.mrf.mxu0  ;;  %v3164_v24 = vadd.f32 %v3163_v62, %v10992_v47 }
 0x2e8   : > { %vm2915_vm4 = vcmp.gt.f32.partialorder %v2831_v43, 0.0  ;;  %v2947_v54 = vmul.f32 0.01, %v2831_v43  ;;  %v2673_v50 = vadd.f32 %v8170_v52, %v10985_v49  ;;  %13467 = vst [vmem:[#allocation47_spill] sm:$0xff] %v11091_v39 }
 0x2e9   : > { %vm3271_vm6 = vcmp.gt.f32.partialorder %v3239_v44, 0.0  ;;  %v3303_v38 = vmul.f32 0.01, %v3239_v44  ;;  %v8172_v60 = vpop.f32.mrf.mxu1 }
 0x2ea   : > { %v2979_v30 = vsel %vm2915_vm4, %v2831_v43, %v2947_v54  ;;  %v2834_v40 = vadd.f32 %v10947_v10, %v2673_v50  ;;  %v8173_v20 = vadd.f32 %v8172_v60, %v8171_v63 }
 0x2eb   : > { %v3240_v57 = vadd.f32 %v3156_v11, %v2979_v30  ;;  %v8174_v18 = vpop.f32.mrf.mxu1  ;;  %v11089_v45 = vsel %vm3271_vm6, %v3239_v44, %v3303_v38  ;;  %v3166_v44 = vpop.f32.mrf.mxu0 }
 0x2ec   : > { %13466 = vst [vmem:[#allocation44_spill] sm:$0xff] %v11089_v45  ;;  %vm2916_vm7 = vcmp.gt.f32.partialorder %v2834_v40, 0.0  ;;  %v2948_v31 = vmul.f32 0.01, %v2834_v40  ;;  %v2678_v34 = vadd.f32 %v8173_v20, %v10985_v49  ;;  %v3649_v37 = vpack.c.bf16 %v11089_v45, %v11091_v39 }
 0x2ed   : > { %v8175_v48 = vpop.f32.mrf.mxu1  ;;  %v3304_v43 = vmul.f32 0.01, %v3240_v57  ;;  %vm3272_vm8 = vcmp.gt.f32.partialorder %v3240_v57, 0.0  ;;  %v3167_v30 = vadd.f32 %v3166_v44, %v10992_v47 }
 0x2ee   : > { %v2980_v19 = vsel %vm2916_vm7, %v2834_v40, %v2948_v31  ;;  %v2839_v10 = vadd.f32 %v10953_v17, %v2678_v34  ;;  %v8176_v35 = vadd.f32 %v8175_v48, %v8174_v18  ;;  %9016 = vmatprep.mubr.bf16.mxu0 %v3649_v37  ;;  %v11108_v31 = vpop.f32.mrf.mxu0 }
 0x2ef   : > { %v3241_v12 = vadd.f32 %v3159_v59, %v2980_v19  ;;  %v8177_v3 = vpop.f32.mrf.mxu1  ;;  %v11101_v40 = vsel %vm3272_vm8, %v3240_v57, %v3304_v43  ;;  %v3172_v57 = vadd.f32 %v11081_v53, %v10992_v47 }
 0x2f0   : > { %v2681_v52 = vadd.f32 %v8176_v35, %v10985_v49  ;;  %vm2917_vm3 = vcmp.gt.f32.partialorder %v2839_v10, 0.0  ;;  %v2949_v11 = vmul.f32 0.01, %v2839_v10  ;;  %13468 = vst [vmem:[#allocation45_spill] sm:$0xff] %v11101_v40 }
 0x2f1   : > { %v3305_v63 = vmul.f32 0.01, %v3241_v12  ;;  %v8178_v23 = vpop.f32.mrf.mxu1  ;;  %vm3273_vm9 = vcmp.gt.f32.partialorder %v3241_v12, 0.0 }
 0x2f2   : > { %v2842_v54 = vadd.f32 %v10957_v13, %v2681_v52  ;;  %v2981_v50 = vsel %vm2917_vm3, %v2839_v10, %v2949_v11  ;;  %v8179_v17 = vadd.f32 %v8178_v23, %v8177_v3  ;;  %v3179_v3 = vpop.f32.mrf.mxu0  ;;  %v3175_v23 = vadd.f32 %v8975_v41, %v10992_v47 }
 0x2f3   : > { %v3242_v38 = vadd.f32 %v3164_v24, %v2981_v50  ;;  %v8180_v60 = vpop.f32.mrf.mxu1  ;;  %v11103_v62 = vsel %vm3273_vm9, %v3241_v12, %v3305_v63 }
 0x2f4   : > { %13469 = vst [vmem:[#allocation48_spill] sm:$0xff] %v11103_v62  ;;  %v2686_v20 = vadd.f32 %v8179_v17, %v10985_v49  ;;  %vm2918_vm10 = vcmp.gt.f32.partialorder %v2842_v54, 0.0  ;;  %v2950_v59 = vmul.f32 0.01, %v2842_v54  ;;  %v3650_v18 = vpack.c.bf16 %v11103_v62, %v11101_v40 }
 0x2f5   : > { %v8181_v13 = vpop.f32.mrf.mxu1  ;;  %v3306_v35 = vmul.f32 0.01, %v3242_v38  ;;  %vm3274_vm12 = vcmp.gt.f32.partialorder %v3242_v38, 0.0 }
 0x2f6   : > { %v2847_v34 = vadd.f32 %v10951_v5, %v2686_v20  ;;  %v2982_v48 = vsel %vm2918_vm10, %v2842_v54, %v2950_v59  ;;  %v8182_v37 = vadd.f32 %v8181_v13, %v8180_v60  ;;  %9017 = vmatmul.mubr.bf16.gmra.mxu0 %v3650_v18 }
 0x2f7   : > { %v3243_v19 = vadd.f32 %v3167_v30, %v2982_v48  ;;  %v8183_v10 = vpop.f32.mrf.mxu1  ;;  %v11118_v50 = vsel %vm3274_vm12, %v3242_v38, %v3306_v35  ;;  %v8979_v30 = vpop.f32.mrf.mxu0  ;;  %v3180_v38 = vadd.f32 %v3179_v3, %v10992_v47 }
 0x2f8   : > { %vm2919_vm11 = vcmp.gt.f32.partialorder %v2847_v34, 0.0  ;;  %v2951_v43 = vmul.f32 0.01, %v2847_v34  ;;  %v2689_v12 = vadd.f32 %v8182_v37, %v10985_v49  ;;  %13471 = vst [vmem:[#allocation49_spill] sm:$0xff] %v11118_v50 }
 0x2f9   : > { %vm3275_vm13 = vcmp.gt.f32.partialorder %v3243_v19, 0.0  ;;  %v3307_v24 = vmul.f32 0.01, %v3243_v19  ;;  %v8184_v52 = vpop.f32.mrf.mxu1 }
 0x2fa   : > { %v2983_v11 = vsel %vm2919_vm11, %v2847_v34, %v2951_v43  ;;  %v2850_v5 = vadd.f32 %v10955_v29, %v2689_v12  ;;  %v8185_v44 = vadd.f32 %v8184_v52, %v8183_v10 }
 0x2fb   : > { %v3244_v63 = vadd.f32 %v3172_v57, %v2983_v11  ;;  %v8186_v53 = vpop.f32.mrf.mxu1  ;;  %v11116_v54 = vsel %vm3275_vm13, %v3243_v19, %v3307_v24  ;;  %v3182_v19 = vpop.f32.mrf.mxu0 }
 0x2fc   : > { %13470 = vst [vmem:[#allocation46_spill] sm:$0xff] %v11116_v54  ;;  %vm2920_vm14 = vcmp.gt.f32.partialorder %v2850_v5, 0.0  ;;  %v2952_v17 = vmul.f32 0.01, %v2850_v5  ;;  %v2694_v60 = vadd.f32 %v8185_v44, %v10985_v49  ;;  %v3651_v59 = vpack.c.bf16 %v11116_v54, %v11118_v50 }
 0x2fd   : > { %v8187_v20 = vpop.f32.mrf.mxu1  ;;  %v3308_v34 = vmul.f32 0.01, %v3244_v63  ;;  %vm3276_vm0 = vcmp.gt.f32.partialorder %v3244_v63, 0.0  ;;  %v3183_v11 = vadd.f32 %v3182_v19, %v10992_v47 }
 0x2fe   : > { %v2984_v18 = vsel %vm2920_vm14, %v2850_v5, %v2952_v17  ;;  %v2855_v29 = vadd.f32 %v10961_v9, %v2694_v60  ;;  %v8188_v13 = vadd.f32 %v8187_v20, %v8186_v53  ;;  %9020 = vmatprep.mubr.bf16.mxu0 %v3651_v59  ;;  %v11135_v17 = vpop.f32.mrf.mxu0 }
 0x2ff   : > { %v3245_v41 = vadd.f32 %v3175_v23, %v2984_v18  ;;  %v8189_v48 = vpop.f32.mrf.mxu1  ;;  %v11128_v5 = vsel %vm3276_vm0, %v3244_v63, %v3308_v34  ;;  %v3188_v63 = vadd.f32 %v11108_v31, %v10992_v47 }
 0x300   : > { %v2697_v37 = vadd.f32 %v8188_v13, %v10985_v49  ;;  %vm2921_vm15 = vcmp.gt.f32.partialorder %v2855_v29, 0.0  ;;  %v2953_v57 = vmul.f32 0.01, %v2855_v29  ;;  %13472 = vst [vmem:[#allocation50_spill] sm:$0xff] %v11128_v5 }
 0x301   : > { %v3309_v10 = vmul.f32 0.01, %v3245_v41  ;;  %v8190_v35 = vpop.f32.mrf.mxu1  ;;  %vm3277_vm1 = vcmp.gt.f32.partialorder %v3245_v41, 0.0 }
 0x302   : > { %v2858_v43 = vadd.f32 %v10965_v58, %v2697_v37  ;;  %v2985_v12 = vsel %vm2921_vm15, %v2855_v29, %v2953_v57  ;;  %v8191_v9 = vadd.f32 %v8190_v35, %v8189_v48  ;;  %v3195_v48 = vpop.f32.mrf.mxu0  ;;  %v3191_v35 = vadd.f32 %v8979_v30, %v10992_v47 }
 0x303   : > { %v3246_v24 = vadd.f32 %v3180_v38, %v2985_v12  ;;  %v8192_v52 = vpop.f32.mrf.mxu1  ;;  %v11130_v3 = vsel %vm3277_vm1, %v3245_v41, %v3309_v10 }
 0x304   : > { %13473 = vst [vmem:[#allocation52_spill] sm:$0xff] %v11130_v3  ;;  %v2702_v44 = vadd.f32 %v8191_v9, %v10985_v49  ;;  %vm2922_vm4 = vcmp.gt.f32.partialorder %v2858_v43, 0.0  ;;  %v2954_v23 = vmul.f32 0.01, %v2858_v43  ;;  %v3652_v53 = vpack.c.bf16 %v11130_v3, %v11128_v5 }
 0x305   : > { %v8193_v58 = vpop.f32.mrf.mxu1  ;;  %v3310_v13 = vmul.f32 0.01, %v3246_v24  ;;  %vm3278_vm6 = vcmp.gt.f32.partialorder %v3246_v24, 0.0 }
 0x306   : > { %v2863_v60 = vadd.f32 %v10959_v61, %v2702_v44  ;;  %v2986_v20 = vsel %vm2922_vm4, %v2858_v43, %v2954_v23  ;;  %v8194_v59 = vadd.f32 %v8193_v58, %v8192_v52  ;;  %9021 = vmatmul.mubr.bf16.gmra.mxu0 %v3652_v53 }
 0x307   : > { %v3247_v18 = vadd.f32 %v3183_v11, %v2986_v20  ;;  %v8195_v29 = vpop.f32.mrf.mxu1  ;;  %v11145_v12 = vsel %vm3278_vm6, %v3246_v24, %v3310_v13  ;;  %v8983_v11 = vpop.f32.mrf.mxu0  ;;  %v3196_v24 = vadd.f32 %v3195_v48, %v10992_v47 }
 0x308   : > { %vm2923_vm5 = vcmp.gt.f32.partialorder %v2863_v60, 0.0  ;;  %v2955_v34 = vmul.f32 0.01, %v2863_v60  ;;  %v2705_v41 = vadd.f32 %v8194_v59, %v10985_v49  ;;  %13475 = vst [vmem:[#allocation53_spill] sm:$0xff] %v11145_v12 }
 0x309   : > { %vm3279_vm7 = vcmp.gt.f32.partialorder %v3247_v18, 0.0  ;;  %v3311_v38 = vmul.f32 0.01, %v3247_v18  ;;  %v8196_v37 = vpop.f32.mrf.mxu1 }
 0x30a   : > { %v2987_v57 = vsel %vm2923_vm5, %v2863_v60, %v2955_v34  ;;  %v2866_v61 = vadd.f32 %v10963_v7, %v2705_v41  ;;  %v8197_v19 = vadd.f32 %v8196_v37, %v8195_v29 }
 0x30b   : > { %v3248_v10 = vadd.f32 %v3188_v63, %v2987_v57  ;;  %v8198_v31 = vpop.f32.mrf.mxu1  ;;  %v11143_v43 = vsel %vm3279_vm7, %v3247_v18, %v3311_v38  ;;  %v3198_v18 = vpop.f32.mrf.mxu0 }
 0x30c   : > { %13474 = vst [vmem:[#allocation51_spill] sm:$0xff] %v11143_v43  ;;  %vm2924_vm3 = vcmp.gt.f32.partialorder %v2866_v61, 0.0  ;;  %v2956_v9 = vmul.f32 0.01, %v2866_v61  ;;  %v2710_v52 = vadd.f32 %v8197_v19, %v10985_v49  ;;  %v3653_v23 = vpack.c.bf16 %v11143_v43, %v11145_v12 }
 0x30d   : > { %v8199_v44 = vpop.f32.mrf.mxu1  ;;  %v3312_v60 = vmul.f32 0.01, %v3248_v10  ;;  %vm3280_vm9 = vcmp.gt.f32.partialorder %v3248_v10, 0.0  ;;  %v3199_v57 = vadd.f32 %v3198_v18, %v10992_v47 }
 0x30e   : > { %v2988_v53 = vsel %vm2924_vm3, %v2866_v61, %v2956_v9  ;;  %v2871_v7 = vadd.f32 %v10969_v0, %v2710_v52  ;;  %v8200_v58 = vadd.f32 %v8199_v44, %v8198_v31  ;;  %9024 = vmatprep.mubr.bf16.mxu0 %v3653_v23  ;;  %v11162_v9 = vpop.f32.mrf.mxu0 }
 0x30f   : > { %v3249_v30 = vadd.f32 %v3191_v35, %v2988_v53  ;;  %v8201_v20 = vpop.f32.mrf.mxu1  ;;  %v11155_v61 = vsel %vm3280_vm9, %v3248_v10, %v3312_v60  ;;  %v3204_v10 = vadd.f32 %v11135_v17, %v10992_v47 }
 0x310   : > { %v2713_v59 = vadd.f32 %v8200_v58, %v10985_v49  ;;  %vm2925_vm8 = vcmp.gt.f32.partialorder %v2871_v7, 0.0  ;;  %v2957_v63 = vmul.f32 0.01, %v2871_v7  ;;  %13476 = vst [vmem:[#allocation54_spill] sm:$0xff] %v11155_v61 }
 0x311   : > { %v3313_v29 = vmul.f32 0.01, %v3249_v30  ;;  %v8202_v13 = vpop.f32.mrf.mxu1  ;;  %vm3281_vm10 = vcmp.gt.f32.partialorder %v3249_v30, 0.0 }
 0x312   : > { %v2874_v34 = vadd.f32 %v10973_v51, %v2713_v59  ;;  %v2989_v41 = vsel %vm2925_vm8, %v2871_v7, %v2957_v63  ;;  %v8203_v0 = vadd.f32 %v8202_v13, %v8201_v20  ;;  %v3211_v20 = vpop.f32.mrf.mxu0  ;;  %v3207_v13 = vadd.f32 %v8983_v11, %v10992_v47 }
 0x313   : > { %v3250_v38 = vadd.f32 %v3196_v24, %v2989_v41  ;;  %v8204_v37 = vpop.f32.mrf.mxu1  ;;  %v11157_v48 = vsel %vm3281_vm10, %v3249_v30, %v3313_v29 }
 0x314   : > { %13477 = vst [vmem:[#allocation55_spill] sm:$0xff] %v11157_v48  ;;  %v2718_v19 = vadd.f32 %v8203_v0, %v10985_v49  ;;  %vm2926_vm11 = vcmp.gt.f32.partialorder %v2874_v34, 0.0  ;;  %v2958_v35 = vmul.f32 0.01, %v2874_v34  ;;  %v3654_v31 = vpack.c.bf16 %v11157_v48, %v11155_v61 }
 0x315   : > { %v8205_v51 = vpop.f32.mrf.mxu1  ;;  %v3314_v58 = vmul.f32 0.01, %v3250_v38  ;;  %vm3282_vm13 = vcmp.gt.f32.partialorder %v3250_v38, 0.0 }
 0x316   : > { %v2879_v52 = vadd.f32 %v10967_v22, %v2718_v19  ;;  %v2990_v44 = vsel %vm2926_vm11, %v2874_v34, %v2958_v35  ;;  %v8206_v23 = vadd.f32 %v8205_v51, %v8204_v37  ;;  %9025 = vmatmul.mubr.bf16.gmra.mxu0 %v3654_v31 }
 0x317   : > { %v3251_v53 = vadd.f32 %v3199_v57, %v2990_v44  ;;  %v8207_v7 = vpop.f32.mrf.mxu1  ;;  %v11172_v41 = vsel %vm3282_vm13, %v3250_v38, %v3314_v58  ;;  %v8987_v57 = vpop.f32.mrf.mxu0  ;;  %v3212_v38 = vadd.f32 %v3211_v20, %v10992_v47 }
 0x318   : > { %vm2927_vm12 = vcmp.gt.f32.partialorder %v2879_v52, 0.0  ;;  %v2959_v60 = vmul.f32 0.01, %v2879_v52  ;;  %v2721_v30 = vadd.f32 %v8206_v23, %v10985_v49  ;;  %13479 = vst [vmem:[#allocation57_spill] sm:$0xff] %v11172_v41 }
 0x319   : > { %vm3283_vm14 = vcmp.gt.f32.partialorder %v3251_v53, 0.0  ;;  %v3315_v24 = vmul.f32 0.01, %v3251_v53  ;;  %v8208_v59 = vpop.f32.mrf.mxu1 }
 0x31a   : > { %v2991_v63 = vsel %vm2927_vm12, %v2879_v52, %v2959_v60  ;;  %v2882_v22 = vadd.f32 %v10971_v6, %v2721_v30  ;;  %v8209_v18 = vadd.f32 %v8208_v59, %v8207_v7  ;;  %vm3450_vm12 = vcmp.lt.s32.totalorder %v9960_v14, 4 }
 0x31b   : > { %v3252_v29 = vadd.f32 %v3204_v10, %v2991_v63  ;;  %v8210_v17 = vpop.f32.mrf.mxu1  ;;  %v11170_v34 = vsel %vm3283_vm14, %v3251_v53, %v3315_v24  ;;  %v3214_v53 = vpop.f32.mrf.mxu0 }
 0x31c   : > { %13478 = vst [vmem:[#allocation56_spill] sm:$0xff] %v11170_v34  ;;  %vm2928_vm15 = vcmp.gt.f32.partialorder %v2882_v22, 0.0  ;;  %v2960_v0 = vmul.f32 0.01, %v2882_v22  ;;  %v2726_v37 = vadd.f32 %v8209_v18, %v10985_v49  ;;  %v3655_v35 = vpack.c.bf16 %v11170_v34, %v11172_v41 }
 0x31d   : > { %v8211_v19 = vpop.f32.mrf.mxu1  ;;  %v3316_v52 = vmul.f32 0.01, %v3252_v29  ;;  %vm3284_vm1 = vcmp.gt.f32.partialorder %v3252_v29, 0.0  ;;  %v3215_v63 = vadd.f32 %v3214_v53, %v10992_v47  ;;  %v3223_v53 = vadd.f32 %v8987_v57, %v10992_v47 }
 0x31e   : > { %v2992_v31 = vsel %vm2928_vm15, %v2882_v22, %v2960_v0  ;;  %v2887_v6 = vadd.f32 %v10977_v15, %v2726_v37  ;;  %v8212_v51 = vadd.f32 %v8211_v19, %v8210_v17  ;;  %9028 = vmatprep.mubr.bf16.mxu0 %v3655_v35  ;;  %v3220_v35 = vadd.f32 %v11162_v9, %v10992_v47 }
 0x31f   : > { %v3253_v11 = vadd.f32 %v3207_v13, %v2992_v31  ;;  %v8213_v44 = vpop.f32.mrf.mxu1  ;;  %v11182_v22 = vsel %vm3284_vm1, %v3252_v29, %v3316_v52  ;;  %v3532_v57 = vrot.slane %v11008_v1, 6 }
 0x320   : > { %v2729_v23 = vadd.f32 %v8212_v51, %v10985_v49  ;;  %vm2929_vm0 = vcmp.gt.f32.partialorder %v2887_v6, 0.0  ;;  %v2961_v10 = vmul.f32 0.01, %v2887_v6  ;;  %13480 = vst [vmem:[#allocation58_spill] sm:$0xff] %v11182_v22 }
 0x321   : > { %v3317_v7 = vmul.f32 0.01, %v3253_v11  ;;  %v8214_v58 = vpop.f32.mrf.mxu1  ;;  %vm3285_vm4 = vcmp.gt.f32.partialorder %v3253_v11, 0.0 }
 0x322   : > { %v2890_v60 = vadd.f32 %v10981_v21, %v2729_v23  ;;  %v2993_v30 = vsel %vm2929_vm0, %v2887_v6, %v2961_v10  ;;  %v8215_v15 = vadd.f32 %v8214_v58, %v8213_v44 }
 0x323   : > { %v3254_v24 = vadd.f32 %v3212_v38, %v2993_v30  ;;  %v8216_v59 = vpop.f32.mrf.mxu1  ;;  %v11184_v20 = vsel %vm3285_vm4, %v3253_v11, %v3317_v7  ;;  %v13485_v30 = vmov 0.0  }
 0x324   : > { %13481 = vst [vmem:[#allocation59_spill] sm:$0xff] %v11184_v20  ;;  %v2734_v18 = vadd.f32 %v8215_v15, %v10985_v49  ;;  %vm2930_vm5 = vcmp.gt.f32.partialorder %v2890_v60, 0.0  ;;  %v2962_v13 = vmul.f32 0.01, %v2890_v60  ;;  %v3656_v17 = vpack.c.bf16 %v11184_v20, %v11182_v22 }
 0x325   : > { %v8217_v0 = vpop.f32.mrf.mxu1  ;;  %v3318_v29 = vmul.f32 0.01, %v3254_v24  ;;  %vm3286_vm6 = vcmp.gt.f32.partialorder %v3254_v24, 0.0 }
 0x326   : > { %v2895_v21 = vadd.f32 %v10975_v55, %v2734_v18  ;;  %v2994_v37 = vsel %vm2930_vm5, %v2890_v60, %v2962_v13  ;;  %v8218_v19 = vadd.f32 %v8217_v0, %v8216_v59  ;;  %9029 = vmatmul.mubr.bf16.gmra.mxu0 %v3656_v17  ;;  %v3531_v59 = vrot.slane %v11010_v2, 6 }
 0x327   : > { %v3255_v31 = vadd.f32 %v3215_v63, %v2994_v37  ;;  %v11194_v38 = vsel %vm3286_vm6, %v3254_v24, %v3318_v29  ;;  %v3418_v24 = vrot.slane %v11010_v2, 4  ;;  %v3419_v63 = vrot.slane %v11008_v1, 4 }
 0x328   : > { %vm2931_vm7 = vcmp.gt.f32.partialorder %v2895_v21, 0.0  ;;  %v2963_v6 = vmul.f32 0.01, %v2895_v21  ;;  %v2737_v51 = vadd.f32 %v8218_v19, %v10985_v49  ;;  %13482 = vst [vmem:[#allocation60_spill] sm:$0xff] %v11194_v38  ;;  %v13484_v49 = vld [vmem:[#allocation17_spill] sm:$0xff] }
 0x329   : > { %vm3287_vm3 = vcmp.gt.f32.partialorder %v3255_v31, 0.0  ;;  %v3319_v52 = vmul.f32 0.01, %v3255_v31  ;;  %vm966_vm9 = vcmp.ge.s32.totalorder %v13484_v49, 4  ;;  %v3420_v49 = vrot.slane %v11019_v36, 4 }
 0x32a   : > { %v2995_v11 = vsel %vm2931_vm7, %v2895_v21, %v2963_v6  ;;  %v2898_v44 = vadd.f32 %v10979_v28, %v2737_v51  ;;  %v11203_v15 = vsel %vm966_vm9, 1.0, %v13485_v30  ;;  %v3534_v21 = vrot.slane %v11021_v32, 6 }
 0x32b   : > { %v3256_v55 = vadd.f32 %v3220_v35, %v2995_v11  ;;  %v11196_v23 = vsel %vm3287_vm3, %v3255_v31, %v3319_v52  ;;  %v3533_v35 = vrot.slane %v11019_v36, 6  ;;  %v3593_v6 = vsel %vm1318_vm2, %v3531_v59, %v3532_v57 }
 0x32c   : > { %13483 = vst [vmem:[#allocation61_spill] sm:$0xff] %v11196_v23  ;;  %vm2932_vm8 = vcmp.gt.f32.partialorder %v2898_v44, 0.0  ;;  %v2964_v10 = vmul.f32 0.01, %v2898_v44  ;;  %v3657_v9 = vpack.c.bf16 %v11196_v23, %v11194_v38  ;;  %v3481_v51 = vsel %vm3450_vm12, %v3418_v24, %v3419_v63 }
 0x32d   : > { %v3320_v58 = vmul.f32 0.01, %v3256_v55  ;;  %vm3288_vm10 = vcmp.gt.f32.partialorder %v3256_v55, 0.0  ;;  %v3591_v52 = vsel %vm1318_vm2, %v3533_v35, %v3534_v21 }
 0x32e   : > { %v2996_v7 = vsel %vm2932_vm8, %v2898_v44, %v2964_v10  ;;  %9032 = vmatprep.mubr.bf16.mxu0 %v3657_v9  ;;  %v3535_v10 = vrot.slane %v11034_v42, 6 }
 0x32f   : > { %v3257_v60 = vadd.f32 %v3223_v53, %v2996_v7  ;;  %v11208_v18 = vsel %vm3288_vm10, %v3256_v55, %v3320_v58  ;;  %v3592_v55 = vsel %vm1318_vm2, %v3532_v57, %v3533_v35  ;;  %v3421_v53 = vrot.slane %v11021_v32, 4 }
 0x330   : > { %13486 = vst [vmem:[#allocation17_spill] sm:$0xff] %v11208_v18  ;;  %v3628_v9 = vpack.c.bf16 %v3591_v52, %v3592_v55  ;;  %v3536_v7 = vrot.slane %v11037_v4, 6  ;;  %v3590_v58 = vsel %vm1318_vm2, %v3534_v21, %v3535_v10  ;;  %v3538_v21 = vrot.slane %v11049_v46, 6 }
 0x331   : > { %v3321_v28 = vmul.f32 0.01, %v3257_v60  ;;  %vm3289_vm11 = vcmp.gt.f32.partialorder %v3257_v60, 0.0 }
 0x333   : > { %v11210_v47 = vsel %vm3289_vm11, %v3257_v60, %v3321_v28  ;;  %v3479_v60 = vsel %vm3450_vm12, %v3420_v49, %v3421_v53  ;;  %v3589_v28 = vsel %vm1318_vm2, %v3535_v10, %v3536_v7  ;;  %v3539_v10 = vrot.slane %v11064_v8, 6 }
 0x334   : > { %13487 = vst [vmem:[#allocation62_spill] sm:$0xff] %v11210_v47  ;;  %v13231_v13 = vrot.slane %v11210_v47, 4  ;;  %v3658_v17 = vpack.c.bf16 %v11210_v47, %v11208_v18  ;;  %v13232_v0 = vrot.slane %v11210_v47, 6 }
 0x336   : > { %9033 = vmatmul.mubr.bf16.gmra.mxu0 %v3658_v17  ;;  %v3594_v37 = vsel %vm1318_vm2, %v13232_v0, %v3531_v59  ;;  %v3482_v19 = vsel %vm3450_vm12, %v13231_v13, %v3418_v24  ;;  %v3480_v24 = vsel %vm3450_vm12, %v3419_v63, %v3420_v49  ;;  %v13488_v59 = vld [vmem:[#allocation23_spill] sm:$0xff]  ;;  %v3422_v17 = vrot.slane %v11034_v42, 4 }
 0x337   : > { %v3595_v29 = vmul.f32 %v13406_v27, %v3594_v37  ;;  %v3483_v31 = vmul.f32 %v11203_v15, %v3482_v19  ;;  %v3599_v57 = vmul.f32 %v13488_v59, %v3590_v58  ;;  %v3516_v37 = vpack.c.bf16 %v3479_v60, %v3480_v24  ;;  %v13489_v19 = vld [vmem:[#allocation18_spill] sm:$0xff]  ;;  %v9421_v0 = vld [vmem:[#allocation6 + $0x2e8] sm:$0xff]  }
 0x338   : > { %vm970_vm13 = vcmp.ge.s32.totalorder %v13489_v19, 4  ;;  %v3478_v63 = vsel %vm3450_vm12, %v3421_v53, %v3422_v17  ;;  %v3425_v49 = vrot.slane %v11049_v46, 4  ;;  %v3540_v53 = vrot.slane %v11062_v56, 6 }
 0x339   : > { %v3627_v11 = vpack.c.bf16 %v3593_v6, %v3595_v29  ;;  %v3515_v44 = vpack.c.bf16 %v3481_v51, %v3483_v31  ;;  %v3629_v35 = vpack.c.bf16 %v3589_v28, %v3599_v57  ;;  %v3423_v29 = vrot.slane %v11037_v4, 4 }
 0x33a   : > { %v11256_v31 = vsel %vm970_vm13, 1.0, %v13485_v30  ;;  %v3537_v6 = vrot.slane %v11047_v16, 6  ;;  %v3424_v58 = vrot.slane %v11047_v16, 4  ;;  %v3586_v60 = vsel %vm1318_vm2, %v3538_v21, %v3539_v10 }
 0x33b   : > { %3888 = vmatprep.mubr.bf16.mxu1 %v3627_v11  ;;  %13490 = vst [vmem:[#allocation23_spill] sm:$0xff] %v11256_v31  ;;  %v3477_v51 = vsel %vm3450_vm12, %v3422_v17, %v3423_v29  ;;  %v3487_v52 = vmul.f32 %v11256_v31, %v3478_v63  ;;  %v3426_v24 = vrot.slane %v11064_v8, 4  ;;  %v13491_v17 = vld [vmem:[#allocation25_spill] sm:$0xff]  ;;  %v3427_v63 = vrot.slane %v11062_v56, 4 }
 0x33c   : > { %3889 = vmatmul.mubr.bf16.vlgmr.msra.gmra.mxu1 %v3515_v44  ;;  %v3587_v11 = vsel %vm1318_vm2, %v3537_v6, %v3538_v21  ;;  %v3588_v55 = vsel %vm1318_vm2, %v3536_v7, %v3537_v6  ;;  %v3475_v28 = vsel %vm3450_vm12, %v3424_v58, %v3425_v49  ;;  %v3585_v7 = vsel %vm1318_vm2, %v3539_v10, %v3540_v53 }
 0x33d   : > { %3896 = vmatprep.mubr.bf16.mxu1 %v3628_v9  ;;  %v3517_v44 = vpack.c.bf16 %v3477_v51, %v3487_v52  ;;  %v3630_v9 = vpack.c.bf16 %v3587_v11, %v3588_v55  ;;  %v3476_v57 = vsel %vm3450_vm12, %v3423_v29, %v3424_v58  ;;  %v3542_v21 = vrot.slane %v11076_v25, 6 }
 0x33e   : > { %v3518_v19 = vpack.c.bf16 %v3475_v28, %v3476_v57  ;;  %v3474_v52 = vsel %vm3450_vm12, %v3425_v49, %v3426_v24  ;;  %v3541_v29 = vrot.slane %v11074_v33, 6  ;;  %v3473_v11 = vsel %vm3450_vm12, %v3426_v24, %v3427_v63 }
 0x33f   : > { %v3543_v58 = vrot.slane %v11091_v39, 6  ;;  %v3429_v28 = vrot.slane %v11076_v25, 4  ;;  %v3544_v49 = vrot.slane %v11089_v45, 6 }
 0x340   : > { %v3583_v55 = vsel %vm1318_vm2, %v3541_v29, %v3542_v21 }
 0x341   : > { %v3582_v24 = vsel %vm1318_vm2, %v3542_v21, %v3543_v58  ;;  %v3546_v21 = vrot.slane %v11103_v62, 6 }
 0x344   : > { %3897 = vmatmul.mubr.bf16.gmra.mxu1 %v3516_v37  ;;  %v3603_v37 = vmul.f32 %v13491_v17, %v3586_v60 }
 0x345   : > { %3904 = vmatprep.mubr.bf16.mxu1 %v3629_v35  ;;  %v13492_v35 = vld [vmem:[#allocation21_spill] sm:$0xff] }
 0x346   : > { %vm974_vm14 = vcmp.ge.s32.totalorder %v13492_v35, 4  ;;  %v3631_v6 = vpack.c.bf16 %v3585_v7, %v3603_v37  ;;  %v3428_v7 = vrot.slane %v11074_v33, 4  ;;  %v3430_v37 = vrot.slane %v11091_v39, 4  ;;  %v13494_v35 = vld [vmem:[#allocation27_spill] sm:$0xff] }
 0x347   : > { %v11286_v51 = vsel %vm974_vm14, 1.0, %v13485_v30 }
 0x348   : > { %13493 = vst [vmem:[#allocation18_spill] sm:$0xff] %v11286_v51  ;;  %v3471_v57 = vsel %vm3450_vm12, %v3428_v7, %v3429_v28 }
 0x34c   : > { %3905 = vmatmul.mubr.bf16.gmra.mxu1 %v3517_v44  ;;  %v3491_v44 = vmul.f32 %v11286_v51, %v3474_v52 }
 0x34d   : > { %3912 = vmatprep.mubr.bf16.mxu1 %v3630_v9  ;;  %v3584_v9 = vsel %vm1318_vm2, %v3540_v53, %v3541_v29  ;;  %v3581_v53 = vsel %vm1318_vm2, %v3543_v58, %v3544_v49  ;;  %v13495_v29 = vld [vmem:[#allocation24_spill] sm:$0xff] }
 0x34e   : > { %v3519_v10 = vpack.c.bf16 %v3473_v11, %v3491_v44  ;;  %v3632_v60 = vpack.c.bf16 %v3583_v55, %v3584_v9  ;;  %vm978_vm15 = vcmp.ge.s32.totalorder %v13495_v29, 4  ;;  %v3431_v11 = vrot.slane %v11089_v45, 4 }
 0x34f   : > { %v11316_v55 = vsel %vm978_vm15, 1.0, %v13485_v30  ;;  %v3434_v29 = vrot.slane %v11118_v50, 4 }
 0x350   : > { %13496 = vst [vmem:[#allocation25_spill] sm:$0xff] %v11316_v55  ;;  %v3469_v9 = vsel %vm3450_vm12, %v3430_v37, %v3431_v11 }
 0x354   : > { %3913 = vmatmul.mubr.bf16.gmra.mxu1 %v3518_v19  ;;  %v3472_v19 = vsel %vm3450_vm12, %v3427_v63, %v3428_v7  ;;  %v3545_v63 = vrot.slane %v11101_v40, 6 }
 0x355   : > { %3920 = vmatprep.mubr.bf16.mxu1 %v3631_v6  ;;  %v3607_v6 = vmul.f32 %v13494_v35, %v3582_v24  ;;  %v3520_v52 = vpack.c.bf16 %v3471_v57, %v3472_v19  ;;  %v3547_v57 = vrot.slane %v11118_v50, 6  ;;  %v3433_v19 = vrot.slane %v11103_v62, 4 }
 0x356   : > { %v3580_v24 = vsel %vm1318_vm2, %v3544_v49, %v3545_v63 }
 0x357   : > { %v3633_v44 = vpack.c.bf16 %v3581_v53, %v3607_v6  ;;  %v3578_v6 = vsel %vm1318_vm2, %v3546_v21, %v3547_v57 }
 0x35c   : > { %3921 = vmatmul.mubr.bf16.gmra.mxu1 %v3519_v10  ;;  %v3470_v10 = vsel %vm3450_vm12, %v3429_v28, %v3430_v37  ;;  %v3548_v28 = vrot.slane %v11116_v54, 6  ;;  %v3432_v37 = vrot.slane %v11101_v40, 4 }
 0x35d   : > { %3928 = vmatprep.mubr.bf16.mxu1 %v3632_v60  ;;  %v3495_v58 = vmul.f32 %v11316_v55, %v3470_v10  ;;  %v3579_v60 = vsel %vm1318_vm2, %v3545_v63, %v3546_v21  ;;  %v13497_v10 = vld [vmem:[#allocation29_spill] sm:$0xff]  ;;  %v3550_v21 = vrot.slane %v11130_v3, 6 }
 0x35e   : > { %v3634_v53 = vpack.c.bf16 %v3579_v60, %v3580_v24  ;;  %v3577_v49 = vsel %vm1318_vm2, %v3547_v57, %v3548_v28  ;;  %v3611_v63 = vmul.f32 %v13497_v10, %v3578_v6  ;;  %v3435_v60 = vrot.slane %v11116_v54, 4 }
 0x35f   : > { %v3521_v7 = vpack.c.bf16 %v3469_v9, %v3495_v58  ;;  %v13498_v58 = vld [vmem:[#allocation26_spill] sm:$0xff]  ;;  %v3466_v57 = vsel %vm3450_vm12, %v3433_v19, %v3434_v29 }
 0x360   : > { %vm982_vm0 = vcmp.ge.s32.totalorder %v13498_v58, 4  ;;  %v3437_v58 = vrot.slane %v11130_v3, 4 }
 0x361   : > { %v11346_v24 = vsel %vm982_vm0, 1.0, %v13485_v30 }
 0x362   : > { %13499 = vst [vmem:[#allocation21_spill] sm:$0xff] %v11346_v24  ;;  %v3499_v6 = vmul.f32 %v11346_v24, %v3466_v57 }
 0x364   : > { %3929 = vmatmul.mubr.bf16.gmra.mxu1 %v3520_v52  ;;  %v3467_v52 = vsel %vm3450_vm12, %v3432_v37, %v3433_v19  ;;  %v9420_v19 = vld [vmem:[#allocation6 + $0x2f0] sm:$0xff]  }
 0x365   : > { %3936 = vmatprep.mubr.bf16.mxu1 %v3633_v44  ;;  %v3468_v44 = vsel %vm3450_vm12, %v3431_v11, %v3432_v37  ;;  %v3549_v11 = vrot.slane %v11128_v5, 6  ;;  %v3465_v37 = vsel %vm3450_vm12, %v3434_v29, %v3435_v60  ;;  %v3552_v29 = vrot.slane %v11143_v43, 6 }
 0x366   : > { %v3522_v9 = vpack.c.bf16 %v3467_v52, %v3468_v44 }
 0x367   : > { %v3575_v52 = vsel %vm1318_vm2, %v3549_v11, %v3550_v21  ;;  %v3576_v44 = vsel %vm1318_vm2, %v3548_v28, %v3549_v11 }
 0x36c   : > { %3937 = vmatmul.mubr.bf16.gmra.mxu1 %v3521_v7  ;;  %v3635_v7 = vpack.c.bf16 %v3577_v49, %v3611_v63  ;;  %v3523_v49 = vpack.c.bf16 %v3465_v37, %v3499_v6  ;;  %v3551_v63 = vrot.slane %v11145_v12, 6  ;;  %v13500_v6 = vld [vmem:[#allocation30_spill] sm:$0xff] }
 0x36d   : > { %3944 = vmatprep.mubr.bf16.mxu1 %v3634_v53  ;;  %v9419_v53 = vld [vmem:[#allocation6 + $0x2f8] sm:$0xff]  }
 0x36e   : > { %9036 = vmatprep.subr.bf16.mxu1 %v9419_v53  ;;  %v3574_v57 = vsel %vm1318_vm2, %v3550_v21, %v3551_v63  ;;  %v3573_v11 = vsel %vm1318_vm2, %v3551_v63, %v3552_v29  ;;  %v3554_v21 = vrot.slane %v11157_v48, 6 }
 0x36f   : > { %9037 = vmatpush3.bf16.msra.mxu1 %v9419_v53  ;;  %v3438_v53 = vrot.slane %v11145_v12, 4 }
 0x370   : > { %9038 = vmatprep.subr.bf16.mxu1 %v9420_v19 }
 0x371   : > { %v3462_v63 = vsel %vm3450_vm12, %v3437_v58, %v3438_v53 }
 0x373   : > { %9039 = vmatpush3.bf16.msra.mxu1 %v9420_v19  ;;  %v3439_v19 = vrot.slane %v11143_v43, 4 }
 0x374   : > { %3945 = vmatmul.mubr.bf16.gmra.mxu1 %v3522_v9  ;;  %v3636_v9 = vpack.c.bf16 %v3575_v52, %v3576_v44  ;;  %v3615_v52 = vmul.f32 %v13500_v6, %v3574_v57  ;;  %v13501_v44 = vld [vmem:[#allocation28_spill] sm:$0xff]  ;;  %9040 = vmatprep.subr.bf16.mxu1 %v9421_v0 }
 0x375   : > { %3952 = vmatprep.mubr.bf16.mxu1 %v3635_v7  ;;  %v3436_v7 = vrot.slane %v11128_v5, 4  ;;  %vm986_vm1 = vcmp.ge.s32.totalorder %v13501_v44, 4  ;;  %v3441_v44 = vrot.slane %v11157_v48, 4  ;;  %v3558_v48 = vrot.slane %v11184_v20, 6 }
 0x376   : > { %v11376_v13 = vsel %vm986_vm1, 1.0, %v13485_v30 }
 0x377   : > { %v3463_v28 = vsel %vm3450_vm12, %v3436_v7, %v3437_v58  ;;  %v3464_v37 = vsel %vm3450_vm12, %v3435_v60, %v3436_v7  ;;  %13502 = vst [vmem:[#allocation27_spill] sm:$0xff] %v11376_v13  ;;  %v3553_v60 = vrot.slane %v11155_v61, 6  ;;  %v3461_v7 = vsel %vm3450_vm12, %v3438_v53, %v3439_v19  ;;  %9041 = vmatpush3.bf16.msra.mxu1 %v9421_v0 }
 0x378   : > { %v3503_v57 = vmul.f32 %v11376_v13, %v3462_v63  ;;  %v3555_v58 = vrot.slane %v11172_v41, 6  ;;  %v3556_v53 = vrot.slane %v11170_v34, 6 }
 0x37a   : > { %v3570_v0 = vsel %vm1318_vm2, %v3554_v21, %v3555_v58 }
 0x37c   : > { %3953 = vmatmul.mubr.bf16.gmra.mxu1 %v3523_v49  ;;  %v3524_v49 = vpack.c.bf16 %v3463_v28, %v3464_v37  ;;  %v3571_v28 = vsel %vm1318_vm2, %v3553_v60, %v3554_v21  ;;  %v3525_v37 = vpack.c.bf16 %v3461_v7, %v3503_v57  ;;  %v3442_v7 = vrot.slane %v11172_v41, 4 }
 0x37d   : > { %3960 = vmatprep.mubr.bf16.mxu1 %v3636_v9  ;;  %v3637_v9 = vpack.c.bf16 %v3573_v11, %v3615_v52  ;;  %v9422_v11 = vld [vmem:[#allocation6 + $0x2e0] sm:$0xff]   ;;  %v3572_v52 = vsel %vm1318_vm2, %v3552_v29, %v3553_v60  ;;  %v3569_v29 = vsel %vm1318_vm2, %v3555_v58, %v3556_v53  ;;  %v9423_v60 = vld [vmem:[#allocation6 + $0x2d8] sm:$0xff]   ;;  %v3443_v21 = vrot.slane %v11170_v34, 4  ;;  %v9424_v58 = vld [vmem:[#allocation6 + $0x2d0] sm:$0xff]  }
 0x37e   : > { %9042 = vmatprep.subr.bf16.mxu1 %v9422_v11 }
 0x37f   : > { %9043 = vmatpush3.bf16.msra.mxu1 %v9422_v11 }
 0x380   : > { %9044 = vmatprep.subr.bf16.mxu1 %v9423_v60 }
 0x383   : > { %9045 = vmatpush3.bf16.msra.mxu1 %v9423_v60 }
 0x384   : > { %3961 = vmatmul.mubr.bf16.gmra.mxu1 %v3524_v49  ;;  %v3638_v49 = vpack.c.bf16 %v3571_v28, %v3572_v52  ;;  %v13503_v28 = vld [vmem:[#allocation32_spill] sm:$0xff]  ;;  %9046 = vmatprep.subr.bf16.mxu1 %v9424_v58 }
 0x385   : > { %3968 = vmatprep.mubr.bf16.mxu1 %v3637_v9  ;;  %v3440_v9 = vrot.slane %v11155_v61, 4 }
 0x387   : > { %v3459_v63 = vsel %vm3450_vm12, %v3440_v9, %v3441_v44  ;;  %v3460_v57 = vsel %vm3450_vm12, %v3439_v19, %v3440_v9  ;;  %v3458_v19 = vsel %vm3450_vm12, %v3441_v44, %v3442_v7  ;;  %v9425_v9 = vld [vmem:[#allocation6 + $0x2c8] sm:$0xff]   ;;  %9047 = vmatpush3.bf16.msra.mxu1 %v9424_v58  ;;  %v3559_v44 = vrot.slane %v11194_v38, 6 }
 0x388   : > { %v3526_v52 = vpack.c.bf16 %v3459_v63, %v3460_v57  ;;  %v3457_v63 = vsel %vm3450_vm12, %v3442_v7, %v3443_v21  ;;  %9048 = vmatprep.subr.bf16.mxu1 %v9425_v9  ;;  %v9426_v57 = vld [vmem:[#allocation6 + $0x2c0] sm:$0xff]   ;;  %v3560_v7 = vrot.slane %v11196_v23, 6  ;;  %v3444_v58 = vrot.slane %v11182_v22, 4 }
 0x38b   : > { %9049 = vmatpush3.bf16.msra.mxu1 %v9425_v9  ;;  %v3456_v9 = vsel %vm3450_vm12, %v3443_v21, %v3444_v58 }
 0x38c   : > { %3969 = vmatmul.mubr.bf16.gmra.mxu1 %v3525_v37  ;;  %v3619_v37 = vmul.f32 %v13503_v28, %v3570_v0  ;;  %v3557_v0 = vrot.slane %v11182_v22, 6  ;;  %9050 = vmatprep.subr.bf16.mxu1 %v9426_v57 }
 0x38d   : > { %3976 = vmatprep.mubr.bf16.mxu1 %v3638_v49  ;;  %v13504_v49 = vld [vmem:[#allocation31_spill] sm:$0xff] }
 0x38e   : > { %vm990_vm4 = vcmp.ge.s32.totalorder %v13504_v49, 4  ;;  %v3639_v11 = vpack.c.bf16 %v3569_v29, %v3619_v37  ;;  %v3567_v60 = vsel %vm1318_vm2, %v3557_v0, %v3558_v48 }
 0x38f   : > { %v11406_v41 = vsel %vm990_vm4, 1.0, %v13485_v30  ;;  %9051 = vmatpush3.bf16.msra.mxu1 %v9426_v57 }
 0x390   : > { %13505 = vst [vmem:[#allocation24_spill] sm:$0xff] %v11406_v41  ;;  %v3507_v29 = vmul.f32 %v11406_v41, %v3458_v19  ;;  %v3566_v19 = vsel %vm1318_vm2, %v3558_v48, %v3559_v44 }
 0x392   : > { %v3527_v37 = vpack.c.bf16 %v3457_v63, %v3507_v29  ;;  %v3623_v29 = vmul.f32 %v10327_v26, %v3566_v19  ;;  %v13507_v19 = vrot.slane %v11210_v47, 6 }
 0x394   : > { %3977 = vmatmul.mubr.bf16.gmra.mxu1 %v3526_v52  ;;  %v3568_v52 = vsel %vm1318_vm2, %v3556_v53, %v3557_v0  ;;  %v3565_v53 = vsel %vm1318_vm2, %v3559_v44, %v3560_v7  ;;  %v3446_v0 = vrot.slane %v11194_v38, 4 }
 0x395   : > { %3984 = vmatprep.mubr.bf16.mxu1 %v3639_v11  ;;  %v3640_v49 = vpack.c.bf16 %v3567_v60, %v3568_v52  ;;  %v3445_v11 = vrot.slane %v11184_v20, 4  ;;  %v3447_v52 = vrot.slane %v11196_v23, 4  ;;  %v3641_v48 = vpack.c.bf16 %v3565_v53, %v3623_v29 }
 0x397   : > { %v3455_v63 = vsel %vm3450_vm12, %v3444_v58, %v3445_v11  ;;  %v3454_v44 = vsel %vm3450_vm12, %v3445_v11, %v3446_v0  ;;  %v3453_v21 = vsel %vm3450_vm12, %v3446_v0, %v3447_v52  ;;  %v3448_v11 = vrot.slane %v11208_v18, 4 }
 0x398   : > { %v3528_v60 = vpack.c.bf16 %v3455_v63, %v3456_v9 }
 0x39c   : > { %3985 = vmatmul.mubr.bf16.gmra.mxu1 %v3527_v37  ;;  %v13506_v37 = vld [vmem:[#allocation33_spill] sm:$0xff] }
 0x39d   : > { %3992 = vmatprep.mubr.bf16.mxu1 %v3640_v49  ;;  %vm994_vm5 = vcmp.ge.s32.totalorder %v13506_v37, 4  ;;  %v3561_v49 = vrot.slane %v11208_v18, 6  ;;  %v3452_v37 = vsel %vm3450_vm12, %v3447_v52, %v3448_v11  ;;  %v9436_v52 = vld [vmem:[#allocation6 + $0x258] sm:$0xff]  }
 0x39e   : > { %v11435_v57 = vsel %vm994_vm5, 1.0, %v13485_v30 }
 0x39f   : > { %v3511_v58 = vmul.f32 %v11435_v57, %v3454_v44  ;;  %v3563_v63 = vsel %vm1318_vm2, %v3561_v49, %v13507_v19  ;;  %v3564_v9 = vsel %vm1318_vm2, %v3560_v7, %v3561_v49  ;;  %v9427_v44 = vld [vmem:[#allocation6 + $0x2b8] sm:$0xff]   ;;  %v9429_v7 = vld [vmem:[#allocation6 + $0x2b0] sm:$0xff]   ;;  %v9432_v19 = vld [vmem:[#allocation6 + $0x268] sm:$0xff]  }
 0x3a0   : > { %v3642_v29 = vpack.c.bf16 %v3563_v63, %v3564_v9  ;;  %8403 = vmatprep.subr.bf16.mxu0 %v9427_v44  ;;  %v9430_v49 = vld [vmem:[#allocation6 + $0x270] sm:$0xff]   ;;  %v9433_v63 = vld [vmem:[#allocation6 + $0x2a0] sm:$0xff]   ;;  %v9435_v9 = vld [vmem:[#allocation6 + $0x298] sm:$0xff]  }
 0x3a1   : > { %v3529_v53 = vpack.c.bf16 %v3453_v21, %v3511_v58  ;;  %v9428_v21 = vld [vmem:[#allocation6 + $0x278] sm:$0xff]   ;;  %v9431_v58 = vld [vmem:[#allocation6 + $0x2a8] sm:$0xff]  }
 0x3a2   : > { %8404 = vmatpush3.bf16.msra.mxu0 %v9428_v21 }
 0x3a3   : > { %8405 = vmatprep.subr.bf16.mxu0 %v9429_v7 }
 0x3a4   : > { %3993 = vmatmul.mubr.bf16.gmra.mxu1 %v3528_v60  ;;  %v13508_v60 = vrot.slane %v11210_v47, 4 }
 0x3a5   : > { %4000 = vmatprep.mubr.bf16.mxu1 %v3641_v48 }
 0x3a6   : > { %v3451_v0 = vsel %vm3450_vm12, %v3448_v11, %v13508_v60  ;;  %8406 = vmatpush3.bf16.msra.mxu0 %v9430_v49  ;;  %v9437_v11 = vld [vmem:[#allocation6 + $0x290] sm:$0xff]  }
 0x3a7   : > { %v3530_v48 = vpack.c.bf16 %v3451_v0, %v3452_v37  ;;  %8407 = vmatprep.subr.bf16.mxu0 %v9431_v58  ;;  %v9438_v60 = vld [vmem:[#allocation6 + $0x250] sm:$0xff]   ;;  %v9006_v0 = vpop.f32.mrf.mxu0 }
 0x3a9   : > { %v4051_v21 = vpop.f32.mrf.mxu0 }
 0x3aa   : > { %8408 = vmatpush3.bf16.msra.mxu0 %v9432_v19 }
 0x3ab   : > { %8409 = vmatprep.subr.bf16.mxu0 %v9433_v63  ;;  %v9439_v63 = vld [vmem:[#allocation6 + $0x288] sm:$0xff]  }
 0x3ac   : > { %4001 = vmatmul.mubr.bf16.gmra.mxu1 %v3529_v53  ;;  %v9434_v53 = vld [vmem:[#allocation6 + $0x260] sm:$0xff]  }
 0x3ad   : > { %4008 = vmatprep.mubr.bf16.mxu1 %v3642_v29  ;;  %v3710_v29 = vsub.s32 2, %v9960_v14 }
 0x3ae   : > { %8410 = vmatpush3.bf16.msra.mxu0 %v9434_v53  ;;  %v9440_v53 = vld [vmem:[#allocation6 + $0x248] sm:$0xff]  }
 0x3af   : > { %8411 = vmatprep.subr.bf16.mxu0 %v9435_v9  ;;  %v9441_v9 = vld [vmem:[#allocation6 + $0x280] sm:$0xff]  }
 0x3b2   : > { %8412 = vmatpush3.bf16.msra.mxu0 %v9436_v52  ;;  %v9007_v52 = vpop.f32.mrf.mxu0 }
 0x3b3   : > { %8413 = vmatprep.subr.bf16.mxu0 %v9437_v11 }
 0x3b4   : > { %4009 = vmatmul.mubr.bf16.gmra.mxu1 %v3530_v48  ;;  %v9527_v48 = vld [vmem:[#allocation8] sm:$0x3f] }
 0x3b5   : > { %v11457_v44 = vrot.slane %v9527_v48, %v3710_v29 }
 0x3b6   : > { %8414 = vmatpush3.bf16.msra.mxu0 %v9438_v60  ;;  %v9442_v60 = vld [vmem:[#allocation6 + $0x240] sm:$0xff]  }
 0x3b7   : > { %8415 = vmatprep.subr.bf16.mxu0 %v9439_v63 }
 0x3ba   : > { %8416 = vmatpush3.bf16.msra.mxu0 %v9440_v53 }
 0x3bb   : > { %8417 = vmatprep.subr.bf16.mxu0 %v9441_v9 }
 0x3be   : > { %8418 = vmatpush3.bf16.msra.mxu0 %v9442_v60 }
 0x3fc   : > { %v8283_v37 = vpop.f32.mrf.mxu1 }
 0x3fe   : > { %v8284_v7 = vpop.f32.mrf.mxu1 }
 0x3ff   : > { %v8285_v49 = vadd.f32 %v8284_v7, %v8283_v37  ;;  %v4054_v37 = vpop.f32.mrf.mxu0 }
 0x400   : > { %v8286_v58 = vpop.f32.mrf.mxu1 }
 0x401   : > { %v3891_v19 = vadd.f32 %v8285_v49, %v11457_v44 }
 0x402   : > { %v8287_v30 = vpop.f32.mrf.mxu1 }
 0x403   : > { %v4052_v47 = vadd.f32 %v4051_v21, %v3891_v19  ;;  %v8288_v18 = vadd.f32 %v8287_v30, %v8286_v58  ;;  %v11464_v21 = vpop.f32.mrf.mxu0 }
 0x404   : > { %v8289_v11 = vpop.f32.mrf.mxu1 }
 0x405   : > { %v4210_v23 = vmul.f32 0.01, %v4052_v47  ;;  %v3894_v29 = vadd.f32 %v8288_v18, %v11457_v44  ;;  %vm4178_vm6 = vcmp.gt.f32.partialorder %v4052_v47, 0.0 }
 0x406   : > { %v8290_v48 = vpop.f32.mrf.mxu1 }
 0x407   : > { %v4055_v7 = vadd.f32 %v4054_v37, %v3894_v29  ;;  %v8291_v49 = vadd.f32 %v8290_v48, %v8289_v11  ;;  %v11461_v20 = vsel %vm4178_vm6, %v4052_v47, %v4210_v23  ;;  %v4067_v37 = vpop.f32.mrf.mxu0 }
 0x408   : > { %v8292_v38 = vpop.f32.mrf.mxu1  ;;  %v13245_v53 = vrot.slane %v11461_v20, 4  ;;  %v13246_v11 = vrot.slane %v11461_v20, 6 }
 0x409   : > { %v4211_v22 = vmul.f32 0.01, %v4055_v7  ;;  %v3899_v30 = vadd.f32 %v8291_v49, %v11457_v44  ;;  %vm4179_vm7 = vcmp.gt.f32.partialorder %v4055_v7, 0.0  ;;  %v9011_v43 = vpop.f32.mrf.mxu0 }
 0x40a   : > { %v8293_v58 = vpop.f32.mrf.mxu1 }
 0x40b   : > { %v4060_v19 = vadd.f32 %v9006_v0, %v3899_v30  ;;  %v8294_v63 = vadd.f32 %v8293_v58, %v8292_v38  ;;  %v4243_v18 = vsel %vm4179_vm7, %v4055_v7, %v4211_v22  ;;  %v4070_v5 = vpop.f32.mrf.mxu0 }
 0x40c   : > { %v8295_v9 = vpop.f32.mrf.mxu1  ;;  %v4275_v34 = vrot.slane %v4243_v18, 4  ;;  %v4387_v29 = vrot.slane %v4243_v18, 6  ;;  %v4498_v23 = vpack.c.bf16 %v4243_v18, %v11461_v20 }
 0x40d   : > { %vm4180_vm3 = vcmp.gt.f32.partialorder %v4060_v19, 0.0  ;;  %v4212_v47 = vmul.f32 0.01, %v4060_v19  ;;  %v3902_v60 = vadd.f32 %v8294_v63, %v11457_v44 }
 0x40e   : > { %v8296_v48 = vpop.f32.mrf.mxu1  ;;  %v11474_v22 = vsel %vm3450_vm12, %v13245_v53, %v4275_v34  ;;  %9052 = vmatprep.mubr.bf16.mxu1 %v4498_v23  ;;  %v11480_v38 = vsel %vm1318_vm2, %v13246_v11, %v4387_v29 }
 0x40f   : > { %v4244_v0 = vsel %vm4180_vm3, %v4060_v19, %v4212_v47  ;;  %v4063_v7 = vadd.f32 %v9007_v52, %v3902_v60  ;;  %v8297_v49 = vadd.f32 %v8296_v48, %v8295_v9 }
 0x410   : > { %v4276_v30 = vrot.slane %v4244_v0, 4  ;;  %v8298_v58 = vpop.f32.mrf.mxu1  ;;  %v4388_v63 = vrot.slane %v4244_v0, 6 }
 0x411   : > { %vm4181_vm8 = vcmp.gt.f32.partialorder %v4063_v7, 0.0  ;;  %v4213_v18 = vmul.f32 0.01, %v4063_v7  ;;  %v3907_v61 = vadd.f32 %v8297_v49, %v11457_v44 }
 0x412   : > { %v8299_v53 = vpop.f32.mrf.mxu1  ;;  %v11485_v23 = vsel %vm1318_vm2, %v4387_v29, %v4388_v63  ;;  %v11489_v11 = vsel %vm3450_vm12, %v4275_v34, %v4276_v30 }
 0x413   : > { %v4245_v19 = vsel %vm4181_vm8, %v4063_v7, %v4213_v18  ;;  %v4068_v52 = vadd.f32 %v4067_v37, %v3907_v61  ;;  %v8300_v9 = vadd.f32 %v8299_v53, %v8298_v58 }
 0x414   : > { %v4277_v47 = vrot.slane %v4245_v19, 4  ;;  %v4499_v60 = vpack.c.bf16 %v4245_v19, %v4244_v0  ;;  %v8301_v48 = vpop.f32.mrf.mxu1  ;;  %v4389_v12 = vrot.slane %v4245_v19, 6 }
 0x415   : > { %v4214_v3 = vmul.f32 0.01, %v4068_v52  ;;  %v3910_v49 = vadd.f32 %v8300_v9, %v11457_v44  ;;  %vm4182_vm9 = vcmp.gt.f32.partialorder %v4068_v52, 0.0 }
 0x416   : > { %v8302_v54 = vpop.f32.mrf.mxu1  ;;  %9053 = vmatmul.mubr.bf16.vlgmr.msra.gmra.mxu1 %v4499_v60  ;;  %v11494_v29 = vsel %vm1318_vm2, %v4388_v63, %v4389_v12  ;;  %v11498_v34 = vsel %vm3450_vm12, %v4276_v30, %v4277_v47  ;;  %v11505_v60 = vpop.f32.mrf.mxu0 }
 0x417   : > { %v4071_v61 = vadd.f32 %v4070_v5, %v3910_v49  ;;  %v8303_v53 = vadd.f32 %v8302_v54, %v8301_v48  ;;  %v4246_v37 = vsel %vm4182_vm9, %v4068_v52, %v4214_v3 }
 0x418   : > { %v8304_v7 = vpop.f32.mrf.mxu1  ;;  %v4278_v58 = vrot.slane %v4246_v37, 4  ;;  %v4390_v18 = vrot.slane %v4246_v37, 6  ;;  %v4083_v45 = vpop.f32.mrf.mxu0 }
 0x419   : > { %v4215_v9 = vmul.f32 0.01, %v4071_v61  ;;  %v3915_v63 = vadd.f32 %v8303_v53, %v11457_v44  ;;  %vm4183_vm10 = vcmp.gt.f32.partialorder %v4071_v61, 0.0 }
 0x41a   : > { %v8305_v30 = vpop.f32.mrf.mxu1  ;;  %v4445_v54 = vsel %vm1318_vm2, %v4389_v12, %v4390_v18  ;;  %v4333_v5 = vsel %vm3450_vm12, %v4277_v47, %v4278_v58 }
 0x41b   : > { %v4076_v3 = vadd.f32 %v11464_v21, %v3915_v63  ;;  %v8306_v52 = vadd.f32 %v8305_v30, %v8304_v7  ;;  %v4247_v48 = vsel %vm4183_vm10, %v4071_v61, %v4215_v9  ;;  %v11514_v40 = vmul.f32 %v13488_v59, %v4445_v54 }
 0x41c   : > { %v8307_v49 = vpop.f32.mrf.mxu1  ;;  %v4279_v0 = vrot.slane %v4247_v48, 4  ;;  %v4391_v19 = vrot.slane %v4247_v48, 6  ;;  %v4500_v50 = vpack.c.bf16 %v4247_v48, %v4246_v37  ;;  %v11525_v61 = vmul.f32 %v11256_v31, %v4333_v5 }
 0x41d   : > { %vm4184_vm11 = vcmp.gt.f32.partialorder %v4076_v3, 0.0  ;;  %v4216_v53 = vmul.f32 0.01, %v4076_v3  ;;  %v3918_v62 = vadd.f32 %v8306_v52, %v11457_v44  ;;  %v9015_v52 = vpop.f32.mrf.mxu0 }
 0x41e   : > { %v8308_v12 = vpop.f32.mrf.mxu1  ;;  %9056 = vmatprep.mubr.bf16.mxu1 %v4500_v50  ;;  %v11518_v47 = vsel %vm1318_vm2, %v4390_v18, %v4391_v19  ;;  %v11522_v21 = vsel %vm3450_vm12, %v4278_v58, %v4279_v0 }
 0x41f   : > { %v4248_v37 = vsel %vm4184_vm11, %v4076_v3, %v4216_v53  ;;  %v4079_v7 = vadd.f32 %v9011_v43, %v3918_v62  ;;  %v8309_v9 = vadd.f32 %v8308_v12, %v8307_v49  ;;  %v4086_v25 = vpop.f32.mrf.mxu0 }
 0x420   : > { %v4280_v63 = vrot.slane %v4248_v37, 4  ;;  %v8310_v30 = vpop.f32.mrf.mxu1  ;;  %v4392_v18 = vrot.slane %v4248_v37, 6 }
 0x421   : > { %vm4185_vm13 = vcmp.gt.f32.partialorder %v4079_v7, 0.0  ;;  %v4217_v54 = vmul.f32 0.01, %v4079_v7  ;;  %v3923_v58 = vadd.f32 %v8309_v9, %v11457_v44 }
 0x422   : > { %v8311_v48 = vpop.f32.mrf.mxu1  ;;  %v11534_v5 = vsel %vm1318_vm2, %v4391_v19, %v4392_v18  ;;  %v11538_v62 = vsel %vm3450_vm12, %v4279_v0, %v4280_v63 }
 0x423   : > { %v4084_v43 = vadd.f32 %v4083_v45, %v3923_v58  ;;  %v8312_v3 = vadd.f32 %v8311_v48, %v8310_v30  ;;  %v4249_v49 = vsel %vm4185_vm13, %v4079_v7, %v4217_v54 }
 0x424   : > { %v8313_v53 = vpop.f32.mrf.mxu1  ;;  %v4281_v12 = vrot.slane %v4249_v49, 4  ;;  %v4501_v50 = vpack.c.bf16 %v4249_v49, %v4248_v37  ;;  %v4393_v59 = vrot.slane %v4249_v49, 6  ;;  %v11554_v49 = vpop.f32.mrf.mxu0 }
 0x425   : > { %v4218_v39 = vmul.f32 0.01, %v4084_v43  ;;  %v3926_v9 = vadd.f32 %v8312_v3, %v11457_v44  ;;  %vm4186_vm14 = vcmp.gt.f32.partialorder %v4084_v43, 0.0 }
 0x426   : > { %v8314_v33 = vpop.f32.mrf.mxu1  ;;  %9057 = vmatmul.mubr.bf16.gmra.mxu1 %v4501_v50  ;;  %v11543_v19 = vsel %vm1318_vm2, %v4392_v18, %v4393_v59  ;;  %v11547_v45 = vsel %vm3450_vm12, %v4280_v63, %v4281_v12  ;;  %v4099_v31 = vpop.f32.mrf.mxu0 }
 0x427   : > { %v4087_v0 = vadd.f32 %v4086_v25, %v3926_v9  ;;  %v8315_v7 = vadd.f32 %v8314_v33, %v8313_v53  ;;  %v4250_v30 = vsel %vm4186_vm14, %v4084_v43, %v4218_v39 }
 0x428   : > { %v8316_v54 = vpop.f32.mrf.mxu1  ;;  %v4282_v58 = vrot.slane %v4250_v30, 4  ;;  %v4394_v48 = vrot.slane %v4250_v30, 6 }
 0x429   : > { %v4219_v3 = vmul.f32 0.01, %v4087_v0  ;;  %v3931_v18 = vadd.f32 %v8315_v7, %v11457_v44  ;;  %vm4187_vm15 = vcmp.gt.f32.partialorder %v4087_v0, 0.0 }
 0x42a   : > { %v8317_v63 = vpop.f32.mrf.mxu1  ;;  %v4441_v33 = vsel %vm1318_vm2, %v4393_v59, %v4394_v48  ;;  %v4329_v25 = vsel %vm3450_vm12, %v4281_v12, %v4282_v58 }
 0x42b   : > { %v4092_v39 = vadd.f32 %v11505_v60, %v3931_v18  ;;  %v8318_v43 = vadd.f32 %v8317_v63, %v8316_v54  ;;  %v4251_v53 = vsel %vm4187_vm15, %v4087_v0, %v4219_v3  ;;  %v11563_v46 = vmul.f32 %v13491_v17, %v4441_v33 }
 0x42c   : > { %v8319_v9 = vpop.f32.mrf.mxu1  ;;  %v4283_v37 = vrot.slane %v4251_v53, 4  ;;  %v4395_v50 = vrot.slane %v4251_v53, 6  ;;  %v4502_v56 = vpack.c.bf16 %v4251_v53, %v4250_v30  ;;  %v11574_v0 = vmul.f32 %v11286_v51, %v4329_v25 }
 0x42d   : > { %vm4188_vm0 = vcmp.gt.f32.partialorder %v4092_v39, 0.0  ;;  %v4220_v7 = vmul.f32 0.01, %v4092_v39  ;;  %v3934_v8 = vadd.f32 %v8318_v43, %v11457_v44  ;;  %v9019_v43 = vpop.f32.mrf.mxu0 }
 0x42e   : > { %v8320_v59 = vpop.f32.mrf.mxu1  ;;  %9060 = vmatprep.mubr.bf16.mxu1 %v4502_v56  ;;  %v11567_v12 = vsel %vm1318_vm2, %v4394_v48, %v4395_v50  ;;  %v11571_v60 = vsel %vm3450_vm12, %v4282_v58, %v4283_v37 }
 0x42f   : > { %v4252_v30 = vsel %vm4188_vm0, %v4092_v39, %v4220_v7  ;;  %v4095_v54 = vadd.f32 %v9015_v52, %v3934_v8  ;;  %v8321_v3 = vadd.f32 %v8320_v59, %v8319_v9  ;;  %v4102_v16 = vpop.f32.mrf.mxu0 }
 0x430   : > { %v4284_v18 = vrot.slane %v4252_v30, 4  ;;  %v8322_v63 = vpop.f32.mrf.mxu1  ;;  %v4396_v48 = vrot.slane %v4252_v30, 6 }
 0x431   : > { %vm4189_vm1 = vcmp.gt.f32.partialorder %v4095_v54, 0.0  ;;  %v4221_v33 = vmul.f32 0.01, %v4095_v54  ;;  %v3939_v58 = vadd.f32 %v8321_v3, %v11457_v44 }
 0x432   : > { %v8323_v53 = vpop.f32.mrf.mxu1  ;;  %v11583_v25 = vsel %vm1318_vm2, %v4395_v50, %v4396_v48  ;;  %v11587_v8 = vsel %vm3450_vm12, %v4283_v37, %v4284_v18 }
 0x433   : > { %v4100_v52 = vadd.f32 %v4099_v31, %v3939_v58  ;;  %v8324_v39 = vadd.f32 %v8323_v53, %v8322_v63  ;;  %v4253_v9 = vsel %vm4189_vm1, %v4095_v54, %v4221_v33 }
 0x434   : > { %v8325_v7 = vpop.f32.mrf.mxu1  ;;  %v4285_v59 = vrot.slane %v4253_v9, 4  ;;  %v4503_v56 = vpack.c.bf16 %v4253_v9, %v4252_v30  ;;  %v4397_v17 = vrot.slane %v4253_v9, 6  ;;  %v11603_v9 = vpop.f32.mrf.mxu0 }
 0x435   : > { %v4222_v51 = vmul.f32 0.01, %v4100_v52  ;;  %v3942_v3 = vadd.f32 %v8324_v39, %v11457_v44  ;;  %vm4190_vm4 = vcmp.gt.f32.partialorder %v4100_v52, 0.0 }
 0x436   : > { %v8326_v4 = vpop.f32.mrf.mxu1  ;;  %9061 = vmatmul.mubr.bf16.gmra.mxu1 %v4503_v56  ;;  %v11592_v50 = vsel %vm1318_vm2, %v4396_v48, %v4397_v17  ;;  %v11596_v31 = vsel %vm3450_vm12, %v4284_v18, %v4285_v59  ;;  %v4115_v1 = vpop.f32.mrf.mxu0 }
 0x437   : > { %v4103_v37 = vadd.f32 %v4102_v16, %v3942_v3  ;;  %v8327_v54 = vadd.f32 %v8326_v4, %v8325_v7  ;;  %v4254_v63 = vsel %vm4190_vm4, %v4100_v52, %v4222_v51 }
 0x438   : > { %v8328_v33 = vpop.f32.mrf.mxu1  ;;  %v4286_v58 = vrot.slane %v4254_v63, 4  ;;  %v4398_v53 = vrot.slane %v4254_v63, 6 }
 0x439   : > { %v4223_v39 = vmul.f32 0.01, %v4103_v37  ;;  %v3947_v48 = vadd.f32 %v8327_v54, %v11457_v44  ;;  %vm4191_vm5 = vcmp.gt.f32.partialorder %v4103_v37, 0.0 }
 0x43a   : > { %v8329_v18 = vpop.f32.mrf.mxu1  ;;  %v4437_v4 = vsel %vm1318_vm2, %v4397_v17, %v4398_v53  ;;  %v4325_v16 = vsel %vm3450_vm12, %v4285_v59, %v4286_v58 }
 0x43b   : > { %v4108_v51 = vadd.f32 %v11554_v49, %v3947_v48  ;;  %v8330_v52 = vadd.f32 %v8329_v18, %v8328_v33  ;;  %v4255_v7 = vsel %vm4191_vm5, %v4103_v37, %v4223_v39  ;;  %v11612_v36 = vmul.f32 %v13494_v35, %v4437_v4 }
 0x43c   : > { %v8331_v3 = vpop.f32.mrf.mxu1  ;;  %v4287_v30 = vrot.slane %v4255_v7, 4  ;;  %v4399_v56 = vrot.slane %v4255_v7, 6  ;;  %v4504_v42 = vpack.c.bf16 %v4255_v7, %v4254_v63  ;;  %v11623_v37 = vmul.f32 %v11316_v55, %v4325_v16 }
 0x43d   : > { %vm4192_vm6 = vcmp.gt.f32.partialorder %v4108_v51, 0.0  ;;  %v4224_v54 = vmul.f32 0.01, %v4108_v51  ;;  %v3950_v32 = vadd.f32 %v8330_v52, %v11457_v44  ;;  %v9023_v52 = vpop.f32.mrf.mxu0 }
 0x43e   : > { %v8332_v17 = vpop.f32.mrf.mxu1  ;;  %9064 = vmatprep.mubr.bf16.mxu1 %v4504_v42  ;;  %v11616_v59 = vsel %vm1318_vm2, %v4398_v53, %v4399_v56  ;;  %v11620_v49 = vsel %vm3450_vm12, %v4286_v58, %v4287_v30  ;;  %13509 = vst [vmem:[#allocation29_spill] sm:$0xff] %v11623_v37 }
 0x43f   : > { %v4256_v63 = vsel %vm4192_vm6, %v4108_v51, %v4224_v54  ;;  %v4111_v33 = vadd.f32 %v9019_v43, %v3950_v32  ;;  %v8333_v39 = vadd.f32 %v8332_v17, %v8331_v3  ;;  %v4118_v2 = vpop.f32.mrf.mxu0 }
 0x440   : > { %v4288_v48 = vrot.slane %v4256_v63, 4  ;;  %v8334_v18 = vpop.f32.mrf.mxu1  ;;  %v4400_v53 = vrot.slane %v4256_v63, 6 }
 0x441   : > { %vm4193_vm7 = vcmp.gt.f32.partialorder %v4111_v33, 0.0  ;;  %v4225_v4 = vmul.f32 0.01, %v4111_v33  ;;  %v3955_v58 = vadd.f32 %v8333_v39, %v11457_v44 }
 0x442   : > { %v8335_v7 = vpop.f32.mrf.mxu1  ;;  %v11632_v16 = vsel %vm1318_vm2, %v4399_v56, %v4400_v53  ;;  %v11636_v32 = vsel %vm3450_vm12, %v4287_v30, %v4288_v48 }
 0x443   : > { %13510 = vst [vmem:[#allocation26_spill] sm:$0xff] %v11632_v16  ;;  %13511 = vst [vmem:[#allocation30_spill] sm:$0xff] %v11636_v32  ;;  %v4116_v43 = vadd.f32 %v4115_v1, %v3955_v58  ;;  %v8336_v51 = vadd.f32 %v8335_v7, %v8334_v18  ;;  %v4257_v3 = vsel %vm4193_vm7, %v4111_v33, %v4225_v4 }
 0x444   : > { %v8337_v54 = vpop.f32.mrf.mxu1  ;;  %v4289_v17 = vrot.slane %v4257_v3, 4  ;;  %v4505_v42 = vpack.c.bf16 %v4257_v3, %v4256_v63  ;;  %v4401_v35 = vrot.slane %v4257_v3, 6  ;;  %v11652_v3 = vpop.f32.mrf.mxu0 }
 0x445   : > { %v4226_v55 = vmul.f32 0.01, %v4116_v43  ;;  %v3958_v39 = vadd.f32 %v8336_v51, %v11457_v44  ;;  %vm4194_vm3 = vcmp.gt.f32.partialorder %v4116_v43, 0.0 }
 0x446   : > { %v8338_v37 = vpop.f32.mrf.mxu1  ;;  %9065 = vmatmul.mubr.bf16.gmra.mxu1 %v4505_v42  ;;  %v11641_v56 = vsel %vm1318_vm2, %v4400_v53, %v4401_v35  ;;  %v11645_v1 = vsel %vm3450_vm12, %v4288_v48, %v4289_v17 }
 0x447   : > { %13512 = vst [vmem:[#allocation28_spill] sm:$0xff] %v11641_v56  ;;  %13513 = vst [vmem:[#allocation32_spill] sm:$0xff] %v11645_v1  ;;  %v4119_v30 = vadd.f32 %v4118_v2, %v3958_v39  ;;  %v8339_v33 = vadd.f32 %v8338_v37, %v8337_v54  ;;  %v4258_v18 = vsel %vm4194_vm3, %v4116_v43, %v4226_v55  ;;  %v4131_v56 = vpop.f32.mrf.mxu0 }
 0x448   : > { %v8340_v4 = vpop.f32.mrf.mxu1  ;;  %v4290_v58 = vrot.slane %v4258_v18, 4  ;;  %v4402_v7 = vrot.slane %v4258_v18, 6 }
 0x449   : > { %v4227_v51 = vmul.f32 0.01, %v4119_v30  ;;  %v3963_v53 = vadd.f32 %v8339_v33, %v11457_v44  ;;  %vm4195_vm8 = vcmp.gt.f32.partialorder %v4119_v30, 0.0 }
 0x44a   : > { %v8341_v48 = vpop.f32.mrf.mxu1  ;;  %v4433_v2 = vsel %vm1318_vm2, %v4401_v35, %v4402_v7  ;;  %v4321_v55 = vsel %vm3450_vm12, %v4289_v17, %v4290_v58 }
 0x44b   : > { %v4124_v37 = vadd.f32 %v11603_v9, %v3963_v53  ;;  %v8342_v43 = vadd.f32 %v8341_v48, %v8340_v4  ;;  %v4259_v54 = vsel %vm4195_vm8, %v4119_v30, %v4227_v51  ;;  %v11661_v16 = vmul.f32 %v13497_v10, %v4433_v2 }
 0x44c   : > { %v8343_v39 = vpop.f32.mrf.mxu1  ;;  %v4291_v63 = vrot.slane %v4259_v54, 4  ;;  %v4403_v42 = vrot.slane %v4259_v54, 6  ;;  %v4506_v32 = vpack.c.bf16 %v4259_v54, %v4258_v18  ;;  %v11672_v30 = vmul.f32 %v11346_v24, %v4321_v55 }
 0x44d   : > { %vm4196_vm9 = vcmp.gt.f32.partialorder %v4124_v37, 0.0  ;;  %v4228_v33 = vmul.f32 0.01, %v4124_v37  ;;  %v3966_v1 = vadd.f32 %v8342_v43, %v11457_v44  ;;  %v9027_v43 = vpop.f32.mrf.mxu0 }
 0x44e   : > { %v8344_v35 = vpop.f32.mrf.mxu1  ;;  %9068 = vmatprep.mubr.bf16.mxu1 %v4506_v32  ;;  %v11665_v17 = vsel %vm1318_vm2, %v4402_v7, %v4403_v42  ;;  %v11669_v9 = vsel %vm3450_vm12, %v4290_v58, %v4291_v63  ;;  %13515 = vst [vmem:[#allocation33_spill] sm:$0xff] %v11672_v30 }
 0x44f   : > { %13514 = vst [vmem:[#allocation31_spill] sm:$0xff] %v11669_v9  ;;  %v4260_v18 = vsel %vm4196_vm9, %v4124_v37, %v4228_v33  ;;  %v4127_v4 = vadd.f32 %v9023_v52, %v3966_v1  ;;  %v8345_v51 = vadd.f32 %v8344_v35, %v8343_v39  ;;  %v4134_v30 = vpop.f32.mrf.mxu0 }
 0x450   : > { %v4292_v53 = vrot.slane %v4260_v18, 4  ;;  %v8346_v48 = vpop.f32.mrf.mxu1  ;;  %v4404_v7 = vrot.slane %v4260_v18, 6 }
 0x451   : > { %vm4197_vm10 = vcmp.gt.f32.partialorder %v4127_v4, 0.0  ;;  %v4229_v2 = vmul.f32 0.01, %v4127_v4  ;;  %v3971_v58 = vadd.f32 %v8345_v51, %v11457_v44 }
 0x452   : > { %v8347_v54 = vpop.f32.mrf.mxu1  ;;  %v11681_v55 = vsel %vm1318_vm2, %v4403_v42, %v4404_v7  ;;  %v11685_v52 = vsel %vm3450_vm12, %v4291_v63, %v4292_v53 }
 0x453   : > { %13516 = vst [vmem:[#allocation63_spill] sm:$0xff] %v11681_v55  ;;  %13517 = vst [vmem:[#allocation64_spill] sm:$0xff] %v11685_v52  ;;  %v4132_v1 = vadd.f32 %v4131_v56, %v3971_v58  ;;  %v8348_v37 = vadd.f32 %v8347_v54, %v8346_v48  ;;  %v4261_v39 = vsel %vm4197_vm10, %v4127_v4, %v4229_v2 }
 0x454   : > { %v8349_v33 = vpop.f32.mrf.mxu1  ;;  %v4293_v35 = vrot.slane %v4261_v39, 4  ;;  %v4507_v32 = vpack.c.bf16 %v4261_v39, %v4260_v18  ;;  %v4405_v10 = vrot.slane %v4261_v39, 6  ;;  %v11701_v39 = vpop.f32.mrf.mxu0 }
 0x455   : > { %v4230_v24 = vmul.f32 0.01, %v4132_v1  ;;  %v3974_v51 = vadd.f32 %v8348_v37, %v11457_v44  ;;  %vm4198_vm11 = vcmp.gt.f32.partialorder %v4132_v1, 0.0 }
 0x456   : > { %v8350_v9 = vpop.f32.mrf.mxu1  ;;  %9069 = vmatmul.mubr.bf16.gmra.mxu1 %v4507_v32  ;;  %v11690_v42 = vsel %vm1318_vm2, %v4404_v7, %v4405_v10  ;;  %v11694_v56 = vsel %vm3450_vm12, %v4292_v53, %v4293_v35 }
 0x457   : > { %13518 = vst [vmem:[#allocation65_spill] sm:$0xff] %v11690_v42  ;;  %13519 = vst [vmem:[#allocation66_spill] sm:$0xff] %v11694_v56  ;;  %v4135_v63 = vadd.f32 %v4134_v30, %v3974_v51  ;;  %v8351_v4 = vadd.f32 %v8350_v9, %v8349_v33  ;;  %v4262_v48 = vsel %vm4198_vm11, %v4132_v1, %v4230_v24  ;;  %v4147_v42 = vpop.f32.mrf.mxu0 }
 0x458   : > { %v8352_v2 = vpop.f32.mrf.mxu1  ;;  %v4294_v58 = vrot.slane %v4262_v48, 4  ;;  %v4406_v54 = vrot.slane %v4262_v48, 6 }
 0x459   : > { %v4231_v37 = vmul.f32 0.01, %v4135_v63  ;;  %v3979_v7 = vadd.f32 %v8351_v4, %v11457_v44  ;;  %vm4199_vm13 = vcmp.gt.f32.partialorder %v4135_v63, 0.0 }
 0x45a   : > { %v8353_v53 = vpop.f32.mrf.mxu1  ;;  %v4429_v9 = vsel %vm1318_vm2, %v4405_v10, %v4406_v54  ;;  %v4317_v24 = vsel %vm3450_vm12, %v4293_v35, %v4294_v58 }
 0x45b   : > { %v4140_v30 = vadd.f32 %v11652_v3, %v3979_v7  ;;  %v8354_v1 = vadd.f32 %v8353_v53, %v8352_v2  ;;  %v4263_v33 = vsel %vm4199_vm13, %v4135_v63, %v4231_v37  ;;  %v11710_v55 = vmul.f32 %v13500_v6, %v4429_v9 }
 0x45c   : > { %v8355_v51 = vpop.f32.mrf.mxu1  ;;  %v4295_v18 = vrot.slane %v4263_v33, 4  ;;  %v4407_v32 = vrot.slane %v4263_v33, 6  ;;  %v4508_v52 = vpack.c.bf16 %v4263_v33, %v4262_v48  ;;  %v11721_v63 = vmul.f32 %v11376_v13, %v4317_v24 }
 0x45d   : > { %vm4200_vm14 = vcmp.gt.f32.partialorder %v4140_v30, 0.0  ;;  %v4232_v4 = vmul.f32 0.01, %v4140_v30  ;;  %v3982_v56 = vadd.f32 %v8354_v1, %v11457_v44  ;;  %v9031_v1 = vpop.f32.mrf.mxu0 }
 0x45e   : > { %v8356_v10 = vpop.f32.mrf.mxu1  ;;  %9072 = vmatprep.mubr.bf16.mxu1 %v4508_v52  ;;  %v11714_v35 = vsel %vm1318_vm2, %v4406_v54, %v4407_v32  ;;  %v11718_v3 = vsel %vm3450_vm12, %v4294_v58, %v4295_v18  ;;  %13521 = vst [vmem:[#allocation68_spill] sm:$0xff] %v11721_v63 }
 0x45f   : > { %13520 = vst [vmem:[#allocation67_spill] sm:$0xff] %v11718_v3  ;;  %v4264_v48 = vsel %vm4200_vm14, %v4140_v30, %v4232_v4  ;;  %v4143_v2 = vadd.f32 %v9027_v43, %v3982_v56  ;;  %v8357_v37 = vadd.f32 %v8356_v10, %v8355_v51  ;;  %v4150_v63 = vpop.f32.mrf.mxu0 }
 0x460   : > { %v4296_v7 = vrot.slane %v4264_v48, 4  ;;  %v8358_v53 = vpop.f32.mrf.mxu1  ;;  %v4408_v54 = vrot.slane %v4264_v48, 6 }
 0x461   : > { %vm4201_vm15 = vcmp.gt.f32.partialorder %v4143_v2, 0.0  ;;  %v4233_v9 = vmul.f32 0.01, %v4143_v2  ;;  %v3987_v58 = vadd.f32 %v8357_v37, %v11457_v44 }
 0x462   : > { %v8359_v33 = vpop.f32.mrf.mxu1  ;;  %v11730_v24 = vsel %vm1318_vm2, %v4407_v32, %v4408_v54  ;;  %v11734_v43 = vsel %vm3450_vm12, %v4295_v18, %v4296_v7 }
 0x463   : > { %13522 = vst [vmem:[#allocation69_spill] sm:$0xff] %v11730_v24  ;;  %13523 = vst [vmem:[#allocation70_spill] sm:$0xff] %v11734_v43  ;;  %v4148_v56 = vadd.f32 %v4147_v42, %v3987_v58  ;;  %v8360_v30 = vadd.f32 %v8359_v33, %v8358_v53  ;;  %v4265_v51 = vsel %vm4201_vm15, %v4143_v2, %v4233_v9 }
 0x464   : > { %v8361_v4 = vpop.f32.mrf.mxu1  ;;  %v4297_v10 = vrot.slane %v4265_v51, 4  ;;  %v4509_v52 = vpack.c.bf16 %v4265_v51, %v4264_v48  ;;  %v4409_v6 = vrot.slane %v4265_v51, 6  ;;  %v11750_v51 = vpop.f32.mrf.mxu0 }
 0x465   : > { %v4234_v13 = vmul.f32 0.01, %v4148_v56  ;;  %v3990_v37 = vadd.f32 %v8360_v30, %v11457_v44  ;;  %vm4202_vm0 = vcmp.gt.f32.partialorder %v4148_v56, 0.0 }
 0x466   : > { %v8362_v3 = vpop.f32.mrf.mxu1  ;;  %9073 = vmatmul.mubr.bf16.gmra.mxu1 %v4509_v52  ;;  %v11739_v32 = vsel %vm1318_vm2, %v4408_v54, %v4409_v6  ;;  %v11743_v42 = vsel %vm3450_vm12, %v4296_v7, %v4297_v10 }
 0x467   : > { %13524 = vst [vmem:[#allocation71_spill] sm:$0xff] %v11739_v32  ;;  %13525 = vst [vmem:[#allocation72_spill] sm:$0xff] %v11743_v42  ;;  %v4151_v18 = vadd.f32 %v4150_v63, %v3990_v37  ;;  %v8363_v2 = vadd.f32 %v8362_v3, %v8361_v4  ;;  %v4266_v53 = vsel %vm4202_vm0, %v4148_v56, %v4234_v13  ;;  %v4163_v32 = vpop.f32.mrf.mxu0 }
 0x468   : > { %v8364_v9 = vpop.f32.mrf.mxu1  ;;  %v4298_v58 = vrot.slane %v4266_v53, 4  ;;  %v4410_v33 = vrot.slane %v4266_v53, 6 }
 0x469   : > { %v4235_v30 = vmul.f32 0.01, %v4151_v18  ;;  %v3995_v54 = vadd.f32 %v8363_v2, %v11457_v44  ;;  %vm4203_vm1 = vcmp.gt.f32.partialorder %v4151_v18, 0.0 }
 0x46a   : > { %v8365_v7 = vpop.f32.mrf.mxu1  ;;  %v4425_v3 = vsel %vm1318_vm2, %v4409_v6, %v4410_v33  ;;  %v4313_v13 = vsel %vm3450_vm12, %v4297_v10, %v4298_v58 }
 0x46b   : > { %v4156_v63 = vadd.f32 %v11701_v39, %v3995_v54  ;;  %v8366_v56 = vadd.f32 %v8365_v7, %v8364_v9  ;;  %v4267_v4 = vsel %vm4203_vm1, %v4151_v18, %v4235_v30  ;;  %v11759_v24 = vmul.f32 %v13503_v28, %v4425_v3 }
 0x46c   : > { %v8367_v37 = vpop.f32.mrf.mxu1  ;;  %v4299_v48 = vrot.slane %v4267_v4, 4  ;;  %v4411_v52 = vrot.slane %v4267_v4, 6  ;;  %v4510_v43 = vpack.c.bf16 %v4267_v4, %v4266_v53  ;;  %v11770_v18 = vmul.f32 %v11406_v41, %v4313_v13 }
 0x46d   : > { %vm4204_vm4 = vcmp.gt.f32.partialorder %v4156_v63, 0.0  ;;  %v4236_v2 = vmul.f32 0.01, %v4156_v63  ;;  %v3998_v42 = vadd.f32 %v8366_v56, %v11457_v44  ;;  %v9035_v56 = vpop.f32.mrf.mxu0 }
 0x46e   : > { %v8368_v6 = vpop.f32.mrf.mxu1  ;;  %9076 = vmatprep.mubr.bf16.mxu1 %v4510_v43  ;;  %v11763_v10 = vsel %vm1318_vm2, %v4410_v33, %v4411_v52  ;;  %v11767_v39 = vsel %vm3450_vm12, %v4298_v58, %v4299_v48  ;;  %13527 = vst [vmem:[#allocation74_spill] sm:$0xff] %v11770_v18 }
 0x46f   : > { %13526 = vst [vmem:[#allocation73_spill] sm:$0xff] %v11767_v39  ;;  %v4268_v53 = vsel %vm4204_vm4, %v4156_v63, %v4236_v2  ;;  %v4159_v9 = vadd.f32 %v9031_v1, %v3998_v42  ;;  %v8369_v30 = vadd.f32 %v8368_v6, %v8367_v37  ;;  %v4166_v18 = vpop.f32.mrf.mxu0 }
 0x470   : > { %v4300_v54 = vrot.slane %v4268_v53, 4  ;;  %v8370_v7 = vpop.f32.mrf.mxu1  ;;  %v4412_v33 = vrot.slane %v4268_v53, 6 }
 0x471   : > { %vm4205_vm5 = vcmp.gt.f32.partialorder %v4159_v9, 0.0  ;;  %v4237_v3 = vmul.f32 0.01, %v4159_v9  ;;  %v4003_v58 = vadd.f32 %v8369_v30, %v11457_v44 }
 0x472   : > { %v8371_v4 = vpop.f32.mrf.mxu1  ;;  %v11779_v13 = vsel %vm1318_vm2, %v4411_v52, %v4412_v33  ;;  %v11783_v1 = vsel %vm3450_vm12, %v4299_v48, %v4300_v54 }
 0x473   : > { %13528 = vst [vmem:[#allocation75_spill] sm:$0xff] %v11783_v1  ;;  %v4164_v42 = vadd.f32 %v4163_v32, %v4003_v58  ;;  %v8372_v63 = vadd.f32 %v8371_v4, %v8370_v7  ;;  %v4269_v37 = vsel %vm4205_vm5, %v4159_v9, %v4237_v3 }
 0x474   : > { %v8373_v2 = vpop.f32.mrf.mxu1  ;;  %v4301_v6 = vrot.slane %v4269_v37, 4  ;;  %v4511_v43 = vpack.c.bf16 %v4269_v37, %v4268_v53  ;;  %v4413_v28 = vrot.slane %v4269_v37, 6 }
 0x475   : > { %v4238_v41 = vmul.f32 0.01, %v4164_v42  ;;  %v4006_v30 = vadd.f32 %v8372_v63, %v11457_v44  ;;  %vm4206_vm6 = vcmp.gt.f32.partialorder %v4164_v42, 0.0 }
 0x476   : > { %v8374_v39 = vpop.f32.mrf.mxu1  ;;  %9077 = vmatmul.mubr.bf16.gmra.mxu1 %v4511_v43  ;;  %v11788_v52 = vsel %vm1318_vm2, %v4412_v33, %v4413_v28  ;;  %v11792_v32 = vsel %vm3450_vm12, %v4300_v54, %v4301_v6 }
 0x477   : > { %13529 = vst [vmem:[#allocation76_spill] sm:$0xff] %v11792_v32  ;;  %v4167_v48 = vadd.f32 %v4166_v18, %v4006_v30  ;;  %v8375_v9 = vadd.f32 %v8374_v39, %v8373_v2  ;;  %v4270_v7 = vsel %vm4206_vm6, %v4164_v42, %v4238_v41 }
 0x478   : > { %v8376_v3 = vpop.f32.mrf.mxu1  ;;  %v4302_v58 = vrot.slane %v4270_v7, 4  ;;  %v4414_v4 = vrot.slane %v4270_v7, 6 }
 0x479   : > { %v4239_v63 = vmul.f32 0.01, %v4167_v48  ;;  %v4011_v33 = vadd.f32 %v8375_v9, %v11457_v44  ;;  %vm4207_vm7 = vcmp.gt.f32.partialorder %v4167_v48, 0.0 }
 0x47a   : > { %v8377_v37 = vpop.f32.mrf.mxu1  ;;  %v4421_v54 = vsel %vm1318_vm2, %v4413_v28, %v4414_v4  ;;  %v4309_v41 = vsel %vm3450_vm12, %v4301_v6, %v4302_v58 }
 0x47b   : > { %v4172_v39 = vadd.f32 %v11750_v51, %v4011_v33  ;;  %v8378_v18 = vadd.f32 %v8377_v37, %v8376_v3  ;;  %v4271_v42 = vsel %vm4207_vm7, %v4167_v48, %v4239_v63  ;;  %v11805_v43 = vmul.f32 %v10327_v26, %v4421_v54 }
 0x47c   : > { %v4303_v2 = vrot.slane %v4271_v42, 4  ;;  %v4415_v30 = vrot.slane %v4271_v42, 6  ;;  %v4512_v53 = vpack.c.bf16 %v4271_v42, %v4270_v7  ;;  %v11809_v32 = vmul.f32 %v11435_v57, %v4309_v41 }
 0x47d   : > { %vm4208_vm3 = vcmp.gt.f32.partialorder %v4172_v39, 0.0  ;;  %v4240_v9 = vmul.f32 0.01, %v4172_v39  ;;  %v4014_v1 = vadd.f32 %v8378_v18, %v11457_v44  ;;  %v13530_v37 = vrot.slane %v11461_v20, 4 }
 0x47e   : > { %9080 = vmatprep.mubr.bf16.mxu1 %v4512_v53  ;;  %v11813_v28 = vsel %vm1318_vm2, %v4414_v4, %v4415_v30  ;;  %v11817_v51 = vsel %vm3450_vm12, %v4302_v58, %v4303_v2  ;;  %v13531_v41 = vrot.slane %v11461_v20, 6 }
 0x47f   : > { %v4272_v6 = vsel %vm4208_vm3, %v4172_v39, %v4240_v9  ;;  %v4175_v48 = vadd.f32 %v9035_v56, %v4014_v1  ;;  %v4496_v26 = vpack.c.bf16 %v11813_v28, %v11805_v43  ;;  %v4384_v44 = vpack.c.bf16 %v11817_v51, %v11809_v32  ;;  %v9457_v43 = vld [vmem:[#allocation6 + $0x360] sm:$0xff]   ;;  %v9459_v32 = vld [vmem:[#allocation6 + $0x358] sm:$0xff]  }
 0x480   : > { %v4304_v7 = vrot.slane %v4272_v6, 4  ;;  %v4416_v3 = vrot.slane %v4272_v6, 6  ;;  %v9458_v28 = vld [vmem:[#allocation6 + $0x320] sm:$0xff]   ;;  %v9460_v51 = vld [vmem:[#allocation6 + $0x318] sm:$0xff]  }
 0x481   : > { %vm4209_vm8 = vcmp.gt.f32.partialorder %v4175_v48, 0.0  ;;  %v4241_v53 = vmul.f32 0.01, %v4175_v48 }
 0x482   : > { %v11825_v4 = vsel %vm1318_vm2, %v4415_v30, %v4416_v3  ;;  %v11829_v58 = vsel %vm3450_vm12, %v4303_v2, %v4304_v7 }
 0x483   : > { %v4273_v63 = vsel %vm4209_vm8, %v4175_v48, %v4241_v53  ;;  %v13535_v53 = vpack.c.bf16 %v11522_v21, %v11525_v61  ;;  %v13545_v21 = vld [vmem:[#allocation28_spill] sm:$0xff]  ;;  %v13546_v61 = vld [vmem:[#allocation26_spill] sm:$0xff] }
 0x484   : > { %v4305_v56 = vrot.slane %v4273_v63, 4  ;;  %v4513_v1 = vpack.c.bf16 %v4273_v63, %v4272_v6  ;;  %v4417_v33 = vrot.slane %v4273_v63, 6  ;;  %v13562_v63 = vld [vmem:[#allocation67_spill] sm:$0xff] }
 0x486   : > { %v4337_v54 = vsel %vm3450_vm12, %v4305_v56, %v13530_v37  ;;  %9081 = vmatmul.mubr.bf16.gmra.mxu1 %v4513_v1  ;;  %v4449_v39 = vsel %vm1318_vm2, %v4417_v33, %v13531_v41  ;;  %v4418_v18 = vsel %vm1318_vm2, %v4416_v3, %v4417_v33  ;;  %v4306_v42 = vsel %vm3450_vm12, %v4304_v7, %v4305_v56  ;;  %v13563_v56 = vld [vmem:[#allocation68_spill] sm:$0xff]  ;;  %v13565_v33 = vld [vmem:[#allocation71_spill] sm:$0xff]  ;;  %v13566_v37 = vld [vmem:[#allocation69_spill] sm:$0xff] }
 0x487   : > { %v4338_v2 = vmul.f32 %v11203_v15, %v4337_v54  ;;  %v4450_v30 = vmul.f32 %v13406_v27, %v4449_v39  ;;  %v4497_v9 = vpack.c.bf16 %v4418_v18, %v11825_v4  ;;  %v4385_v6 = vpack.c.bf16 %v4306_v42, %v11829_v58  ;;  %v13568_v41 = vld [vmem:[#allocation72_spill] sm:$0xff]  ;;  %v13569_v39 = vld [vmem:[#allocation70_spill] sm:$0xff]  ;;  %v9447_v42 = vld [vmem:[#allocation6 + $0x398] sm:$0xff]  }
 0x488   : > { %v13532_v3 = vpack.c.bf16 %v11494_v29, %v11485_v23  ;;  %v13533_v7 = vpack.c.bf16 %v11498_v34, %v11489_v11  ;;  %v13534_v27 = vpack.c.bf16 %v11518_v47, %v11514_v40  ;;  %v13538_v11 = vpack.c.bf16 %v11567_v12, %v11563_v46  ;;  %v13543_v47 = vld [vmem:[#allocation29_spill] sm:$0xff] }
 0x489   : > { %v4482_v48 = vpack.c.bf16 %v11480_v38, %v4450_v30  ;;  %v4370_v20 = vpack.c.bf16 %v11474_v22, %v4338_v2  ;;  %v13536_v22 = vpack.c.bf16 %v11543_v19, %v11534_v5  ;;  %v13537_v38 = vpack.c.bf16 %v11547_v45, %v11538_v62  ;;  %v13548_v62 = vld [vmem:[#allocation32_spill] sm:$0xff]  ;;  %v13549_v19 = vld [vmem:[#allocation30_spill] sm:$0xff]  ;;  %v13572_v30 = vld [vmem:[#allocation73_spill] sm:$0xff] }
 0x48a   : > { %v13539_v40 = vpack.c.bf16 %v11571_v60, %v11574_v0  ;;  %v13540_v23 = vpack.c.bf16 %v11592_v50, %v11583_v25  ;;  %v13541_v29 = vpack.c.bf16 %v11596_v31, %v11587_v8  ;;  %v13542_v34 = vpack.c.bf16 %v11616_v59, %v11612_v36  ;;  %v9443_v60 = vld [vmem:[#allocation6 + $0x3b8] sm:$0xff]   ;;  %v13552_v0 = vld [vmem:[#allocation31_spill] sm:$0xff]  ;;  %v13558_v59 = vld [vmem:[#allocation66_spill] sm:$0xff] }
 0x48b   : > { %4743 = vmatprep.mubr.bf16.mxu0 %v4482_v48  ;;  %v13544_v46 = vpack.c.bf16 %v11620_v49, %v13543_v47  ;;  %v13547_v5 = vpack.c.bf16 %v13545_v21, %v13546_v61  ;;  %v13550_v45 = vpack.c.bf16 %v13548_v62, %v13549_v19  ;;  %v13551_v12 = vpack.c.bf16 %v11665_v17, %v11661_v16  ;;  %v13553_v36 = vld [vmem:[#allocation33_spill] sm:$0xff]  ;;  %v13556_v50 = vld [vmem:[#allocation63_spill] sm:$0xff]  ;;  %v13559_v49 = vld [vmem:[#allocation64_spill] sm:$0xff] }
 0x48c   : > { %4744 = vmatmul.mubr.bf16.vlgmr.msra.gmra.mxu0 %v4370_v20  ;;  %v13554_v25 = vpack.c.bf16 %v13552_v0, %v13553_v36  ;;  %9084 = vmatprep.subr.bf16.mxu0 %v9443_v60  ;;  %v13555_v8 = vld [vmem:[#allocation65_spill] sm:$0xff]  ;;  %v13560_v4 = vpack.c.bf16 %v13558_v59, %v13559_v49  ;;  %v13561_v58 = vpack.c.bf16 %v11714_v35, %v11710_v55  ;;  %v9444_v16 = vld [vmem:[#allocation6 + $0x3b0] sm:$0xff]   ;;  %v9445_v17 = vld [vmem:[#allocation6 + $0x3a8] sm:$0xff]  }
 0x48d   : > { %4751 = vmatprep.mubr.bf16.mxu0 %v13532_v3  ;;  %v13557_v31 = vpack.c.bf16 %v13555_v8, %v13556_v50  ;;  %9085 = vmatpush3.bf16.msra.mxu0 %v9443_v60  ;;  %v13564_v1 = vpack.c.bf16 %v13562_v63, %v13563_v56  ;;  %v13567_v54 = vpack.c.bf16 %v13565_v33, %v13566_v37  ;;  %v9446_v55 = vld [vmem:[#allocation6 + $0x3a0] sm:$0xff]   ;;  %v9448_v2 = vld [vmem:[#allocation6 + $0x390] sm:$0xff]   ;;  %v9449_v3 = vld [vmem:[#allocation6 + $0x388] sm:$0xff]  }
 0x48e   : > { %9086 = vmatprep.subr.bf16.mxu0 %v9444_v16  ;;  %v13570_v18 = vpack.c.bf16 %v13568_v41, %v13569_v39  ;;  %v13571_v35 = vpack.c.bf16 %v11763_v10, %v11759_v24  ;;  %v13573_v48 = vld [vmem:[#allocation74_spill] sm:$0xff]  ;;  %v13576_v10 = vld [vmem:[#allocation76_spill] sm:$0xff]  ;;  %v9463_v0 = vld [vmem:[#allocation6 + $0x348] sm:$0xff]  }
 0x48f   : > { %v13574_v20 = vpack.c.bf16 %v13572_v30, %v13573_v48  ;;  %v9450_v24 = vld [vmem:[#allocation6 + $0x380] sm:$0xff]   ;;  %v9461_v21 = vld [vmem:[#allocation6 + $0x350] sm:$0xff]   ;;  %v9464_v36 = vld [vmem:[#allocation6 + $0x308] sm:$0xff]  }
 0x490   : > { %v9462_v61 = vld [vmem:[#allocation6 + $0x310] sm:$0xff]  }
 0x491   : > { %9087 = vmatpush3.bf16.msra.mxu0 %v9444_v16  ;;  %v9466_v16 = vld [vmem:[#allocation6 + $0x300] sm:$0xff]   ;;  %v13579_v63 = vld [vmem:[#allocation20_spill] sm:$0xff] }
 0x492   : > { %9088 = vmatprep.subr.bf16.mxu0 %v9445_v17 }
 0x494   : > { %4752 = vmatmul.mubr.bf16.gmra.mxu0 %v13533_v7  ;;  %v13575_v7 = vpack.c.bf16 %v11788_v52, %v11779_v13  ;;  %v9451_v13 = vld [vmem:[#allocation6 + $0x378] sm:$0xff]  }
 0x495   : > { %4759 = vmatprep.mubr.bf16.mxu0 %v13534_v27  ;;  %9089 = vmatpush3.bf16.msra.mxu0 %v9445_v17  ;;  %v13577_v27 = vld [vmem:[#allocation75_spill] sm:$0xff]  ;;  %v9452_v52 = vld [vmem:[#allocation6 + $0x338] sm:$0xff]  }
 0x496   : > { %9090 = vmatprep.subr.bf16.mxu0 %v9446_v55  ;;  %8539 = vmatprep.subr.bf16.mxu1 %v9451_v13 }
 0x497   : > { %8540 = vmatpush3.bf16.msra.mxu1 %v9452_v52 }
 0x499   : > { %9091 = vmatpush3.bf16.msra.mxu0 %v9446_v55 }
 0x49a   : > { %9092 = vmatprep.subr.bf16.mxu0 %v9447_v42 }
 0x49c   : > { %4760 = vmatmul.mubr.bf16.gmra.mxu0 %v13535_v53  ;;  %v13578_v53 = vpack.c.bf16 %v13576_v10, %v13577_v27 }
 0x49d   : > { %4767 = vmatprep.mubr.bf16.mxu0 %v13536_v22  ;;  %9093 = vmatpush3.bf16.msra.mxu0 %v9447_v42  ;;  %v9453_v22 = vld [vmem:[#allocation6 + $0x370] sm:$0xff]  }
 0x49e   : > { %9094 = vmatprep.subr.bf16.mxu0 %v9448_v2  ;;  %8541 = vmatprep.subr.bf16.mxu1 %v9453_v22 }
 0x4a1   : > { %9095 = vmatpush3.bf16.msra.mxu0 %v9448_v2 }
 0x4a2   : > { %9096 = vmatprep.subr.bf16.mxu0 %v9449_v3 }
 0x4a4   : > { %4768 = vmatmul.mubr.bf16.gmra.mxu0 %v13537_v38  ;;  %v9454_v38 = vld [vmem:[#allocation6 + $0x330] sm:$0xff]  }
 0x4a5   : > { %4775 = vmatprep.mubr.bf16.mxu0 %v13538_v11  ;;  %9097 = vmatpush3.bf16.msra.mxu0 %v9449_v3  ;;  %v9455_v11 = vld [vmem:[#allocation6 + $0x368] sm:$0xff]  }
 0x4a6   : > { %9098 = vmatprep.subr.bf16.mxu0 %v9450_v24  ;;  %8542 = vmatpush3.bf16.msra.mxu1 %v9454_v38 }
 0x4a7   : > { %8543 = vmatprep.subr.bf16.mxu1 %v9455_v11 }
 0x4a9   : > { %9099 = vmatpush3.bf16.msra.mxu0 %v9450_v24 }
 0x4ac   : > { %4776 = vmatmul.mubr.bf16.gmra.mxu0 %v13539_v40  ;;  %v9456_v40 = vld [vmem:[#allocation6 + $0x328] sm:$0xff]  }
 0x4ad   : > { %4783 = vmatprep.mubr.bf16.mxu0 %v13540_v23  ;;  %8544 = vmatpush3.bf16.msra.mxu1 %v9456_v40 }
 0x4ae   : > { %8545 = vmatprep.subr.bf16.mxu1 %v9457_v43 }
 0x4b1   : > { %8546 = vmatpush3.bf16.msra.mxu1 %v9458_v28 }
 0x4b2   : > { %8547 = vmatprep.subr.bf16.mxu1 %v9459_v32 }
 0x4b4   : > { %4784 = vmatmul.mubr.bf16.gmra.mxu0 %v13541_v29 }
 0x4b5   : > { %4791 = vmatprep.mubr.bf16.mxu0 %v13542_v34  ;;  %8548 = vmatpush3.bf16.msra.mxu1 %v9460_v51 }
 0x4b6   : > { %8549 = vmatprep.subr.bf16.mxu1 %v9461_v21 }
 0x4b9   : > { %8550 = vmatpush3.bf16.msra.mxu1 %v9462_v61 }
 0x4ba   : > { %8551 = vmatprep.subr.bf16.mxu1 %v9463_v0 }
 0x4bc   : > { %4792 = vmatmul.mubr.bf16.gmra.mxu0 %v13544_v46 }
 0x4bd   : > { %4799 = vmatprep.mubr.bf16.mxu0 %v13547_v5  ;;  %8552 = vmatpush3.bf16.msra.mxu1 %v9464_v36 }
 0x4c4   : > { %4800 = vmatmul.mubr.bf16.gmra.mxu0 %v13550_v45 }
 0x4c5   : > { %4807 = vmatprep.mubr.bf16.mxu0 %v13551_v12 }
 0x4cc   : > { %4808 = vmatmul.mubr.bf16.gmra.mxu0 %v13554_v25  ;;  %v9465_v25 = vld [vmem:[#allocation6 + $0x340] sm:$0xff]  }
 0x4cd   : > { %4815 = vmatprep.mubr.bf16.mxu0 %v13557_v31  ;;  %8553 = vmatprep.subr.bf16.mxu1 %v9465_v25 }
 0x4ce   : > { %8554 = vmatpush3.bf16.msra.mxu1 %v9466_v16 }
 0x4d4   : > { %4816 = vmatmul.mubr.bf16.gmra.mxu0 %v13560_v4 }
 0x4d5   : > { %4823 = vmatprep.mubr.bf16.mxu0 %v13561_v58 }
 0x4dc   : > { %4824 = vmatmul.mubr.bf16.gmra.mxu0 %v13564_v1 }
 0x4dd   : > { %4831 = vmatprep.mubr.bf16.mxu0 %v13567_v54 }
 0x4e4   : > { %4832 = vmatmul.mubr.bf16.gmra.mxu0 %v13570_v18 }
 0x4e5   : > { %4839 = vmatprep.mubr.bf16.mxu0 %v13571_v35  ;;  %v13580_v35 = vld [vmem:[#allocation19_spill] sm:$0xff] }
 0x4ec   : > { %4840 = vmatmul.mubr.bf16.gmra.mxu0 %v13574_v20 }
 0x4ed   : > { %4847 = vmatprep.mubr.bf16.mxu0 %v13575_v7 }
 0x4f4   : > { %4848 = vmatmul.mubr.bf16.gmra.mxu0 %v13578_v53  ;;  %v13581_v53 = vld [vmem:[#allocation34_spill] sm:$0xff] }
 0x4f5   : > { %4855 = vmatprep.mubr.bf16.mxu0 %v4496_v26  ;;  %v4565_v26 = vsub.s32 3, %v9960_v14 }
 0x4fc   : > { %4856 = vmatmul.mubr.bf16.gmra.mxu0 %v4384_v44  ;;  %v9054_v44 = vpop.f32.mrf.mxu1 }
 0x4fd   : > { %4863 = vmatprep.mubr.bf16.mxu0 %v4497_v9 }
 0x4fe   : > { %v4906_v29 = vpop.f32.mrf.mxu1 }
 0x500   : > { %v9055_v62 = vpop.f32.mrf.mxu1 }
 0x502   : > { %v4909_v31 = vpop.f32.mrf.mxu1 }
 0x504   : > { %4864 = vmatmul.mubr.bf16.gmra.mxu0 %v4385_v6  ;;  %v9528_v6 = vld [vmem:[#allocation8] sm:$0x3f]  ;;  %v11940_v37 = vpop.f32.mrf.mxu1 }
 0x505   : > { %v11934_v23 = vrot.slane %v9528_v6, %v4565_v26 }
 0x506   : > { %v4922_v20 = vpop.f32.mrf.mxu1 }
 0x508   : > { %v9059_v43 = vpop.f32.mrf.mxu1 }
 0x54c   : > { %v8419_v9 = vpop.f32.mrf.mxu0 }
 0x54e   : > { %v8420_v34 = vpop.f32.mrf.mxu0 }
 0x54f   : > { %v8421_v47 = vadd.f32 %v8420_v34, %v8419_v9 }
 0x550   : > { %v8422_v46 = vpop.f32.mrf.mxu0 }
 0x551   : > { %v4746_v5 = vadd.f32 %v8421_v47, %v11934_v23 }
 0x552   : > { %v8423_v19 = vpop.f32.mrf.mxu0 }
 0x553   : > { %v4907_v45 = vadd.f32 %v4906_v29, %v4746_v5  ;;  %v8424_v12 = vadd.f32 %v8423_v19, %v8422_v46  ;;  %v13583_v29 = vld [vmem:[#allocation36_spill] sm:$0xff] }
 0x554   : > { %v8425_v60 = vpop.f32.mrf.mxu0 }
 0x555   : > { %vm5033_vm2 = vcmp.gt.f32.partialorder %v4907_v45, 0.0  ;;  %v5065_v8 = vmul.f32 0.01, %v4907_v45  ;;  %v4749_v50 = vadd.f32 %v8424_v12, %v11934_v23 }
 0x556   : > { %v8426_v59 = vpop.f32.mrf.mxu0 }
 0x557   : > { %v5097_v49 = vsel %vm5033_vm2, %v4907_v45, %v5065_v8  ;;  %v4910_v4 = vadd.f32 %v4909_v31, %v4749_v50  ;;  %v8427_v58 = vadd.f32 %v8426_v59, %v8425_v60  ;;  %v13584_v50 = vld [vmem:[#allocation35_spill] sm:$0xff] }
 0x558   : > { %v8428_v17 = vpop.f32.mrf.mxu0  ;;  %v5129_v56 = vadd.f32 %v5097_v49, %v13579_v63 }
 0x559   : > { %vm5034_vm9 = vcmp.gt.f32.partialorder %v4910_v4, 0.0  ;;  %v5066_v1 = vmul.f32 0.01, %v4910_v4  ;;  %v4754_v33 = vadd.f32 %v8427_v58, %v11934_v23 }
 0x55a   : > { %v8429_v54 = vpop.f32.mrf.mxu0  ;;  %v5193_v48 = vmul.f32 0.01, %v5129_v56  ;;  %vm5161_vm11 = vcmp.gt.f32.partialorder %v5129_v56, 0.0 }
 0x55b   : > { %v5098_v41 = vsel %vm5034_vm9, %v4910_v4, %v5066_v1  ;;  %v4915_v39 = vadd.f32 %v9054_v44, %v4754_v33  ;;  %v8430_v18 = vadd.f32 %v8429_v54, %v8428_v17 }
 0x55c   : > { %v8431_v55 = vpop.f32.mrf.mxu0  ;;  %v5130_v42 = vadd.f32 %v5098_v41, %v13580_v35  ;;  %v11948_v40 = vsel %vm5161_vm11, %v5129_v56, %v5193_v48 }
 0x55d   : > { %vm5035_vm10 = vcmp.gt.f32.partialorder %v4915_v39, 0.0  ;;  %v5067_v2 = vmul.f32 0.01, %v4915_v39  ;;  %v4757_v30 = vadd.f32 %v8430_v18, %v11934_v23 }
 0x55e   : > { %v8432_v3 = vpop.f32.mrf.mxu0  ;;  %vm5162_vm13 = vcmp.gt.f32.partialorder %v5130_v42, 0.0  ;;  %v5194_v7 = vmul.f32 0.01, %v5130_v42 }
 0x55f   : > { %v5099_v24 = vsel %vm5035_vm10, %v4915_v39, %v5067_v2  ;;  %v4918_v10 = vadd.f32 %v9055_v62, %v4757_v30  ;;  %v8433_v27 = vadd.f32 %v8432_v3, %v8431_v55  ;;  %v4925_v62 = vpop.f32.mrf.mxu1  ;;  %v13586_v39 = vld [vmem:[#allocation37_spill] sm:$0xff] }
 0x560   : > { %v5131_v13 = vadd.f32 %v5099_v24, %v13581_v53  ;;  %v8434_v52 = vpop.f32.mrf.mxu0  ;;  %v11945_v22 = vsel %vm5162_vm13, %v5130_v42, %v5194_v7 }
 0x561   : > { %vm5036_vm14 = vcmp.gt.f32.partialorder %v4918_v10, 0.0  ;;  %v5068_v38 = vmul.f32 0.01, %v4918_v10  ;;  %v4762_v11 = vadd.f32 %v8433_v27, %v11934_v23  ;;  %v11952_v51 = vpack.c.bf16 %v11945_v22, %v11948_v40  ;;  %v11974_v16 = vpop.f32.mrf.mxu1 }
 0x562   : > { %vm5163_vm15 = vcmp.gt.f32.partialorder %v5131_v13, 0.0  ;;  %v5195_v28 = vmul.f32 0.01, %v5131_v13  ;;  %v8435_v32 = vpop.f32.mrf.mxu0  ;;  %v13301_v47 = vrot.slane %v11945_v22, 4 }
 0x563   : > { %13582 = vst [vmem:[#allocation29_spill] sm:$0xff] %v11952_v51  ;;  %v5100_v26 = vsel %vm5036_vm14, %v4918_v10, %v5068_v38  ;;  %v4923_v44 = vadd.f32 %v4922_v20, %v4762_v11  ;;  %v8436_v9 = vadd.f32 %v8435_v32, %v8434_v52  ;;  %9100 = vmatprep.mubr.bf16.mxu0 %v11952_v51  ;;  %v4938_v48 = vpop.f32.mrf.mxu1  ;;  %v13587_v52 = vld [vmem:[#allocation38_spill] sm:$0xff] }
 0x564   : > { %v11954_v6 = vsel %vm5163_vm15, %v5131_v13, %v5195_v28  ;;  %v5132_v34 = vadd.f32 %v5100_v26, %v13583_v29  ;;  %v8437_v46 = vpop.f32.mrf.mxu0 }
 0x565   : > { %vm5037_vm0 = vcmp.gt.f32.partialorder %v4923_v44, 0.0  ;;  %v5069_v21 = vmul.f32 0.01, %v4923_v44  ;;  %v4765_v61 = vadd.f32 %v8436_v9, %v11934_v23  ;;  %v5371_v5 = vrot.slane %v11954_v6, 4  ;;  %v9063_v9 = vpop.f32.mrf.mxu1 }
 0x566   : > { %vm5164_vm1 = vcmp.gt.f32.partialorder %v5132_v34, 0.0  ;;  %v5196_v19 = vmul.f32 0.01, %v5132_v34  ;;  %v8438_v45 = vpop.f32.mrf.mxu0 }
 0x567   : > { %v5101_v60 = vsel %vm5037_vm0, %v4923_v44, %v5069_v21  ;;  %v4926_v0 = vadd.f32 %v4925_v62, %v4765_v61  ;;  %v8439_v36 = vadd.f32 %v8438_v45, %v8437_v46  ;;  %v11967_v25 = vsel %vm3450_vm12, %v13301_v47, %v5371_v5  ;;  %v13589_v46 = vld [vmem:[#allocation23_spill] sm:$0xff]  ;;  %v13590_v45 = vld [vmem:[#allocation41_spill] sm:$0xff] }
 0x568   : > { %v5228_v8 = vsel %vm5164_vm1, %v5132_v34, %v5196_v19  ;;  %v5133_v31 = vadd.f32 %v5101_v60, %v13584_v50  ;;  %v8440_v59 = vpop.f32.mrf.mxu0 }
 0x569   : > { %vm5038_vm4 = vcmp.gt.f32.partialorder %v4926_v0, 0.0  ;;  %v5070_v49 = vmul.f32 0.01, %v4926_v0  ;;  %v4770_v4 = vadd.f32 %v8439_v36, %v11934_v23  ;;  %v11972_v58 = vpack.c.bf16 %v5228_v8, %v11954_v6 }
 0x56a   : > { %v8441_v17 = vpop.f32.mrf.mxu0  ;;  %vm5165_vm5 = vcmp.gt.f32.partialorder %v5133_v31, 0.0  ;;  %v5197_v63 = vmul.f32 0.01, %v5133_v31  ;;  %v5372_v56 = vrot.slane %v5228_v8, 4  ;;  %v11985_v42 = vmul.f32 0.0, %v5228_v8 }
 0x56b   : > { %13585 = vst [vmem:[#allocation28_spill] sm:$0xff] %v11972_v58  ;;  %v5102_v1 = vsel %vm5038_vm4, %v4926_v0, %v5070_v49  ;;  %v4931_v33 = vadd.f32 %v11940_v37, %v4770_v4  ;;  %v8442_v54 = vadd.f32 %v8441_v17, %v8440_v59  ;;  %9101 = vmatmul.mubr.bf16.vlgmr.msra.gmra.mxu0 %v11972_v58  ;;  %v4941_v49 = vpop.f32.mrf.mxu1 }
 0x56c   : > { %v8443_v41 = vpop.f32.mrf.mxu0  ;;  %v5134_v18 = vadd.f32 %v5102_v1, %v13586_v39  ;;  %v11979_v55 = vsel %vm5165_vm5, %v5133_v31, %v5197_v63  ;;  %v11983_v35 = vsel %vm3450_vm12, %v5371_v5, %v5372_v56 }
 0x56d   : > { %vm5039_vm6 = vcmp.gt.f32.partialorder %v4931_v33, 0.0  ;;  %v5071_v2 = vmul.f32 0.01, %v4931_v33  ;;  %v4773_v30 = vadd.f32 %v8442_v54, %v11934_v23  ;;  %v5373_v37 = vrot.slane %v11979_v55, 4 }
 0x56e   : > { %v8444_v20 = vpop.f32.mrf.mxu0  ;;  %vm5166_vm7 = vcmp.gt.f32.partialorder %v5134_v18, 0.0  ;;  %v5198_v3 = vmul.f32 0.01, %v5134_v18 }
 0x56f   : > { %v5103_v10 = vsel %vm5039_vm6, %v4931_v33, %v5071_v2  ;;  %v4934_v27 = vadd.f32 %v9059_v43, %v4773_v30  ;;  %v8445_v53 = vadd.f32 %v8444_v20, %v8443_v41  ;;  %v5428_v13 = vsel %vm3450_vm12, %v5372_v56, %v5373_v37  ;;  %v13591_v41 = vld [vmem:[#allocation42_spill] sm:$0xff]  ;;  %v12030_v20 = vpop.f32.mrf.mxu1 }
 0x570   : > { %v5135_v38 = vadd.f32 %v5103_v10, %v13587_v52  ;;  %v8446_v11 = vpop.f32.mrf.mxu0  ;;  %v11996_v28 = vsel %vm5166_vm7, %v5134_v18, %v5198_v3  ;;  %v12005_v21 = vmul.f32 %v13589_v46, %v5428_v13 }
 0x571   : > { %vm5040_vm3 = vcmp.gt.f32.partialorder %v4934_v27, 0.0  ;;  %v5072_v32 = vmul.f32 0.01, %v4934_v27  ;;  %v4778_v26 = vadd.f32 %v8445_v53, %v11934_v23  ;;  %v5374_v44 = vrot.slane %v11996_v28, 4 }
 0x572   : > { %v8447_v29 = vpop.f32.mrf.mxu0  ;;  %v12002_v43 = vpack.c.bf16 %v11996_v28, %v11979_v55  ;;  %vm5167_vm8 = vcmp.gt.f32.partialorder %v5135_v38, 0.0  ;;  %v5199_v34 = vmul.f32 0.01, %v5135_v38 }
 0x573   : > { %v5104_v61 = vsel %vm5040_vm3, %v4934_v27, %v5072_v32  ;;  %v4939_v5 = vadd.f32 %v4938_v48, %v4778_v26  ;;  %v8448_v62 = vadd.f32 %v8447_v29, %v8446_v11  ;;  %v12009_v19 = vsel %vm3450_vm12, %v5373_v37, %v5374_v44  ;;  %v13593_v11 = vld [vmem:[#allocation39_spill] sm:$0xff] }
 0x574   : > { %13588 = vst [vmem:[#allocation26_spill] sm:$0xff] %v12002_v43  ;;  %v5136_v60 = vadd.f32 %v5104_v61, %v13590_v45  ;;  %9104 = vmatprep.mubr.bf16.mxu0 %v12002_v43  ;;  %v8449_v0 = vpop.f32.mrf.mxu0  ;;  %v12013_v36 = vsel %vm5167_vm8, %v5135_v38, %v5199_v34 }
 0x575   : > { %vm5041_vm2 = vcmp.gt.f32.partialorder %v4939_v5, 0.0  ;;  %v5073_v50 = vmul.f32 0.01, %v4939_v5  ;;  %v4781_v31 = vadd.f32 %v8448_v62, %v11934_v23  ;;  %v5375_v59 = vrot.slane %v12013_v36, 4 }
 0x576   : > { %v8450_v4 = vpop.f32.mrf.mxu0  ;;  %vm5168_vm9 = vcmp.gt.f32.partialorder %v5136_v60, 0.0  ;;  %v5200_v17 = vmul.f32 0.01, %v5136_v60 }
 0x577   : > { %v5105_v56 = vsel %vm5041_vm2, %v4939_v5, %v5073_v50  ;;  %v4942_v1 = vadd.f32 %v4941_v49, %v4781_v31  ;;  %v8451_v33 = vadd.f32 %v8450_v4, %v8449_v0  ;;  %v12023_v54 = vsel %vm3450_vm12, %v5374_v44, %v5375_v59  ;;  %v4954_v5 = vpop.f32.mrf.mxu1  ;;  %v13594_v4 = vld [vmem:[#allocation40_spill] sm:$0xff] }
 0x578   : > { %v5137_v39 = vadd.f32 %v5105_v56, %v13591_v41  ;;  %v8452_v18 = vpop.f32.mrf.mxu0  ;;  %v5232_v2 = vsel %vm5168_vm9, %v5136_v60, %v5200_v17 }
 0x579   : > { %vm5042_vm10 = vcmp.gt.f32.partialorder %v4942_v1, 0.0  ;;  %v5074_v30 = vmul.f32 0.01, %v4942_v1  ;;  %v4786_v37 = vadd.f32 %v8451_v33, %v11934_v23  ;;  %v12028_v48 = vpack.c.bf16 %v5232_v2, %v12013_v36 }
 0x57a   : > { %v8453_v3 = vpop.f32.mrf.mxu0  ;;  %vm5169_vm11 = vcmp.gt.f32.partialorder %v5137_v39, 0.0  ;;  %v5201_v10 = vmul.f32 0.01, %v5137_v39  ;;  %v5376_v27 = vrot.slane %v5232_v2, 4  ;;  %v12041_v29 = vmul.f32 0.0, %v5232_v2 }
 0x57b   : > { %13592 = vst [vmem:[#allocation32_spill] sm:$0xff] %v12028_v48  ;;  %v5106_v53 = vsel %vm5042_vm10, %v4942_v1, %v5074_v30  ;;  %v4947_v13 = vadd.f32 %v11974_v16, %v4786_v37  ;;  %v8454_v52 = vadd.f32 %v8453_v3, %v8452_v18  ;;  %9105 = vmatmul.mubr.bf16.gmra.mxu0 %v12028_v48  ;;  %v9067_v18 = vpop.f32.mrf.mxu1  ;;  %v13596_v37 = vld [vmem:[#allocation18_spill] sm:$0xff] }
 0x57c   : > { %v8455_v38 = vpop.f32.mrf.mxu0  ;;  %v5138_v32 = vadd.f32 %v5106_v53, %v13593_v11  ;;  %v12035_v26 = vsel %vm5169_vm11, %v5137_v39, %v5201_v10  ;;  %v12039_v44 = vsel %vm3450_vm12, %v5375_v59, %v5376_v27 }
 0x57d   : > { %vm5043_vm13 = vcmp.gt.f32.partialorder %v4947_v13, 0.0  ;;  %v5075_v34 = vmul.f32 0.01, %v4947_v13  ;;  %v4789_v61 = vadd.f32 %v8454_v52, %v11934_v23  ;;  %v5377_v16 = vrot.slane %v12035_v26, 4  ;;  %v13597_v52 = vld [vmem:[#allocation43_spill] sm:$0xff] }
 0x57e   : > { %v8456_v62 = vpop.f32.mrf.mxu0  ;;  %vm5170_vm14 = vcmp.gt.f32.partialorder %v5138_v32, 0.0  ;;  %v5202_v45 = vmul.f32 0.01, %v5138_v32 }
 0x57f   : > { %v5107_v50 = vsel %vm5043_vm13, %v4947_v13, %v5075_v34  ;;  %v4950_v31 = vadd.f32 %v9063_v9, %v4789_v61  ;;  %v8457_v59 = vadd.f32 %v8456_v62, %v8455_v38  ;;  %v5424_v49 = vsel %vm3450_vm12, %v5376_v27, %v5377_v16 }
 0x580   : > { %v5139_v17 = vadd.f32 %v5107_v50, %v13594_v4  ;;  %v8458_v56 = vpop.f32.mrf.mxu0  ;;  %v12052_v1 = vsel %vm5170_vm14, %v5138_v32, %v5202_v45  ;;  %v12061_v3 = vmul.f32 %v13596_v37, %v5424_v49  ;;  %v4957_v45 = vpop.f32.mrf.mxu1 }
 0x581   : > { %vm5044_vm15 = vcmp.gt.f32.partialorder %v4950_v31, 0.0  ;;  %v5076_v33 = vmul.f32 0.01, %v4950_v31  ;;  %v4794_v41 = vadd.f32 %v8457_v59, %v11934_v23  ;;  %v5378_v39 = vrot.slane %v12052_v1, 4 }
 0x582   : > { %v8459_v2 = vpop.f32.mrf.mxu0  ;;  %v12058_v9 = vpack.c.bf16 %v12052_v1, %v12035_v26  ;;  %vm5171_vm0 = vcmp.gt.f32.partialorder %v5139_v17, 0.0  ;;  %v5203_v30 = vmul.f32 0.01, %v5139_v17 }
 0x583   : > { %v5108_v10 = vsel %vm5044_vm15, %v4950_v31, %v5076_v33  ;;  %v4955_v27 = vadd.f32 %v4954_v5, %v4794_v41  ;;  %v8460_v53 = vadd.f32 %v8459_v2, %v8458_v56  ;;  %v12065_v13 = vsel %vm3450_vm12, %v5377_v16, %v5378_v39  ;;  %v13598_v56 = vld [vmem:[#allocation47_spill] sm:$0xff] }
 0x584   : > { %13595 = vst [vmem:[#allocation30_spill] sm:$0xff] %v12058_v9  ;;  %v5140_v38 = vadd.f32 %v5108_v10, %v13597_v52  ;;  %9108 = vmatprep.mubr.bf16.mxu0 %v12058_v9  ;;  %v8461_v11 = vpop.f32.mrf.mxu0  ;;  %v12069_v32 = vsel %vm5171_vm0, %v5139_v17, %v5203_v30  ;;  %v12086_v52 = vpop.f32.mrf.mxu1 }
 0x585   : > { %vm5045_vm1 = vcmp.gt.f32.partialorder %v4955_v27, 0.0  ;;  %v5077_v61 = vmul.f32 0.01, %v4955_v27  ;;  %v4797_v62 = vadd.f32 %v8460_v53, %v11934_v23  ;;  %v5379_v5 = vrot.slane %v12069_v32, 4 }
 0x586   : > { %v8462_v50 = vpop.f32.mrf.mxu0  ;;  %vm5172_vm4 = vcmp.gt.f32.partialorder %v5140_v38, 0.0  ;;  %v5204_v16 = vmul.f32 0.01, %v5140_v38 }
 0x587   : > { %v5109_v59 = vsel %vm5045_vm1, %v4955_v27, %v5077_v61  ;;  %v4958_v49 = vadd.f32 %v4957_v45, %v4797_v62  ;;  %v8463_v4 = vadd.f32 %v8462_v50, %v8461_v11  ;;  %v12079_v17 = vsel %vm3450_vm12, %v5378_v39, %v5379_v5  ;;  %v13600_v50 = vld [vmem:[#allocation44_spill] sm:$0xff] }
 0x588   : > { %v5141_v33 = vadd.f32 %v5109_v59, %v13598_v56  ;;  %v8464_v41 = vpop.f32.mrf.mxu0  ;;  %v5236_v2 = vsel %vm5172_vm4, %v5140_v38, %v5204_v16 }
 0x589   : > { %vm5046_vm5 = vcmp.gt.f32.partialorder %v4958_v49, 0.0  ;;  %v5078_v30 = vmul.f32 0.01, %v4958_v49  ;;  %v4802_v10 = vadd.f32 %v8463_v4, %v11934_v23  ;;  %v12084_v53 = vpack.c.bf16 %v5236_v2, %v12069_v32 }
 0x58a   : > { %v8465_v27 = vpop.f32.mrf.mxu0  ;;  %vm5173_vm6 = vcmp.gt.f32.partialorder %v5141_v33, 0.0  ;;  %v5205_v11 = vmul.f32 0.01, %v5141_v33  ;;  %v5380_v61 = vrot.slane %v5236_v2, 4  ;;  %v12097_v56 = vmul.f32 0.0, %v5236_v2 }
 0x58b   : > { %13599 = vst [vmem:[#allocation31_spill] sm:$0xff] %v12084_v53  ;;  %v5110_v62 = vsel %vm5046_vm5, %v4958_v49, %v5078_v30  ;;  %v4963_v39 = vadd.f32 %v12030_v20, %v4802_v10  ;;  %v8466_v45 = vadd.f32 %v8465_v27, %v8464_v41  ;;  %9109 = vmatmul.mubr.bf16.gmra.mxu0 %v12084_v53  ;;  %v4970_v41 = vpop.f32.mrf.mxu1 }
 0x58c   : > { %v8467_v38 = vpop.f32.mrf.mxu0  ;;  %v5142_v16 = vadd.f32 %v5110_v62, %v13600_v50  ;;  %v12091_v59 = vsel %vm5173_vm6, %v5141_v33, %v5205_v11  ;;  %v12095_v4 = vsel %vm3450_vm12, %v5379_v5, %v5380_v61  ;;  %v13601_v50 = vld [vmem:[#allocation45_spill] sm:$0xff] }
 0x58d   : > { %vm5047_vm7 = vcmp.gt.f32.partialorder %v4963_v39, 0.0  ;;  %v5079_v31 = vmul.f32 0.01, %v4963_v39  ;;  %v4805_v49 = vadd.f32 %v8466_v45, %v11934_v23  ;;  %v5381_v20 = vrot.slane %v12091_v59, 4  ;;  %v9071_v24 = vpop.f32.mrf.mxu1 }
 0x58e   : > { %v8468_v30 = vpop.f32.mrf.mxu0  ;;  %vm5174_vm3 = vcmp.gt.f32.partialorder %v5142_v16, 0.0  ;;  %v5206_v10 = vmul.f32 0.01, %v5142_v16 }
 0x58f   : > { %v5111_v5 = vsel %vm5047_vm7, %v4963_v39, %v5079_v31  ;;  %v4966_v11 = vadd.f32 %v9067_v18, %v4805_v49  ;;  %v8469_v2 = vadd.f32 %v8468_v30, %v8467_v38  ;;  %v5420_v62 = vsel %vm3450_vm12, %v5380_v61, %v5381_v20  ;;  %v13603_v61 = vld [vmem:[#allocation25_spill] sm:$0xff] }
 0x590   : > { %v5143_v45 = vadd.f32 %v5111_v5, %v13601_v50  ;;  %v8470_v0 = vpop.f32.mrf.mxu0  ;;  %v12108_v34 = vsel %vm5174_vm3, %v5142_v16, %v5206_v10  ;;  %v12117_v39 = vmul.f32 %v13603_v61, %v5420_v62  ;;  %v13604_v10 = vld [vmem:[#allocation48_spill] sm:$0xff] }
 0x591   : > { %vm5048_vm8 = vcmp.gt.f32.partialorder %v4966_v11, 0.0  ;;  %v5080_v63 = vmul.f32 0.01, %v4966_v11  ;;  %v4810_v60 = vadd.f32 %v8469_v2, %v11934_v23  ;;  %v5382_v33 = vrot.slane %v12108_v34, 4 }
 0x592   : > { %v8471_v8 = vpop.f32.mrf.mxu0  ;;  %v12114_v18 = vpack.c.bf16 %v12108_v34, %v12091_v59  ;;  %vm5175_vm2 = vcmp.gt.f32.partialorder %v5143_v45, 0.0  ;;  %v5207_v31 = vmul.f32 0.01, %v5143_v45 }
 0x593   : > { %v5112_v38 = vsel %vm5048_vm8, %v4966_v11, %v5080_v63  ;;  %v4971_v16 = vadd.f32 %v4970_v41, %v4810_v60  ;;  %v8472_v49 = vadd.f32 %v8471_v8, %v8470_v0  ;;  %v12121_v30 = vsel %vm3450_vm12, %v5381_v20, %v5382_v33  ;;  %v4973_v60 = vpop.f32.mrf.mxu1 }
 0x594   : > { %13602 = vst [vmem:[#allocation33_spill] sm:$0xff] %v12114_v18  ;;  %v5144_v5 = vadd.f32 %v5112_v38, %v13604_v10  ;;  %9112 = vmatprep.mubr.bf16.mxu0 %v12114_v18  ;;  %v8473_v2 = vpop.f32.mrf.mxu0  ;;  %v12125_v50 = vsel %vm5175_vm2, %v5143_v45, %v5207_v31  ;;  %v13605_v10 = vld [vmem:[#allocation49_spill] sm:$0xff] }
 0x595   : > { %vm5049_vm9 = vcmp.gt.f32.partialorder %v4971_v16, 0.0  ;;  %v5081_v62 = vmul.f32 0.01, %v4971_v16  ;;  %v4813_v63 = vadd.f32 %v8472_v49, %v11934_v23  ;;  %v5383_v8 = vrot.slane %v12125_v50, 4  ;;  %v12142_v53 = vpop.f32.mrf.mxu1 }
 0x596   : > { %v8474_v0 = vpop.f32.mrf.mxu0  ;;  %vm5176_vm10 = vcmp.gt.f32.partialorder %v5144_v5, 0.0  ;;  %v5208_v20 = vmul.f32 0.01, %v5144_v5 }
 0x597   : > { %v5113_v11 = vsel %vm5049_vm9, %v4971_v16, %v5081_v62  ;;  %v4974_v38 = vadd.f32 %v4973_v60, %v4813_v63  ;;  %v8475_v45 = vadd.f32 %v8474_v0, %v8473_v2  ;;  %v12135_v31 = vsel %vm3450_vm12, %v5382_v33, %v5383_v8  ;;  %v13607_v0 = vld [vmem:[#allocation46_spill] sm:$0xff] }
 0x598   : > { %v5145_v27 = vadd.f32 %v5113_v11, %v13605_v10  ;;  %v8476_v12 = vpop.f32.mrf.mxu0  ;;  %v5240_v49 = vsel %vm5176_vm10, %v5144_v5, %v5208_v20 }
 0x599   : > { %vm5050_vm11 = vcmp.gt.f32.partialorder %v4974_v38, 0.0  ;;  %v5082_v7 = vmul.f32 0.01, %v4974_v38  ;;  %v4818_v47 = vadd.f32 %v8475_v45, %v11934_v23  ;;  %v12140_v18 = vpack.c.bf16 %v5240_v49, %v12125_v50 }
 0x59a   : > { %v8477_v16 = vpop.f32.mrf.mxu0  ;;  %vm5177_vm13 = vcmp.gt.f32.partialorder %v5145_v27, 0.0  ;;  %v5209_v2 = vmul.f32 0.01, %v5145_v27  ;;  %v5384_v62 = vrot.slane %v5240_v49, 4  ;;  %v12153_v10 = vmul.f32 0.0, %v5240_v49 }
 0x59b   : > { %13606 = vst [vmem:[#allocation65_spill] sm:$0xff] %v12140_v18  ;;  %v5114_v63 = vsel %vm5050_vm11, %v4974_v38, %v5082_v7  ;;  %v4979_v33 = vadd.f32 %v12086_v52, %v4818_v47  ;;  %v8478_v60 = vadd.f32 %v8477_v16, %v8476_v12  ;;  %9113 = vmatmul.mubr.bf16.gmra.mxu0 %v12140_v18  ;;  %v4986_v12 = vpop.f32.mrf.mxu1 }
 0x59c   : > { %v8479_v5 = vpop.f32.mrf.mxu0  ;;  %v5146_v20 = vadd.f32 %v5114_v63, %v13607_v0  ;;  %v12147_v11 = vsel %vm5177_vm13, %v5145_v27, %v5209_v2  ;;  %v12151_v45 = vsel %vm3450_vm12, %v5383_v8, %v5384_v62  ;;  %13608 = vst [vmem:[#allocation63_spill] sm:$0xff] %v12153_v10  ;;  %v13609_v0 = vld [vmem:[#allocation50_spill] sm:$0xff] }
 0x59d   : > { %vm5051_vm14 = vcmp.gt.f32.partialorder %v4979_v33, 0.0  ;;  %v5083_v41 = vmul.f32 0.01, %v4979_v33  ;;  %v4821_v7 = vadd.f32 %v8478_v60, %v11934_v23  ;;  %v5385_v47 = vrot.slane %v12147_v11, 4  ;;  %v9075_v58 = vpop.f32.mrf.mxu1 }
 0x59e   : > { %v8480_v52 = vpop.f32.mrf.mxu0  ;;  %vm5178_vm15 = vcmp.gt.f32.partialorder %v5146_v20, 0.0  ;;  %v5210_v38 = vmul.f32 0.01, %v5146_v20 }
 0x59f   : > { %v5115_v8 = vsel %vm5051_vm14, %v4979_v33, %v5083_v41  ;;  %v4982_v2 = vadd.f32 %v9071_v24, %v4821_v7  ;;  %v8481_v49 = vadd.f32 %v8480_v52, %v8479_v5  ;;  %v5416_v63 = vsel %vm3450_vm12, %v5384_v62, %v5385_v47  ;;  %v13612_v62 = vld [vmem:[#allocation21_spill] sm:$0xff] }
 0x5a0   : > { %v5147_v60 = vadd.f32 %v5115_v8, %v13609_v0  ;;  %v8482_v18 = vpop.f32.mrf.mxu0  ;;  %v12164_v9 = vsel %vm5178_vm15, %v5146_v20, %v5210_v38  ;;  %v12173_v33 = vmul.f32 %v13612_v62, %v5416_v63  ;;  %v13613_v38 = vld [vmem:[#allocation52_spill] sm:$0xff] }
 0x5a1   : > { %13610 = vst [vmem:[#allocation66_spill] sm:$0xff] %v12164_v9  ;;  %vm5052_vm0 = vcmp.gt.f32.partialorder %v4982_v2, 0.0  ;;  %v5084_v48 = vmul.f32 0.01, %v4982_v2  ;;  %v4826_v43 = vadd.f32 %v8481_v49, %v11934_v23  ;;  %v5386_v27 = vrot.slane %v12164_v9, 4 }
 0x5a2   : > { %v8483_v51 = vpop.f32.mrf.mxu0  ;;  %v12170_v24 = vpack.c.bf16 %v12164_v9, %v12147_v11  ;;  %vm5179_vm1 = vcmp.gt.f32.partialorder %v5147_v60, 0.0  ;;  %v5211_v41 = vmul.f32 0.01, %v5147_v60 }
 0x5a3   : > { %v5116_v5 = vsel %vm5052_vm0, %v4982_v2, %v5084_v48  ;;  %v4987_v20 = vadd.f32 %v4986_v12, %v4826_v43  ;;  %v8484_v7 = vadd.f32 %v8483_v51, %v8482_v18  ;;  %v12177_v52 = vsel %vm3450_vm12, %v5385_v47, %v5386_v27  ;;  %v4989_v43 = vpop.f32.mrf.mxu1 }
 0x5a4   : > { %13611 = vst [vmem:[#allocation64_spill] sm:$0xff] %v12170_v24  ;;  %v5148_v8 = vadd.f32 %v5116_v5, %v13613_v38  ;;  %9116 = vmatprep.mubr.bf16.mxu0 %v12170_v24  ;;  %v8485_v49 = vpop.f32.mrf.mxu0  ;;  %v12181_v0 = vsel %vm5179_vm1, %v5147_v60, %v5211_v41  ;;  %v13616_v38 = vld [vmem:[#allocation53_spill] sm:$0xff] }
 0x5a5   : > { %13614 = vst [vmem:[#allocation67_spill] sm:$0xff] %v12181_v0  ;;  %vm5053_vm4 = vcmp.gt.f32.partialorder %v4987_v20, 0.0  ;;  %v5085_v63 = vmul.f32 0.01, %v4987_v20  ;;  %v4829_v48 = vadd.f32 %v8484_v7, %v11934_v23  ;;  %v5387_v51 = vrot.slane %v12181_v0, 4  ;;  %v12198_v46 = vpop.f32.mrf.mxu1 }
 0x5a6   : > { %v8486_v18 = vpop.f32.mrf.mxu0  ;;  %vm5180_vm5 = vcmp.gt.f32.partialorder %v5148_v8, 0.0  ;;  %v5212_v47 = vmul.f32 0.01, %v5148_v8 }
 0x5a7   : > { %v5117_v2 = vsel %vm5053_vm4, %v4987_v20, %v5085_v63  ;;  %v4990_v5 = vadd.f32 %v4989_v43, %v4829_v48  ;;  %v8487_v60 = vadd.f32 %v8486_v18, %v8485_v49  ;;  %v12191_v41 = vsel %vm3450_vm12, %v5386_v27, %v5387_v51  ;;  %v13618_v18 = vld [vmem:[#allocation51_spill] sm:$0xff] }
 0x5a8   : > { %13615 = vst [vmem:[#allocation68_spill] sm:$0xff] %v12191_v41  ;;  %v5149_v16 = vadd.f32 %v5117_v2, %v13616_v38  ;;  %v8488_v24 = vpop.f32.mrf.mxu0  ;;  %v5244_v7 = vsel %vm5180_vm5, %v5148_v8, %v5212_v47 }
 0x5a9   : > { %vm5054_vm6 = vcmp.gt.f32.partialorder %v4990_v5, 0.0  ;;  %v5086_v62 = vmul.f32 0.01, %v4990_v5  ;;  %v4834_v61 = vadd.f32 %v8487_v60, %v11934_v23  ;;  %v12196_v37 = vpack.c.bf16 %v5244_v7, %v12181_v0 }
 0x5aa   : > { %v8489_v20 = vpop.f32.mrf.mxu0  ;;  %vm5181_vm7 = vcmp.gt.f32.partialorder %v5149_v16, 0.0  ;;  %v5213_v49 = vmul.f32 0.01, %v5149_v16  ;;  %v5388_v63 = vrot.slane %v5244_v7, 4  ;;  %v12209_v38 = vmul.f32 0.0, %v5244_v7 }
 0x5ab   : > { %13617 = vst [vmem:[#allocation71_spill] sm:$0xff] %v12196_v37  ;;  %v5118_v48 = vsel %vm5054_vm6, %v4990_v5, %v5086_v62  ;;  %v4995_v27 = vadd.f32 %v12142_v53, %v4834_v61  ;;  %v8490_v43 = vadd.f32 %v8489_v20, %v8488_v24  ;;  %9117 = vmatmul.mubr.bf16.gmra.mxu0 %v12196_v37  ;;  %v5002_v61 = vpop.f32.mrf.mxu1 }
 0x5ac   : > { %v8491_v8 = vpop.f32.mrf.mxu0  ;;  %v5150_v47 = vadd.f32 %v5118_v48, %v13618_v18  ;;  %v12203_v2 = vsel %vm5181_vm7, %v5149_v16, %v5213_v49  ;;  %v12207_v60 = vsel %vm3450_vm12, %v5387_v51, %v5388_v63  ;;  %13621 = vst [vmem:[#allocation70_spill] sm:$0xff] %v12209_v38  ;;  %v13622_v18 = vld [vmem:[#allocation54_spill] sm:$0xff] }
 0x5ad   : > { %13619 = vst [vmem:[#allocation69_spill] sm:$0xff] %v12203_v2  ;;  %13620 = vst [vmem:[#allocation72_spill] sm:$0xff] %v12207_v60  ;;  %vm5055_vm3 = vcmp.gt.f32.partialorder %v4995_v27, 0.0  ;;  %v5087_v12 = vmul.f32 0.01, %v4995_v27  ;;  %v4837_v62 = vadd.f32 %v8490_v43, %v11934_v23  ;;  %v5389_v53 = vrot.slane %v12203_v2, 4  ;;  %v9079_v41 = vpop.f32.mrf.mxu1 }
 0x5ae   : > { %v8492_v24 = vpop.f32.mrf.mxu0  ;;  %vm5182_vm8 = vcmp.gt.f32.partialorder %v5150_v47, 0.0  ;;  %v5214_v5 = vmul.f32 0.01, %v5150_v47 }
 0x5af   : > { %v5119_v51 = vsel %vm5055_vm3, %v4995_v27, %v5087_v12  ;;  %v4998_v49 = vadd.f32 %v9075_v58, %v4837_v62  ;;  %v8493_v7 = vadd.f32 %v8492_v24, %v8491_v8  ;;  %v5412_v48 = vsel %vm3450_vm12, %v5388_v63, %v5389_v53  ;;  %v13625_v63 = vld [vmem:[#allocation27_spill] sm:$0xff] }
 0x5b0   : > { %v5151_v43 = vadd.f32 %v5119_v51, %v13622_v18  ;;  %v8494_v37 = vpop.f32.mrf.mxu0  ;;  %v12220_v9 = vsel %vm5182_vm8, %v5150_v47, %v5214_v5  ;;  %v12229_v27 = vmul.f32 %v13625_v63, %v5412_v48  ;;  %v13628_v5 = vld [vmem:[#allocation55_spill] sm:$0xff] }
 0x5b1   : > { %13623 = vst [vmem:[#allocation73_spill] sm:$0xff] %v12220_v9  ;;  %vm5056_vm2 = vcmp.gt.f32.partialorder %v4998_v49, 0.0  ;;  %v5088_v0 = vmul.f32 0.01, %v4998_v49  ;;  %v4842_v10 = vadd.f32 %v8493_v7, %v11934_v23  ;;  %v5390_v16 = vrot.slane %v12220_v9, 4 }
 0x5b2   : > { %v8495_v60 = vpop.f32.mrf.mxu0  ;;  %v12226_v58 = vpack.c.bf16 %v12220_v9, %v12203_v2  ;;  %vm5183_vm9 = vcmp.gt.f32.partialorder %v5151_v43, 0.0  ;;  %v5215_v12 = vmul.f32 0.01, %v5151_v43  ;;  %13626 = vst [vmem:[#allocation76_spill] sm:$0xff] %v12229_v27 }
 0x5b3   : > { %v5120_v8 = vsel %vm5056_vm2, %v4998_v49, %v5088_v0  ;;  %v5003_v47 = vadd.f32 %v5002_v61, %v4842_v10  ;;  %v8496_v62 = vadd.f32 %v8495_v60, %v8494_v37  ;;  %v12233_v24 = vsel %vm3450_vm12, %v5389_v53, %v5390_v16  ;;  %v5005_v10 = vpop.f32.mrf.mxu1 }
 0x5b4   : > { %13624 = vst [vmem:[#allocation74_spill] sm:$0xff] %v12226_v58  ;;  %13627 = vst [vmem:[#allocation75_spill] sm:$0xff] %v12233_v24  ;;  %v5152_v51 = vadd.f32 %v5120_v8, %v13628_v5  ;;  %9120 = vmatprep.mubr.bf16.mxu0 %v12226_v58  ;;  %v8497_v7 = vpop.f32.mrf.mxu0  ;;  %v12237_v18 = vsel %vm5183_vm9, %v5151_v43, %v5215_v12  ;;  %v13631_v5 = vld [vmem:[#allocation57_spill] sm:$0xff] }
 0x5b5   : > { %13629 = vst [vmem:[#allocation20_spill] sm:$0xff] %v12237_v18  ;;  %vm5057_vm10 = vcmp.gt.f32.partialorder %v5003_v47, 0.0  ;;  %v5089_v48 = vmul.f32 0.01, %v5003_v47  ;;  %v4845_v0 = vadd.f32 %v8496_v62, %v11934_v23  ;;  %v5391_v37 = vrot.slane %v12237_v18, 4  ;;  %v12254_v27 = vpop.f32.mrf.mxu1 }
 0x5b6   : > { %v8498_v60 = vpop.f32.mrf.mxu0  ;;  %vm5184_vm11 = vcmp.gt.f32.partialorder %v5152_v51, 0.0  ;;  %v5216_v53 = vmul.f32 0.01, %v5152_v51 }
 0x5b7   : > { %v5121_v49 = vsel %vm5057_vm10, %v5003_v47, %v5089_v48  ;;  %v5006_v8 = vadd.f32 %v5005_v10, %v4845_v0  ;;  %v8499_v43 = vadd.f32 %v8498_v60, %v8497_v7  ;;  %v12247_v12 = vsel %vm3450_vm12, %v5390_v16, %v5391_v37  ;;  %v13633_v60 = vld [vmem:[#allocation56_spill] sm:$0xff] }
 0x5b8   : > { %13630 = vst [vmem:[#allocation19_spill] sm:$0xff] %v12247_v12  ;;  %v5153_v20 = vadd.f32 %v5121_v49, %v13631_v5  ;;  %v8500_v58 = vpop.f32.mrf.mxu0  ;;  %v5248_v62 = vsel %vm5184_vm11, %v5152_v51, %v5216_v53 }
 0x5b9   : > { %vm5058_vm13 = vcmp.gt.f32.partialorder %v5006_v8, 0.0  ;;  %v5090_v63 = vmul.f32 0.01, %v5006_v8  ;;  %v4850_v38 = vadd.f32 %v8499_v43, %v11934_v23  ;;  %v12252_v2 = vpack.c.bf16 %v5248_v62, %v12237_v18 }
 0x5ba   : > { %v8501_v47 = vpop.f32.mrf.mxu0  ;;  %vm5185_vm14 = vcmp.gt.f32.partialorder %v5153_v20, 0.0  ;;  %v5217_v7 = vmul.f32 0.01, %v5153_v20  ;;  %v5392_v48 = vrot.slane %v5248_v62, 4  ;;  %v12265_v5 = vmul.f32 0.0, %v5248_v62 }
 0x5bb   : > { %13632 = vst [vmem:[#allocation34_spill] sm:$0xff] %v12252_v2  ;;  %v5122_v0 = vsel %vm5058_vm13, %v5006_v8, %v5090_v63  ;;  %v5011_v16 = vadd.f32 %v12198_v46, %v4850_v38  ;;  %v8502_v10 = vadd.f32 %v8501_v47, %v8500_v58  ;;  %9121 = vmatmul.mubr.bf16.gmra.mxu0 %v12252_v2  ;;  %v5018_v38 = vpop.f32.mrf.mxu1 }
 0x5bc   : > { %v8503_v51 = vpop.f32.mrf.mxu0  ;;  %v5154_v53 = vadd.f32 %v5122_v0, %v13633_v60  ;;  %v12259_v49 = vsel %vm5185_vm14, %v5153_v20, %v5217_v7  ;;  %v12263_v43 = vsel %vm3450_vm12, %v5391_v37, %v5392_v48  ;;  %13636 = vst [vmem:[#allocation37_spill] sm:$0xff] %v12265_v5  ;;  %v13637_v60 = vld [vmem:[#allocation58_spill] sm:$0xff] }
 0x5bd   : > { %13634 = vst [vmem:[#allocation36_spill] sm:$0xff] %v12259_v49  ;;  %13635 = vst [vmem:[#allocation35_spill] sm:$0xff] %v12263_v43  ;;  %vm5059_vm15 = vcmp.gt.f32.partialorder %v5011_v16, 0.0  ;;  %v5091_v61 = vmul.f32 0.01, %v5011_v16  ;;  %v4853_v63 = vadd.f32 %v8502_v10, %v11934_v23  ;;  %v5393_v46 = vrot.slane %v12259_v49, 4  ;;  %v9083_v12 = vpop.f32.mrf.mxu1 }
 0x5be   : > { %v8504_v58 = vpop.f32.mrf.mxu0  ;;  %vm5186_vm0 = vcmp.gt.f32.partialorder %v5154_v53, 0.0  ;;  %v5218_v8 = vmul.f32 0.01, %v5154_v53 }
 0x5bf   : > { %v5123_v37 = vsel %vm5059_vm15, %v5011_v16, %v5091_v61  ;;  %v5014_v7 = vadd.f32 %v9079_v41, %v4853_v63  ;;  %v8505_v62 = vadd.f32 %v8504_v58, %v8503_v51  ;;  %v5408_v0 = vsel %vm3450_vm12, %v5392_v48, %v5393_v46  ;;  %v13639_v48 = vld [vmem:[#allocation24_spill] sm:$0xff] }
 0x5c0   : > { %v5155_v10 = vadd.f32 %v5123_v37, %v13637_v60  ;;  %v8506_v2 = vpop.f32.mrf.mxu0  ;;  %v12276_v9 = vsel %vm5186_vm0, %v5154_v53, %v5218_v8  ;;  %v12285_v16 = vmul.f32 %v13639_v48, %v5408_v0  ;;  %v13641_v8 = vld [vmem:[#allocation59_spill] sm:$0xff] }
 0x5c1   : > { %vm5060_vm1 = vcmp.gt.f32.partialorder %v5014_v7, 0.0  ;;  %v5092_v18 = vmul.f32 0.01, %v5014_v7  ;;  %v4858_v24 = vadd.f32 %v8505_v62, %v11934_v23  ;;  %v5394_v20 = vrot.slane %v12276_v9, 4 }
 0x5c2   : > { %v8507_v43 = vpop.f32.mrf.mxu0  ;;  %v12282_v41 = vpack.c.bf16 %v12276_v9, %v12259_v49  ;;  %vm5187_vm4 = vcmp.gt.f32.partialorder %v5155_v10, 0.0  ;;  %v5219_v61 = vmul.f32 0.01, %v5155_v10  ;;  %13640 = vst [vmem:[#allocation41_spill] sm:$0xff] %v12285_v16 }
 0x5c3   : > { %v5124_v51 = vsel %vm5060_vm1, %v5014_v7, %v5092_v18  ;;  %v5019_v53 = vadd.f32 %v5018_v38, %v4858_v24  ;;  %v8508_v63 = vadd.f32 %v8507_v43, %v8506_v2  ;;  %v12289_v58 = vsel %vm3450_vm12, %v5393_v46, %v5394_v20  ;;  %v5021_v24 = vpop.f32.mrf.mxu1 }
 0x5c4   : > { %13638 = vst [vmem:[#allocation38_spill] sm:$0xff] %v12282_v41  ;;  %v5156_v37 = vadd.f32 %v5124_v51, %v13641_v8  ;;  %9124 = vmatprep.mubr.bf16.mxu0 %v12282_v41  ;;  %v8509_v62 = vpop.f32.mrf.mxu0  ;;  %v12293_v60 = vsel %vm5187_vm4, %v5155_v10, %v5219_v61  ;;  %v13642_v8 = vld [vmem:[#allocation60_spill] sm:$0xff]  ;;  %v13647_v38 = vpack.c.bf16 %v11983_v35, %v11967_v25 }
 0x5c5   : > { %vm5061_vm5 = vcmp.gt.f32.partialorder %v5019_v53, 0.0  ;;  %v5093_v0 = vmul.f32 0.01, %v5019_v53  ;;  %v4861_v18 = vadd.f32 %v8508_v63, %v11934_v23  ;;  %v5395_v2 = vrot.slane %v12293_v60, 4 }
 0x5c6   : > { %v8510_v43 = vpop.f32.mrf.mxu0  ;;  %vm5188_vm6 = vcmp.gt.f32.partialorder %v5156_v37, 0.0  ;;  %v5220_v46 = vmul.f32 0.01, %v5156_v37  ;;  %v13652_v25 = vpack.c.bf16 %v12013_v36, %v11996_v28  ;;  %v13656_v35 = vpack.c.bf16 %v12069_v32, %v12052_v1  ;;  %v13664_v1 = vld [vmem:[#allocation72_spill] sm:$0xff]  ;;  %v13667_v32 = vld [vmem:[#allocation67_spill] sm:$0xff] }
 0x5c7   : > { %v5125_v7 = vsel %vm5061_vm5, %v5019_v53, %v5093_v0  ;;  %v5022_v51 = vadd.f32 %v5021_v24, %v4861_v18  ;;  %v8511_v10 = vadd.f32 %v8510_v43, %v8509_v62  ;;  %v12303_v61 = vsel %vm3450_vm12, %v5394_v20, %v5395_v2  ;;  %v13643_v24 = vld [vmem:[#allocation61_spill] sm:$0xff] }
 0x5c8   : > { %v5157_v47 = vadd.f32 %v5125_v7, %v13642_v8  ;;  %v8512_v41 = vpop.f32.mrf.mxu0  ;;  %v5252_v63 = vsel %vm5188_vm6, %v5156_v37, %v5220_v46  ;;  %v13658_v28 = vpack.c.bf16 %v12091_v59, %v12097_v56  ;;  %v13661_v36 = vpack.c.bf16 %v12177_v52, %v12173_v33  ;;  %v13670_v59 = vld [vmem:[#allocation75_spill] sm:$0xff] }
 0x5c9   : > { %vm5062_vm7 = vcmp.gt.f32.partialorder %v5022_v51, 0.0  ;;  %v5094_v48 = vmul.f32 0.01, %v5022_v51  ;;  %v4866_v5 = vadd.f32 %v8511_v10, %v11934_v23  ;;  %v12308_v49 = vpack.c.bf16 %v5252_v63, %v12293_v60  ;;  %v13677_v33 = vld [vmem:[#allocation19_spill] sm:$0xff] }
 0x5ca   : > { %v8513_v16 = vpop.f32.mrf.mxu0  ;;  %vm5189_vm3 = vcmp.gt.f32.partialorder %v5157_v47, 0.0  ;;  %v5221_v53 = vmul.f32 0.01, %v5157_v47  ;;  %v5396_v0 = vrot.slane %v5252_v63, 4  ;;  %v12319_v7 = vmul.f32 0.0, %v5252_v63 }
 0x5cb   : > { %v5126_v62 = vsel %vm5062_vm7, %v5022_v51, %v5094_v48  ;;  %v5027_v18 = vadd.f32 %v12254_v27, %v4866_v5  ;;  %v8514_v20 = vadd.f32 %v8513_v16, %v8512_v41  ;;  %9125 = vmatmul.mubr.bf16.gmra.mxu0 %v12308_v49  ;;  %v13644_v51 = vld [vmem:[#allocation17_spill] sm:$0xff] }
 0x5cc   : > { %v5158_v43 = vadd.f32 %v5126_v62, %v13643_v24  ;;  %v12313_v37 = vsel %vm5189_vm3, %v5157_v47, %v5221_v53  ;;  %v12317_v46 = vsel %vm3450_vm12, %v5395_v2, %v5396_v0 }
 0x5cd   : > { %vm5063_vm8 = vcmp.gt.f32.partialorder %v5027_v18, 0.0  ;;  %v5095_v10 = vmul.f32 0.01, %v5027_v18  ;;  %v4869_v8 = vadd.f32 %v8514_v20, %v11934_v23  ;;  %v5397_v48 = vrot.slane %v12313_v37, 4 }
 0x5ce   : > { %vm5190_vm2 = vcmp.gt.f32.partialorder %v5158_v43, 0.0  ;;  %v5222_v27 = vmul.f32 0.01, %v5158_v43  ;;  %v5478_v5 = vpack.c.bf16 %v12317_v46, %v12303_v61  ;;  %v9475_v61 = vld [vmem:[#allocation6 + $0x438] sm:$0xff]  }
 0x5cf   : > { %v5127_v41 = vsel %vm5063_vm8, %v5027_v18, %v5095_v10  ;;  %v5030_v16 = vadd.f32 %v9083_v12, %v4869_v8  ;;  %v5404_v2 = vsel %vm3450_vm12, %v5396_v0, %v5397_v48  ;;  %v9476_v46 = vld [vmem:[#allocation6 + $0x3f8] sm:$0xff]   ;;  %8675 = vmatprep.subr.bf16.mxu0 %v9475_v61 }
 0x5d0   : > { %v5159_v63 = vadd.f32 %v5127_v41, %v13644_v51  ;;  %v12330_v53 = vsel %vm5190_vm2, %v5158_v43, %v5222_v27  ;;  %v12338_v18 = vmul.f32 %v11435_v57, %v5404_v2  ;;  %v13645_v43 = vld [vmem:[#allocation62_spill] sm:$0xff]  ;;  %8676 = vmatpush3.bf16.msra.mxu0 %v9476_v46 }
 0x5d1   : > { %vm5064_vm9 = vcmp.gt.f32.partialorder %v5030_v16, 0.0  ;;  %v5096_v23 = vmul.f32 0.01, %v5030_v16  ;;  %v5398_v62 = vrot.slane %v12330_v53, 4  ;;  %v12335_v20 = vpack.c.bf16 %v12330_v53, %v12313_v37 }
 0x5d2   : > { %vm5191_vm10 = vcmp.gt.f32.partialorder %v5159_v63, 0.0  ;;  %v5223_v24 = vmul.f32 0.01, %v5159_v63 }
 0x5d3   : > { %v5128_v12 = vsel %vm5064_vm9, %v5030_v16, %v5096_v23  ;;  %9128 = vmatprep.mubr.bf16.mxu0 %v12335_v20  ;;  %v12343_v0 = vsel %vm3450_vm12, %v5397_v48, %v5398_v62  ;;  %v5369_v23 = vrot.slane %v11948_v40, 4 }
 0x5d4   : > { %v5160_v10 = vadd.f32 %v5128_v12, %v13645_v43  ;;  %v12346_v8 = vsel %vm5191_vm10, %v5159_v63, %v5223_v24 }
 0x5d5   : > { %v5399_v41 = vrot.slane %v12346_v8, 4 }
 0x5d6   : > { %vm5192_vm11 = vcmp.gt.f32.partialorder %v5160_v10, 0.0  ;;  %v5224_v16 = vmul.f32 0.01, %v5160_v10 }
 0x5d7   : > { %v12355_v51 = vsel %vm3450_vm12, %v5398_v62, %v5399_v41 }
 0x5d8   : > { %v5256_v48 = vsel %vm5192_vm11, %v5160_v10, %v5224_v16  ;;  %v13646_v10 = vrot.slane %v11945_v22, 4 }
 0x5d9   : > { %v12359_v63 = vpack.c.bf16 %v5256_v48, %v12346_v8  ;;  %v5400_v24 = vrot.slane %v5256_v48, 4  ;;  %v5321_v12 = vmul.f32 0.0, %v5256_v48 }
 0x5da   : > { %v5431_v16 = vsel %vm3450_vm12, %v5369_v23, %v13646_v10  ;;  %v9473_v10 = vld [vmem:[#allocation6 + $0x448] sm:$0xff]  }
 0x5db   : > { %9129 = vmatmul.mubr.bf16.gmra.mxu0 %v12359_v63  ;;  %v5432_v43 = vsel %vm3450_vm12, %v5400_v24, %v5369_v23  ;;  %v5401_v2 = vsel %vm3450_vm12, %v5399_v41, %v5400_v24  ;;  %v5353_v48 = vpack.c.bf16 %v11948_v40, %v5321_v12  ;;  %v13648_v41 = vpack.c.bf16 %v11954_v6, %v11945_v22  ;;  %v9472_v24 = vld [vmem:[#allocation6 + $0x450] sm:$0xff]   ;;  %v13682_v12 = vld [vmem:[#allocation41_spill] sm:$0xff] }
 0x5dc   : > { %v5433_v47 = vmul.f32 %v11203_v15, %v5432_v43  ;;  %v5480_v62 = vpack.c.bf16 %v5401_v2, %v12355_v51  ;;  %v13649_v2 = vpack.c.bf16 %v12009_v19, %v12005_v21  ;;  %v13650_v51 = vpack.c.bf16 %v11979_v55, %v11985_v42 }
 0x5dd   : > { %v13651_v40 = vpack.c.bf16 %v12039_v44, %v12023_v54  ;;  %v13653_v22 = vpack.c.bf16 %v12065_v13, %v12061_v3  ;;  %v13654_v6 = vpack.c.bf16 %v12035_v26, %v12041_v29  ;;  %v13655_v55 = vpack.c.bf16 %v12095_v4, %v12079_v17  ;;  %v9467_v54 = vld [vmem:[#allocation6 + $0x478] sm:$0xff]   ;;  %v9468_v26 = vld [vmem:[#allocation6 + $0x470] sm:$0xff]   ;;  %v13662_v44 = vld [vmem:[#allocation63_spill] sm:$0xff] }
 0x5de   : > { %v5465_v27 = vpack.c.bf16 %v5431_v16, %v5433_v47  ;;  %v13657_v42 = vpack.c.bf16 %v12121_v30, %v12117_v39  ;;  %v13659_v21 = vpack.c.bf16 %v12151_v45, %v12135_v31  ;;  %v13660_v19 = vpack.c.bf16 %v12125_v50, %v12108_v34  ;;  %9132 = vmatprep.subr.bf16.mxu1 %v9467_v54  ;;  %v13665_v3 = vld [vmem:[#allocation68_spill] sm:$0xff]  ;;  %v13668_v34 = vld [vmem:[#allocation66_spill] sm:$0xff]  ;;  %v9469_v39 = vld [vmem:[#allocation6 + $0x468] sm:$0xff]  }
 0x5df   : > { %v13663_v29 = vpack.c.bf16 %v12147_v11, %v13662_v44  ;;  %v13666_v13 = vpack.c.bf16 %v13664_v1, %v13665_v3  ;;  %v13669_v17 = vpack.c.bf16 %v13667_v32, %v13668_v34  ;;  %v13671_v4 = vld [vmem:[#allocation76_spill] sm:$0xff]  ;;  %v9470_v30 = vld [vmem:[#allocation6 + $0x460] sm:$0xff]   ;;  %v13673_v50 = vld [vmem:[#allocation69_spill] sm:$0xff]  ;;  %v13683_v43 = vpack.c.bf16 %v12289_v58, %v13682_v12 }
 0x5e0   : > { %5726 = vmatprep.mubr.bf16.mxu1 %v5465_v27  ;;  %v13672_v56 = vpack.c.bf16 %v13670_v59, %v13671_v4  ;;  %v13674_v31 = vld [vmem:[#allocation70_spill] sm:$0xff]  ;;  %v13676_v45 = vld [vmem:[#allocation35_spill] sm:$0xff]  ;;  %v13679_v47 = vld [vmem:[#allocation20_spill] sm:$0xff]  ;;  %v13687_v58 = vpack.c.bf16 %v12293_v60, %v12276_v9 }
 0x5e1   : > { %5727 = vmatmul.mubr.bf16.vlgmr.msra.gmra.mxu1 %v5353_v48  ;;  %v13675_v11 = vpack.c.bf16 %v13673_v50, %v13674_v31  ;;  %v13678_v52 = vpack.c.bf16 %v13676_v45, %v13677_v33  ;;  %v13680_v27 = vld [vmem:[#allocation73_spill] sm:$0xff]  ;;  %v9474_v16 = vld [vmem:[#allocation6 + $0x440] sm:$0xff]   ;;  %v13684_v48 = vld [vmem:[#allocation36_spill] sm:$0xff] }
 0x5e2   : > { %5734 = vmatprep.mubr.bf16.mxu1 %v13647_v38  ;;  %9133 = vmatpush3.bf16.msra.mxu1 %v9467_v54  ;;  %v9471_v38 = vld [vmem:[#allocation6 + $0x458] sm:$0xff]   ;;  %v13681_v23 = vpack.c.bf16 %v13679_v47, %v13680_v27  ;;  %v9478_v9 = vld [vmem:[#allocation6 + $0x3f0] sm:$0xff]   ;;  %v9479_v60 = vld [vmem:[#allocation6 + $0x428] sm:$0xff]  }
 0x5e3   : > { %9134 = vmatprep.subr.bf16.mxu1 %v9468_v26  ;;  %v9491_v59 = vld [vmem:[#allocation6 + $0x408] sm:$0xff]   ;;  %v9495_v50 = vld [vmem:[#allocation6 + $0x400] sm:$0xff]  }
 0x5e4   : > { %v9492_v4 = vld [vmem:[#allocation6 + $0x3c8] sm:$0xff]   ;;  %v9496_v33 = vld [vmem:[#allocation6 + $0x3c0] sm:$0xff]  }
 0x5e6   : > { %9135 = vmatpush3.bf16.msra.mxu1 %v9468_v26 }
 0x5e7   : > { %9136 = vmatprep.subr.bf16.mxu1 %v9469_v39 }
 0x5e9   : > { %5735 = vmatmul.mubr.bf16.gmra.mxu1 %v13648_v41  ;;  %v13685_v41 = vld [vmem:[#allocation37_spill] sm:$0xff] }
 0x5ea   : > { %5742 = vmatprep.mubr.bf16.mxu1 %v13649_v2  ;;  %9137 = vmatpush3.bf16.msra.mxu1 %v9469_v39  ;;  %v13686_v2 = vpack.c.bf16 %v13684_v48, %v13685_v41 }
 0x5eb   : > { %9138 = vmatprep.subr.bf16.mxu1 %v9470_v30 }
 0x5ee   : > { %9139 = vmatpush3.bf16.msra.mxu1 %v9470_v30 }
 0x5ef   : > { %9140 = vmatprep.subr.bf16.mxu1 %v9471_v38 }
 0x5f1   : > { %5743 = vmatmul.mubr.bf16.gmra.mxu1 %v13650_v51  ;;  %v13688_v51 = vpack.c.bf16 %v12343_v0, %v12338_v18  ;;  %v9480_v18 = vld [vmem:[#allocation6 + $0x3e8] sm:$0xff]   ;;  %v9481_v0 = vld [vmem:[#allocation6 + $0x420] sm:$0xff]  }
 0x5f2   : > { %5750 = vmatprep.mubr.bf16.mxu1 %v13651_v40  ;;  %9141 = vmatpush3.bf16.msra.mxu1 %v9471_v38  ;;  %v13689_v40 = vpack.c.bf16 %v12313_v37, %v12319_v7  ;;  %v9482_v37 = vld [vmem:[#allocation6 + $0x3e0] sm:$0xff]   ;;  %v9483_v7 = vld [vmem:[#allocation6 + $0x418] sm:$0xff]  }
 0x5f3   : > { %9142 = vmatprep.subr.bf16.mxu1 %v9472_v24 }
 0x5f6   : > { %9143 = vmatpush3.bf16.msra.mxu1 %v9472_v24 }
 0x5f7   : > { %9144 = vmatprep.subr.bf16.mxu1 %v9473_v10 }
 0x5f9   : > { %5751 = vmatmul.mubr.bf16.gmra.mxu1 %v13652_v25  ;;  %v13690_v25 = vpack.c.bf16 %v12346_v8, %v12330_v53  ;;  %v12460_v53 = vld [vmem:[#allocation9 + $0x78] sm:$0xff]   ;;  %v5548_v8 = vsub.s32 4, %v9960_v14 }
 0x5fa   : > { %5758 = vmatprep.mubr.bf16.mxu1 %v13653_v22  ;;  %9145 = vmatpush3.bf16.msra.mxu1 %v9473_v10  ;;  %v9487_v22 = vld [vmem:[#allocation6 + $0x410] sm:$0xff]  }
 0x5fb   : > { %9146 = vmatprep.subr.bf16.mxu1 %v9474_v16 }
 0x5fe   : > { %9147 = vmatpush3.bf16.msra.mxu1 %v9474_v16 }
 0x5ff   : > { %9180 = vmatprep.subr.bf16.mxu1 %v12460_v53 }
 0x601   : > { %5759 = vmatmul.mubr.bf16.gmra.mxu1 %v13654_v6  ;;  %v9488_v6 = vld [vmem:[#allocation6 + $0x3d0] sm:$0xff]  }
 0x602   : > { %5766 = vmatprep.mubr.bf16.mxu1 %v13655_v55 }
 0x609   : > { %5767 = vmatmul.mubr.bf16.gmra.mxu1 %v13656_v35 }
 0x60a   : > { %5774 = vmatprep.mubr.bf16.mxu1 %v13657_v42  ;;  %v9529_v42 = vld [vmem:[#allocation8] sm:$0x3f] }
 0x611   : > { %5775 = vmatmul.mubr.bf16.gmra.mxu1 %v13658_v28  ;;  %v12464_v28 = vrot.slane %v9529_v42, %v5548_v8 }
 0x612   : > { %5782 = vmatprep.mubr.bf16.mxu1 %v13659_v21 }
 0x619   : > { %5783 = vmatmul.mubr.bf16.gmra.mxu1 %v13660_v19 }
 0x61a   : > { %5790 = vmatprep.mubr.bf16.mxu1 %v13661_v36 }
 0x621   : > { %5791 = vmatmul.mubr.bf16.gmra.mxu1 %v13663_v29 }
 0x622   : > { %5798 = vmatprep.mubr.bf16.mxu1 %v13666_v13 }
 0x629   : > { %5799 = vmatmul.mubr.bf16.gmra.mxu1 %v13669_v17 }
 0x62a   : > { %5806 = vmatprep.mubr.bf16.mxu1 %v13672_v56 }
 0x62b   : > { %v9102_v55 = vpop.f32.mrf.mxu0 }
 0x62d   : > { %v5889_v21 = vpop.f32.mrf.mxu0 }
 0x62f   : > { %v9103_v44 = vpop.f32.mrf.mxu0 }
 0x631   : > { %5807 = vmatmul.mubr.bf16.gmra.mxu1 %v13675_v11  ;;  %v5892_v34 = vpop.f32.mrf.mxu0 }
 0x632   : > { %5814 = vmatprep.mubr.bf16.mxu1 %v13678_v52 }
 0x639   : > { %5815 = vmatmul.mubr.bf16.gmra.mxu1 %v13681_v23 }
 0x63a   : > { %5822 = vmatprep.mubr.bf16.mxu1 %v13683_v43 }
 0x63b   : > { %v9106_v52 = vpop.f32.mrf.mxu0 }
 0x63d   : > { %v5905_v48 = vpop.f32.mrf.mxu0 }
 0x641   : > { %5823 = vmatmul.mubr.bf16.gmra.mxu1 %v13686_v2  ;;  %v13691_v2 = vmov 0.0  }
 0x642   : > { %5830 = vmatprep.mubr.bf16.mxu1 %v5478_v5  ;;  %v9477_v5 = vld [vmem:[#allocation6 + $0x430] sm:$0xff]  }
 0x643   : > { %8677 = vmatprep.subr.bf16.mxu0 %v9477_v5 }
 0x644   : > { %8678 = vmatpush3.bf16.msra.mxu0 %v9478_v9 }
 0x645   : > { %8679 = vmatprep.subr.bf16.mxu0 %v9479_v60 }
 0x648   : > { %8680 = vmatpush3.bf16.msra.mxu0 %v9480_v18  ;;  %v9107_v18 = vpop.f32.mrf.mxu0 }
 0x649   : > { %5831 = vmatmul.mubr.bf16.gmra.mxu1 %v13687_v58  ;;  %8681 = vmatprep.subr.bf16.mxu0 %v9481_v0 }
 0x64a   : > { %5838 = vmatprep.mubr.bf16.mxu1 %v13688_v51 }
 0x64c   : > { %8682 = vmatpush3.bf16.msra.mxu0 %v9482_v37 }
 0x64d   : > { %8683 = vmatprep.subr.bf16.mxu0 %v9483_v7 }
 0x651   : > { %5839 = vmatmul.mubr.bf16.gmra.mxu1 %v13689_v40 }
 0x652   : > { %5846 = vmatprep.mubr.bf16.mxu1 %v5480_v62  ;;  %v9484_v62 = vld [vmem:[#allocation6 + $0x3d8] sm:$0xff]  }
 0x653   : > { %8684 = vmatpush3.bf16.msra.mxu0 %v9484_v62 }
 0x654   : > { %8685 = vmatprep.subr.bf16.mxu0 %v9487_v22 }
 0x657   : > { %8686 = vmatpush3.bf16.msra.mxu0 %v9488_v6 }
 0x658   : > { %8687 = vmatprep.subr.bf16.mxu0 %v9491_v59 }
 0x659   : > { %5847 = vmatmul.mubr.bf16.gmra.mxu1 %v13690_v25 }
 0x65b   : > { %8688 = vmatpush3.bf16.msra.mxu0 %v9492_v4 }
 0x65c   : > { %8689 = vmatprep.subr.bf16.mxu0 %v9495_v50 }
 0x65f   : > { %8690 = vmatpush3.bf16.msra.mxu0 %v9496_v33 }
 0x660   : > { %9228 = vmatprep.subr.bf16.mxu0 %v13691_v2 }
 0x6a1   : > { %v8555_v35 = vpop.f32.mrf.mxu1 }
 0x6a3   : > { %v8556_v19 = vpop.f32.mrf.mxu1 }
 0x6a4   : > { %v8557_v36 = vadd.f32 %v8556_v19, %v8555_v35  ;;  %v5908_v19 = vpop.f32.mrf.mxu0 }
 0x6a5   : > { %v8558_v54 = vpop.f32.mrf.mxu1 }
 0x6a6   : > { %v5729_v26 = vadd.f32 %v8557_v36, %v12464_v28 }
 0x6a7   : > { %v8559_v29 = vpop.f32.mrf.mxu1 }
 0x6a8   : > { %v5890_v1 = vadd.f32 %v5889_v21, %v5729_v26  ;;  %v8560_v3 = vadd.f32 %v8559_v29, %v8558_v54 }
 0x6a9   : > { %v8561_v13 = vpop.f32.mrf.mxu1 }
 0x6aa   : > { %v5732_v32 = vadd.f32 %v8560_v3, %v12464_v28  ;;  %v6048_v56 = vmul.f32 0.01, %v5890_v1  ;;  %vm6016_vm13 = vcmp.gt.f32.partialorder %v5890_v1, 0.0 }
 0x6ab   : > { %v8562_v17 = vpop.f32.mrf.mxu1 }
 0x6ac   : > { %v5893_v39 = vadd.f32 %v5892_v34, %v5732_v32  ;;  %v8563_v30 = vadd.f32 %v8562_v17, %v8561_v13  ;;  %v12469_v23 = vsel %vm6016_vm13, %v5890_v1, %v6048_v56  ;;  %v9489_v34 = vld [vmem:[#allocation9 + $0x68] sm:$0xff]   ;;  %v12507_v56 = vpop.f32.mrf.mxu0 }
 0x6ad   : > { %v8564_v31 = vpop.f32.mrf.mxu1 }
 0x6ae   : > { %v6049_v11 = vmul.f32 0.01, %v5893_v39  ;;  %v5737_v45 = vadd.f32 %v8563_v30, %v12464_v28  ;;  %vm6017_vm14 = vcmp.gt.f32.partialorder %v5893_v39, 0.0 }
 0x6af   : > { %v8565_v38 = vpop.f32.mrf.mxu1 }
 0x6b0   : > { %v5898_v47 = vadd.f32 %v9102_v55, %v5737_v45  ;;  %v8566_v27 = vadd.f32 %v8565_v38, %v8564_v31  ;;  %v12471_v24 = vsel %vm6017_vm14, %v5893_v39, %v6049_v11  ;;  %v9486_v55 = vld [vmem:[#allocation9 + $0x70] sm:$0xff]   ;;  %v9490_v38 = vld [vmem:[#allocation9 + $0x60] sm:$0xff]  }
 0x6b1   : > { %v8567_v12 = vpop.f32.mrf.mxu1  ;;  %v6272_v43 = vpack.c.bf16 %v12471_v24, %v12469_v23  ;;  %v13331_v25 = vrot.slane %v12471_v24, 4 }
 0x6b2   : > { %vm6018_vm15 = vcmp.gt.f32.partialorder %v5898_v47, 0.0  ;;  %v6050_v10 = vmul.f32 0.01, %v5898_v47  ;;  %v5740_v16 = vadd.f32 %v8566_v27, %v12464_v28 }
 0x6b3   : > { %v8568_v41 = vpop.f32.mrf.mxu1  ;;  %9148 = vmatprep.mubr.bf16.mxu1 %v6272_v43 }
 0x6b4   : > { %v12477_v58 = vsel %vm6018_vm15, %v5898_v47, %v6050_v10  ;;  %v5901_v51 = vadd.f32 %v9103_v44, %v5740_v16  ;;  %v8569_v40 = vadd.f32 %v8568_v41, %v8567_v12  ;;  %v13692_v12 = vld [vmem:[#allocation23_spill] sm:$0xff] }
 0x6b5   : > { %v8570_v61 = vpop.f32.mrf.mxu1  ;;  %v6162_v46 = vrot.slane %v12477_v58, 4 }
 0x6b6   : > { %vm6019_vm0 = vcmp.gt.f32.partialorder %v5901_v51, 0.0  ;;  %v6051_v9 = vmul.f32 0.01, %v5901_v51  ;;  %v5745_v60 = vadd.f32 %v8569_v40, %v12464_v28 }
 0x6b7   : > { %v8571_v0 = vpop.f32.mrf.mxu1  ;;  %v12488_v37 = vsel %vm3450_vm12, %v13331_v25, %v6162_v46 }
 0x6b8   : > { %v6083_v7 = vsel %vm6019_vm0, %v5901_v51, %v6051_v9  ;;  %v5906_v62 = vadd.f32 %v5905_v48, %v5745_v60  ;;  %v8572_v8 = vadd.f32 %v8571_v0, %v8570_v61 }
 0x6b9   : > { %v6273_v22 = vpack.c.bf16 %v6083_v7, %v12477_v58  ;;  %v8573_v6 = vpop.f32.mrf.mxu1  ;;  %v6163_v35 = vrot.slane %v6083_v7, 4  ;;  %v12496_v26 = vmul.f32 0.0, %v6083_v7 }
 0x6ba   : > { %v6052_v42 = vmul.f32 0.01, %v5906_v62  ;;  %v5748_v21 = vadd.f32 %v8572_v8, %v12464_v28  ;;  %vm6020_vm1 = vcmp.gt.f32.partialorder %v5906_v62, 0.0 }
 0x6bb   : > { %v8574_v36 = vpop.f32.mrf.mxu1  ;;  %9149 = vmatmul.mubr.bf16.vlgmr.msra.gmra.mxu1 %v6273_v22  ;;  %v12494_v54 = vsel %vm3450_vm12, %v6162_v46, %v6163_v35  ;;  %v9493_v46 = vld [vmem:[#allocation9 + $0x58] sm:$0xff]  }
 0x6bc   : > { %v5909_v44 = vadd.f32 %v5908_v19, %v5748_v21  ;;  %v8575_v29 = vadd.f32 %v8574_v36, %v8573_v6  ;;  %v12498_v1 = vsel %vm6020_vm1, %v5906_v62, %v6052_v42  ;;  %9181 = vmatpush3.bf16.msra.mxu1 %v12460_v53  ;;  %v9494_v21 = vld [vmem:[#allocation9 + $0x50] sm:$0xff]  }
 0x6bd   : > { %v8576_v13 = vpop.f32.mrf.mxu1  ;;  %v6164_v32 = vrot.slane %v12498_v1, 4  ;;  %9182 = vmatprep.subr.bf16.mxu1 %v9486_v55 }
 0x6be   : > { %v6053_v59 = vmul.f32 0.01, %v5909_v44  ;;  %v5753_v4 = vadd.f32 %v8575_v29, %v12464_v28  ;;  %vm6021_vm4 = vcmp.gt.f32.partialorder %v5909_v44, 0.0 }
 0x6bf   : > { %v8577_v39 = vpop.f32.mrf.mxu1  ;;  %v6219_v53 = vsel %vm3450_vm12, %v6163_v35, %v6164_v32 }
 0x6c0   : > { %v5914_v30 = vadd.f32 %v9106_v52, %v5753_v4  ;;  %v8578_v50 = vadd.f32 %v8577_v39, %v8576_v13  ;;  %v12511_v31 = vsel %vm6021_vm4, %v5909_v44, %v6053_v59  ;;  %9183 = vmatpush3.bf16.msra.mxu1 %v9486_v55  ;;  %v12518_v43 = vmul.f32 %v13692_v12, %v6219_v53  ;;  %v5921_v52 = vpop.f32.mrf.mxu0  ;;  %v13696_v53 = vld [vmem:[#allocation21_spill] sm:$0xff] }
 0x6c1   : > { %v8579_v11 = vpop.f32.mrf.mxu1  ;;  %v6165_v45 = vrot.slane %v12511_v31, 4  ;;  %v6274_v33 = vpack.c.bf16 %v12511_v31, %v12498_v1  ;;  %9184 = vmatprep.subr.bf16.mxu1 %v9489_v34 }
 0x6c2   : > { %vm6022_vm5 = vcmp.gt.f32.partialorder %v5914_v30, 0.0  ;;  %v6054_v47 = vmul.f32 0.01, %v5914_v30  ;;  %v5756_v27 = vadd.f32 %v8578_v50, %v12464_v28  ;;  %v9111_v62 = vpop.f32.mrf.mxu0 }
 0x6c3   : > { %v8580_v10 = vpop.f32.mrf.mxu1  ;;  %9152 = vmatprep.mubr.bf16.mxu1 %v6274_v33  ;;  %v12522_v16 = vsel %vm3450_vm12, %v6164_v32, %v6165_v45 }
 0x6c4   : > { %v12524_v48 = vsel %vm6022_vm5, %v5914_v30, %v6054_v47  ;;  %v5917_v41 = vadd.f32 %v9107_v18, %v5756_v27  ;;  %v8581_v51 = vadd.f32 %v8580_v10, %v8579_v11  ;;  %9185 = vmatpush3.bf16.msra.mxu1 %v9489_v34  ;;  %v5924_v29 = vpop.f32.mrf.mxu0  ;;  %v9497_v11 = vld [vmem:[#allocation9 + $0x48] sm:$0xff]  }
 0x6c5   : > { %v8582_v61 = vpop.f32.mrf.mxu1  ;;  %9186 = vmatprep.subr.bf16.mxu1 %v9490_v38  ;;  %v6166_v9 = vrot.slane %v12524_v48, 4 }
 0x6c6   : > { %vm6023_vm6 = vcmp.gt.f32.partialorder %v5917_v41, 0.0  ;;  %v6055_v0 = vmul.f32 0.01, %v5917_v41  ;;  %v5761_v7 = vadd.f32 %v8581_v51, %v12464_v28  ;;  %v12552_v47 = vpop.f32.mrf.mxu0 }
 0x6c7   : > { %v8583_v8 = vpop.f32.mrf.mxu1  ;;  %v12534_v18 = vsel %vm3450_vm12, %v6165_v45, %v6166_v9 }
 0x6c8   : > { %v5922_v22 = vadd.f32 %v5921_v52, %v5761_v7  ;;  %v8584_v6 = vadd.f32 %v8583_v8, %v8582_v61  ;;  %v6087_v55 = vsel %vm6023_vm6, %v5917_v41, %v6055_v0  ;;  %9187 = vmatpush3.bf16.msra.mxu1 %v9490_v38  ;;  %v13693_v8 = vld [vmem:[#allocation18_spill] sm:$0xff] }
 0x6c9   : > { %v8585_v35 = vpop.f32.mrf.mxu1  ;;  %v6275_v42 = vpack.c.bf16 %v6087_v55, %v12524_v48  ;;  %9188 = vmatprep.subr.bf16.mxu1 %v9493_v46  ;;  %v6167_v19 = vrot.slane %v6087_v55, 4  ;;  %v12542_v34 = vmul.f32 0.0, %v6087_v55 }
 0x6ca   : > { %v6056_v36 = vmul.f32 0.01, %v5922_v22  ;;  %v5764_v44 = vadd.f32 %v8584_v6, %v12464_v28  ;;  %vm6024_vm7 = vcmp.gt.f32.partialorder %v5922_v22, 0.0 }
 0x6cb   : > { %v8586_v13 = vpop.f32.mrf.mxu1  ;;  %9153 = vmatmul.mubr.bf16.gmra.mxu1 %v6275_v42  ;;  %v12540_v32 = vsel %vm3450_vm12, %v6166_v9, %v6167_v19  ;;  %v9498_v9 = vld [vmem:[#allocation9 + $0x40] sm:$0xff]  }
 0x6cc   : > { %v5925_v59 = vadd.f32 %v5924_v29, %v5764_v44  ;;  %v8587_v4 = vadd.f32 %v8586_v13, %v8585_v35  ;;  %v12544_v39 = vsel %vm6024_vm7, %v5922_v22, %v6056_v36  ;;  %9189 = vmatpush3.bf16.msra.mxu1 %v9493_v46 }
 0x6cd   : > { %v8588_v30 = vpop.f32.mrf.mxu1  ;;  %v6168_v50 = vrot.slane %v12544_v39, 4  ;;  %9190 = vmatprep.subr.bf16.mxu1 %v9494_v21 }
 0x6ce   : > { %v6057_v33 = vmul.f32 0.01, %v5925_v59  ;;  %v5769_v38 = vadd.f32 %v8587_v4, %v12464_v28  ;;  %vm6025_vm3 = vcmp.gt.f32.partialorder %v5925_v59, 0.0 }
 0x6cf   : > { %v8589_v27 = vpop.f32.mrf.mxu1  ;;  %v6215_v12 = vsel %vm3450_vm12, %v6167_v19, %v6168_v50 }
 0x6d0   : > { %v5930_v52 = vadd.f32 %v12507_v56, %v5769_v38  ;;  %v8590_v10 = vadd.f32 %v8589_v27, %v8588_v30  ;;  %v12557_v41 = vsel %vm6025_vm3, %v5925_v59, %v6057_v33  ;;  %9191 = vmatpush3.bf16.msra.mxu1 %v9494_v21  ;;  %v12564_v22 = vmul.f32 %v13693_v8, %v6215_v12  ;;  %v5937_v56 = vpop.f32.mrf.mxu0 }
 0x6d1   : > { %v8591_v51 = vpop.f32.mrf.mxu1  ;;  %v6169_v61 = vrot.slane %v12557_v41, 4  ;;  %v6276_v46 = vpack.c.bf16 %v12557_v41, %v12544_v39  ;;  %9192 = vmatprep.subr.bf16.mxu1 %v9497_v11 }
 0x6d2   : > { %vm6026_vm8 = vcmp.gt.f32.partialorder %v5930_v52, 0.0  ;;  %v6058_v0 = vmul.f32 0.01, %v5930_v52  ;;  %v5772_v7 = vadd.f32 %v8590_v10, %v12464_v28  ;;  %v9115_v4 = vpop.f32.mrf.mxu0 }
 0x6d3   : > { %v8592_v6 = vpop.f32.mrf.mxu1  ;;  %9156 = vmatprep.mubr.bf16.mxu1 %v6276_v46  ;;  %v12568_v55 = vsel %vm3450_vm12, %v6168_v50, %v6169_v61 }
 0x6d4   : > { %v12570_v35 = vsel %vm6026_vm8, %v5930_v52, %v6058_v0  ;;  %v5933_v42 = vadd.f32 %v9111_v62, %v5772_v7  ;;  %v8593_v21 = vadd.f32 %v8592_v6, %v8591_v51  ;;  %9193 = vmatpush3.bf16.msra.mxu1 %v9497_v11  ;;  %v5940_v51 = vpop.f32.mrf.mxu0 }
 0x6d5   : > { %v8594_v36 = vpop.f32.mrf.mxu1  ;;  %9194 = vmatprep.subr.bf16.mxu1 %v9498_v9  ;;  %v6170_v44 = vrot.slane %v12570_v35, 4 }
 0x6d6   : > { %vm6027_vm2 = vcmp.gt.f32.partialorder %v5933_v42, 0.0  ;;  %v6059_v13 = vmul.f32 0.01, %v5933_v42  ;;  %v5777_v59 = vadd.f32 %v8593_v21, %v12464_v28 }
 0x6d7   : > { %v8595_v30 = vpop.f32.mrf.mxu1  ;;  %v12580_v62 = vsel %vm3450_vm12, %v6169_v61, %v6170_v44 }
 0x6d8   : > { %v6091_v50 = vsel %vm6027_vm2, %v5933_v42, %v6059_v13  ;;  %v5938_v11 = vadd.f32 %v5937_v56, %v5777_v59  ;;  %v8596_v33 = vadd.f32 %v8595_v30, %v8594_v36  ;;  %9195 = vmatpush3.bf16.msra.mxu1 %v9498_v9 }
 0x6d9   : > { %v8597_v38 = vpop.f32.mrf.mxu1  ;;  %v6277_v27 = vpack.c.bf16 %v6091_v50, %v12570_v35  ;;  %v6171_v12 = vrot.slane %v6091_v50, 4  ;;  %v12588_v61 = vmul.f32 0.0, %v6091_v50 }
 0x6da   : > { %v6060_v52 = vmul.f32 0.01, %v5938_v11  ;;  %v5780_v10 = vadd.f32 %v8596_v33, %v12464_v28  ;;  %vm6028_vm9 = vcmp.gt.f32.partialorder %v5938_v11, 0.0 }
 0x6db   : > { %v8598_v46 = vpop.f32.mrf.mxu1  ;;  %9157 = vmatmul.mubr.bf16.gmra.mxu1 %v6277_v27  ;;  %v12586_v0 = vsel %vm3450_vm12, %v6170_v44, %v6171_v12  ;;  %v9118_v44 = vpop.f32.mrf.mxu0 }
 0x6dc   : > { %v5941_v7 = vadd.f32 %v5940_v51, %v5780_v10  ;;  %v8599_v8 = vadd.f32 %v8598_v46, %v8597_v38  ;;  %v12590_v9 = vsel %vm6028_vm9, %v5938_v11, %v6060_v52  ;;  %v13694_v46 = vld [vmem:[#allocation25_spill] sm:$0xff] }
 0x6dd   : > { %v8600_v6 = vpop.f32.mrf.mxu1  ;;  %v6172_v42 = vrot.slane %v12590_v9, 4  ;;  %v5953_v21 = vpop.f32.mrf.mxu0 }
 0x6de   : > { %v6061_v36 = vmul.f32 0.01, %v5941_v7  ;;  %v5785_v13 = vadd.f32 %v8599_v8, %v12464_v28  ;;  %vm6029_vm10 = vcmp.gt.f32.partialorder %v5941_v7, 0.0 }
 0x6df   : > { %v8601_v59 = vpop.f32.mrf.mxu1  ;;  %v6211_v30 = vsel %vm3450_vm12, %v6171_v12, %v6172_v42  ;;  %v9119_v29 = vpop.f32.mrf.mxu0 }
 0x6e0   : > { %v5946_v50 = vadd.f32 %v12552_v47, %v5785_v13  ;;  %v8602_v11 = vadd.f32 %v8601_v59, %v8600_v6  ;;  %v12601_v33 = vsel %vm6029_vm10, %v5941_v7, %v6061_v36  ;;  %v12608_v8 = vmul.f32 %v13694_v46, %v6211_v30 }
 0x6e1   : > { %v8603_v38 = vpop.f32.mrf.mxu1  ;;  %v6173_v27 = vrot.slane %v12601_v33, 4  ;;  %v6278_v52 = vpack.c.bf16 %v12601_v33, %v12590_v9  ;;  %v5956_v45 = vpop.f32.mrf.mxu0 }
 0x6e2   : > { %vm6030_vm11 = vcmp.gt.f32.partialorder %v5946_v50, 0.0  ;;  %v6062_v10 = vmul.f32 0.01, %v5946_v50  ;;  %v5788_v51 = vadd.f32 %v8602_v11, %v12464_v28 }
 0x6e3   : > { %v8604_v12 = vpop.f32.mrf.mxu1  ;;  %9160 = vmatprep.mubr.bf16.mxu1 %v6278_v52  ;;  %v12612_v47 = vsel %vm3450_vm12, %v6172_v42, %v6173_v27 }
 0x6e4   : > { %v12614_v7 = vsel %vm6030_vm11, %v5946_v50, %v6062_v10  ;;  %v5949_v6 = vadd.f32 %v9115_v4, %v5788_v51  ;;  %v8605_v36 = vadd.f32 %v8604_v12, %v8603_v38 }
 0x6e5   : > { %v8606_v59 = vpop.f32.mrf.mxu1  ;;  %v6174_v11 = vrot.slane %v12614_v7, 4 }
 0x6e6   : > { %vm6031_vm13 = vcmp.gt.f32.partialorder %v5949_v6, 0.0  ;;  %v6063_v46 = vmul.f32 0.01, %v5949_v6  ;;  %v5793_v52 = vadd.f32 %v8605_v36, %v12464_v28 }
 0x6e7   : > { %v8607_v42 = vpop.f32.mrf.mxu1  ;;  %v12624_v50 = vsel %vm3450_vm12, %v6173_v27, %v6174_v11 }
 0x6e8   : > { %v6095_v4 = vsel %vm6031_vm13, %v5949_v6, %v6063_v46  ;;  %v5954_v38 = vadd.f32 %v5953_v21, %v5793_v52  ;;  %v8608_v10 = vadd.f32 %v8607_v42, %v8606_v59 }
 0x6e9   : > { %v8609_v51 = vpop.f32.mrf.mxu1  ;;  %v6279_v12 = vpack.c.bf16 %v6095_v4, %v12614_v7  ;;  %v6175_v13 = vrot.slane %v6095_v4, 4  ;;  %v12632_v27 = vmul.f32 0.0, %v6095_v4 }
 0x6ea   : > { %v6064_v56 = vmul.f32 0.01, %v5954_v38  ;;  %v5796_v30 = vadd.f32 %v8608_v10, %v12464_v28  ;;  %vm6032_vm14 = vcmp.gt.f32.partialorder %v5954_v38, 0.0 }
 0x6eb   : > { %v8610_v19 = vpop.f32.mrf.mxu1  ;;  %9161 = vmatmul.mubr.bf16.gmra.mxu1 %v6279_v12  ;;  %v12630_v36 = vsel %vm3450_vm12, %v6174_v11, %v6175_v13  ;;  %v9122_v11 = vpop.f32.mrf.mxu0 }
 0x6ec   : > { %v5957_v6 = vadd.f32 %v5956_v45, %v5796_v30  ;;  %v8611_v21 = vadd.f32 %v8610_v19, %v8609_v51  ;;  %v12634_v59 = vsel %vm6032_vm14, %v5954_v38, %v6064_v56 }
 0x6ed   : > { %v8612_v52 = vpop.f32.mrf.mxu1  ;;  %v6176_v42 = vrot.slane %v12634_v59, 4  ;;  %v5969_v40 = vpop.f32.mrf.mxu0 }
 0x6ee   : > { %v6065_v12 = vmul.f32 0.01, %v5957_v6  ;;  %v5801_v60 = vadd.f32 %v8611_v21, %v12464_v28  ;;  %vm6033_vm15 = vcmp.gt.f32.partialorder %v5957_v6, 0.0 }
 0x6ef   : > { %v8613_v4 = vpop.f32.mrf.mxu1  ;;  %v6207_v45 = vsel %vm3450_vm12, %v6175_v13, %v6176_v42 }
 0x6f0   : > { %v5962_v19 = vadd.f32 %v9118_v44, %v5801_v60  ;;  %v8614_v56 = vadd.f32 %v8613_v4, %v8612_v52  ;;  %v12644_v30 = vsel %vm6033_vm15, %v5957_v6, %v6065_v12  ;;  %v12651_v17 = vmul.f32 %v13696_v53, %v6207_v45 }
 0x6f1   : > { %13695 = vst [vmem:[#allocation42_spill] sm:$0xff] %v12644_v30  ;;  %v8615_v38 = vpop.f32.mrf.mxu1  ;;  %v6177_v51 = vrot.slane %v12644_v30, 4  ;;  %v6280_v46 = vpack.c.bf16 %v12644_v30, %v12634_v59 }
 0x6f2   : > { %vm6034_vm0 = vcmp.gt.f32.partialorder %v5962_v19, 0.0  ;;  %v6066_v10 = vmul.f32 0.01, %v5962_v19  ;;  %v5804_v21 = vadd.f32 %v8614_v56, %v12464_v28  ;;  %v9123_v56 = vpop.f32.mrf.mxu0 }
 0x6f3   : > { %v8616_v5 = vpop.f32.mrf.mxu1  ;;  %9164 = vmatprep.mubr.bf16.mxu1 %v6280_v46  ;;  %v12655_v60 = vsel %vm3450_vm12, %v6176_v42, %v6177_v51 }
 0x6f4   : > { %v12657_v44 = vsel %vm6034_vm0, %v5962_v19, %v6066_v10  ;;  %v5965_v13 = vadd.f32 %v9119_v29, %v5804_v21  ;;  %v8617_v6 = vadd.f32 %v8616_v5, %v8615_v38  ;;  %v5972_v25 = vpop.f32.mrf.mxu0 }
 0x6f5   : > { %13697 = vst [vmem:[#allocation39_spill] sm:$0xff] %v12657_v44  ;;  %v8618_v12 = vpop.f32.mrf.mxu1  ;;  %v6178_v4 = vrot.slane %v12657_v44, 4 }
 0x6f6   : > { %vm6035_vm1 = vcmp.gt.f32.partialorder %v5965_v13, 0.0  ;;  %v6067_v45 = vmul.f32 0.01, %v5965_v13  ;;  %v5809_v46 = vadd.f32 %v8617_v6, %v12464_v28 }
 0x6f7   : > { %v8619_v42 = vpop.f32.mrf.mxu1  ;;  %v12667_v10 = vsel %vm3450_vm12, %v6177_v51, %v6178_v4 }
 0x6f8   : > { %13698 = vst [vmem:[#allocation40_spill] sm:$0xff] %v12667_v10  ;;  %v6099_v5 = vsel %vm6035_vm1, %v5965_v13, %v6067_v45  ;;  %v5970_v29 = vadd.f32 %v5969_v40, %v5809_v46  ;;  %v8620_v19 = vadd.f32 %v8619_v42, %v8618_v12 }
 0x6f9   : > { %v8621_v38 = vpop.f32.mrf.mxu1  ;;  %v6281_v21 = vpack.c.bf16 %v6099_v5, %v12657_v44  ;;  %v6179_v52 = vrot.slane %v6099_v5, 4  ;;  %v12675_v51 = vmul.f32 0.0, %v6099_v5 }
 0x6fa   : > { %v6068_v3 = vmul.f32 0.01, %v5970_v29  ;;  %v5812_v53 = vadd.f32 %v8620_v19, %v12464_v28  ;;  %vm6036_vm4 = vcmp.gt.f32.partialorder %v5970_v29, 0.0 }
 0x6fb   : > { %v8622_v2 = vpop.f32.mrf.mxu1  ;;  %9165 = vmatmul.mubr.bf16.gmra.mxu1 %v6281_v21  ;;  %v12673_v6 = vsel %vm3450_vm12, %v6178_v4, %v6179_v52  ;;  %13700 = vst [vmem:[#allocation47_spill] sm:$0xff] %v12675_v51  ;;  %v9126_v4 = vpop.f32.mrf.mxu0  ;;  %v13703_v51 = vld [vmem:[#allocation27_spill] sm:$0xff] }
 0x6fc   : > { %13699 = vst [vmem:[#allocation43_spill] sm:$0xff] %v12673_v6  ;;  %v5973_v13 = vadd.f32 %v5972_v25, %v5812_v53  ;;  %v8623_v40 = vadd.f32 %v8622_v2, %v8621_v38  ;;  %v12677_v12 = vsel %vm6036_vm4, %v5970_v29, %v6068_v3 }
 0x6fd   : > { %13701 = vst [vmem:[#allocation44_spill] sm:$0xff] %v12677_v12  ;;  %v8624_v46 = vpop.f32.mrf.mxu1  ;;  %v6180_v42 = vrot.slane %v12677_v12, 4  ;;  %v5985_v10 = vpop.f32.mrf.mxu0 }
 0x6fe   : > { %v6069_v21 = vmul.f32 0.01, %v5973_v13  ;;  %v5817_v30 = vadd.f32 %v8623_v40, %v12464_v28  ;;  %vm6037_vm5 = vcmp.gt.f32.partialorder %v5973_v13, 0.0 }
 0x6ff   : > { %v8625_v5 = vpop.f32.mrf.mxu1  ;;  %v6203_v2 = vsel %vm3450_vm12, %v6179_v52, %v6180_v42 }
 0x700   : > { %v5978_v25 = vadd.f32 %v9122_v11, %v5817_v30  ;;  %v8626_v3 = vadd.f32 %v8625_v5, %v8624_v46  ;;  %v12687_v53 = vsel %vm6037_vm5, %v5973_v13, %v6069_v21  ;;  %v12694_v44 = vmul.f32 %v13703_v51, %v6203_v2 }
 0x701   : > { %13702 = vst [vmem:[#allocation45_spill] sm:$0xff] %v12687_v53  ;;  %v8627_v29 = vpop.f32.mrf.mxu1  ;;  %v6181_v38 = vrot.slane %v12687_v53, 4  ;;  %v6282_v45 = vpack.c.bf16 %v12687_v53, %v12677_v12 }
 0x702   : > { %vm6038_vm6 = vcmp.gt.f32.partialorder %v5978_v25, 0.0  ;;  %v6070_v19 = vmul.f32 0.01, %v5978_v25  ;;  %v5820_v40 = vadd.f32 %v8626_v3, %v12464_v28  ;;  %13704 = vst [vmem:[#allocation48_spill] sm:$0xff] %v12694_v44  ;;  %v9127_v3 = vpop.f32.mrf.mxu0 }
 0x703   : > { %v8628_v6 = vpop.f32.mrf.mxu1  ;;  %9168 = vmatprep.mubr.bf16.mxu1 %v6282_v45  ;;  %v12698_v11 = vsel %vm3450_vm12, %v6180_v42, %v6181_v38 }
 0x704   : > { %13705 = vst [vmem:[#allocation49_spill] sm:$0xff] %v12698_v11  ;;  %v12700_v30 = vsel %vm6038_vm6, %v5978_v25, %v6070_v19  ;;  %v5981_v52 = vadd.f32 %v9123_v56, %v5820_v40  ;;  %v8629_v13 = vadd.f32 %v8628_v6, %v8627_v29  ;;  %v5988_v53 = vpop.f32.mrf.mxu0 }
 0x705   : > { %13706 = vst [vmem:[#allocation46_spill] sm:$0xff] %v12700_v30  ;;  %v8630_v21 = vpop.f32.mrf.mxu1  ;;  %v6182_v5 = vrot.slane %v12700_v30, 4 }
 0x706   : > { %vm6039_vm7 = vcmp.gt.f32.partialorder %v5981_v52, 0.0  ;;  %v6071_v2 = vmul.f32 0.01, %v5981_v52  ;;  %v5825_v45 = vadd.f32 %v8629_v13, %v12464_v28 }
 0x707   : > { %v8631_v42 = vpop.f32.mrf.mxu1  ;;  %v12710_v19 = vsel %vm3450_vm12, %v6181_v38, %v6182_v5 }
 0x708   : > { %13707 = vst [vmem:[#allocation50_spill] sm:$0xff] %v12710_v19  ;;  %v6103_v56 = vsel %vm6039_vm7, %v5981_v52, %v6071_v2  ;;  %v5986_v6 = vadd.f32 %v5985_v10, %v5825_v45  ;;  %v8632_v25 = vadd.f32 %v8631_v42, %v8630_v21 }
 0x709   : > { %v8633_v29 = vpop.f32.mrf.mxu1  ;;  %v6283_v40 = vpack.c.bf16 %v6103_v56, %v12700_v30  ;;  %v6183_v46 = vrot.slane %v6103_v56, 4  ;;  %v12718_v38 = vmul.f32 0.0, %v6103_v56 }
 0x70a   : > { %v6072_v12 = vmul.f32 0.01, %v5986_v6  ;;  %v5828_v51 = vadd.f32 %v8632_v25, %v12464_v28  ;;  %vm6040_vm3 = vcmp.gt.f32.partialorder %v5986_v6, 0.0 }
 0x70b   : > { %v8634_v44 = vpop.f32.mrf.mxu1  ;;  %9169 = vmatmul.mubr.bf16.gmra.mxu1 %v6283_v40  ;;  %v12716_v13 = vsel %vm3450_vm12, %v6182_v5, %v6183_v46  ;;  %13709 = vst [vmem:[#allocation53_spill] sm:$0xff] %v12718_v38  ;;  %v9130_v5 = vpop.f32.mrf.mxu0  ;;  %v13712_v38 = vld [vmem:[#allocation24_spill] sm:$0xff] }
 0x70c   : > { %13708 = vst [vmem:[#allocation52_spill] sm:$0xff] %v12716_v13  ;;  %v5989_v52 = vadd.f32 %v5988_v53, %v5828_v51  ;;  %v8635_v10 = vadd.f32 %v8634_v44, %v8633_v29  ;;  %v12720_v21 = vsel %vm6040_vm3, %v5986_v6, %v6072_v12 }
 0x70d   : > { %13710 = vst [vmem:[#allocation51_spill] sm:$0xff] %v12720_v21  ;;  %v8636_v45 = vpop.f32.mrf.mxu1  ;;  %v6184_v42 = vrot.slane %v12720_v21, 4  ;;  %v6001_v13 = vpop.f32.mrf.mxu0 }
 0x70e   : > { %v6073_v40 = vmul.f32 0.01, %v5989_v52  ;;  %v5833_v30 = vadd.f32 %v8635_v10, %v12464_v28  ;;  %vm6041_vm8 = vcmp.gt.f32.partialorder %v5989_v52, 0.0 }
 0x70f   : > { %v8637_v56 = vpop.f32.mrf.mxu1  ;;  %v6199_v44 = vsel %vm3450_vm12, %v6183_v46, %v6184_v42 }
 0x710   : > { %v5994_v12 = vadd.f32 %v9126_v4, %v5833_v30  ;;  %v8638_v53 = vadd.f32 %v8637_v56, %v8636_v45  ;;  %v12730_v51 = vsel %vm6041_vm8, %v5989_v52, %v6073_v40  ;;  %v12737_v19 = vmul.f32 %v13712_v38, %v6199_v44 }
 0x711   : > { %13711 = vst [vmem:[#allocation54_spill] sm:$0xff] %v12730_v51  ;;  %v8639_v6 = vpop.f32.mrf.mxu1  ;;  %v6185_v29 = vrot.slane %v12730_v51, 4  ;;  %v6284_v2 = vpack.c.bf16 %v12730_v51, %v12720_v21 }
 0x712   : > { %vm6042_vm2 = vcmp.gt.f32.partialorder %v5994_v12, 0.0  ;;  %v6074_v25 = vmul.f32 0.01, %v5994_v12  ;;  %v5836_v10 = vadd.f32 %v8638_v53, %v12464_v28  ;;  %13713 = vst [vmem:[#allocation55_spill] sm:$0xff] %v12737_v19  ;;  %v9131_v53 = vpop.f32.mrf.mxu0 }
 0x713   : > { %v8640_v11 = vpop.f32.mrf.mxu1  ;;  %9172 = vmatprep.mubr.bf16.mxu1 %v6284_v2  ;;  %v12741_v4 = vsel %vm3450_vm12, %v6184_v42, %v6185_v29 }
 0x714   : > { %v12743_v30 = vsel %vm6042_vm2, %v5994_v12, %v6074_v25  ;;  %v5997_v46 = vadd.f32 %v9127_v3, %v5836_v10  ;;  %v8641_v52 = vadd.f32 %v8640_v11, %v8639_v6  ;;  %v6004_v51 = vpop.f32.mrf.mxu0  ;;  %vm9745_vm2 = vmmov 0  }
 0x715   : > { %13714 = vst [vmem:[#allocation57_spill] sm:$0xff] %v12743_v30  ;;  %v8642_v40 = vpop.f32.mrf.mxu1  ;;  %v6186_v56 = vrot.slane %v12743_v30, 4 }
 0x716   : > { %vm6043_vm9 = vcmp.gt.f32.partialorder %v5997_v46, 0.0  ;;  %v6075_v44 = vmul.f32 0.01, %v5997_v46  ;;  %v5841_v2 = vadd.f32 %v8641_v52, %v12464_v28 }
 0x717   : > { %v8643_v42 = vpop.f32.mrf.mxu1  ;;  %v12753_v25 = vsel %vm3450_vm12, %v6185_v29, %v6186_v56 }
 0x718   : > { %v6107_v11 = vsel %vm6043_vm9, %v5997_v46, %v6075_v44  ;;  %v6002_v3 = vadd.f32 %v6001_v13, %v5841_v2  ;;  %v8644_v12 = vadd.f32 %v8643_v42, %v8642_v40 }
 0x719   : > { %v8645_v6 = vpop.f32.mrf.mxu1  ;;  %v6285_v10 = vpack.c.bf16 %v6107_v11, %v12743_v30  ;;  %v6187_v45 = vrot.slane %v6107_v11, 4  ;;  %v12761_v29 = vmul.f32 0.0, %v6107_v11 }
 0x71a   : > { %v6076_v21 = vmul.f32 0.01, %v6002_v3  ;;  %v5844_v38 = vadd.f32 %v8644_v12, %v12464_v28  ;;  %vm6044_vm10 = vcmp.gt.f32.partialorder %v6002_v3, 0.0 }
 0x71b   : > { %v8646_v19 = vpop.f32.mrf.mxu1  ;;  %9173 = vmatmul.mubr.bf16.gmra.mxu1 %v6285_v10  ;;  %v12759_v52 = vsel %vm3450_vm12, %v6186_v56, %v6187_v45 }
 0x71c   : > { %v6005_v46 = vadd.f32 %v6004_v51, %v5844_v38  ;;  %v8647_v13 = vadd.f32 %v8646_v19, %v8645_v6  ;;  %v12763_v40 = vsel %vm6044_vm10, %v6002_v3, %v6076_v21  ;;  %v6269_v44 = vpack.c.bf16 %v12759_v52, %v12753_v25 }
 0x71d   : > { %v8648_v2 = vpop.f32.mrf.mxu1  ;;  %v6188_v42 = vrot.slane %v12763_v40, 4  ;;  %v13771_v25 = vpack.c.bf16 %v12763_v40, %v12761_v29  ;;  %v13773_v29 = vmov 0.0  }
 0x71e   : > { %v6077_v10 = vmul.f32 0.01, %v6005_v46  ;;  %v5849_v30 = vadd.f32 %v8647_v13, %v12464_v28  ;;  %vm6045_vm11 = vcmp.gt.f32.partialorder %v6005_v46, 0.0 }
 0x71f   : > { %v8649_v56 = vpop.f32.mrf.mxu1  ;;  %v6195_v51 = vsel %vm3450_vm12, %v6187_v45, %v6188_v42 }
 0x720   : > { %v6010_v19 = vadd.f32 %v9130_v5, %v5849_v30  ;;  %v8650_v21 = vadd.f32 %v8649_v56, %v8648_v2  ;;  %v12773_v38 = vsel %vm6045_vm11, %v6005_v46, %v6077_v10  ;;  %v12780_v13 = vmul.f32 %v11435_v57, %v6195_v51 }
 0x721   : > { %v6189_v11 = vrot.slane %v12773_v38, 4  ;;  %v6286_v3 = vpack.c.bf16 %v12773_v38, %v12763_v40 }
 0x722   : > { %vm6046_vm13 = vcmp.gt.f32.partialorder %v6010_v19, 0.0  ;;  %v6078_v6 = vmul.f32 0.01, %v6010_v19  ;;  %v5852_v12 = vadd.f32 %v8650_v21, %v12464_v28 }
 0x723   : > { %9176 = vmatprep.mubr.bf16.mxu1 %v6286_v3  ;;  %v12784_v45 = vsel %vm3450_vm12, %v6188_v42, %v6189_v11  ;;  %v6160_v42 = vrot.slane %v12469_v23, 4  ;;  %v13715_v3 = vld [vmem:[#allocation29_spill] sm:$0xff] }
 0x724   : > { %v12786_v5 = vsel %vm6046_vm13, %v6010_v19, %v6078_v6  ;;  %v6013_v30 = vadd.f32 %v9131_v53, %v5852_v12  ;;  %v6270_v46 = vpack.c.bf16 %v12784_v45, %v12780_v13  ;;  %v9499_v45 = vld [vmem:[#allocation11 + $0x38] sm:$0xff]  }
 0x725   : > { %v6190_v2 = vrot.slane %v12786_v5, 4 }
 0x726   : > { %vm6047_vm14 = vcmp.gt.f32.partialorder %v6013_v30, 0.0  ;;  %v6079_v28 = vmul.f32 0.01, %v6013_v30 }
 0x727   : > { %v12795_v57 = vsel %vm3450_vm12, %v6189_v11, %v6190_v2 }
 0x728   : > { %v6111_v56 = vsel %vm6047_vm14, %v6013_v30, %v6079_v28  ;;  %v13716_v30 = vrot.slane %v12471_v24, 4 }
 0x729   : > { %v6191_v51 = vrot.slane %v6111_v56, 4  ;;  %v6287_v53 = vpack.c.bf16 %v6111_v56, %v12786_v5  ;;  %v6112_v12 = vmul.f32 0.0, %v6111_v56 }
 0x72a   : > { %v6222_v28 = vsel %vm3450_vm12, %v6160_v42, %v13716_v30 }
 0x72b   : > { %9177 = vmatmul.mubr.bf16.gmra.mxu1 %v6287_v53  ;;  %v6223_v19 = vsel %vm3450_vm12, %v6191_v51, %v6160_v42  ;;  %v6192_v21 = vsel %vm3450_vm12, %v6190_v2, %v6191_v51  ;;  %v6144_v56 = vpack.c.bf16 %v12469_v23, %v6112_v12  ;;  %v13717_v53 = vpack.c.bf16 %v12494_v54, %v12488_v37  ;;  %v13718_v2 = vld [vmem:[#allocation28_spill] sm:$0xff]  ;;  %v13719_v51 = vld [vmem:[#allocation26_spill] sm:$0xff] }
 0x72c   : > { %9196 = vmatprep.mubr.bf16.mxu1 %v13715_v3  ;;  %v6224_v6 = vmul.f32 %v11203_v15, %v6223_v19  ;;  %v6271_v11 = vpack.c.bf16 %v6192_v21, %v12795_v57  ;;  %v13720_v15 = vpack.c.bf16 %v12477_v58, %v12471_v24  ;;  %v13721_v57 = vpack.c.bf16 %v12522_v16, %v12518_v43  ;;  %v13722_v42 = vld [vmem:[#allocation32_spill] sm:$0xff]  ;;  %v13723_v23 = vld [vmem:[#allocation30_spill] sm:$0xff]  ;;  %v13727_v24 = vld [vmem:[#allocation33_spill] sm:$0xff] }
 0x72d   : > { %v13724_v37 = vpack.c.bf16 %v12498_v1, %v12496_v26  ;;  %v13725_v54 = vpack.c.bf16 %v12540_v32, %v12534_v18  ;;  %v13728_v58 = vpack.c.bf16 %v12524_v48, %v12511_v31  ;;  %v13729_v43 = vpack.c.bf16 %v12568_v55, %v12564_v22  ;;  %v13730_v16 = vld [vmem:[#allocation65_spill] sm:$0xff]  ;;  %v13731_v26 = vld [vmem:[#allocation64_spill] sm:$0xff]  ;;  %v13734_v32 = vld [vmem:[#allocation71_spill] sm:$0xff] }
 0x72e   : > { %v6256_v10 = vpack.c.bf16 %v6222_v28, %v6224_v6  ;;  %v13732_v1 = vpack.c.bf16 %v12544_v39, %v12542_v34  ;;  %v13733_v18 = vpack.c.bf16 %v12586_v0, %v12580_v62  ;;  %v13735_v31 = vld [vmem:[#allocation74_spill] sm:$0xff]  ;;  %v13736_v48 = vpack.c.bf16 %v12570_v35, %v12557_v41  ;;  %v13761_v21 = vld [vmem:[#allocation45_spill] sm:$0xff]  ;;  %v13763_v6 = vld [vmem:[#allocation55_spill] sm:$0xff] }
 0x72f   : > { %v13737_v22 = vpack.c.bf16 %v12612_v47, %v12608_v8  ;;  %v13738_v55 = vld [vmem:[#allocation34_spill] sm:$0xff]  ;;  %v13740_v39 = vpack.c.bf16 %v12590_v9, %v12588_v61  ;;  %v13741_v62 = vpack.c.bf16 %v12630_v36, %v12624_v50  ;;  %v13742_v41 = vpack.c.bf16 %v12614_v7, %v12601_v33  ;;  %v13745_v61 = vld [vmem:[#allocation43_spill] sm:$0xff]  ;;  %v13746_v9 = vld [vmem:[#allocation40_spill] sm:$0xff] }
 0x730   : > { %6517 = vmatprep.mubr.bf16.mxu0 %v6256_v10  ;;  %v13726_v10 = vld [vmem:[#allocation31_spill] sm:$0xff]  ;;  %v13739_v34 = vld [vmem:[#allocation38_spill] sm:$0xff]  ;;  %v13743_v35 = vpack.c.bf16 %v12655_v60, %v12651_v17  ;;  %v13744_v0 = vpack.c.bf16 %v12634_v59, %v12632_v27  ;;  %v13747_v8 = vpack.c.bf16 %v13745_v61, %v13746_v9  ;;  %v13751_v33 = vld [vmem:[#allocation49_spill] sm:$0xff]  ;;  %v13764_v30 = vpack.c.bf16 %v12741_v4, %v13763_v6 }
 0x731   : > { %6518 = vmatmul.mubr.bf16.vlgmr.msra.gmra.mxu0 %v6144_v56  ;;  %v13752_v7 = vld [vmem:[#allocation48_spill] sm:$0xff]  ;;  %v13755_v36 = vld [vmem:[#allocation47_spill] sm:$0xff]  ;;  %v13758_v12 = vld [vmem:[#allocation50_spill] sm:$0xff]  ;;  %v6339_v61 = vsub.s32 5, %v9960_v14 }
 0x732   : > { %6525 = vmatprep.mubr.bf16.mxu0 %v13717_v53  ;;  %v13753_v50 = vpack.c.bf16 %v13751_v33, %v13752_v7  ;;  %v13754_v17 = vld [vmem:[#allocation44_spill] sm:$0xff]  ;;  %v13760_v19 = vld [vmem:[#allocation46_spill] sm:$0xff]  ;;  %v13765_v53 = vld [vmem:[#allocation51_spill] sm:$0xff]  ;;  %9229 = vmatpush3.bf16.msra.mxu0 %v9499_v45 }
 0x733   : > { %9197 = vmatmul.mubr.bf16.vlgmr.msra.gmra.mxu1 %v13718_v2  ;;  %v13756_v60 = vpack.c.bf16 %v13754_v17, %v13755_v36  ;;  %v13762_v3 = vpack.c.bf16 %v13760_v19, %v13761_v21  ;;  %v13766_v2 = vld [vmem:[#allocation53_spill] sm:$0xff]  ;;  %9230 = vmatprep.subr.bf16.mxu0 %v13773_v29  ;;  %v9503_v9 = vld [vmem:[#allocation11 + $0x18] sm:$0xff]  }
 0x734   : > { %9200 = vmatprep.mubr.bf16.mxu1 %v13719_v51  ;;  %v13767_v51 = vpack.c.bf16 %v13765_v53, %v13766_v2 }
 0x739   : > { %6526 = vmatmul.mubr.bf16.gmra.mxu0 %v13720_v15 }
 0x73a   : > { %6533 = vmatprep.mubr.bf16.mxu0 %v13721_v57 }
 0x73b   : > { %9201 = vmatmul.mubr.bf16.gmra.mxu1 %v13722_v42  ;;  %v13768_v42 = vld [vmem:[#allocation57_spill] sm:$0xff] }
 0x73c   : > { %9204 = vmatprep.mubr.bf16.mxu1 %v13723_v23  ;;  %v13769_v23 = vld [vmem:[#allocation54_spill] sm:$0xff] }
 0x73d   : > { %v13770_v4 = vpack.c.bf16 %v13768_v42, %v13769_v23 }
 0x741   : > { %6534 = vmatmul.mubr.bf16.gmra.mxu0 %v13724_v37 }
 0x742   : > { %6541 = vmatprep.mubr.bf16.mxu0 %v13725_v54 }
 0x743   : > { %9205 = vmatmul.mubr.bf16.gmra.mxu1 %v13726_v10 }
 0x744   : > { %9208 = vmatprep.mubr.bf16.mxu1 %v13727_v24  ;;  %v13772_v24 = vpack.c.bf16 %v12786_v5, %v12773_v38  ;;  %v9500_v38 = vld [vmem:[#allocation11 + $0x30] sm:$0xff]  }
 0x745   : > { %9231 = vmatpush3.bf16.msra.mxu0 %v9500_v38 }
 0x746   : > { %9232 = vmatprep.subr.bf16.mxu0 %v13773_v29 }
 0x749   : > { %6542 = vmatmul.mubr.bf16.gmra.mxu0 %v13728_v58 }
 0x74a   : > { %6549 = vmatprep.mubr.bf16.mxu0 %v13729_v43 }
 0x74b   : > { %9209 = vmatmul.mubr.bf16.gmra.mxu1 %v13730_v16 }
 0x74c   : > { %9212 = vmatprep.mubr.bf16.mxu1 %v13731_v26 }
 0x751   : > { %6550 = vmatmul.mubr.bf16.gmra.mxu0 %v13732_v1 }
 0x752   : > { %6557 = vmatprep.mubr.bf16.mxu0 %v13733_v18  ;;  %v9501_v18 = vld [vmem:[#allocation11 + $0x28] sm:$0xff]  }
 0x753   : > { %9213 = vmatmul.mubr.bf16.gmra.mxu1 %v13734_v32  ;;  %9233 = vmatpush3.bf16.msra.mxu0 %v9501_v18 }
 0x754   : > { %9216 = vmatprep.mubr.bf16.mxu1 %v13735_v31  ;;  %9234 = vmatprep.subr.bf16.mxu0 %v13773_v29 }
 0x759   : > { %6558 = vmatmul.mubr.bf16.gmra.mxu0 %v13736_v48 }
 0x75a   : > { %6565 = vmatprep.mubr.bf16.mxu0 %v13737_v22 }
 0x75b   : > { %9217 = vmatmul.mubr.bf16.gmra.mxu1 %v13738_v55 }
 0x75c   : > { %9220 = vmatprep.mubr.bf16.mxu1 %v13739_v34  ;;  %v9502_v34 = vld [vmem:[#allocation11 + $0x20] sm:$0xff]  }
 0x75d   : > { %9235 = vmatpush3.bf16.msra.mxu0 %v9502_v34  ;;  %v9504_v34 = vld [vmem:[#allocation11 + $0x10] sm:$0xff]  }
 0x75e   : > { %9236 = vmatprep.subr.bf16.mxu0 %v13773_v29 }
 0x761   : > { %6566 = vmatmul.mubr.bf16.gmra.mxu0 %v13740_v39 }
 0x762   : > { %6573 = vmatprep.mubr.bf16.mxu0 %v13741_v62  ;;  %9237 = vmatpush3.bf16.msra.mxu0 %v9503_v9 }
 0x763   : > { %9221 = vmatmul.mubr.bf16.gmra.mxu1 %v12308_v49  ;;  %v13748_v49 = vld [vmem:[#allocation39_spill] sm:$0xff]  ;;  %9238 = vmatprep.subr.bf16.mxu0 %v13773_v29 }
 0x764   : > { %9224 = vmatprep.mubr.bf16.mxu1 %v12335_v20  ;;  %v13749_v20 = vld [vmem:[#allocation42_spill] sm:$0xff] }
 0x765   : > { %v13750_v47 = vpack.c.bf16 %v13748_v49, %v13749_v20 }
 0x766   : > { %9239 = vmatpush3.bf16.msra.mxu0 %v9504_v34 }
 0x767   : > { %9240 = vmatprep.subr.bf16.mxu0 %v13773_v29 }
 0x769   : > { %6574 = vmatmul.mubr.bf16.gmra.mxu0 %v13742_v41 }
 0x76a   : > { %6581 = vmatprep.mubr.bf16.mxu0 %v13743_v35 }
 0x76b   : > { %9225 = vmatmul.mubr.bf16.gmra.mxu1 %v12359_v63  ;;  %v13757_v63 = vld [vmem:[#allocation52_spill] sm:$0xff] }
 0x76c   : > { %v13759_v27 = vpack.c.bf16 %v13757_v63, %v13758_v12 }
 0x771   : > { %6582 = vmatmul.mubr.bf16.gmra.mxu0 %v13744_v0 }
 0x772   : > { %6589 = vmatprep.mubr.bf16.mxu0 %v13747_v8 }
 0x779   : > { %6590 = vmatmul.mubr.bf16.gmra.mxu0 %v13750_v47  ;;  %v9530_v47 = vld [vmem:[#allocation8] sm:$0x3f] }
 0x77a   : > { %6597 = vmatprep.mubr.bf16.mxu0 %v13753_v50  ;;  %v12983_v33 = vrot.slane %v9530_v47, %v6339_v61 }
 0x77b   : > { %v12889_v59 = vpop.f32.mrf.mxu1 }
 0x77d   : > { %v12897_v28 = vpop.f32.mrf.mxu1 }
 0x77f   : > { %v12899_v56 = vpop.f32.mrf.mxu1 }
 0x781   : > { %6598 = vmatmul.mubr.bf16.gmra.mxu0 %v13756_v60  ;;  %v12907_v15 = vpop.f32.mrf.mxu1 }
 0x782   : > { %6605 = vmatprep.mubr.bf16.mxu0 %v13759_v27 }
 0x789   : > { %6606 = vmatmul.mubr.bf16.gmra.mxu0 %v13762_v3 }
 0x78a   : > { %6613 = vmatprep.mubr.bf16.mxu0 %v13764_v30  ;;  %v13774_v30 = vld [vmem:[#allocation22_spill] sm:$0xff] }
 0x78b   : > { %v12909_v57 = vpop.f32.mrf.mxu1 }
 0x78d   : > { %v12917_v37 = vpop.f32.mrf.mxu1 }
 0x78f   : > { %v12919_v54 = vpop.f32.mrf.mxu1 }
 0x791   : > { %6614 = vmatmul.mubr.bf16.gmra.mxu0 %v13767_v51  ;;  %v12924_v52 = vpop.f32.mrf.mxu1 }
 0x792   : > { %6621 = vmatprep.mubr.bf16.mxu0 %v6269_v44 }
 0x799   : > { %6622 = vmatmul.mubr.bf16.gmra.mxu0 %v13770_v4 }
 0x79a   : > { %6629 = vmatprep.mubr.bf16.mxu0 %v6270_v46 }
 0x79b   : > { %v12926_v44 = vpop.f32.mrf.mxu1 }
 0x79d   : > { %v12928_v10 = vpop.f32.mrf.mxu1 }
 0x79f   : > { %v12933_v13 = vpop.f32.mrf.mxu1 }
 0x7a1   : > { %6630 = vmatmul.mubr.bf16.gmra.mxu0 %v13771_v25  ;;  %v12935_v46 = vpop.f32.mrf.mxu1 }
 0x7a2   : > { %6637 = vmatprep.mubr.bf16.mxu0 %v6271_v11 }
 0x7a9   : > { %6638 = vmatmul.mubr.bf16.gmra.mxu0 %v13772_v24 }
 0x7aa   : > { %9244 = vmatprep.mubr.msk.bf16.mxu0 %vm9745_vm2, %v13773_v29  ;;  %vm7444_vm2 = vcmask 1041409  }
 0x7ab   : > { %v12937_v58 = vpop.f32.mrf.mxu1 }
 0x7ad   : > { %v12940_v40 = vpop.f32.mrf.mxu1 }
 0x7af   : > { %v12942_v11 = vpop.f32.mrf.mxu1 }
 0x7b1   : > { %v12944_v43 = vpop.f32.mrf.mxu1 }
 0x7bb   : > { %v12946_v16 = vpop.f32.mrf.mxu1 }
 0x7bd   : > { %v12949_v5 = vpop.f32.mrf.mxu1 }
 0x7bf   : > { %v12951_v26 = vpop.f32.mrf.mxu1 }
 0x7c1   : > { %v12953_v1 = vpop.f32.mrf.mxu1 }
 0x7cb   : > { %v12955_v32 = vpop.f32.mrf.mxu1 }
 0x7cd   : > { %v12958_v31 = vpop.f32.mrf.mxu1 }
 0x7cf   : > { %v12960_v48 = vpop.f32.mrf.mxu1 }
 0x7d1   : > { %v12962_v22 = vpop.f32.mrf.mxu1 }
 0x7db   : > { %v12964_v55 = vpop.f32.mrf.mxu1 }
 0x7dd   : > { %v12966_v39 = vpop.f32.mrf.mxu1 }
 0x7df   : > { %v12969_v62 = vpop.f32.mrf.mxu1 }
 0x7e1   : > { %v12971_v41 = vpop.f32.mrf.mxu1 }
 0x7eb   : > { %v12973_v35 = vpop.f32.mrf.mxu1 }
 0x7ed   : > { %v12975_v0 = vpop.f32.mrf.mxu1 }
 0x7ef   : > { %v12978_v8 = vpop.f32.mrf.mxu1 }
 0x7f1   : > { %v8691_v49 = vpop.f32.mrf.mxu0  ;;  %v12980_v20 = vpop.f32.mrf.mxu1 }
 0x7f3   : > { %v8692_v7 = vpop.f32.mrf.mxu0  ;;  %v9198_v50 = vpop.f32.mrf.mxu1 }
 0x7f4   : > { %v8693_v17 = vadd.f32 %v8692_v7, %v8691_v49 }
 0x7f5   : > { %v8694_v36 = vpop.f32.mrf.mxu0  ;;  %v7006_v60 = vpop.f32.mrf.mxu1 }
 0x7f6   : > { %v6520_v63 = vadd.f32 %v8693_v17, %v12983_v33  ;;  %v7007_v53 = vadd.f32 %v7006_v60, %v13774_v30 }
 0x7f7   : > { %v8695_v14 = vpop.f32.mrf.mxu0  ;;  %v9199_v19 = vpop.f32.mrf.mxu1 }
 0x7f8   : > { %v6681_v12 = vadd.f32 %v12897_v28, %v6520_v63  ;;  %v8696_v27 = vadd.f32 %v8695_v14, %v8694_v36  ;;  %v7015_v63 = vadd.f32 %v9198_v50, %v13774_v30 }
 0x7f9   : > { %v8697_v21 = vpop.f32.mrf.mxu0  ;;  %v7009_v23 = vpop.f32.mrf.mxu1 }
 0x7fa   : > { %vm6807_vm12 = vcmp.gt.f32.partialorder %v6681_v12, 0.0  ;;  %v6839_v3 = vmul.f32 0.01, %v6681_v12  ;;  %v6523_v6 = vadd.f32 %v8696_v27, %v12983_v33  ;;  %v7010_v38 = vadd.f32 %v7009_v23, %v13774_v30 }
 0x7fb   : > { %v8698_v2 = vpop.f32.mrf.mxu0  ;;  %v12993_v49 = vpop.f32.mrf.mxu1 }
 0x7fc   : > { %v6871_v51 = vsel %vm6807_vm12, %v6681_v12, %v6839_v3  ;;  %v6684_v42 = vadd.f32 %v12907_v15, %v6523_v6  ;;  %v8699_v4 = vadd.f32 %v8698_v2, %v8697_v21 }
 0x7fd   : > { %v7133_v25 = vadd.f32 %v7007_v53, %v6871_v51  ;;  %v8700_v24 = vpop.f32.mrf.mxu0  ;;  %v7022_v27 = vpop.f32.mrf.mxu1 }
 0x7fe   : > { %vm6808_vm15 = vcmp.gt.f32.partialorder %v6684_v42, 0.0  ;;  %v6840_v45 = vmul.f32 0.01, %v6684_v42  ;;  %v6528_v28 = vadd.f32 %v8699_v4, %v12983_v33 }
 0x7ff   : > { %v8701_v18 = vpop.f32.mrf.mxu0  ;;  %v7197_v7 = vmul.f32 0.01, %v7133_v25  ;;  %vm7165_vm0 = vcmp.gt.f32.partialorder %v7133_v25, 0.0 }
 0x800   : > { %v6872_v61 = vsel %vm6808_vm15, %v6684_v42, %v6840_v45  ;;  %v6689_v9 = vadd.f32 %v12889_v59, %v6528_v28  ;;  %v8702_v47 = vadd.f32 %v8701_v18, %v8700_v24  ;;  %v7018_v24 = vadd.f32 %v9199_v19, %v13774_v30 }
 0x801   : > { %v7134_v15 = vadd.f32 %v7010_v38, %v6872_v61  ;;  %v8703_v17 = vpop.f32.mrf.mxu0  ;;  %v7229_v6 = vsel %vm7165_vm0, %v7133_v25, %v7197_v7  ;;  %v9203_v38 = vpop.f32.mrf.mxu1 }
 0x802   : > { %vm6809_vm1 = vcmp.gt.f32.partialorder %v6689_v9, 0.0  ;;  %v6841_v36 = vmul.f32 0.01, %v6689_v9  ;;  %v6531_v60 = vadd.f32 %v8702_v47, %v12983_v33 }
 0x803   : > { %vm7166_vm4 = vcmp.gt.f32.partialorder %v7134_v15, 0.0  ;;  %v7198_v14 = vmul.f32 0.01, %v7134_v15  ;;  %v8704_v12 = vpop.f32.mrf.mxu0 }
 0x804   : > { %v6873_v59 = vsel %vm6809_vm1, %v6689_v9, %v6841_v36  ;;  %v6692_v21 = vadd.f32 %v12899_v56, %v6531_v60  ;;  %v8705_v3 = vadd.f32 %v8704_v12, %v8703_v17  ;;  %v7025_v36 = vpop.f32.mrf.mxu1 }
 0x805   : > { %v7230_v53 = vsel %vm7166_vm4, %v7134_v15, %v7198_v14  ;;  %v7135_v2 = vadd.f32 %v7015_v63, %v6873_v59  ;;  %v8706_v51 = vpop.f32.mrf.mxu0  ;;  %v7023_v15 = vadd.f32 %v7022_v27, %v13774_v30  ;;  %v7026_v27 = vadd.f32 %v7025_v36, %v13774_v30 }
 0x806   : > { %v7325_v42 = vmax.f32 %v7229_v6, %v7230_v53  ;;  %vm6810_vm5 = vcmp.gt.f32.partialorder %v6692_v21, 0.0  ;;  %v6842_v23 = vmul.f32 0.01, %v6692_v21  ;;  %v6536_v4 = vadd.f32 %v8705_v3, %v12983_v33 }
 0x807   : > { %vm7167_vm6 = vcmp.gt.f32.partialorder %v7135_v2, 0.0  ;;  %v7199_v50 = vmul.f32 0.01, %v7135_v2  ;;  %v8707_v45 = vpop.f32.mrf.mxu0 }
 0x808   : > { %v6874_v28 = vsel %vm6810_vm5, %v6692_v21, %v6842_v23  ;;  %v6697_v18 = vadd.f32 %v12917_v37, %v6536_v4  ;;  %v8708_v56 = vadd.f32 %v8707_v45, %v8706_v51  ;;  %v9505_v37 = vld [vmem:[#allocation11 + $0x8] sm:$0xff]  }
 0x809   : > { %v7231_v34 = vsel %vm7167_vm6, %v7135_v2, %v7199_v50  ;;  %v7136_v25 = vadd.f32 %v7018_v24, %v6874_v28  ;;  %v8709_v61 = vpop.f32.mrf.mxu0  ;;  %9241 = vmatpush3.bf16.msra.mxu0 %v9505_v37  ;;  %v9506_v2 = vld [vmem:[#allocation11] sm:$0xff]  }
 0x80a   : > { %v7326_v9 = vmax.f32 %v7325_v42, %v7231_v34  ;;  %vm6811_vm7 = vcmp.gt.f32.partialorder %v6697_v18, 0.0  ;;  %v6843_v47 = vmul.f32 0.01, %v6697_v18  ;;  %v6539_v7 = vadd.f32 %v8708_v56, %v12983_v33  ;;  %9242 = vmatprep.subr.bf16.mxu0 %v13773_v29 }
 0x80b   : > { %vm7168_vm3 = vcmp.gt.f32.partialorder %v7136_v25, 0.0  ;;  %v7200_v19 = vmul.f32 0.01, %v7136_v25  ;;  %v8710_v17 = vpop.f32.mrf.mxu0  ;;  %v7031_v34 = vadd.f32 %v12993_v49, %v13774_v30 }
 0x80c   : > { %v6875_v60 = vsel %vm6811_vm7, %v6697_v18, %v6843_v47  ;;  %v6700_v63 = vadd.f32 %v12924_v52, %v6539_v7  ;;  %v8711_v14 = vadd.f32 %v8710_v17, %v8709_v61  ;;  %v13009_v52 = vpop.f32.mrf.mxu1 }
 0x80d   : > { %v7232_v12 = vsel %vm7168_vm3, %v7136_v25, %v7200_v19  ;;  %v7137_v59 = vadd.f32 %v7023_v15, %v6875_v60  ;;  %v8712_v21 = vpop.f32.mrf.mxu0  ;;  %9243 = vmatpush3.bf16.msra.mxu0 %v9506_v2 }
 0x80e   : > { %v7327_v3 = vmax.f32 %v7326_v9, %v7232_v12  ;;  %vm6812_vm8 = vcmp.gt.f32.partialorder %v6700_v63, 0.0  ;;  %v6844_v6 = vmul.f32 0.01, %v6700_v63  ;;  %v6544_v53 = vadd.f32 %v8711_v14, %v12983_v33  ;;  %v7038_v61 = vpop.f32.mrf.mxu1 }
 0x80f   : > { %v8713_v51 = vpop.f32.mrf.mxu0  ;;  %v7201_v50 = vmul.f32 0.01, %v7137_v59  ;;  %vm7169_vm9 = vcmp.gt.f32.partialorder %v7137_v59, 0.0  ;;  %v7034_v14 = vadd.f32 %v9203_v38, %v13774_v30 }
 0x810   : > { %v6876_v42 = vsel %vm6812_vm8, %v6700_v63, %v6844_v6  ;;  %v6705_v23 = vadd.f32 %v12909_v57, %v6544_v53  ;;  %v8714_v4 = vadd.f32 %v8713_v51, %v8712_v21  ;;  %v7328_v24 = vrot.slane %v7327_v3, 4  ;;  %v9207_v21 = vpop.f32.mrf.mxu1 }
 0x811   : > { %v7138_v45 = vadd.f32 %v7026_v27, %v6876_v42  ;;  %v8715_v28 = vpop.f32.mrf.mxu0  ;;  %v7233_v15 = vsel %vm7169_vm9, %v7137_v59, %v7201_v50 }
 0x812   : > { %vm6813_vm10 = vcmp.gt.f32.partialorder %v6705_v23, 0.0  ;;  %v6845_v18 = vmul.f32 0.01, %v6705_v23  ;;  %v6547_v56 = vadd.f32 %v8714_v4, %v12983_v33  ;;  %v7329_v7 = vmax.f32 %v7327_v3, %v7328_v24  ;;  %v7041_v50 = vpop.f32.mrf.mxu1 }
 0x813   : > { %vm7170_vm11 = vcmp.gt.f32.partialorder %v7138_v45, 0.0  ;;  %v7202_v29 = vmul.f32 0.01, %v7138_v45  ;;  %v8716_v25 = vpop.f32.mrf.mxu0  ;;  %v7039_v24 = vadd.f32 %v7038_v61, %v13774_v30 }
 0x814   : > { %v6877_v9 = vsel %vm6813_vm10, %v6705_v23, %v6845_v18  ;;  %v6708_v57 = vadd.f32 %v12919_v54, %v6547_v56  ;;  %v8717_v47 = vadd.f32 %v8716_v25, %v8715_v28  ;;  %v7330_v54 = vrot.slane %v7329_v7, 2 }
 0x815   : > { %v7234_v19 = vsel %vm7170_vm11, %v7138_v45, %v7202_v29  ;;  %v7139_v17 = vadd.f32 %v7031_v34, %v6877_v9  ;;  %v8718_v36 = vpop.f32.mrf.mxu0 }
 0x816   : > { %v7334_v60 = vmax.f32 %v7233_v15, %v7234_v19  ;;  %vm6814_vm13 = vcmp.gt.f32.partialorder %v6708_v57, 0.0  ;;  %v6846_v63 = vmul.f32 0.01, %v6708_v57  ;;  %v6552_v37 = vadd.f32 %v8717_v47, %v12983_v33  ;;  %v13024_v19 = vpop.f32.mrf.mxu1 }
 0x817   : > { %vm7171_vm14 = vcmp.gt.f32.partialorder %v7139_v17, 0.0  ;;  %v7203_v49 = vmul.f32 0.01, %v7139_v17  ;;  %v8719_v12 = vpop.f32.mrf.mxu0  ;;  %v7331_v18 = vmax.f32 %v7329_v7, %v7330_v54  ;;  %v7042_v15 = vadd.f32 %v7041_v50, %v13774_v30 }
 0x818   : > { %v6878_v6 = vsel %vm6814_vm13, %v6708_v57, %v6846_v63  ;;  %v8720_v53 = vadd.f32 %v8719_v12, %v8718_v36  ;;  %v6713_v59 = vadd.f32 %v12928_v10, %v6552_v37  ;;  %v7047_v12 = vadd.f32 %v13009_v52, %v13774_v30  ;;  %v7054_v54 = vpop.f32.mrf.mxu1 }
 0x819   : > { %v7235_v2 = vsel %vm7171_vm14, %v7139_v17, %v7203_v49  ;;  %v7140_v3 = vadd.f32 %v7034_v14, %v6878_v6  ;;  %v8721_v27 = vpop.f32.mrf.mxu0  ;;  %v7332_v36 = vrot.slane %v7331_v18, 1  ;;  %v7050_v52 = vadd.f32 %v9207_v21, %v13774_v30 }
 0x81a   : > { %v7335_v51 = vmax.f32 %v7334_v60, %v7235_v2  ;;  %v6555_v42 = vadd.f32 %v8720_v53, %v12983_v33  ;;  %vm6815_vm15 = vcmp.gt.f32.partialorder %v6713_v59, 0.0  ;;  %v6847_v38 = vmul.f32 0.01, %v6713_v59 }
 0x81b   : > { %vm7172_vm12 = vcmp.gt.f32.partialorder %v7140_v3, 0.0  ;;  %v7204_v23 = vmul.f32 0.01, %v7140_v3  ;;  %v8722_v4 = vpop.f32.mrf.mxu0 }
 0x81c   : > { %v6716_v45 = vadd.f32 %v12935_v46, %v6555_v42  ;;  %v8723_v28 = vadd.f32 %v8722_v4, %v8721_v27  ;;  %v6879_v34 = vsel %vm6815_vm15, %v6713_v59, %v6847_v38  ;;  %v7333_v27 = vmax.f32 %v7331_v18, %v7332_v36 }
 0x81d   : > { %v7236_v56 = vsel %vm7172_vm12, %v7140_v3, %v7204_v23  ;;  %v8724_v29 = vpop.f32.mrf.mxu0  ;;  %v7141_v25 = vadd.f32 %v7039_v24, %v6879_v34 }
 0x81e   : > { %v7336_v10 = vmax.f32 %v7335_v51, %v7236_v56  ;;  %vm6816_vm0 = vcmp.gt.f32.partialorder %v6716_v45, 0.0  ;;  %v6848_v9 = vmul.f32 0.01, %v6716_v45  ;;  %v6560_v57 = vadd.f32 %v8723_v28, %v12983_v33 }
 0x81f   : > { %v8725_v47 = vpop.f32.mrf.mxu0  ;;  %v7205_v46 = vmul.f32 0.01, %v7141_v25  ;;  %vm7173_vm1 = vcmp.gt.f32.partialorder %v7141_v25, 0.0 }
 0x820   : > { %v7337_v61 = vrot.slane %v7336_v10, 4  ;;  %v8726_v17 = vadd.f32 %v8725_v47, %v8724_v29  ;;  %v6880_v60 = vsel %vm6816_vm0, %v6716_v45, %v6848_v9  ;;  %v6721_v7 = vadd.f32 %v12926_v44, %v6560_v57  ;;  %v13033_v29 = vpop.f32.mrf.mxu1 }
 0x821   : > { %v8727_v63 = vpop.f32.mrf.mxu0  ;;  %v7142_v49 = vadd.f32 %v7042_v15, %v6880_v60  ;;  %v7237_v44 = vsel %vm7173_vm1, %v7141_v25, %v7205_v46  ;;  %vm7446_vm1 = vcmask 1042434  }
 0x822   : > { %v7338_v14 = vmax.f32 %v7336_v10, %v7337_v61  ;;  %v6563_v37 = vadd.f32 %v8726_v17, %v12983_v33  ;;  %vm6817_vm4 = vcmp.gt.f32.partialorder %v6721_v7, 0.0  ;;  %v6849_v6 = vmul.f32 0.01, %v6721_v7 }
 0x823   : > { %v8728_v53 = vpop.f32.mrf.mxu0  ;;  %vm7174_vm5 = vcmp.gt.f32.partialorder %v7142_v49, 0.0  ;;  %v7206_v3 = vmul.f32 0.01, %v7142_v49  ;;  %v7397_v10 = vpack.c.bf16 %v7333_v27, %v7333_v27  ;;  %v7055_v17 = vadd.f32 %v7054_v54, %v13774_v30 }
 0x824   : > { %v7339_v2 = vrot.slane %v7338_v14, 2  ;;  %v6724_v59 = vadd.f32 %v12933_v13, %v6563_v37  ;;  %v6881_v51 = vsel %vm6817_vm4, %v6721_v7, %v6849_v6  ;;  %v8729_v42 = vadd.f32 %v8728_v53, %v8727_v63  ;;  %v7057_v63 = vpop.f32.mrf.mxu1 }
 0x825   : > { %v8730_v23 = vpop.f32.mrf.mxu0  ;;  %v7238_v4 = vsel %vm7174_vm5, %v7142_v49, %v7206_v3  ;;  %v7143_v24 = vadd.f32 %v7047_v12, %v6881_v51  ;;  %v7436_v37 = vunpack.c.l.b16 %v7397_v10 }
 0x826   : > { %v7340_v38 = vmax.f32 %v7338_v14, %v7339_v2  ;;  %vm6818_vm6 = vcmp.gt.f32.partialorder %v6724_v59, 0.0  ;;  %v7343_v50 = vmax.f32 %v7237_v44, %v7238_v4  ;;  %v6850_v45 = vmul.f32 0.01, %v6724_v59 }
 0x827   : > { %v6568_v28 = vadd.f32 %v8729_v42, %v12983_v33  ;;  %v8731_v56 = vpop.f32.mrf.mxu0  ;;  %vm7175_vm7 = vcmp.gt.f32.partialorder %v7143_v24, 0.0  ;;  %v7207_v13 = vmul.f32 0.01, %v7143_v24  ;;  %v7058_v42 = vadd.f32 %v7057_v63, %v13774_v30 }
 0x828   : > { %v7341_v34 = vrot.slane %v7340_v38, 1  ;;  %v8732_v18 = vadd.f32 %v8731_v56, %v8730_v23  ;;  %v6882_v25 = vsel %vm6818_vm6, %v6724_v59, %v6850_v45  ;;  %v13043_v23 = vpop.f32.mrf.mxu1  ;;  %v7063_v56 = vadd.f32 %v13024_v19, %v13774_v30 }
 0x829   : > { %v6729_v9 = vadd.f32 %v12940_v40, %v6568_v28  ;;  %v8733_v57 = vpop.f32.mrf.mxu0  ;;  %v7239_v15 = vsel %vm7175_vm7, %v7143_v24, %v7207_v13  ;;  %v7144_v61 = vadd.f32 %v7050_v52, %v6882_v25  ;;  %v7066_v19 = vadd.f32 %v13033_v29, %v13774_v30 }
 0x82a   : > { %v7342_v47 = vmax.f32 %v7340_v38, %v7341_v34  ;;  %v6571_v21 = vadd.f32 %v8732_v18, %v12983_v33  ;;  %v7344_v36 = vmax.f32 %v7343_v50, %v7239_v15  ;;  %v7070_v10 = vpop.f32.mrf.mxu1 }
 0x82b   : > { %vm6819_vm3 = vcmp.gt.f32.partialorder %v6729_v9, 0.0  ;;  %v6851_v46 = vmul.f32 0.01, %v6729_v9  ;;  %v8734_v60 = vpop.f32.mrf.mxu0  ;;  %vm7176_vm8 = vcmp.gt.f32.partialorder %v7144_v61, 0.0  ;;  %v7208_v14 = vmul.f32 0.01, %v7144_v61 }
 0x82c   : > { %v7398_v7 = vpack.c.bf16 %v7342_v47, %v7342_v47  ;;  %v6732_v49 = vadd.f32 %v12944_v43, %v6571_v21  ;;  %v8735_v12 = vadd.f32 %v8734_v60, %v8733_v57 }
 0x82d   : > { %v6883_v40 = vsel %vm6819_vm3, %v6729_v9, %v6851_v46  ;;  %v8736_v6 = vpop.f32.mrf.mxu0  ;;  %v7240_v2 = vsel %vm7176_vm8, %v7144_v61, %v7208_v14  ;;  %v13053_v14 = vpop.f32.mrf.mxu1 }
 0x82e   : > { %v7437_v53 = vunpack.c.l.b16 %v7398_v7  ;;  %v7145_v3 = vadd.f32 %v7055_v17, %v6883_v40  ;;  %vm6820_vm9 = vcmp.gt.f32.partialorder %v6732_v49, 0.0  ;;  %v7345_v54 = vmax.f32 %v7344_v36, %v7240_v2 }
 0x82f   : > { %v6852_v59 = vmul.f32 0.01, %v6732_v49  ;;  %v6576_v27 = vadd.f32 %v8735_v12, %v12983_v33  ;;  %v8737_v44 = vpop.f32.mrf.mxu0 }
 0x830   : > { %v13040_v51 = vsel %vm7444_vm2, %v7437_v53, %v7436_v37  ;;  %v8738_v43 = vadd.f32 %v8737_v44, %v8736_v6  ;;  %v7346_v38 = vrot.slane %v7345_v54, 4  ;;  %v7209_v4 = vmul.f32 0.01, %v7145_v3  ;;  %v7073_v44 = vpop.f32.mrf.mxu1 }
 0x831   : > { %v6884_v24 = vsel %vm6820_vm9, %v6732_v49, %v6852_v59  ;;  %v6737_v52 = vadd.f32 %v12937_v58, %v6576_v27  ;;  %v8739_v50 = vpop.f32.mrf.mxu0  ;;  %vm7177_vm10 = vcmp.gt.f32.partialorder %v7145_v3, 0.0 }
 0x832   : > { %v7146_v45 = vadd.f32 %v7058_v42, %v6884_v24  ;;  %v6579_v28 = vadd.f32 %v8738_v43, %v12983_v33  ;;  %v7347_v34 = vmax.f32 %v7345_v54, %v7346_v38  ;;  %v7241_v58 = vsel %vm7177_vm10, %v7145_v3, %v7209_v4 }
 0x833   : > { %vm6821_vm11 = vcmp.gt.f32.partialorder %v6737_v52, 0.0  ;;  %v6853_v13 = vmul.f32 0.01, %v6737_v52  ;;  %v8740_v18 = vpop.f32.mrf.mxu0  ;;  %v7071_v4 = vadd.f32 %v7070_v10, %v13774_v30  ;;  %vm7448_vm10 = vcmask 1043459  }
 0x834   : > { %vm7178_vm13 = vcmp.gt.f32.partialorder %v7146_v45, 0.0  ;;  %v7210_v25 = vmul.f32 0.01, %v7146_v45  ;;  %v6740_v9 = vadd.f32 %v12942_v11, %v6579_v28  ;;  %v8741_v57 = vadd.f32 %v8740_v18, %v8739_v50 }
 0x835   : > { %v7348_v47 = vrot.slane %v7347_v34, 2  ;;  %v6885_v15 = vsel %vm6821_vm11, %v6737_v52, %v6853_v13  ;;  %v8742_v61 = vpop.f32.mrf.mxu0 }
 0x836   : > { %v7242_v21 = vsel %vm7178_vm13, %v7146_v45, %v7210_v25  ;;  %v7147_v17 = vadd.f32 %v7063_v56, %v6885_v15  ;;  %vm6822_vm14 = vcmp.gt.f32.partialorder %v6740_v9, 0.0  ;;  %v6854_v36 = vmul.f32 0.01, %v6740_v9 }
 0x837   : > { %v7349_v46 = vmax.f32 %v7347_v34, %v7348_v47  ;;  %v7352_v60 = vmax.f32 %v7241_v58, %v7242_v21  ;;  %v6584_v7 = vadd.f32 %v8741_v57, %v12983_v33  ;;  %v8743_v63 = vpop.f32.mrf.mxu0  ;;  %v7074_v56 = vadd.f32 %v7073_v44, %v13774_v30 }
 0x838   : > { %vm7179_vm12 = vcmp.gt.f32.partialorder %v7147_v17, 0.0  ;;  %v7211_v11 = vmul.f32 0.01, %v7147_v17  ;;  %v6886_v49 = vsel %vm6822_vm14, %v6740_v9, %v6854_v36  ;;  %v8744_v37 = vadd.f32 %v8743_v63, %v8742_v61  ;;  %v13061_v9 = vpop.f32.mrf.mxu1 }
 0x839   : > { %v7350_v40 = vrot.slane %v7349_v46, 1  ;;  %v7148_v12 = vadd.f32 %v7066_v19, %v6886_v49  ;;  %v6745_v6 = vadd.f32 %v12949_v5, %v6584_v7  ;;  %v8745_v53 = vpop.f32.mrf.mxu0 }
 0x83a   : > { %v7243_v2 = vsel %vm7179_vm12, %v7147_v17, %v7211_v11  ;;  %v6587_v3 = vadd.f32 %v8744_v37, %v12983_v33 }
 0x83b   : > { %v7351_v29 = vmax.f32 %v7349_v46, %v7350_v40  ;;  %v7353_v54 = vmax.f32 %v7352_v60, %v7243_v2  ;;  %vm7180_vm15 = vcmp.gt.f32.partialorder %v7148_v12, 0.0  ;;  %v7212_v59 = vmul.f32 0.01, %v7148_v12  ;;  %v8746_v27 = vpop.f32.mrf.mxu0  ;;  %v7086_v60 = vpop.f32.mrf.mxu1 }
 0x83c   : > { %vm6823_vm0 = vcmp.gt.f32.partialorder %v6745_v6, 0.0  ;;  %v6855_v42 = vmul.f32 0.01, %v6745_v6  ;;  %v6748_v43 = vadd.f32 %v12953_v1, %v6587_v3  ;;  %v8747_v38 = vadd.f32 %v8746_v27, %v8745_v53 }
 0x83d   : > { %v7399_v24 = vpack.c.bf16 %v7351_v29, %v7351_v29  ;;  %v7244_v5 = vsel %vm7180_vm15, %v7148_v12, %v7212_v59  ;;  %v8748_v52 = vpop.f32.mrf.mxu0  ;;  %v7082_v59 = vadd.f32 %v13053_v14, %v13774_v30 }
 0x83e   : > { %v7354_v50 = vmax.f32 %v7353_v54, %v7244_v5  ;;  %v6887_v45 = vsel %vm6823_vm0, %v6745_v6, %v6855_v42  ;;  %vm6824_vm4 = vcmp.gt.f32.partialorder %v6748_v43, 0.0  ;;  %v6856_v28 = vmul.f32 0.01, %v6748_v43 }
 0x83f   : > { %v7438_v34 = vunpack.c.l.b16 %v7399_v24  ;;  %v7149_v13 = vadd.f32 %v7071_v4, %v6887_v45  ;;  %v6592_v18 = vadd.f32 %v8747_v38, %v12983_v33  ;;  %v8749_v25 = vpop.f32.mrf.mxu0 }
 0x840   : > { %v7355_v1 = vrot.slane %v7354_v50, 4  ;;  %v6888_v57 = vsel %vm6824_vm4, %v6748_v43, %v6856_v28  ;;  %v8750_v10 = vadd.f32 %v8749_v25, %v8748_v52  ;;  %v7087_v52 = vadd.f32 %v7086_v60, %v13774_v30 }
 0x841   : > { %v13065_v47 = vsel %vm7446_vm1, %v7438_v34, %v13040_v51  ;;  %v7213_v58 = vmul.f32 0.01, %v7149_v13  ;;  %v7150_v15 = vadd.f32 %v7074_v56, %v6888_v57  ;;  %v8751_v61 = vpop.f32.mrf.mxu0  ;;  %vm7181_vm5 = vcmp.gt.f32.partialorder %v7149_v13, 0.0 }
 0x842   : > { %v7356_v21 = vmax.f32 %v7354_v50, %v7355_v1  ;;  %v6753_v17 = vadd.f32 %v12946_v16, %v6592_v18  ;;  %v6595_v36 = vadd.f32 %v8750_v10, %v12983_v33  ;;  %v7079_v51 = vadd.f32 %v13043_v23, %v13774_v30 }
 0x843   : > { %vm7182_vm6 = vcmp.gt.f32.partialorder %v7150_v15, 0.0  ;;  %v7214_v19 = vmul.f32 0.01, %v7150_v15  ;;  %v8752_v46 = vpop.f32.mrf.mxu0  ;;  %v7245_v49 = vsel %vm7181_vm5, %v7149_v13, %v7213_v58  ;;  %vm7450_vm5 = vcmask 1044484  }
 0x844   : > { %v7357_v7 = vrot.slane %v7356_v21, 2  ;;  %vm6825_vm7 = vcmp.gt.f32.partialorder %v6753_v17, 0.0  ;;  %v6857_v63 = vmul.f32 0.01, %v6753_v17  ;;  %v6756_v11 = vadd.f32 %v12951_v26, %v6595_v36  ;;  %v13075_v26 = vpop.f32.mrf.mxu1 }
 0x845   : > { %v7246_v37 = vsel %vm7182_vm6, %v7150_v15, %v7214_v19  ;;  %v8753_v40 = vadd.f32 %v8752_v46, %v8751_v61  ;;  %v8754_v12 = vpop.f32.mrf.mxu0 }
 0x846   : > { %v7358_v6 = vmax.f32 %v7356_v21, %v7357_v7  ;;  %v7361_v16 = vmax.f32 %v7245_v49, %v7246_v37  ;;  %v6889_v53 = vsel %vm6825_vm7, %v6753_v17, %v6857_v63  ;;  %vm6826_vm3 = vcmp.gt.f32.partialorder %v6756_v11, 0.0  ;;  %v7089_v28 = vpop.f32.mrf.mxu1 }
 0x847   : > { %v7151_v2 = vadd.f32 %v7079_v51, %v6889_v53  ;;  %v6858_v3 = vmul.f32 0.01, %v6756_v11  ;;  %v6600_v29 = vadd.f32 %v8753_v40, %v12983_v33  ;;  %v8755_v54 = vpop.f32.mrf.mxu0  ;;  %v7090_v36 = vadd.f32 %v7089_v28, %v13774_v30 }
 0x848   : > { %v7359_v27 = vrot.slane %v7358_v6, 1  ;;  %v8756_v23 = vadd.f32 %v8755_v54, %v8754_v12  ;;  %v13083_v19 = vpop.f32.mrf.mxu1  ;;  %v7095_v40 = vadd.f32 %v13061_v9, %v13774_v30  ;;  %v7098_v9 = vadd.f32 %v13075_v26, %v13774_v30 }
 0x849   : > { %vm7183_vm8 = vcmp.gt.f32.partialorder %v7151_v2, 0.0  ;;  %v7215_v44 = vmul.f32 0.01, %v7151_v2  ;;  %v6890_v42 = vsel %vm6826_vm3, %v6756_v11, %v6858_v3  ;;  %v6761_v43 = vadd.f32 %v12958_v31, %v6600_v29  ;;  %v8757_v38 = vpop.f32.mrf.mxu0 }
 0x84a   : > { %v7360_v4 = vmax.f32 %v7358_v6, %v7359_v27  ;;  %v7152_v24 = vadd.f32 %v7082_v59, %v6890_v42  ;;  %v6603_v5 = vadd.f32 %v8756_v23, %v12983_v33  ;;  %v7102_v53 = vpop.f32.mrf.mxu1 }
 0x84b   : > { %v7247_v50 = vsel %vm7183_vm8, %v7151_v2, %v7215_v44  ;;  %vm6827_vm2 = vcmp.gt.f32.partialorder %v6761_v43, 0.0  ;;  %v6859_v45 = vmul.f32 0.01, %v6761_v43  ;;  %v8758_v14 = vpop.f32.mrf.mxu0 }
 0x84c   : > { %v7400_v56 = vpack.c.bf16 %v7360_v4, %v7360_v4  ;;  %v7362_v34 = vmax.f32 %v7361_v16, %v7247_v50  ;;  %vm7184_vm9 = vcmp.gt.f32.partialorder %v7152_v24, 0.0  ;;  %v7216_v13 = vmul.f32 0.01, %v7152_v24 }
 0x84d   : > { %v6891_v18 = vsel %vm6827_vm2, %v6761_v43, %v6859_v45  ;;  %v6764_v25 = vadd.f32 %v12962_v22, %v6603_v5  ;;  %v8759_v31 = vadd.f32 %v8758_v14, %v8757_v38  ;;  %v8760_v1 = vpop.f32.mrf.mxu0 }
 0x84e   : > { %v7439_v57 = vunpack.c.l.b16 %v7400_v56  ;;  %v7248_v10 = vsel %vm7184_vm9, %v7152_v24, %v7216_v13  ;;  %v7153_v58 = vadd.f32 %v7087_v52, %v6891_v18  ;;  %v13096_v24 = vpop.f32.mrf.mxu1 }
 0x84f   : > { %v7363_v15 = vmax.f32 %v7362_v34, %v7248_v10  ;;  %vm6828_vm11 = vcmp.gt.f32.partialorder %v6764_v25, 0.0  ;;  %v6860_v61 = vmul.f32 0.01, %v6764_v25  ;;  %v6608_v21 = vadd.f32 %v8759_v31, %v12983_v33  ;;  %v8761_v17 = vpop.f32.mrf.mxu0 }
 0x850   : > { %v8762_v46 = vadd.f32 %v8761_v17, %v8760_v1  ;;  %v13086_v60 = vsel %vm7448_vm10, %v7439_v57, %v13065_v47  ;;  %v7217_v7 = vmul.f32 0.01, %v7153_v58  ;;  %vm7185_vm13 = vcmp.gt.f32.partialorder %v7153_v58, 0.0  ;;  %v7105_v31 = vpop.f32.mrf.mxu1 }
 0x851   : > { %v7364_v22 = vrot.slane %v7363_v15, 4  ;;  %v6892_v63 = vsel %vm6828_vm11, %v6764_v25, %v6860_v61  ;;  %v6769_v11 = vadd.f32 %v12955_v32, %v6608_v21  ;;  %v8763_v51 = vpop.f32.mrf.mxu0 }
 0x852   : > { %v7154_v49 = vadd.f32 %v7090_v36, %v6892_v63  ;;  %v6611_v37 = vadd.f32 %v8762_v46, %v12983_v33  ;;  %v7249_v32 = vsel %vm7185_vm13, %v7153_v58, %v7217_v7  ;;  %v7103_v58 = vadd.f32 %v7102_v53, %v13774_v30 }
 0x853   : > { %v7365_v12 = vmax.f32 %v7363_v15, %v7364_v22  ;;  %vm6829_vm14 = vcmp.gt.f32.partialorder %v6769_v11, 0.0  ;;  %v6861_v6 = vmul.f32 0.01, %v6769_v11  ;;  %v8764_v16 = vpop.f32.mrf.mxu0  ;;  %v7106_v46 = vadd.f32 %v7105_v31, %v13774_v30 }
 0x854   : > { %vm7186_vm12 = vcmp.gt.f32.partialorder %v7154_v49, 0.0  ;;  %v7218_v47 = vmul.f32 0.01, %v7154_v49  ;;  %v6772_v2 = vadd.f32 %v12960_v48, %v6611_v37  ;;  %v8765_v3 = vadd.f32 %v8764_v16, %v8763_v51  ;;  %v13104_v37 = vpop.f32.mrf.mxu1 }
 0x855   : > { %v7366_v29 = vrot.slane %v7365_v12, 2  ;;  %v6893_v54 = vsel %vm6829_vm14, %v6769_v11, %v6861_v6  ;;  %v8766_v59 = vpop.f32.mrf.mxu0  ;;  %vm7452_vm13 = vcmask 1045509  }
 0x856   : > { %v7250_v27 = vsel %vm7186_vm12, %v7154_v49, %v7218_v47  ;;  %v7155_v23 = vadd.f32 %v7095_v40, %v6893_v54  ;;  %vm6830_vm15 = vcmp.gt.f32.partialorder %v6772_v2, 0.0  ;;  %v6862_v44 = vmul.f32 0.01, %v6772_v2 }
 0x857   : > { %v7367_v42 = vmax.f32 %v7365_v12, %v7366_v29  ;;  %v7370_v43 = vmax.f32 %v7249_v32, %v7250_v27  ;;  %v6616_v38 = vadd.f32 %v8765_v3, %v12983_v33  ;;  %v8767_v4 = vpop.f32.mrf.mxu0 }
 0x858   : > { %vm7187_vm0 = vcmp.gt.f32.partialorder %v7155_v23, 0.0  ;;  %v7219_v48 = vmul.f32 0.01, %v7155_v23  ;;  %v6894_v5 = vsel %vm6830_vm15, %v6772_v2, %v6862_v44  ;;  %v8768_v52 = vadd.f32 %v8767_v4, %v8766_v59 }
 0x859   : > { %v7368_v50 = vrot.slane %v7367_v42, 1  ;;  %v7156_v45 = vadd.f32 %v7098_v9, %v6894_v5  ;;  %v6777_v14 = vadd.f32 %v12966_v39, %v6616_v38  ;;  %v8769_v28 = vpop.f32.mrf.mxu0 }
 0x85a   : > { %v7251_v56 = vsel %vm7187_vm0, %v7155_v23, %v7219_v48  ;;  %v6619_v34 = vadd.f32 %v8768_v52, %v12983_v33  ;;  %v7118_v23 = vpop.f32.mrf.mxu1 }
 0x85b   : > { %v7369_v26 = vmax.f32 %v7367_v42, %v7368_v50  ;;  %v7371_v13 = vmax.f32 %v7370_v43, %v7251_v56  ;;  %vm7188_vm1 = vcmp.gt.f32.partialorder %v7156_v45, 0.0  ;;  %v7220_v18 = vmul.f32 0.01, %v7156_v45  ;;  %v8770_v25 = vpop.f32.mrf.mxu0 }
 0x85c   : > { %vm6831_vm4 = vcmp.gt.f32.partialorder %v6777_v14, 0.0  ;;  %v6863_v1 = vmul.f32 0.01, %v6777_v14  ;;  %v6780_v57 = vadd.f32 %v12971_v41, %v6619_v34  ;;  %v8771_v10 = vadd.f32 %v8770_v25, %v8769_v28 }
 0x85d   : > { %v7401_v15 = vpack.c.bf16 %v7369_v26, %v7369_v26  ;;  %v7252_v61 = vsel %vm7188_vm1, %v7156_v45, %v7220_v18  ;;  %v8772_v39 = vpop.f32.mrf.mxu0  ;;  %v7119_v25 = vadd.f32 %v7118_v23, %v13774_v30 }
 0x85e   : > { %v7372_v21 = vmax.f32 %v7371_v13, %v7252_v61  ;;  %v6895_v17 = vsel %vm6831_vm4, %v6777_v14, %v6863_v1  ;;  %vm6832_vm6 = vcmp.gt.f32.partialorder %v6780_v57, 0.0  ;;  %v6864_v36 = vmul.f32 0.01, %v6780_v57  ;;  %v9227_v14 = vpop.f32.mrf.mxu1 }
 0x85f   : > { %v7440_v22 = vunpack.c.l.b16 %v7401_v15  ;;  %v7157_v7 = vadd.f32 %v7103_v58, %v6895_v17  ;;  %v6624_v63 = vadd.f32 %v8771_v10, %v12983_v33  ;;  %v8773_v11 = vpop.f32.mrf.mxu0 }
 0x860   : > { %v7373_v51 = vrot.slane %v7372_v21, 4  ;;  %v6896_v41 = vsel %vm6832_vm6, %v6780_v57, %v6864_v36  ;;  %v8774_v49 = vadd.f32 %v8773_v11, %v8772_v39  ;;  %v7121_v15 = vpop.f32.mrf.mxu1  ;;  %vm7454_vm6 = vcmask 1046534  }
 0x861   : > { %v7221_v40 = vmul.f32 0.01, %v7157_v7  ;;  %v7158_v12 = vadd.f32 %v7106_v46, %v6896_v41  ;;  %v6785_v6 = vadd.f32 %v12964_v55, %v6624_v63  ;;  %v8775_v16 = vpop.f32.mrf.mxu0  ;;  %vm7189_vm7 = vcmp.gt.f32.partialorder %v7157_v7, 0.0 }
 0x862   : > { %v7374_v53 = vmax.f32 %v7372_v21, %v7373_v51  ;;  %v6627_v47 = vadd.f32 %v8774_v49, %v12983_v33  ;;  %v7451_v2 = vsel %vm7450_vm5, %v7440_v22, %v13086_v60  ;;  %v7111_v55 = vadd.f32 %v13083_v19, %v13774_v30 }
 0x863   : > { %vm7190_vm3 = vcmp.gt.f32.partialorder %v7158_v12, 0.0  ;;  %v7222_v3 = vmul.f32 0.01, %v7158_v12  ;;  %vm6833_vm8 = vcmp.gt.f32.partialorder %v6785_v6, 0.0  ;;  %v8776_v29 = vpop.f32.mrf.mxu0  ;;  %v6865_v54 = vmul.f32 0.01, %v6785_v6 }
 0x864   : > { %v7375_v32 = vrot.slane %v7374_v53, 2  ;;  %v6788_v59 = vadd.f32 %v12969_v62, %v6627_v47  ;;  %v8777_v27 = vadd.f32 %v8776_v29, %v8775_v16  ;;  %v7253_v44 = vsel %vm7189_vm7, %v7157_v7, %v7221_v40 }
 0x865   : > { %v7254_v9 = vsel %vm7190_vm3, %v7158_v12, %v7222_v3  ;;  %v8778_v42 = vpop.f32.mrf.mxu0  ;;  %v6897_v4 = vsel %vm6833_vm8, %v6785_v6, %v6865_v54  ;;  %v7114_v62 = vadd.f32 %v13096_v24, %v13774_v30  ;;  %v7122_v51 = vadd.f32 %v7121_v15, %v13774_v30 }
 0x866   : > { %v7376_v43 = vmax.f32 %v7374_v53, %v7375_v32  ;;  %v7379_v38 = vmax.f32 %v7253_v44, %v7254_v9  ;;  %vm6834_vm2 = vcmp.gt.f32.partialorder %v6788_v59, 0.0  ;;  %v7159_v60 = vadd.f32 %v7111_v55, %v6897_v4 }
 0x867   : > { %v6866_v48 = vmul.f32 0.01, %v6788_v59  ;;  %v6632_v5 = vadd.f32 %v8777_v27, %v12983_v33  ;;  %v8779_v52 = vpop.f32.mrf.mxu0  ;;  %v7127_v29 = vadd.f32 %v13104_v37, %v13774_v30  ;;  %v7130_v44 = vadd.f32 %v9227_v14, %v13774_v30 }
 0x868   : > { %v7377_v50 = vrot.slane %v7376_v43, 1  ;;  %v8780_v45 = vadd.f32 %v8779_v52, %v8778_v42  ;;  %vm7191_vm9 = vcmp.gt.f32.partialorder %v7159_v60, 0.0  ;;  %v7223_v19 = vmul.f32 0.01, %v7159_v60 }
 0x869   : > { %v6898_v28 = vsel %vm6834_vm2, %v6788_v59, %v6866_v48  ;;  %v6793_v56 = vadd.f32 %v12975_v0, %v6632_v5  ;;  %v8781_v34 = vpop.f32.mrf.mxu0  ;;  %vm7456_vm7 = vcmask 1047559  }
 0x86a   : > { %v7378_v26 = vmax.f32 %v7376_v43, %v7377_v50  ;;  %v7160_v13 = vadd.f32 %v7114_v62, %v6898_v28  ;;  %v6635_v18 = vadd.f32 %v8780_v45, %v12983_v33  ;;  %v7255_v31 = vsel %vm7191_vm9, %v7159_v60, %v7223_v19 }
 0x86b   : > { %vm6835_vm10 = vcmp.gt.f32.partialorder %v6793_v56, 0.0  ;;  %v6867_v1 = vmul.f32 0.01, %v6793_v56  ;;  %v8782_v57 = vpop.f32.mrf.mxu0  ;;  %v7380_v10 = vmax.f32 %v7379_v38, %v7255_v31  ;;  %v7878_v31 = vld [vmem:[%s13173_s6] ss:$0 sm:$0xff] }
 0x86c   : > { %v7402_v24 = vpack.c.bf16 %v7378_v26, %v7378_v26  ;;  %vm7192_vm11 = vcmp.gt.f32.partialorder %v7160_v13, 0.0  ;;  %v7224_v58 = vmul.f32 0.01, %v7160_v13  ;;  %v6796_v39 = vadd.f32 %v12980_v20, %v6635_v18 }
 0x86d   : > { %v6899_v61 = vsel %vm6835_vm10, %v6793_v56, %v6867_v1  ;;  %v8783_v0 = vadd.f32 %v8782_v57, %v8781_v34  ;;  %v8784_v21 = vpop.f32.mrf.mxu0 }
 0x86e   : > { %v7441_v17 = vunpack.c.l.b16 %v7402_v24  ;;  %v7256_v36 = vsel %vm7192_vm11, %v7160_v13, %v7224_v58  ;;  %v7161_v46 = vadd.f32 %v7119_v25, %v6899_v61  ;;  %vm6836_vm14 = vcmp.gt.f32.partialorder %v6796_v39, 0.0 }
 0x86f   : > { %v7381_v22 = vmax.f32 %v7380_v10, %v7256_v36  ;;  %v6868_v7 = vmul.f32 0.01, %v6796_v39  ;;  %v6640_v63 = vadd.f32 %v8783_v0, %v12983_v33  ;;  %v8785_v11 = vpop.f32.mrf.mxu0 }
 0x870   : > { %v8786_v41 = vadd.f32 %v8785_v11, %v8784_v21  ;;  %v7453_v49 = vsel %vm7452_vm13, %v7441_v17, %v7451_v2  ;;  %v7225_v12 = vmul.f32 0.01, %v7161_v46  ;;  %vm7193_vm12 = vcmp.gt.f32.partialorder %v7161_v46, 0.0 }
 0x871   : > { %v7382_v40 = vrot.slane %v7381_v22, 4  ;;  %v6900_v6 = vsel %vm6836_vm14, %v6796_v39, %v6868_v7  ;;  %v6801_v20 = vadd.f32 %v12973_v35, %v6640_v63 }
 0x872   : > { %v7162_v16 = vadd.f32 %v7122_v51, %v6900_v6  ;;  %v6643_v53 = vadd.f32 %v8786_v41, %v12983_v33  ;;  %v7257_v59 = vsel %vm7193_vm12, %v7161_v46, %v7225_v12 }
 0x873   : > { %v7383_v47 = vmax.f32 %v7381_v22, %v7382_v40  ;;  %vm6837_vm15 = vcmp.gt.f32.partialorder %v6801_v20, 0.0  ;;  %v6869_v3 = vmul.f32 0.01, %v6801_v20 }
 0x874   : > { %vm7194_vm0 = vcmp.gt.f32.partialorder %v7162_v16, 0.0  ;;  %v7226_v32 = vmul.f32 0.01, %v7162_v16  ;;  %v6804_v54 = vadd.f32 %v12978_v8, %v6643_v53 }
 0x875   : > { %v7384_v2 = vrot.slane %v7383_v47, 2  ;;  %v6901_v27 = vsel %vm6837_vm15, %v6801_v20, %v6869_v3 }
 0x876   : > { %v7258_v55 = vsel %vm7194_vm0, %v7162_v16, %v7226_v32  ;;  %v7163_v23 = vadd.f32 %v7127_v29, %v6901_v27  ;;  %vm6838_vm1 = vcmp.gt.f32.partialorder %v6804_v54, 0.0  ;;  %v6870_v35 = vmul.f32 0.01, %v6804_v54 }
 0x877   : > { %v7385_v33 = vmax.f32 %v7383_v47, %v7384_v2  ;;  %v7388_v9 = vmax.f32 %v7257_v59, %v7258_v55 }
 0x878   : > { %vm7195_vm4 = vcmp.gt.f32.partialorder %v7163_v23, 0.0  ;;  %v7227_v42 = vmul.f32 0.01, %v7163_v23  ;;  %v6902_v43 = vsel %vm6838_vm1, %v6804_v54, %v6870_v35 }
 0x879   : > { %v7386_v38 = vrot.slane %v7385_v33, 1  ;;  %v7164_v37 = vadd.f32 %v7130_v44, %v6902_v43 }
 0x87a   : > { %v7259_v4 = vsel %vm7195_vm4, %v7163_v23, %v7227_v42 }
 0x87b   : > { %v7387_v60 = vmax.f32 %v7385_v33, %v7386_v38  ;;  %v7389_v48 = vmax.f32 %v7388_v9, %v7259_v4  ;;  %vm7196_vm5 = vcmp.gt.f32.partialorder %v7164_v37, 0.0  ;;  %v7228_v8 = vmul.f32 0.01, %v7164_v37 }
 0x87d   : > { %v7403_v5 = vpack.c.bf16 %v7387_v60, %v7387_v60  ;;  %v7260_v52 = vsel %vm7196_vm5, %v7164_v37, %v7228_v8 }
 0x87e   : > { %v7390_v62 = vmax.f32 %v7389_v48, %v7260_v52 }
 0x87f   : > { %v7442_v50 = vunpack.c.l.b16 %v7403_v5 }
 0x880   : > { %v7391_v45 = vrot.slane %v7390_v62, 4 }
 0x881   : > { %v7455_v19 = vsel %vm7454_vm6, %v7442_v50, %v7453_v49 }
 0x882   : > { %v7392_v30 = vmax.f32 %v7390_v62, %v7391_v45 }
 0x884   : > { %v7393_v14 = vrot.slane %v7392_v30, 2 }
 0x886   : > { %v7394_v28 = vmax.f32 %v7392_v30, %v7393_v14 }
 0x888   : > { %v7395_v56 = vrot.slane %v7394_v28, 1 }
 0x88a   : > { %v7396_v34 = vmax.f32 %v7394_v28, %v7395_v56 }
 0x88c   : > { %v7404_v26 = vpack.c.bf16 %v7396_v34, %v7396_v34 }
 0x88e   : > { %v7443_v13 = vunpack.c.l.b16 %v7404_v26 }
 0x890   : > { %v7457_v18 = vsel %vm7456_vm7, %v7443_v13, %v7455_v19 }
 0x891   : > { %v7458_v25 = vpack.c.b16 %v7457_v18, %v7457_v18 }
 0x893   : > { %9245 = vmatmul.mubr.bf16.vlgmr.msra.gmra.mxu0 %v7458_v25 }
 0x953   : > { %v7542_v1 = vpop.f32.mrf.mxu0 }
 0x954   : > { %v7543_v57 = vadd.f32 %v7878_v31, %v7542_v1 }
 0x955   : > { %v9246_v24 = vpop.f32.mrf.mxu0 }
 0x956   : > { %v7548_v10 = vmul.f32 %v7543_v57, %v7543_v57 }
 0x957   : > { %v7545_v58 = vpop.f32.mrf.mxu0 }
 0x958   : > { %7549 = vadd.xlane.f32.xlu0 %v7548_v10 }
 0x959   : > { %v9247_v15 = vpop.f32.mrf.mxu0 }
 0x9e1   : > { %v7550_v61 = vpop.xlane.xlu0 %7549 }
 0x9e2   : > { %v7551_v39 = vmax.f32 %v7550_v61, 1e-24 }
 0x9e4   : > { %9507 = vrsqrt.f32 %v7551_v39 }
 0x9f1   : > { %v9508_v0 = vpop.eup %9507 }
 0x9f2   : > { %v7553_v21 = vmul.f32 %v9508_v0, %v7543_v57 }
 0x9f4   : > { %7554 = vst [vmem:[%s352_s13] sm:$0xff] %v7553_v21 }
 0x9f5   : > { %9676 = shalt.err (!%p9673_p5)
}
 0x9f6   : > { %s9677_s20 = scalar_lea.hbm %s7567_s11, 128  ;;  %s9681_s12 = scalar_lea.hbm %s13174_s7, 256 }
 0x9f7   : > { %p9678_p6 = scmp.ne.s32.totalorder %s7567_s11, %s9677_s20  ;;  %p9682_p9 = scmp.lt.s32.totalorder %s7567_s11, %s13174_s7 }
 0x9f8   : > { %p9683_p11 = scmp.lt.s32.totalorder %s9681_s12, %s9677_s20 }
 0x9f9   : > { %p9679_p4 = pnand %p9678_p6, %p13775_p12 }
 0x9fa   : > { %p9684_p0 = por %p9683_p11, %p9682_p9 }
 0x9fb   : > { %p9680_p8 = pneg %p9679_p4 }
 0x9fd   : > { %p9685_p2 = pnand %p9684_p0, %p9680_p8 }
 0x9ff   : > { %9688 = shalt.err (!%p9685_p2)
}
 0xa00   : > { %9266 = dma.vmem_to_hbm [thread:$0]  (%p13775_p12), %s7570_s18, 128, %s7567_s11, %s7556_s15  }
 0xa01 PF: > { %s7581_s13 = sand.u32 1, %s9723_s24   ;;  %p13776_p10 = scmp.ne.s32.totalorder %s13351_s8, 0 }
 0xa02   : > { %p13777_p7 = scmp.ge.s32.totalorder %s9735_s27, 2  ;;  %s7582_s14 = scalar_lea.sflag [#allocation5], %s7581_s13 }
 0xa04   : > { %p9286_p1 = pnand %p13777_p7, %p13776_p10 }
 0xa06   : > { %p9287_p13 = pneg %p9286_p1 }
 0xa08   : > { %9718 = dma.done.wait (%p9287_p13), %s7582_s14, 128  }
 0xa09   : > { %9720 = vsyncadd (%p9287_p13), %s7582_s14, 4294967168  ;;  %p22_p3 = scmp.ge.s32.totalorder %s9884_s21, 4   ;;  %s13778_s24 = smov %s9727_s25 }
 0xa0a   : > { %s13779_s25 = smov %s9731_s26  ;;  %s13780_s26 = smov %s9900_s29 }
 0xa0b   : > { %s13781_s27 = smov %s9884_s21  ;;  %24 = sbr.rel (!%p22_p3) target bundleno = 9 (0x9), region = 115 }
 0xa10   :  { %7587 = vsyncpa [#allocation4], 1 }
 0xa11   :  { %7589 = vsyncpa [#allocation4 + $0x1], 1 }
 0xa12   :  { %7590 = vsyncpa [#allocation7], 1 }
 0xa13   :  { %7591 = vsyncpa [#allocation10], 1 }
 0xa14   :  { %7592 = vsyncpa [#allocation5], 1 }
 0xa15   :  { %7594 = vsyncpa [#allocation5 + $0x1], 1 }

</bundles_post_ra>
